<compile_context>
chip_gen: v7x
topology: tpu7x:2x2x1
jax: 0.10.0
libtpu: 0.0.40
codegen_flags: <defaults>
</compile_context>

<pallas_src>
import functools
import math

import jax
import jax.numpy as jnp
from jax import lax
from jax.experimental import pallas as pl
from jax.experimental.pallas import tpu as pltpu


def _round_up(x, m):
    return ((x + m - 1) // m) * m


def _tree_reduce(xs, op):
    """Balanced pairwise reduction (keeps the VLIW critical path at log2(n))."""
    xs = list(xs)
    while len(xs) > 1:
        nxt = [op(xs[i], xs[i + 1]) for i in range(0, len(xs) - 1, 2)]
        if len(xs) % 2 == 1:
            nxt.append(xs[-1])
        xs = nxt
    return xs[0]


def _pick_tile(B):
    """Batch tile (lanes) and padded batch. >=2 grid steps whenever B > 128."""
    if B <= 128:
        return 128, 128                       # pad up: unmasked 128-lane stores
    n128 = _round_up(B, 128) // 128
    per = 2 if n128 >= 4 else 1               # TB=256 only if >=2 tiles remain
    TB = 128 * per
    return TB, _round_up(B, TB)


def ordering_kernel(slab_ref, w1t_ref, b1t_ref, w2t_ref, b2t_ref,
                    out_ref, pi_ref, *, tau, iters, G, C, TB):
    f32 = jnp.float32
    H = w1t_ref.shape[0]
    Dp = out_ref.shape[1]
    inv_tau = 1.0 / tau

    # Hoisted weight loads / bias broadcasts (broadcast_in_dim is not CSE'd).
    w1t = w1t_ref[...]                                    # (H, C)
    w2t = w2t_ref[...]                                    # (G, H)
    b1b = jnp.broadcast_to(b1t_ref[...], (H, TB))
    b2b = jnp.broadcast_to(b2t_ref[...], (G, TB))

    # ---------------- MLP, batch-on-lanes ----------------
    # la[i][j, b] = scores[b, i, j] / tau   (one (G, TB) plane per source group)
    la = []
    for i in range(G):
        x = slab_ref[i, pl.ds(0, C), :]                   # (C, TB): group-i feats
        h = jnp.dot(w1t, x, preferred_element_type=f32) + b1b
        h = jnp.maximum(h, 0.0)
        s = jnp.dot(w2t, h, preferred_element_type=f32) + b2b
        la.append(s * inv_tau)                            # (G, TB)

    # ---------------- log-space Sinkhorn ----------------
    for _ in range(iters):
        # row normalisation: logsumexp over j (sublane reduce within a plane)
        for i in range(G):
            x = la[i]
            m = jnp.max(x, axis=0, keepdims=True)
            lse = m + jnp.log(jnp.sum(jnp.exp(x - m), axis=0, keepdims=True))
            la[i] = x - lse
        # column normalisation: logsumexp over i (elementwise tree across planes)
        m = _tree_reduce(la, jnp.maximum)
        ssum = _tree_reduce([jnp.exp(x - m) for x in la], jnp.add)
        lse = m + jnp.log(ssum)
        la = [x - lse for x in la]

    # ------- argmax over j, first max wins (exp is monotone -> skip it) -------
    j_iota = lax.broadcasted_iota(jnp.int32, (G, TB), 0)  # sublane index = j
    pi_rows = []                                          # (1, TB) int32 each
    for i in range(G):
        x = la[i]
        rmax = jnp.max(x, axis=0, keepdims=True)
        pi_rows.append(jnp.min(jnp.where(x >= rmax, j_iota, G),
                               axis=0, keepdims=True))
    pi_ref[...] = jnp.concatenate(pi_rows, axis=0)        # (G, TB)

    # ---- scatter-reorder: out[t] = data[last s with pi[s] == t], else zeros --
    zeros = jnp.zeros((Dp, TB), f32)                      # hoisted accumulator init
    for t in range(G):
        acc = zeros
        for s in range(G):                                # ascending s => last-write-wins
            acc = jnp.where(pi_rows[s] == t, slab_ref[s], acc)
        out_ref[t] = acc


def ordering_net_forward(center_coords, group_features, group_coords, params,
                         sinkhorn_tau=0.1, sinkhorn_iters=10):
    """center_coords (B,G,3), group_features (B,G,C), group_coords (B,G,K,3)."""
    B, G, C = group_features.shape
    K = group_coords.shape[2]
    D = C + 3 + 3 * K                    # features FIRST -> MLP reads rows [0, C)
    Dp = _round_up(D, 8)                 # sublane axis: only 8-alignment needed

    TB, Bp = _pick_tile(B)
    nt = Bp // TB

    w1, b1, w2, b2 = params              # w1 (C,H), b1 (1,H), w2 (H,G), b2 (1,G)
    H = w1.shape[1]
    f32 = jnp.float32

    gf = group_features.astype(f32)
    cc = center_coords.astype(f32)
    gc = group_coords.reshape(B, G, 3 * K).astype(f32)

    # Data slab: [gf | cc | gc], padded, laid out as (nt, G, Dp, TB) so each
    # grid block is one contiguous DMA with the batch tile on the lane axis.
    slab = jnp.concatenate([gf, cc, gc], axis=-1)                  # (B, G, D)
    slab = jnp.pad(slab, ((0, Bp - B), (0, 0), (0, Dp - D)))       # (Bp, G, Dp)
    slab_t = slab.reshape(nt, TB, G, Dp).transpose(0, 2, 3, 1)     # (nt,G,Dp,TB)

    # Weights transposed for the batch-on-lanes MLP (sublane = feature dim).
    w1t = jnp.transpose(w1).astype(f32)                            # (H, C)
    b1t = jnp.reshape(b1.astype(f32), (H, 1))
    w2t = jnp.transpose(w2).astype(f32)                            # (G, H)
    b2t = jnp.reshape(b2.astype(f32), (G, 1))

    kernel = functools.partial(ordering_kernel, tau=float(sinkhorn_tau),
                               iters=int(sinkhorn_iters), G=G, C=C, TB=TB)

    out_shapes = (
        jax.ShapeDtypeStruct((nt, G, Dp, TB), f32),                # reordered slab
        jax.ShapeDtypeStruct((nt, G, TB), jnp.int32),              # perm indices
    )
    grid_spec = pltpu.PrefetchScalarGridSpec(
        num_scalar_prefetch=0,
        grid=(nt,),
        in_specs=[
            pl.BlockSpec((None, G, Dp, TB), lambda b: (b, 0, 0, 0)),  # data slab
            pl.BlockSpec((H, C), lambda b: (0, 0)),                   # w1^T (resident)
            pl.BlockSpec((H, 1), lambda b: (0, 0)),                   # b1^T
            pl.BlockSpec((G, H), lambda b: (0, 0)),                   # w2^T
            pl.BlockSpec((G, 1), lambda b: (0, 0)),                   # b2^T
        ],
        out_specs=[
            pl.BlockSpec((None, G, Dp, TB), lambda b: (b, 0, 0, 0)),
            pl.BlockSpec((None, G, TB), lambda b: (b, 0, 0)),
        ],
    )
    out_slab_t, pi_t = pl.pallas_call(
        kernel,
        out_shape=out_shapes,
        grid_spec=grid_spec,
        compiler_params=pltpu.CompilerParams(
            dimension_semantics=("parallel",)),        # megacore / v7x 2-TC sharding
    )(slab_t, w1t, b1t, w2t, b2t)

    # Wrapper-side layout plumbing back to (B, G, ...).
    out_slab = out_slab_t.transpose(0, 3, 1, 2).reshape(Bp, G, Dp)[:B, :, :D]
    rf = out_slab[..., :C]
    rc = out_slab[..., C:C + 3]
    rgc = out_slab[..., C + 3:].reshape(B, G, K, 3)
    pi = pi_t.transpose(0, 2, 1).reshape(Bp, G)[:B]
    return rc, rf, rgc, pi


def init_params(key, in_channels, num_groups, mlp_hidden_channels=None):
    """xavier_uniform weights / zero biases (as in the module's _init_weights)."""
    if mlp_hidden_channels is None:
        mlp_hidden_channels = in_channels * 2
    C, H, G = in_channels, mlp_hidden_channels, num_groups
    k1, k2 = jax.random.split(key)
    bound1 = math.sqrt(6.0 / (C + H))
    w1 = jax.random.uniform(k1, (C, H), jnp.float32, -bound1, bound1)
    bound2 = math.sqrt(6.0 / (H + G))
    w2 = jax.random.uniform(k2, (H, G), jnp.float32, -bound2, bound2)
    b1 = jnp.zeros((1, H), jnp.float32)
    b2 = jnp.zeros((1, G), jnp.float32)
    return w1, b1, w2, b2


def _reference_forward(center_coords, group_features, group_coords, params,
                       tau=0.1, iters=10):
    """Pure-JAX reference with the same semantics (sanity check)."""
    w1, b1, w2, b2 = params
    B, G, C = group_features.shape
    scores = jnp.maximum(group_features @ w1 + b1, 0.0) @ w2 + b2
    log_alpha = scores / tau
    for _ in range(iters):
        log_alpha = log_alpha - jax.nn.logsumexp(log_alpha, axis=-1, keepdims=True)
        log_alpha = log_alpha - jax.nn.logsumexp(log_alpha, axis=-2, keepdims=True)
    P = jnp.exp(log_alpha)
    pi = jnp.argmax(P, axis=-1).astype(jnp.int32)                  # (B, G)

    def scatter_one(pidx, cc, gf, gc):
        tgt = jnp.arange(G)[None, :]
        src = jnp.arange(G)[:, None]
        match = pidx[:, None] == tgt
        best = jnp.max(jnp.where(match, src, -1), axis=0, keepdims=True)
        sel = jnp.where((src == best) & (best >= 0), 1.0, 0.0).T   # (G_tgt, G_src)
        return sel @ cc, sel @ gf, (sel @ gc.reshape(G, -1)).reshape(gc.shape)

    rc, rf, rgc = jax.vmap(scatter_one)(pi, center_coords, group_features, group_coords)
    return rc, rf, rgc, pi


if __name__ == "__main__":
    # Small but batched enough to exercise lane packing, batch padding
    # (200 -> 256) and two "parallel" grid steps.
    B, G, C, K = 200, 8, 32, 8

    key = jax.random.PRNGKey(0)
    k_params, k_cc, k_gf, k_gc = jax.random.split(key, 4)
    params = init_params(k_params, in_channels=C, num_groups=G)

    center_coords = jax.random.normal(k_cc, (B, G, 3), jnp.float32)
    group_features = jax.random.normal(k_gf, (B, G, C), jnp.float32)
    group_coords = jax.random.normal(k_gc, (B, G, K, 3), jnp.float32)

    fwd = jax.jit(lambda cc, gf, gc, p: ordering_net_forward(cc, gf, gc, p))
    rc, rf, rgc, pi = fwd(center_coords, group_features, group_coords, params)
    jax.block_until_ready((rc, rf, rgc, pi))

    # sanity check vs pure-JAX reference
    rc_r, rf_r, rgc_r, pi_r = _reference_forward(center_coords, group_features,
                                                 group_coords, params)
    assert jnp.array_equal(pi, pi_r), "perm_indices mismatch"
    assert jnp.allclose(rc, rc_r, atol=1e-5)
    assert jnp.allclose(rf, rf_r, atol=1e-5)
    assert jnp.allclose(rgc, rgc_r, atol=1e-5)

    print("KERNEL_OK")
</pallas_src>

<mosaic_0001>
module attributes {stable_mosaic.version = 11 : i64} {
  func.func @ordering_kernel(%arg0: i32, %arg1: memref<1x8x64x128xf32, #tpu.memory_space<vmem>>, %arg2: memref<64x32xf32, #tpu.memory_space<vmem>>, %arg3: memref<64x1xf32, #tpu.memory_space<vmem>>, %arg4: memref<8x64xf32, #tpu.memory_space<vmem>>, %arg5: memref<8x1xf32, #tpu.memory_space<vmem>>, %arg6: memref<1x8x64x128xf32, #tpu.memory_space<vmem>>, %arg7: memref<1x8x128xi32, #tpu.memory_space<vmem>>) attributes {dimension_semantics = [#tpu.dimension_semantics<parallel>], iteration_bounds = array<i64: 2>, scalar_prefetch = 0 : i64, scratch_operands = 0 : i64, tpu.core_type = #tpu.core_type<tc>, window_params = [{transform_indices = @transform_0, window_bounds = array<i64: 1, 8, 64, 128>}, {pipeline_mode = #tpu.pipeline_mode<synchronous>, transform_indices = @transform_1, window_bounds = array<i64: 64, 32>}, {pipeline_mode = #tpu.pipeline_mode<synchronous>, transform_indices = @transform_2, window_bounds = array<i64: 64, 1>}, {pipeline_mode = #tpu.pipeline_mode<synchronous>, transform_indices = @transform_3, window_bounds = array<i64: 8, 64>}, {pipeline_mode = #tpu.pipeline_mode<synchronous>, transform_indices = @transform_4, window_bounds = array<i64: 8, 1>}, {transform_indices = @transform_5, window_bounds = array<i64: 1, 8, 64, 128>}, {transform_indices = @transform_6, window_bounds = array<i64: 1, 8, 128>}]} {
    %c0 = arith.constant 0 : index
    %c0_0 = arith.constant 0 : index
    %0 = vector.load %arg2[%c0, %c0_0] : memref<64x32xf32, #tpu.memory_space<vmem>>, vector<64x32xf32>
    %c0_1 = arith.constant 0 : index
    %c0_2 = arith.constant 0 : index
    %1 = vector.load %arg4[%c0_1, %c0_2] : memref<8x64xf32, #tpu.memory_space<vmem>>, vector<8x64xf32>
    %c0_3 = arith.constant 0 : index
    %c0_4 = arith.constant 0 : index
    %2 = vector.load %arg3[%c0_3, %c0_4] : memref<64x1xf32, #tpu.memory_space<vmem>>, vector<64x1xf32>
    %3 = vector.shape_cast %2 : vector<64x1xf32> to vector<64x1xf32>
    %4 = vector.broadcast %3 : vector<64x1xf32> to vector<64x128xf32>
    %c0_5 = arith.constant 0 : index
    %c0_6 = arith.constant 0 : index
    %5 = vector.load %arg5[%c0_5, %c0_6] : memref<8x1xf32, #tpu.memory_space<vmem>>, vector<8x1xf32>
    %6 = vector.shape_cast %5 : vector<8x1xf32> to vector<8x1xf32>
    %7 = vector.broadcast %6 : vector<8x1xf32> to vector<8x128xf32>
    %c0_7 = arith.constant 0 : index
    %c0_8 = arith.constant 0 : index
    %c0_9 = arith.constant 0 : index
    %c0_10 = arith.constant 0 : index
    %8 = vector.load %arg1[%c0_7, %c0_8, %c0_9, %c0_10] : memref<1x8x64x128xf32, #tpu.memory_space<vmem>>, vector<1x1x32x128xf32>
    %9 = vector.shape_cast %8 : vector<1x1x32x128xf32> to vector<32x128xf32>
    %cst = arith.constant dense<0.000000e+00> : vector<64x128xf32>
    %10 = tpu.matmul %0, %9, %cst {dimension_numbers = #tpu.dot_dimension_numbers<[1], [0], [0], [1], [0, 0, 1, 1], [], []>} : vector<64x32xf32>, vector<32x128xf32>, vector<64x128xf32> -> vector<64x128xf32>
    %11 = arith.addf %10, %4 : vector<64x128xf32>
    %cst_11 = arith.constant 0.000000e+00 : f32
    %12 = vector.broadcast %cst_11 : f32 to vector<64x128xf32>
    %13 = arith.maximumf %11, %12 : vector<64x128xf32>
    %cst_12 = arith.constant dense<0.000000e+00> : vector<8x128xf32>
    %14 = tpu.matmul %1, %13, %cst_12 {dimension_numbers = #tpu.dot_dimension_numbers<[1], [0], [0], [1], [0, 0, 1, 1], [], []>} : vector<8x64xf32>, vector<64x128xf32>, vector<8x128xf32> -> vector<8x128xf32>
    %15 = arith.addf %14, %7 : vector<8x128xf32>
    %cst_13 = arith.constant 1.000000e+01 : f32
    %16 = vector.broadcast %cst_13 : f32 to vector<8x128xf32>
    %17 = arith.mulf %15, %16 : vector<8x128xf32>
    %c0_14 = arith.constant 0 : index
    %c1 = arith.constant 1 : index
    %c0_15 = arith.constant 0 : index
    %c0_16 = arith.constant 0 : index
    %18 = vector.load %arg1[%c0_14, %c1, %c0_15, %c0_16] : memref<1x8x64x128xf32, #tpu.memory_space<vmem>>, vector<1x1x32x128xf32>
    %19 = vector.shape_cast %18 : vector<1x1x32x128xf32> to vector<32x128xf32>
    %cst_17 = arith.constant dense<0.000000e+00> : vector<64x128xf32>
    %20 = tpu.matmul %0, %19, %cst_17 {dimension_numbers = #tpu.dot_dimension_numbers<[1], [0], [0], [1], [0, 0, 1, 1], [], []>} : vector<64x32xf32>, vector<32x128xf32>, vector<64x128xf32> -> vector<64x128xf32>
    %21 = arith.addf %20, %4 : vector<64x128xf32>
    %cst_18 = arith.constant 0.000000e+00 : f32
    %22 = vector.broadcast %cst_18 : f32 to vector<64x128xf32>
    %23 = arith.maximumf %21, %22 : vector<64x128xf32>
    %cst_19 = arith.constant dense<0.000000e+00> : vector<8x128xf32>
    %24 = tpu.matmul %1, %23, %cst_19 {dimension_numbers = #tpu.dot_dimension_numbers<[1], [0], [0], [1], [0, 0, 1, 1], [], []>} : vector<8x64xf32>, vector<64x128xf32>, vector<8x128xf32> -> vector<8x128xf32>
    %25 = arith.addf %24, %7 : vector<8x128xf32>
    %cst_20 = arith.constant 1.000000e+01 : f32
    %26 = vector.broadcast %cst_20 : f32 to vector<8x128xf32>
    %27 = arith.mulf %25, %26 : vector<8x128xf32>
    %c0_21 = arith.constant 0 : index
    %c2 = arith.constant 2 : index
    %c0_22 = arith.constant 0 : index
    %c0_23 = arith.constant 0 : index
    %28 = vector.load %arg1[%c0_21, %c2, %c0_22, %c0_23] : memref<1x8x64x128xf32, #tpu.memory_space<vmem>>, vector<1x1x32x128xf32>
    %29 = vector.shape_cast %28 : vector<1x1x32x128xf32> to vector<32x128xf32>
    %cst_24 = arith.constant dense<0.000000e+00> : vector<64x128xf32>
    %30 = tpu.matmul %0, %29, %cst_24 {dimension_numbers = #tpu.dot_dimension_numbers<[1], [0], [0], [1], [0, 0, 1, 1], [], []>} : vector<64x32xf32>, vector<32x128xf32>, vector<64x128xf32> -> vector<64x128xf32>
    %31 = arith.addf %30, %4 : vector<64x128xf32>
    %cst_25 = arith.constant 0.000000e+00 : f32
    %32 = vector.broadcast %cst_25 : f32 to vector<64x128xf32>
    %33 = arith.maximumf %31, %32 : vector<64x128xf32>
    %cst_26 = arith.constant dense<0.000000e+00> : vector<8x128xf32>
    %34 = tpu.matmul %1, %33, %cst_26 {dimension_numbers = #tpu.dot_dimension_numbers<[1], [0], [0], [1], [0, 0, 1, 1], [], []>} : vector<8x64xf32>, vector<64x128xf32>, vector<8x128xf32> -> vector<8x128xf32>
    %35 = arith.addf %34, %7 : vector<8x128xf32>
    %cst_27 = arith.constant 1.000000e+01 : f32
    %36 = vector.broadcast %cst_27 : f32 to vector<8x128xf32>
    %37 = arith.mulf %35, %36 : vector<8x128xf32>
    %c0_28 = arith.constant 0 : index
    %c3 = arith.constant 3 : index
    %c0_29 = arith.constant 0 : index
    %c0_30 = arith.constant 0 : index
    %38 = vector.load %arg1[%c0_28, %c3, %c0_29, %c0_30] : memref<1x8x64x128xf32, #tpu.memory_space<vmem>>, vector<1x1x32x128xf32>
    %39 = vector.shape_cast %38 : vector<1x1x32x128xf32> to vector<32x128xf32>
    %cst_31 = arith.constant dense<0.000000e+00> : vector<64x128xf32>
    %40 = tpu.matmul %0, %39, %cst_31 {dimension_numbers = #tpu.dot_dimension_numbers<[1], [0], [0], [1], [0, 0, 1, 1], [], []>} : vector<64x32xf32>, vector<32x128xf32>, vector<64x128xf32> -> vector<64x128xf32>
    %41 = arith.addf %40, %4 : vector<64x128xf32>
    %cst_32 = arith.constant 0.000000e+00 : f32
    %42 = vector.broadcast %cst_32 : f32 to vector<64x128xf32>
    %43 = arith.maximumf %41, %42 : vector<64x128xf32>
    %cst_33 = arith.constant dense<0.000000e+00> : vector<8x128xf32>
    %44 = tpu.matmul %1, %43, %cst_33 {dimension_numbers = #tpu.dot_dimension_numbers<[1], [0], [0], [1], [0, 0, 1, 1], [], []>} : vector<8x64xf32>, vector<64x128xf32>, vector<8x128xf32> -> vector<8x128xf32>
    %45 = arith.addf %44, %7 : vector<8x128xf32>
    %cst_34 = arith.constant 1.000000e+01 : f32
    %46 = vector.broadcast %cst_34 : f32 to vector<8x128xf32>
    %47 = arith.mulf %45, %46 : vector<8x128xf32>
    %c0_35 = arith.constant 0 : index
    %c4 = arith.constant 4 : index
    %c0_36 = arith.constant 0 : index
    %c0_37 = arith.constant 0 : index
    %48 = vector.load %arg1[%c0_35, %c4, %c0_36, %c0_37] : memref<1x8x64x128xf32, #tpu.memory_space<vmem>>, vector<1x1x32x128xf32>
    %49 = vector.shape_cast %48 : vector<1x1x32x128xf32> to vector<32x128xf32>
    %cst_38 = arith.constant dense<0.000000e+00> : vector<64x128xf32>
    %50 = tpu.matmul %0, %49, %cst_38 {dimension_numbers = #tpu.dot_dimension_numbers<[1], [0], [0], [1], [0, 0, 1, 1], [], []>} : vector<64x32xf32>, vector<32x128xf32>, vector<64x128xf32> -> vector<64x128xf32>
    %51 = arith.addf %50, %4 : vector<64x128xf32>
    %cst_39 = arith.constant 0.000000e+00 : f32
    %52 = vector.broadcast %cst_39 : f32 to vector<64x128xf32>
    %53 = arith.maximumf %51, %52 : vector<64x128xf32>
    %cst_40 = arith.constant dense<0.000000e+00> : vector<8x128xf32>
    %54 = tpu.matmul %1, %53, %cst_40 {dimension_numbers = #tpu.dot_dimension_numbers<[1], [0], [0], [1], [0, 0, 1, 1], [], []>} : vector<8x64xf32>, vector<64x128xf32>, vector<8x128xf32> -> vector<8x128xf32>
    %55 = arith.addf %54, %7 : vector<8x128xf32>
    %cst_41 = arith.constant 1.000000e+01 : f32
    %56 = vector.broadcast %cst_41 : f32 to vector<8x128xf32>
    %57 = arith.mulf %55, %56 : vector<8x128xf32>
    %c0_42 = arith.constant 0 : index
    %c5 = arith.constant 5 : index
    %c0_43 = arith.constant 0 : index
    %c0_44 = arith.constant 0 : index
    %58 = vector.load %arg1[%c0_42, %c5, %c0_43, %c0_44] : memref<1x8x64x128xf32, #tpu.memory_space<vmem>>, vector<1x1x32x128xf32>
    %59 = vector.shape_cast %58 : vector<1x1x32x128xf32> to vector<32x128xf32>
    %cst_45 = arith.constant dense<0.000000e+00> : vector<64x128xf32>
    %60 = tpu.matmul %0, %59, %cst_45 {dimension_numbers = #tpu.dot_dimension_numbers<[1], [0], [0], [1], [0, 0, 1, 1], [], []>} : vector<64x32xf32>, vector<32x128xf32>, vector<64x128xf32> -> vector<64x128xf32>
    %61 = arith.addf %60, %4 : vector<64x128xf32>
    %cst_46 = arith.constant 0.000000e+00 : f32
    %62 = vector.broadcast %cst_46 : f32 to vector<64x128xf32>
    %63 = arith.maximumf %61, %62 : vector<64x128xf32>
    %cst_47 = arith.constant dense<0.000000e+00> : vector<8x128xf32>
    %64 = tpu.matmul %1, %63, %cst_47 {dimension_numbers = #tpu.dot_dimension_numbers<[1], [0], [0], [1], [0, 0, 1, 1], [], []>} : vector<8x64xf32>, vector<64x128xf32>, vector<8x128xf32> -> vector<8x128xf32>
    %65 = arith.addf %64, %7 : vector<8x128xf32>
    %cst_48 = arith.constant 1.000000e+01 : f32
    %66 = vector.broadcast %cst_48 : f32 to vector<8x128xf32>
    %67 = arith.mulf %65, %66 : vector<8x128xf32>
    %c0_49 = arith.constant 0 : index
    %c6 = arith.constant 6 : index
    %c0_50 = arith.constant 0 : index
    %c0_51 = arith.constant 0 : index
    %68 = vector.load %arg1[%c0_49, %c6, %c0_50, %c0_51] : memref<1x8x64x128xf32, #tpu.memory_space<vmem>>, vector<1x1x32x128xf32>
    %69 = vector.shape_cast %68 : vector<1x1x32x128xf32> to vector<32x128xf32>
    %cst_52 = arith.constant dense<0.000000e+00> : vector<64x128xf32>
    %70 = tpu.matmul %0, %69, %cst_52 {dimension_numbers = #tpu.dot_dimension_numbers<[1], [0], [0], [1], [0, 0, 1, 1], [], []>} : vector<64x32xf32>, vector<32x128xf32>, vector<64x128xf32> -> vector<64x128xf32>
    %71 = arith.addf %70, %4 : vector<64x128xf32>
    %cst_53 = arith.constant 0.000000e+00 : f32
    %72 = vector.broadcast %cst_53 : f32 to vector<64x128xf32>
    %73 = arith.maximumf %71, %72 : vector<64x128xf32>
    %cst_54 = arith.constant dense<0.000000e+00> : vector<8x128xf32>
    %74 = tpu.matmul %1, %73, %cst_54 {dimension_numbers = #tpu.dot_dimension_numbers<[1], [0], [0], [1], [0, 0, 1, 1], [], []>} : vector<8x64xf32>, vector<64x128xf32>, vector<8x128xf32> -> vector<8x128xf32>
    %75 = arith.addf %74, %7 : vector<8x128xf32>
    %cst_55 = arith.constant 1.000000e+01 : f32
    %76 = vector.broadcast %cst_55 : f32 to vector<8x128xf32>
    %77 = arith.mulf %75, %76 : vector<8x128xf32>
    %c0_56 = arith.constant 0 : index
    %c7 = arith.constant 7 : index
    %c0_57 = arith.constant 0 : index
    %c0_58 = arith.constant 0 : index
    %78 = vector.load %arg1[%c0_56, %c7, %c0_57, %c0_58] : memref<1x8x64x128xf32, #tpu.memory_space<vmem>>, vector<1x1x32x128xf32>
    %79 = vector.shape_cast %78 : vector<1x1x32x128xf32> to vector<32x128xf32>
    %cst_59 = arith.constant dense<0.000000e+00> : vector<64x128xf32>
    %80 = tpu.matmul %0, %79, %cst_59 {dimension_numbers = #tpu.dot_dimension_numbers<[1], [0], [0], [1], [0, 0, 1, 1], [], []>} : vector<64x32xf32>, vector<32x128xf32>, vector<64x128xf32> -> vector<64x128xf32>
    %81 = arith.addf %80, %4 : vector<64x128xf32>
    %cst_60 = arith.constant 0.000000e+00 : f32
    %82 = vector.broadcast %cst_60 : f32 to vector<64x128xf32>
    %83 = arith.maximumf %81, %82 : vector<64x128xf32>
    %cst_61 = arith.constant dense<0.000000e+00> : vector<8x128xf32>
    %84 = tpu.matmul %1, %83, %cst_61 {dimension_numbers = #tpu.dot_dimension_numbers<[1], [0], [0], [1], [0, 0, 1, 1], [], []>} : vector<8x64xf32>, vector<64x128xf32>, vector<8x128xf32> -> vector<8x128xf32>
    %85 = arith.addf %84, %7 : vector<8x128xf32>
    %cst_62 = arith.constant 1.000000e+01 : f32
    %86 = vector.broadcast %cst_62 : f32 to vector<8x128xf32>
    %87 = arith.mulf %85, %86 : vector<8x128xf32>
    %cst_63 = arith.constant dense<0xFF800000> : vector<128xf32>
    %88 = vector.multi_reduction <maximumf>, %17, %cst_63 [0] : vector<8x128xf32> to vector<128xf32>
    %89 = vector.shape_cast %88 : vector<128xf32> to vector<1x128xf32>
    %90 = vector.broadcast %89 : vector<1x128xf32> to vector<8x128xf32>
    %91 = arith.subf %17, %90 : vector<8x128xf32>
    %92 = math.exp %91 : vector<8x128xf32>
    %cst_64 = arith.constant dense<0.000000e+00> : vector<128xf32>
    %93 = vector.multi_reduction <add>, %92, %cst_64 [0] : vector<8x128xf32> to vector<128xf32>
    %94 = vector.shape_cast %93 : vector<128xf32> to vector<1x128xf32>
    %95 = math.log %94 : vector<1x128xf32>
    %96 = arith.addf %89, %95 : vector<1x128xf32>
    %97 = vector.broadcast %96 : vector<1x128xf32> to vector<8x128xf32>
    %98 = arith.subf %17, %97 : vector<8x128xf32>
    %cst_65 = arith.constant dense<0xFF800000> : vector<128xf32>
    %99 = vector.multi_reduction <maximumf>, %27, %cst_65 [0] : vector<8x128xf32> to vector<128xf32>
    %100 = vector.shape_cast %99 : vector<128xf32> to vector<1x128xf32>
    %101 = vector.broadcast %100 : vector<1x128xf32> to vector<8x128xf32>
    %102 = arith.subf %27, %101 : vector<8x128xf32>
    %103 = math.exp %102 : vector<8x128xf32>
    %cst_66 = arith.constant dense<0.000000e+00> : vector<128xf32>
    %104 = vector.multi_reduction <add>, %103, %cst_66 [0] : vector<8x128xf32> to vector<128xf32>
    %105 = vector.shape_cast %104 : vector<128xf32> to vector<1x128xf32>
    %106 = math.log %105 : vector<1x128xf32>
    %107 = arith.addf %100, %106 : vector<1x128xf32>
    %108 = vector.broadcast %107 : vector<1x128xf32> to vector<8x128xf32>
    %109 = arith.subf %27, %108 : vector<8x128xf32>
    %cst_67 = arith.constant dense<0xFF800000> : vector<128xf32>
    %110 = vector.multi_reduction <maximumf>, %37, %cst_67 [0] : vector<8x128xf32> to vector<128xf32>
    %111 = vector.shape_cast %110 : vector<128xf32> to vector<1x128xf32>
    %112 = vector.broadcast %111 : vector<1x128xf32> to vector<8x128xf32>
    %113 = arith.subf %37, %112 : vector<8x128xf32>
    %114 = math.exp %113 : vector<8x128xf32>
    %cst_68 = arith.constant dense<0.000000e+00> : vector<128xf32>
    %115 = vector.multi_reduction <add>, %114, %cst_68 [0] : vector<8x128xf32> to vector<128xf32>
    %116 = vector.shape_cast %115 : vector<128xf32> to vector<1x128xf32>
    %117 = math.log %116 : vector<1x128xf32>
    %118 = arith.addf %111, %117 : vector<1x128xf32>
    %119 = vector.broadcast %118 : vector<1x128xf32> to vector<8x128xf32>
    %120 = arith.subf %37, %119 : vector<8x128xf32>
    %cst_69 = arith.constant dense<0xFF800000> : vector<128xf32>
    %121 = vector.multi_reduction <maximumf>, %47, %cst_69 [0] : vector<8x128xf32> to vector<128xf32>
    %122 = vector.shape_cast %121 : vector<128xf32> to vector<1x128xf32>
    %123 = vector.broadcast %122 : vector<1x128xf32> to vector<8x128xf32>
    %124 = arith.subf %47, %123 : vector<8x128xf32>
    %125 = math.exp %124 : vector<8x128xf32>
    %cst_70 = arith.constant dense<0.000000e+00> : vector<128xf32>
    %126 = vector.multi_reduction <add>, %125, %cst_70 [0] : vector<8x128xf32> to vector<128xf32>
    %127 = vector.shape_cast %126 : vector<128xf32> to vector<1x128xf32>
    %128 = math.log %127 : vector<1x128xf32>
    %129 = arith.addf %122, %128 : vector<1x128xf32>
    %130 = vector.broadcast %129 : vector<1x128xf32> to vector<8x128xf32>
    %131 = arith.subf %47, %130 : vector<8x128xf32>
    %cst_71 = arith.constant dense<0xFF800000> : vector<128xf32>
    %132 = vector.multi_reduction <maximumf>, %57, %cst_71 [0] : vector<8x128xf32> to vector<128xf32>
    %133 = vector.shape_cast %132 : vector<128xf32> to vector<1x128xf32>
    %134 = vector.broadcast %133 : vector<1x128xf32> to vector<8x128xf32>
    %135 = arith.subf %57, %134 : vector<8x128xf32>
    %136 = math.exp %135 : vector<8x128xf32>
    %cst_72 = arith.constant dense<0.000000e+00> : vector<128xf32>
    %137 = vector.multi_reduction <add>, %136, %cst_72 [0] : vector<8x128xf32> to vector<128xf32>
    %138 = vector.shape_cast %137 : vector<128xf32> to vector<1x128xf32>
    %139 = math.log %138 : vector<1x128xf32>
    %140 = arith.addf %133, %139 : vector<1x128xf32>
    %141 = vector.broadcast %140 : vector<1x128xf32> to vector<8x128xf32>
    %142 = arith.subf %57, %141 : vector<8x128xf32>
    %cst_73 = arith.constant dense<0xFF800000> : vector<128xf32>
    %143 = vector.multi_reduction <maximumf>, %67, %cst_73 [0] : vector<8x128xf32> to vector<128xf32>
    %144 = vector.shape_cast %143 : vector<128xf32> to vector<1x128xf32>
    %145 = vector.broadcast %144 : vector<1x128xf32> to vector<8x128xf32>
    %146 = arith.subf %67, %145 : vector<8x128xf32>
    %147 = math.exp %146 : vector<8x128xf32>
    %cst_74 = arith.constant dense<0.000000e+00> : vector<128xf32>
    %148 = vector.multi_reduction <add>, %147, %cst_74 [0] : vector<8x128xf32> to vector<128xf32>
    %149 = vector.shape_cast %148 : vector<128xf32> to vector<1x128xf32>
    %150 = math.log %149 : vector<1x128xf32>
    %151 = arith.addf %144, %150 : vector<1x128xf32>
    %152 = vector.broadcast %151 : vector<1x128xf32> to vector<8x128xf32>
    %153 = arith.subf %67, %152 : vector<8x128xf32>
    %cst_75 = arith.constant dense<0xFF800000> : vector<128xf32>
    %154 = vector.multi_reduction <maximumf>, %77, %cst_75 [0] : vector<8x128xf32> to vector<128xf32>
    %155 = vector.shape_cast %154 : vector<128xf32> to vector<1x128xf32>
    %156 = vector.broadcast %155 : vector<1x128xf32> to vector<8x128xf32>
    %157 = arith.subf %77, %156 : vector<8x128xf32>
    %158 = math.exp %157 : vector<8x128xf32>
    %cst_76 = arith.constant dense<0.000000e+00> : vector<128xf32>
    %159 = vector.multi_reduction <add>, %158, %cst_76 [0] : vector<8x128xf32> to vector<128xf32>
    %160 = vector.shape_cast %159 : vector<128xf32> to vector<1x128xf32>
    %161 = math.log %160 : vector<1x128xf32>
    %162 = arith.addf %155, %161 : vector<1x128xf32>
    %163 = vector.broadcast %162 : vector<1x128xf32> to vector<8x128xf32>
    %164 = arith.subf %77, %163 : vector<8x128xf32>
    %cst_77 = arith.constant dense<0xFF800000> : vector<128xf32>
    %165 = vector.multi_reduction <maximumf>, %87, %cst_77 [0] : vector<8x128xf32> to vector<128xf32>
    %166 = vector.shape_cast %165 : vector<128xf32> to vector<1x128xf32>
    %167 = vector.broadcast %166 : vector<1x128xf32> to vector<8x128xf32>
    %168 = arith.subf %87, %167 : vector<8x128xf32>
    %169 = math.exp %168 : vector<8x128xf32>
    %cst_78 = arith.constant dense<0.000000e+00> : vector<128xf32>
    %170 = vector.multi_reduction <add>, %169, %cst_78 [0] : vector<8x128xf32> to vector<128xf32>
    %171 = vector.shape_cast %170 : vector<128xf32> to vector<1x128xf32>
    %172 = math.log %171 : vector<1x128xf32>
    %173 = arith.addf %166, %172 : vector<1x128xf32>
    %174 = vector.broadcast %173 : vector<1x128xf32> to vector<8x128xf32>
    %175 = arith.subf %87, %174 : vector<8x128xf32>
    %176 = arith.maximumf %98, %109 : vector<8x128xf32>
    %177 = arith.maximumf %120, %131 : vector<8x128xf32>
    %178 = arith.maximumf %142, %153 : vector<8x128xf32>
    %179 = arith.maximumf %164, %175 : vector<8x128xf32>
    %180 = arith.maximumf %176, %177 : vector<8x128xf32>
    %181 = arith.maximumf %178, %179 : vector<8x128xf32>
    %182 = arith.maximumf %180, %181 : vector<8x128xf32>
    %183 = arith.subf %98, %182 : vector<8x128xf32>
    %184 = math.exp %183 : vector<8x128xf32>
    %185 = arith.subf %109, %182 : vector<8x128xf32>
    %186 = math.exp %185 : vector<8x128xf32>
    %187 = arith.subf %120, %182 : vector<8x128xf32>
    %188 = math.exp %187 : vector<8x128xf32>
    %189 = arith.subf %131, %182 : vector<8x128xf32>
    %190 = math.exp %189 : vector<8x128xf32>
    %191 = arith.subf %142, %182 : vector<8x128xf32>
    %192 = math.exp %191 : vector<8x128xf32>
    %193 = arith.subf %153, %182 : vector<8x128xf32>
    %194 = math.exp %193 : vector<8x128xf32>
    %195 = arith.subf %164, %182 : vector<8x128xf32>
    %196 = math.exp %195 : vector<8x128xf32>
    %197 = arith.subf %175, %182 : vector<8x128xf32>
    %198 = math.exp %197 : vector<8x128xf32>
    %199 = arith.addf %184, %186 : vector<8x128xf32>
    %200 = arith.addf %188, %190 : vector<8x128xf32>
    %201 = arith.addf %192, %194 : vector<8x128xf32>
    %202 = arith.addf %196, %198 : vector<8x128xf32>
    %203 = arith.addf %199, %200 : vector<8x128xf32>
    %204 = arith.addf %201, %202 : vector<8x128xf32>
    %205 = arith.addf %203, %204 : vector<8x128xf32>
    %206 = math.log %205 : vector<8x128xf32>
    %207 = arith.addf %182, %206 : vector<8x128xf32>
    %208 = arith.subf %98, %207 : vector<8x128xf32>
    %209 = arith.subf %109, %207 : vector<8x128xf32>
    %210 = arith.subf %120, %207 : vector<8x128xf32>
    %211 = arith.subf %131, %207 : vector<8x128xf32>
    %212 = arith.subf %142, %207 : vector<8x128xf32>
    %213 = arith.subf %153, %207 : vector<8x128xf32>
    %214 = arith.subf %164, %207 : vector<8x128xf32>
    %215 = arith.subf %175, %207 : vector<8x128xf32>
    %cst_79 = arith.constant dense<0xFF800000> : vector<128xf32>
    %216 = vector.multi_reduction <maximumf>, %208, %cst_79 [0] : vector<8x128xf32> to vector<128xf32>
    %217 = vector.shape_cast %216 : vector<128xf32> to vector<1x128xf32>
    %218 = vector.broadcast %217 : vector<1x128xf32> to vector<8x128xf32>
    %219 = arith.subf %208, %218 : vector<8x128xf32>
    %220 = math.exp %219 : vector<8x128xf32>
    %cst_80 = arith.constant dense<0.000000e+00> : vector<128xf32>
    %221 = vector.multi_reduction <add>, %220, %cst_80 [0] : vector<8x128xf32> to vector<128xf32>
    %222 = vector.shape_cast %221 : vector<128xf32> to vector<1x128xf32>
    %223 = math.log %222 : vector<1x128xf32>
    %224 = arith.addf %217, %223 : vector<1x128xf32>
    %225 = vector.broadcast %224 : vector<1x128xf32> to vector<8x128xf32>
    %226 = arith.subf %208, %225 : vector<8x128xf32>
    %cst_81 = arith.constant dense<0xFF800000> : vector<128xf32>
    %227 = vector.multi_reduction <maximumf>, %209, %cst_81 [0] : vector<8x128xf32> to vector<128xf32>
    %228 = vector.shape_cast %227 : vector<128xf32> to vector<1x128xf32>
    %229 = vector.broadcast %228 : vector<1x128xf32> to vector<8x128xf32>
    %230 = arith.subf %209, %229 : vector<8x128xf32>
    %231 = math.exp %230 : vector<8x128xf32>
    %cst_82 = arith.constant dense<0.000000e+00> : vector<128xf32>
    %232 = vector.multi_reduction <add>, %231, %cst_82 [0] : vector<8x128xf32> to vector<128xf32>
    %233 = vector.shape_cast %232 : vector<128xf32> to vector<1x128xf32>
    %234 = math.log %233 : vector<1x128xf32>
    %235 = arith.addf %228, %234 : vector<1x128xf32>
    %236 = vector.broadcast %235 : vector<1x128xf32> to vector<8x128xf32>
    %237 = arith.subf %209, %236 : vector<8x128xf32>
    %cst_83 = arith.constant dense<0xFF800000> : vector<128xf32>
    %238 = vector.multi_reduction <maximumf>, %210, %cst_83 [0] : vector<8x128xf32> to vector<128xf32>
    %239 = vector.shape_cast %238 : vector<128xf32> to vector<1x128xf32>
    %240 = vector.broadcast %239 : vector<1x128xf32> to vector<8x128xf32>
    %241 = arith.subf %210, %240 : vector<8x128xf32>
    %242 = math.exp %241 : vector<8x128xf32>
    %cst_84 = arith.constant dense<0.000000e+00> : vector<128xf32>
    %243 = vector.multi_reduction <add>, %242, %cst_84 [0] : vector<8x128xf32> to vector<128xf32>
    %244 = vector.shape_cast %243 : vector<128xf32> to vector<1x128xf32>
    %245 = math.log %244 : vector<1x128xf32>
    %246 = arith.addf %239, %245 : vector<1x128xf32>
    %247 = vector.broadcast %246 : vector<1x128xf32> to vector<8x128xf32>
    %248 = arith.subf %210, %247 : vector<8x128xf32>
    %cst_85 = arith.constant dense<0xFF800000> : vector<128xf32>
    %249 = vector.multi_reduction <maximumf>, %211, %cst_85 [0] : vector<8x128xf32> to vector<128xf32>
    %250 = vector.shape_cast %249 : vector<128xf32> to vector<1x128xf32>
    %251 = vector.broadcast %250 : vector<1x128xf32> to vector<8x128xf32>
    %252 = arith.subf %211, %251 : vector<8x128xf32>
    %253 = math.exp %252 : vector<8x128xf32>
    %cst_86 = arith.constant dense<0.000000e+00> : vector<128xf32>
    %254 = vector.multi_reduction <add>, %253, %cst_86 [0] : vector<8x128xf32> to vector<128xf32>
    %255 = vector.shape_cast %254 : vector<128xf32> to vector<1x128xf32>
    %256 = math.log %255 : vector<1x128xf32>
    %257 = arith.addf %250, %256 : vector<1x128xf32>
    %258 = vector.broadcast %257 : vector<1x128xf32> to vector<8x128xf32>
    %259 = arith.subf %211, %258 : vector<8x128xf32>
    %cst_87 = arith.constant dense<0xFF800000> : vector<128xf32>
    %260 = vector.multi_reduction <maximumf>, %212, %cst_87 [0] : vector<8x128xf32> to vector<128xf32>
    %261 = vector.shape_cast %260 : vector<128xf32> to vector<1x128xf32>
    %262 = vector.broadcast %261 : vector<1x128xf32> to vector<8x128xf32>
    %263 = arith.subf %212, %262 : vector<8x128xf32>
    %264 = math.exp %263 : vector<8x128xf32>
    %cst_88 = arith.constant dense<0.000000e+00> : vector<128xf32>
    %265 = vector.multi_reduction <add>, %264, %cst_88 [0] : vector<8x128xf32> to vector<128xf32>
    %266 = vector.shape_cast %265 : vector<128xf32> to vector<1x128xf32>
    %267 = math.log %266 : vector<1x128xf32>
    %268 = arith.addf %261, %267 : vector<1x128xf32>
    %269 = vector.broadcast %268 : vector<1x128xf32> to vector<8x128xf32>
    %270 = arith.subf %212, %269 : vector<8x128xf32>
    %cst_89 = arith.constant dense<0xFF800000> : vector<128xf32>
    %271 = vector.multi_reduction <maximumf>, %213, %cst_89 [0] : vector<8x128xf32> to vector<128xf32>
    %272 = vector.shape_cast %271 : vector<128xf32> to vector<1x128xf32>
    %273 = vector.broadcast %272 : vector<1x128xf32> to vector<8x128xf32>
    %274 = arith.subf %213, %273 : vector<8x128xf32>
    %275 = math.exp %274 : vector<8x128xf32>
    %cst_90 = arith.constant dense<0.000000e+00> : vector<128xf32>
    %276 = vector.multi_reduction <add>, %275, %cst_90 [0] : vector<8x128xf32> to vector<128xf32>
    %277 = vector.shape_cast %276 : vector<128xf32> to vector<1x128xf32>
    %278 = math.log %277 : vector<1x128xf32>
    %279 = arith.addf %272, %278 : vector<1x128xf32>
    %280 = vector.broadcast %279 : vector<1x128xf32> to vector<8x128xf32>
    %281 = arith.subf %213, %280 : vector<8x128xf32>
    %cst_91 = arith.constant dense<0xFF800000> : vector<128xf32>
    %282 = vector.multi_reduction <maximumf>, %214, %cst_91 [0] : vector<8x128xf32> to vector<128xf32>
    %283 = vector.shape_cast %282 : vector<128xf32> to vector<1x128xf32>
    %284 = vector.broadcast %283 : vector<1x128xf32> to vector<8x128xf32>
    %285 = arith.subf %214, %284 : vector<8x128xf32>
    %286 = math.exp %285 : vector<8x128xf32>
    %cst_92 = arith.constant dense<0.000000e+00> : vector<128xf32>
    %287 = vector.multi_reduction <add>, %286, %cst_92 [0] : vector<8x128xf32> to vector<128xf32>
    %288 = vector.shape_cast %287 : vector<128xf32> to vector<1x128xf32>
    %289 = math.log %288 : vector<1x128xf32>
    %290 = arith.addf %283, %289 : vector<1x128xf32>
    %291 = vector.broadcast %290 : vector<1x128xf32> to vector<8x128xf32>
    %292 = arith.subf %214, %291 : vector<8x128xf32>
    %cst_93 = arith.constant dense<0xFF800000> : vector<128xf32>
    %293 = vector.multi_reduction <maximumf>, %215, %cst_93 [0] : vector<8x128xf32> to vector<128xf32>
    %294 = vector.shape_cast %293 : vector<128xf32> to vector<1x128xf32>
    %295 = vector.broadcast %294 : vector<1x128xf32> to vector<8x128xf32>
    %296 = arith.subf %215, %295 : vector<8x128xf32>
    %297 = math.exp %296 : vector<8x128xf32>
    %cst_94 = arith.constant dense<0.000000e+00> : vector<128xf32>
    %298 = vector.multi_reduction <add>, %297, %cst_94 [0] : vector<8x128xf32> to vector<128xf32>
    %299 = vector.shape_cast %298 : vector<128xf32> to vector<1x128xf32>
    %300 = math.log %299 : vector<1x128xf32>
    %301 = arith.addf %294, %300 : vector<1x128xf32>
    %302 = vector.broadcast %301 : vector<1x128xf32> to vector<8x128xf32>
    %303 = arith.subf %215, %302 : vector<8x128xf32>
    %304 = arith.maximumf %226, %237 : vector<8x128xf32>
    %305 = arith.maximumf %248, %259 : vector<8x128xf32>
    %306 = arith.maximumf %270, %281 : vector<8x128xf32>
    %307 = arith.maximumf %292, %303 : vector<8x128xf32>
    %308 = arith.maximumf %304, %305 : vector<8x128xf32>
    %309 = arith.maximumf %306, %307 : vector<8x128xf32>
    %310 = arith.maximumf %308, %309 : vector<8x128xf32>
    %311 = arith.subf %226, %310 : vector<8x128xf32>
    %312 = math.exp %311 : vector<8x128xf32>
    %313 = arith.subf %237, %310 : vector<8x128xf32>
    %314 = math.exp %313 : vector<8x128xf32>
    %315 = arith.subf %248, %310 : vector<8x128xf32>
    %316 = math.exp %315 : vector<8x128xf32>
    %317 = arith.subf %259, %310 : vector<8x128xf32>
    %318 = math.exp %317 : vector<8x128xf32>
    %319 = arith.subf %270, %310 : vector<8x128xf32>
    %320 = math.exp %319 : vector<8x128xf32>
    %321 = arith.subf %281, %310 : vector<8x128xf32>
    %322 = math.exp %321 : vector<8x128xf32>
    %323 = arith.subf %292, %310 : vector<8x128xf32>
    %324 = math.exp %323 : vector<8x128xf32>
    %325 = arith.subf %303, %310 : vector<8x128xf32>
    %326 = math.exp %325 : vector<8x128xf32>
    %327 = arith.addf %312, %314 : vector<8x128xf32>
    %328 = arith.addf %316, %318 : vector<8x128xf32>
    %329 = arith.addf %320, %322 : vector<8x128xf32>
    %330 = arith.addf %324, %326 : vector<8x128xf32>
    %331 = arith.addf %327, %328 : vector<8x128xf32>
    %332 = arith.addf %329, %330 : vector<8x128xf32>
    %333 = arith.addf %331, %332 : vector<8x128xf32>
    %334 = math.log %333 : vector<8x128xf32>
    %335 = arith.addf %310, %334 : vector<8x128xf32>
    %336 = arith.subf %226, %335 : vector<8x128xf32>
    %337 = arith.subf %237, %335 : vector<8x128xf32>
    %338 = arith.subf %248, %335 : vector<8x128xf32>
    %339 = arith.subf %259, %335 : vector<8x128xf32>
    %340 = arith.subf %270, %335 : vector<8x128xf32>
    %341 = arith.subf %281, %335 : vector<8x128xf32>
    %342 = arith.subf %292, %335 : vector<8x128xf32>
    %343 = arith.subf %303, %335 : vector<8x128xf32>
    %cst_95 = arith.constant dense<0xFF800000> : vector<128xf32>
    %344 = vector.multi_reduction <maximumf>, %336, %cst_95 [0] : vector<8x128xf32> to vector<128xf32>
    %345 = vector.shape_cast %344 : vector<128xf32> to vector<1x128xf32>
    %346 = vector.broadcast %345 : vector<1x128xf32> to vector<8x128xf32>
    %347 = arith.subf %336, %346 : vector<8x128xf32>
    %348 = math.exp %347 : vector<8x128xf32>
    %cst_96 = arith.constant dense<0.000000e+00> : vector<128xf32>
    %349 = vector.multi_reduction <add>, %348, %cst_96 [0] : vector<8x128xf32> to vector<128xf32>
    %350 = vector.shape_cast %349 : vector<128xf32> to vector<1x128xf32>
    %351 = math.log %350 : vector<1x128xf32>
    %352 = arith.addf %345, %351 : vector<1x128xf32>
    %353 = vector.broadcast %352 : vector<1x128xf32> to vector<8x128xf32>
    %354 = arith.subf %336, %353 : vector<8x128xf32>
    %cst_97 = arith.constant dense<0xFF800000> : vector<128xf32>
    %355 = vector.multi_reduction <maximumf>, %337, %cst_97 [0] : vector<8x128xf32> to vector<128xf32>
    %356 = vector.shape_cast %355 : vector<128xf32> to vector<1x128xf32>
    %357 = vector.broadcast %356 : vector<1x128xf32> to vector<8x128xf32>
    %358 = arith.subf %337, %357 : vector<8x128xf32>
    %359 = math.exp %358 : vector<8x128xf32>
    %cst_98 = arith.constant dense<0.000000e+00> : vector<128xf32>
    %360 = vector.multi_reduction <add>, %359, %cst_98 [0] : vector<8x128xf32> to vector<128xf32>
    %361 = vector.shape_cast %360 : vector<128xf32> to vector<1x128xf32>
    %362 = math.log %361 : vector<1x128xf32>
    %363 = arith.addf %356, %362 : vector<1x128xf32>
    %364 = vector.broadcast %363 : vector<1x128xf32> to vector<8x128xf32>
    %365 = arith.subf %337, %364 : vector<8x128xf32>
    %cst_99 = arith.constant dense<0xFF800000> : vector<128xf32>
    %366 = vector.multi_reduction <maximumf>, %338, %cst_99 [0] : vector<8x128xf32> to vector<128xf32>
    %367 = vector.shape_cast %366 : vector<128xf32> to vector<1x128xf32>
    %368 = vector.broadcast %367 : vector<1x128xf32> to vector<8x128xf32>
    %369 = arith.subf %338, %368 : vector<8x128xf32>
    %370 = math.exp %369 : vector<8x128xf32>
    %cst_100 = arith.constant dense<0.000000e+00> : vector<128xf32>
    %371 = vector.multi_reduction <add>, %370, %cst_100 [0] : vector<8x128xf32> to vector<128xf32>
    %372 = vector.shape_cast %371 : vector<128xf32> to vector<1x128xf32>
    %373 = math.log %372 : vector<1x128xf32>
    %374 = arith.addf %367, %373 : vector<1x128xf32>
    %375 = vector.broadcast %374 : vector<1x128xf32> to vector<8x128xf32>
    %376 = arith.subf %338, %375 : vector<8x128xf32>
    %cst_101 = arith.constant dense<0xFF800000> : vector<128xf32>
    %377 = vector.multi_reduction <maximumf>, %339, %cst_101 [0] : vector<8x128xf32> to vector<128xf32>
    %378 = vector.shape_cast %377 : vector<128xf32> to vector<1x128xf32>
    %379 = vector.broadcast %378 : vector<1x128xf32> to vector<8x128xf32>
    %380 = arith.subf %339, %379 : vector<8x128xf32>
    %381 = math.exp %380 : vector<8x128xf32>
    %cst_102 = arith.constant dense<0.000000e+00> : vector<128xf32>
    %382 = vector.multi_reduction <add>, %381, %cst_102 [0] : vector<8x128xf32> to vector<128xf32>
    %383 = vector.shape_cast %382 : vector<128xf32> to vector<1x128xf32>
    %384 = math.log %383 : vector<1x128xf32>
    %385 = arith.addf %378, %384 : vector<1x128xf32>
    %386 = vector.broadcast %385 : vector<1x128xf32> to vector<8x128xf32>
    %387 = arith.subf %339, %386 : vector<8x128xf32>
    %cst_103 = arith.constant dense<0xFF800000> : vector<128xf32>
    %388 = vector.multi_reduction <maximumf>, %340, %cst_103 [0] : vector<8x128xf32> to vector<128xf32>
    %389 = vector.shape_cast %388 : vector<128xf32> to vector<1x128xf32>
    %390 = vector.broadcast %389 : vector<1x128xf32> to vector<8x128xf32>
    %391 = arith.subf %340, %390 : vector<8x128xf32>
    %392 = math.exp %391 : vector<8x128xf32>
    %cst_104 = arith.constant dense<0.000000e+00> : vector<128xf32>
    %393 = vector.multi_reduction <add>, %392, %cst_104 [0] : vector<8x128xf32> to vector<128xf32>
    %394 = vector.shape_cast %393 : vector<128xf32> to vector<1x128xf32>
    %395 = math.log %394 : vector<1x128xf32>
    %396 = arith.addf %389, %395 : vector<1x128xf32>
    %397 = vector.broadcast %396 : vector<1x128xf32> to vector<8x128xf32>
    %398 = arith.subf %340, %397 : vector<8x128xf32>
    %cst_105 = arith.constant dense<0xFF800000> : vector<128xf32>
    %399 = vector.multi_reduction <maximumf>, %341, %cst_105 [0] : vector<8x128xf32> to vector<128xf32>
    %400 = vector.shape_cast %399 : vector<128xf32> to vector<1x128xf32>
    %401 = vector.broadcast %400 : vector<1x128xf32> to vector<8x128xf32>
    %402 = arith.subf %341, %401 : vector<8x128xf32>
    %403 = math.exp %402 : vector<8x128xf32>
    %cst_106 = arith.constant dense<0.000000e+00> : vector<128xf32>
    %404 = vector.multi_reduction <add>, %403, %cst_106 [0] : vector<8x128xf32> to vector<128xf32>
    %405 = vector.shape_cast %404 : vector<128xf32> to vector<1x128xf32>
    %406 = math.log %405 : vector<1x128xf32>
    %407 = arith.addf %400, %406 : vector<1x128xf32>
    %408 = vector.broadcast %407 : vector<1x128xf32> to vector<8x128xf32>
    %409 = arith.subf %341, %408 : vector<8x128xf32>
    %cst_107 = arith.constant dense<0xFF800000> : vector<128xf32>
    %410 = vector.multi_reduction <maximumf>, %342, %cst_107 [0] : vector<8x128xf32> to vector<128xf32>
    %411 = vector.shape_cast %410 : vector<128xf32> to vector<1x128xf32>
    %412 = vector.broadcast %411 : vector<1x128xf32> to vector<8x128xf32>
    %413 = arith.subf %342, %412 : vector<8x128xf32>
    %414 = math.exp %413 : vector<8x128xf32>
    %cst_108 = arith.constant dense<0.000000e+00> : vector<128xf32>
    %415 = vector.multi_reduction <add>, %414, %cst_108 [0] : vector<8x128xf32> to vector<128xf32>
    %416 = vector.shape_cast %415 : vector<128xf32> to vector<1x128xf32>
    %417 = math.log %416 : vector<1x128xf32>
    %418 = arith.addf %411, %417 : vector<1x128xf32>
    %419 = vector.broadcast %418 : vector<1x128xf32> to vector<8x128xf32>
    %420 = arith.subf %342, %419 : vector<8x128xf32>
    %cst_109 = arith.constant dense<0xFF800000> : vector<128xf32>
    %421 = vector.multi_reduction <maximumf>, %343, %cst_109 [0] : vector<8x128xf32> to vector<128xf32>
    %422 = vector.shape_cast %421 : vector<128xf32> to vector<1x128xf32>
    %423 = vector.broadcast %422 : vector<1x128xf32> to vector<8x128xf32>
    %424 = arith.subf %343, %423 : vector<8x128xf32>
    %425 = math.exp %424 : vector<8x128xf32>
    %cst_110 = arith.constant dense<0.000000e+00> : vector<128xf32>
    %426 = vector.multi_reduction <add>, %425, %cst_110 [0] : vector<8x128xf32> to vector<128xf32>
    %427 = vector.shape_cast %426 : vector<128xf32> to vector<1x128xf32>
    %428 = math.log %427 : vector<1x128xf32>
    %429 = arith.addf %422, %428 : vector<1x128xf32>
    %430 = vector.broadcast %429 : vector<1x128xf32> to vector<8x128xf32>
    %431 = arith.subf %343, %430 : vector<8x128xf32>
    %432 = arith.maximumf %354, %365 : vector<8x128xf32>
    %433 = arith.maximumf %376, %387 : vector<8x128xf32>
    %434 = arith.maximumf %398, %409 : vector<8x128xf32>
    %435 = arith.maximumf %420, %431 : vector<8x128xf32>
    %436 = arith.maximumf %432, %433 : vector<8x128xf32>
    %437 = arith.maximumf %434, %435 : vector<8x128xf32>
    %438 = arith.maximumf %436, %437 : vector<8x128xf32>
    %439 = arith.subf %354, %438 : vector<8x128xf32>
    %440 = math.exp %439 : vector<8x128xf32>
    %441 = arith.subf %365, %438 : vector<8x128xf32>
    %442 = math.exp %441 : vector<8x128xf32>
    %443 = arith.subf %376, %438 : vector<8x128xf32>
    %444 = math.exp %443 : vector<8x128xf32>
    %445 = arith.subf %387, %438 : vector<8x128xf32>
    %446 = math.exp %445 : vector<8x128xf32>
    %447 = arith.subf %398, %438 : vector<8x128xf32>
    %448 = math.exp %447 : vector<8x128xf32>
    %449 = arith.subf %409, %438 : vector<8x128xf32>
    %450 = math.exp %449 : vector<8x128xf32>
    %451 = arith.subf %420, %438 : vector<8x128xf32>
    %452 = math.exp %451 : vector<8x128xf32>
    %453 = arith.subf %431, %438 : vector<8x128xf32>
    %454 = math.exp %453 : vector<8x128xf32>
    %455 = arith.addf %440, %442 : vector<8x128xf32>
    %456 = arith.addf %444, %446 : vector<8x128xf32>
    %457 = arith.addf %448, %450 : vector<8x128xf32>
    %458 = arith.addf %452, %454 : vector<8x128xf32>
    %459 = arith.addf %455, %456 : vector<8x128xf32>
    %460 = arith.addf %457, %458 : vector<8x128xf32>
    %461 = arith.addf %459, %460 : vector<8x128xf32>
    %462 = math.log %461 : vector<8x128xf32>
    %463 = arith.addf %438, %462 : vector<8x128xf32>
    %464 = arith.subf %354, %463 : vector<8x128xf32>
    %465 = arith.subf %365, %463 : vector<8x128xf32>
    %466 = arith.subf %376, %463 : vector<8x128xf32>
    %467 = arith.subf %387, %463 : vector<8x128xf32>
    %468 = arith.subf %398, %463 : vector<8x128xf32>
    %469 = arith.subf %409, %463 : vector<8x128xf32>
    %470 = arith.subf %420, %463 : vector<8x128xf32>
    %471 = arith.subf %431, %463 : vector<8x128xf32>
    %cst_111 = arith.constant dense<0xFF800000> : vector<128xf32>
    %472 = vector.multi_reduction <maximumf>, %464, %cst_111 [0] : vector<8x128xf32> to vector<128xf32>
    %473 = vector.shape_cast %472 : vector<128xf32> to vector<1x128xf32>
    %474 = vector.broadcast %473 : vector<1x128xf32> to vector<8x128xf32>
    %475 = arith.subf %464, %474 : vector<8x128xf32>
    %476 = math.exp %475 : vector<8x128xf32>
    %cst_112 = arith.constant dense<0.000000e+00> : vector<128xf32>
    %477 = vector.multi_reduction <add>, %476, %cst_112 [0] : vector<8x128xf32> to vector<128xf32>
    %478 = vector.shape_cast %477 : vector<128xf32> to vector<1x128xf32>
    %479 = math.log %478 : vector<1x128xf32>
    %480 = arith.addf %473, %479 : vector<1x128xf32>
    %481 = vector.broadcast %480 : vector<1x128xf32> to vector<8x128xf32>
    %482 = arith.subf %464, %481 : vector<8x128xf32>
    %cst_113 = arith.constant dense<0xFF800000> : vector<128xf32>
    %483 = vector.multi_reduction <maximumf>, %465, %cst_113 [0] : vector<8x128xf32> to vector<128xf32>
    %484 = vector.shape_cast %483 : vector<128xf32> to vector<1x128xf32>
    %485 = vector.broadcast %484 : vector<1x128xf32> to vector<8x128xf32>
    %486 = arith.subf %465, %485 : vector<8x128xf32>
    %487 = math.exp %486 : vector<8x128xf32>
    %cst_114 = arith.constant dense<0.000000e+00> : vector<128xf32>
    %488 = vector.multi_reduction <add>, %487, %cst_114 [0] : vector<8x128xf32> to vector<128xf32>
    %489 = vector.shape_cast %488 : vector<128xf32> to vector<1x128xf32>
    %490 = math.log %489 : vector<1x128xf32>
    %491 = arith.addf %484, %490 : vector<1x128xf32>
    %492 = vector.broadcast %491 : vector<1x128xf32> to vector<8x128xf32>
    %493 = arith.subf %465, %492 : vector<8x128xf32>
    %cst_115 = arith.constant dense<0xFF800000> : vector<128xf32>
    %494 = vector.multi_reduction <maximumf>, %466, %cst_115 [0] : vector<8x128xf32> to vector<128xf32>
    %495 = vector.shape_cast %494 : vector<128xf32> to vector<1x128xf32>
    %496 = vector.broadcast %495 : vector<1x128xf32> to vector<8x128xf32>
    %497 = arith.subf %466, %496 : vector<8x128xf32>
    %498 = math.exp %497 : vector<8x128xf32>
    %cst_116 = arith.constant dense<0.000000e+00> : vector<128xf32>
    %499 = vector.multi_reduction <add>, %498, %cst_116 [0] : vector<8x128xf32> to vector<128xf32>
    %500 = vector.shape_cast %499 : vector<128xf32> to vector<1x128xf32>
    %501 = math.log %500 : vector<1x128xf32>
    %502 = arith.addf %495, %501 : vector<1x128xf32>
    %503 = vector.broadcast %502 : vector<1x128xf32> to vector<8x128xf32>
    %504 = arith.subf %466, %503 : vector<8x128xf32>
    %cst_117 = arith.constant dense<0xFF800000> : vector<128xf32>
    %505 = vector.multi_reduction <maximumf>, %467, %cst_117 [0] : vector<8x128xf32> to vector<128xf32>
    %506 = vector.shape_cast %505 : vector<128xf32> to vector<1x128xf32>
    %507 = vector.broadcast %506 : vector<1x128xf32> to vector<8x128xf32>
    %508 = arith.subf %467, %507 : vector<8x128xf32>
    %509 = math.exp %508 : vector<8x128xf32>
    %cst_118 = arith.constant dense<0.000000e+00> : vector<128xf32>
    %510 = vector.multi_reduction <add>, %509, %cst_118 [0] : vector<8x128xf32> to vector<128xf32>
    %511 = vector.shape_cast %510 : vector<128xf32> to vector<1x128xf32>
    %512 = math.log %511 : vector<1x128xf32>
    %513 = arith.addf %506, %512 : vector<1x128xf32>
    %514 = vector.broadcast %513 : vector<1x128xf32> to vector<8x128xf32>
    %515 = arith.subf %467, %514 : vector<8x128xf32>
    %cst_119 = arith.constant dense<0xFF800000> : vector<128xf32>
    %516 = vector.multi_reduction <maximumf>, %468, %cst_119 [0] : vector<8x128xf32> to vector<128xf32>
    %517 = vector.shape_cast %516 : vector<128xf32> to vector<1x128xf32>
    %518 = vector.broadcast %517 : vector<1x128xf32> to vector<8x128xf32>
    %519 = arith.subf %468, %518 : vector<8x128xf32>
    %520 = math.exp %519 : vector<8x128xf32>
    %cst_120 = arith.constant dense<0.000000e+00> : vector<128xf32>
    %521 = vector.multi_reduction <add>, %520, %cst_120 [0] : vector<8x128xf32> to vector<128xf32>
    %522 = vector.shape_cast %521 : vector<128xf32> to vector<1x128xf32>
    %523 = math.log %522 : vector<1x128xf32>
    %524 = arith.addf %517, %523 : vector<1x128xf32>
    %525 = vector.broadcast %524 : vector<1x128xf32> to vector<8x128xf32>
    %526 = arith.subf %468, %525 : vector<8x128xf32>
    %cst_121 = arith.constant dense<0xFF800000> : vector<128xf32>
    %527 = vector.multi_reduction <maximumf>, %469, %cst_121 [0] : vector<8x128xf32> to vector<128xf32>
    %528 = vector.shape_cast %527 : vector<128xf32> to vector<1x128xf32>
    %529 = vector.broadcast %528 : vector<1x128xf32> to vector<8x128xf32>
    %530 = arith.subf %469, %529 : vector<8x128xf32>
    %531 = math.exp %530 : vector<8x128xf32>
    %cst_122 = arith.constant dense<0.000000e+00> : vector<128xf32>
    %532 = vector.multi_reduction <add>, %531, %cst_122 [0] : vector<8x128xf32> to vector<128xf32>
    %533 = vector.shape_cast %532 : vector<128xf32> to vector<1x128xf32>
    %534 = math.log %533 : vector<1x128xf32>
    %535 = arith.addf %528, %534 : vector<1x128xf32>
    %536 = vector.broadcast %535 : vector<1x128xf32> to vector<8x128xf32>
    %537 = arith.subf %469, %536 : vector<8x128xf32>
    %cst_123 = arith.constant dense<0xFF800000> : vector<128xf32>
    %538 = vector.multi_reduction <maximumf>, %470, %cst_123 [0] : vector<8x128xf32> to vector<128xf32>
    %539 = vector.shape_cast %538 : vector<128xf32> to vector<1x128xf32>
    %540 = vector.broadcast %539 : vector<1x128xf32> to vector<8x128xf32>
    %541 = arith.subf %470, %540 : vector<8x128xf32>
    %542 = math.exp %541 : vector<8x128xf32>
    %cst_124 = arith.constant dense<0.000000e+00> : vector<128xf32>
    %543 = vector.multi_reduction <add>, %542, %cst_124 [0] : vector<8x128xf32> to vector<128xf32>
    %544 = vector.shape_cast %543 : vector<128xf32> to vector<1x128xf32>
    %545 = math.log %544 : vector<1x128xf32>
    %546 = arith.addf %539, %545 : vector<1x128xf32>
    %547 = vector.broadcast %546 : vector<1x128xf32> to vector<8x128xf32>
    %548 = arith.subf %470, %547 : vector<8x128xf32>
    %cst_125 = arith.constant dense<0xFF800000> : vector<128xf32>
    %549 = vector.multi_reduction <maximumf>, %471, %cst_125 [0] : vector<8x128xf32> to vector<128xf32>
    %550 = vector.shape_cast %549 : vector<128xf32> to vector<1x128xf32>
    %551 = vector.broadcast %550 : vector<1x128xf32> to vector<8x128xf32>
    %552 = arith.subf %471, %551 : vector<8x128xf32>
    %553 = math.exp %552 : vector<8x128xf32>
    %cst_126 = arith.constant dense<0.000000e+00> : vector<128xf32>
    %554 = vector.multi_reduction <add>, %553, %cst_126 [0] : vector<8x128xf32> to vector<128xf32>
    %555 = vector.shape_cast %554 : vector<128xf32> to vector<1x128xf32>
    %556 = math.log %555 : vector<1x128xf32>
    %557 = arith.addf %550, %556 : vector<1x128xf32>
    %558 = vector.broadcast %557 : vector<1x128xf32> to vector<8x128xf32>
    %559 = arith.subf %471, %558 : vector<8x128xf32>
    %560 = arith.maximumf %482, %493 : vector<8x128xf32>
    %561 = arith.maximumf %504, %515 : vector<8x128xf32>
    %562 = arith.maximumf %526, %537 : vector<8x128xf32>
    %563 = arith.maximumf %548, %559 : vector<8x128xf32>
    %564 = arith.maximumf %560, %561 : vector<8x128xf32>
    %565 = arith.maximumf %562, %563 : vector<8x128xf32>
    %566 = arith.maximumf %564, %565 : vector<8x128xf32>
    %567 = arith.subf %482, %566 : vector<8x128xf32>
    %568 = math.exp %567 : vector<8x128xf32>
    %569 = arith.subf %493, %566 : vector<8x128xf32>
    %570 = math.exp %569 : vector<8x128xf32>
    %571 = arith.subf %504, %566 : vector<8x128xf32>
    %572 = math.exp %571 : vector<8x128xf32>
    %573 = arith.subf %515, %566 : vector<8x128xf32>
    %574 = math.exp %573 : vector<8x128xf32>
    %575 = arith.subf %526, %566 : vector<8x128xf32>
    %576 = math.exp %575 : vector<8x128xf32>
    %577 = arith.subf %537, %566 : vector<8x128xf32>
    %578 = math.exp %577 : vector<8x128xf32>
    %579 = arith.subf %548, %566 : vector<8x128xf32>
    %580 = math.exp %579 : vector<8x128xf32>
    %581 = arith.subf %559, %566 : vector<8x128xf32>
    %582 = math.exp %581 : vector<8x128xf32>
    %583 = arith.addf %568, %570 : vector<8x128xf32>
    %584 = arith.addf %572, %574 : vector<8x128xf32>
    %585 = arith.addf %576, %578 : vector<8x128xf32>
    %586 = arith.addf %580, %582 : vector<8x128xf32>
    %587 = arith.addf %583, %584 : vector<8x128xf32>
    %588 = arith.addf %585, %586 : vector<8x128xf32>
    %589 = arith.addf %587, %588 : vector<8x128xf32>
    %590 = math.log %589 : vector<8x128xf32>
    %591 = arith.addf %566, %590 : vector<8x128xf32>
    %592 = arith.subf %482, %591 : vector<8x128xf32>
    %593 = arith.subf %493, %591 : vector<8x128xf32>
    %594 = arith.subf %504, %591 : vector<8x128xf32>
    %595 = arith.subf %515, %591 : vector<8x128xf32>
    %596 = arith.subf %526, %591 : vector<8x128xf32>
    %597 = arith.subf %537, %591 : vector<8x128xf32>
    %598 = arith.subf %548, %591 : vector<8x128xf32>
    %599 = arith.subf %559, %591 : vector<8x128xf32>
    %cst_127 = arith.constant dense<0xFF800000> : vector<128xf32>
    %600 = vector.multi_reduction <maximumf>, %592, %cst_127 [0] : vector<8x128xf32> to vector<128xf32>
    %601 = vector.shape_cast %600 : vector<128xf32> to vector<1x128xf32>
    %602 = vector.broadcast %601 : vector<1x128xf32> to vector<8x128xf32>
    %603 = arith.subf %592, %602 : vector<8x128xf32>
    %604 = math.exp %603 : vector<8x128xf32>
    %cst_128 = arith.constant dense<0.000000e+00> : vector<128xf32>
    %605 = vector.multi_reduction <add>, %604, %cst_128 [0] : vector<8x128xf32> to vector<128xf32>
    %606 = vector.shape_cast %605 : vector<128xf32> to vector<1x128xf32>
    %607 = math.log %606 : vector<1x128xf32>
    %608 = arith.addf %601, %607 : vector<1x128xf32>
    %609 = vector.broadcast %608 : vector<1x128xf32> to vector<8x128xf32>
    %610 = arith.subf %592, %609 : vector<8x128xf32>
    %cst_129 = arith.constant dense<0xFF800000> : vector<128xf32>
    %611 = vector.multi_reduction <maximumf>, %593, %cst_129 [0] : vector<8x128xf32> to vector<128xf32>
    %612 = vector.shape_cast %611 : vector<128xf32> to vector<1x128xf32>
    %613 = vector.broadcast %612 : vector<1x128xf32> to vector<8x128xf32>
    %614 = arith.subf %593, %613 : vector<8x128xf32>
    %615 = math.exp %614 : vector<8x128xf32>
    %cst_130 = arith.constant dense<0.000000e+00> : vector<128xf32>
    %616 = vector.multi_reduction <add>, %615, %cst_130 [0] : vector<8x128xf32> to vector<128xf32>
    %617 = vector.shape_cast %616 : vector<128xf32> to vector<1x128xf32>
    %618 = math.log %617 : vector<1x128xf32>
    %619 = arith.addf %612, %618 : vector<1x128xf32>
    %620 = vector.broadcast %619 : vector<1x128xf32> to vector<8x128xf32>
    %621 = arith.subf %593, %620 : vector<8x128xf32>
    %cst_131 = arith.constant dense<0xFF800000> : vector<128xf32>
    %622 = vector.multi_reduction <maximumf>, %594, %cst_131 [0] : vector<8x128xf32> to vector<128xf32>
    %623 = vector.shape_cast %622 : vector<128xf32> to vector<1x128xf32>
    %624 = vector.broadcast %623 : vector<1x128xf32> to vector<8x128xf32>
    %625 = arith.subf %594, %624 : vector<8x128xf32>
    %626 = math.exp %625 : vector<8x128xf32>
    %cst_132 = arith.constant dense<0.000000e+00> : vector<128xf32>
    %627 = vector.multi_reduction <add>, %626, %cst_132 [0] : vector<8x128xf32> to vector<128xf32>
    %628 = vector.shape_cast %627 : vector<128xf32> to vector<1x128xf32>
    %629 = math.log %628 : vector<1x128xf32>
    %630 = arith.addf %623, %629 : vector<1x128xf32>
    %631 = vector.broadcast %630 : vector<1x128xf32> to vector<8x128xf32>
    %632 = arith.subf %594, %631 : vector<8x128xf32>
    %cst_133 = arith.constant dense<0xFF800000> : vector<128xf32>
    %633 = vector.multi_reduction <maximumf>, %595, %cst_133 [0] : vector<8x128xf32> to vector<128xf32>
    %634 = vector.shape_cast %633 : vector<128xf32> to vector<1x128xf32>
    %635 = vector.broadcast %634 : vector<1x128xf32> to vector<8x128xf32>
    %636 = arith.subf %595, %635 : vector<8x128xf32>
    %637 = math.exp %636 : vector<8x128xf32>
    %cst_134 = arith.constant dense<0.000000e+00> : vector<128xf32>
    %638 = vector.multi_reduction <add>, %637, %cst_134 [0] : vector<8x128xf32> to vector<128xf32>
    %639 = vector.shape_cast %638 : vector<128xf32> to vector<1x128xf32>
    %640 = math.log %639 : vector<1x128xf32>
    %641 = arith.addf %634, %640 : vector<1x128xf32>
    %642 = vector.broadcast %641 : vector<1x128xf32> to vector<8x128xf32>
    %643 = arith.subf %595, %642 : vector<8x128xf32>
    %cst_135 = arith.constant dense<0xFF800000> : vector<128xf32>
    %644 = vector.multi_reduction <maximumf>, %596, %cst_135 [0] : vector<8x128xf32> to vector<128xf32>
    %645 = vector.shape_cast %644 : vector<128xf32> to vector<1x128xf32>
    %646 = vector.broadcast %645 : vector<1x128xf32> to vector<8x128xf32>
    %647 = arith.subf %596, %646 : vector<8x128xf32>
    %648 = math.exp %647 : vector<8x128xf32>
    %cst_136 = arith.constant dense<0.000000e+00> : vector<128xf32>
    %649 = vector.multi_reduction <add>, %648, %cst_136 [0] : vector<8x128xf32> to vector<128xf32>
    %650 = vector.shape_cast %649 : vector<128xf32> to vector<1x128xf32>
    %651 = math.log %650 : vector<1x128xf32>
    %652 = arith.addf %645, %651 : vector<1x128xf32>
    %653 = vector.broadcast %652 : vector<1x128xf32> to vector<8x128xf32>
    %654 = arith.subf %596, %653 : vector<8x128xf32>
    %cst_137 = arith.constant dense<0xFF800000> : vector<128xf32>
    %655 = vector.multi_reduction <maximumf>, %597, %cst_137 [0] : vector<8x128xf32> to vector<128xf32>
    %656 = vector.shape_cast %655 : vector<128xf32> to vector<1x128xf32>
    %657 = vector.broadcast %656 : vector<1x128xf32> to vector<8x128xf32>
    %658 = arith.subf %597, %657 : vector<8x128xf32>
    %659 = math.exp %658 : vector<8x128xf32>
    %cst_138 = arith.constant dense<0.000000e+00> : vector<128xf32>
    %660 = vector.multi_reduction <add>, %659, %cst_138 [0] : vector<8x128xf32> to vector<128xf32>
    %661 = vector.shape_cast %660 : vector<128xf32> to vector<1x128xf32>
    %662 = math.log %661 : vector<1x128xf32>
    %663 = arith.addf %656, %662 : vector<1x128xf32>
    %664 = vector.broadcast %663 : vector<1x128xf32> to vector<8x128xf32>
    %665 = arith.subf %597, %664 : vector<8x128xf32>
    %cst_139 = arith.constant dense<0xFF800000> : vector<128xf32>
    %666 = vector.multi_reduction <maximumf>, %598, %cst_139 [0] : vector<8x128xf32> to vector<128xf32>
    %667 = vector.shape_cast %666 : vector<128xf32> to vector<1x128xf32>
    %668 = vector.broadcast %667 : vector<1x128xf32> to vector<8x128xf32>
    %669 = arith.subf %598, %668 : vector<8x128xf32>
    %670 = math.exp %669 : vector<8x128xf32>
    %cst_140 = arith.constant dense<0.000000e+00> : vector<128xf32>
    %671 = vector.multi_reduction <add>, %670, %cst_140 [0] : vector<8x128xf32> to vector<128xf32>
    %672 = vector.shape_cast %671 : vector<128xf32> to vector<1x128xf32>
    %673 = math.log %672 : vector<1x128xf32>
    %674 = arith.addf %667, %673 : vector<1x128xf32>
    %675 = vector.broadcast %674 : vector<1x128xf32> to vector<8x128xf32>
    %676 = arith.subf %598, %675 : vector<8x128xf32>
    %cst_141 = arith.constant dense<0xFF800000> : vector<128xf32>
    %677 = vector.multi_reduction <maximumf>, %599, %cst_141 [0] : vector<8x128xf32> to vector<128xf32>
    %678 = vector.shape_cast %677 : vector<128xf32> to vector<1x128xf32>
    %679 = vector.broadcast %678 : vector<1x128xf32> to vector<8x128xf32>
    %680 = arith.subf %599, %679 : vector<8x128xf32>
    %681 = math.exp %680 : vector<8x128xf32>
    %cst_142 = arith.constant dense<0.000000e+00> : vector<128xf32>
    %682 = vector.multi_reduction <add>, %681, %cst_142 [0] : vector<8x128xf32> to vector<128xf32>
    %683 = vector.shape_cast %682 : vector<128xf32> to vector<1x128xf32>
    %684 = math.log %683 : vector<1x128xf32>
    %685 = arith.addf %678, %684 : vector<1x128xf32>
    %686 = vector.broadcast %685 : vector<1x128xf32> to vector<8x128xf32>
    %687 = arith.subf %599, %686 : vector<8x128xf32>
    %688 = arith.maximumf %610, %621 : vector<8x128xf32>
    %689 = arith.maximumf %632, %643 : vector<8x128xf32>
    %690 = arith.maximumf %654, %665 : vector<8x128xf32>
    %691 = arith.maximumf %676, %687 : vector<8x128xf32>
    %692 = arith.maximumf %688, %689 : vector<8x128xf32>
    %693 = arith.maximumf %690, %691 : vector<8x128xf32>
    %694 = arith.maximumf %692, %693 : vector<8x128xf32>
    %695 = arith.subf %610, %694 : vector<8x128xf32>
    %696 = math.exp %695 : vector<8x128xf32>
    %697 = arith.subf %621, %694 : vector<8x128xf32>
    %698 = math.exp %697 : vector<8x128xf32>
    %699 = arith.subf %632, %694 : vector<8x128xf32>
    %700 = math.exp %699 : vector<8x128xf32>
    %701 = arith.subf %643, %694 : vector<8x128xf32>
    %702 = math.exp %701 : vector<8x128xf32>
    %703 = arith.subf %654, %694 : vector<8x128xf32>
    %704 = math.exp %703 : vector<8x128xf32>
    %705 = arith.subf %665, %694 : vector<8x128xf32>
    %706 = math.exp %705 : vector<8x128xf32>
    %707 = arith.subf %676, %694 : vector<8x128xf32>
    %708 = math.exp %707 : vector<8x128xf32>
    %709 = arith.subf %687, %694 : vector<8x128xf32>
    %710 = math.exp %709 : vector<8x128xf32>
    %711 = arith.addf %696, %698 : vector<8x128xf32>
    %712 = arith.addf %700, %702 : vector<8x128xf32>
    %713 = arith.addf %704, %706 : vector<8x128xf32>
    %714 = arith.addf %708, %710 : vector<8x128xf32>
    %715 = arith.addf %711, %712 : vector<8x128xf32>
    %716 = arith.addf %713, %714 : vector<8x128xf32>
    %717 = arith.addf %715, %716 : vector<8x128xf32>
    %718 = math.log %717 : vector<8x128xf32>
    %719 = arith.addf %694, %718 : vector<8x128xf32>
    %720 = arith.subf %610, %719 : vector<8x128xf32>
    %721 = arith.subf %621, %719 : vector<8x128xf32>
    %722 = arith.subf %632, %719 : vector<8x128xf32>
    %723 = arith.subf %643, %719 : vector<8x128xf32>
    %724 = arith.subf %654, %719 : vector<8x128xf32>
    %725 = arith.subf %665, %719 : vector<8x128xf32>
    %726 = arith.subf %676, %719 : vector<8x128xf32>
    %727 = arith.subf %687, %719 : vector<8x128xf32>
    %cst_143 = arith.constant dense<0xFF800000> : vector<128xf32>
    %728 = vector.multi_reduction <maximumf>, %720, %cst_143 [0] : vector<8x128xf32> to vector<128xf32>
    %729 = vector.shape_cast %728 : vector<128xf32> to vector<1x128xf32>
    %730 = vector.broadcast %729 : vector<1x128xf32> to vector<8x128xf32>
    %731 = arith.subf %720, %730 : vector<8x128xf32>
    %732 = math.exp %731 : vector<8x128xf32>
    %cst_144 = arith.constant dense<0.000000e+00> : vector<128xf32>
    %733 = vector.multi_reduction <add>, %732, %cst_144 [0] : vector<8x128xf32> to vector<128xf32>
    %734 = vector.shape_cast %733 : vector<128xf32> to vector<1x128xf32>
    %735 = math.log %734 : vector<1x128xf32>
    %736 = arith.addf %729, %735 : vector<1x128xf32>
    %737 = vector.broadcast %736 : vector<1x128xf32> to vector<8x128xf32>
    %738 = arith.subf %720, %737 : vector<8x128xf32>
    %cst_145 = arith.constant dense<0xFF800000> : vector<128xf32>
    %739 = vector.multi_reduction <maximumf>, %721, %cst_145 [0] : vector<8x128xf32> to vector<128xf32>
    %740 = vector.shape_cast %739 : vector<128xf32> to vector<1x128xf32>
    %741 = vector.broadcast %740 : vector<1x128xf32> to vector<8x128xf32>
    %742 = arith.subf %721, %741 : vector<8x128xf32>
    %743 = math.exp %742 : vector<8x128xf32>
    %cst_146 = arith.constant dense<0.000000e+00> : vector<128xf32>
    %744 = vector.multi_reduction <add>, %743, %cst_146 [0] : vector<8x128xf32> to vector<128xf32>
    %745 = vector.shape_cast %744 : vector<128xf32> to vector<1x128xf32>
    %746 = math.log %745 : vector<1x128xf32>
    %747 = arith.addf %740, %746 : vector<1x128xf32>
    %748 = vector.broadcast %747 : vector<1x128xf32> to vector<8x128xf32>
    %749 = arith.subf %721, %748 : vector<8x128xf32>
    %cst_147 = arith.constant dense<0xFF800000> : vector<128xf32>
    %750 = vector.multi_reduction <maximumf>, %722, %cst_147 [0] : vector<8x128xf32> to vector<128xf32>
    %751 = vector.shape_cast %750 : vector<128xf32> to vector<1x128xf32>
    %752 = vector.broadcast %751 : vector<1x128xf32> to vector<8x128xf32>
    %753 = arith.subf %722, %752 : vector<8x128xf32>
    %754 = math.exp %753 : vector<8x128xf32>
    %cst_148 = arith.constant dense<0.000000e+00> : vector<128xf32>
    %755 = vector.multi_reduction <add>, %754, %cst_148 [0] : vector<8x128xf32> to vector<128xf32>
    %756 = vector.shape_cast %755 : vector<128xf32> to vector<1x128xf32>
    %757 = math.log %756 : vector<1x128xf32>
    %758 = arith.addf %751, %757 : vector<1x128xf32>
    %759 = vector.broadcast %758 : vector<1x128xf32> to vector<8x128xf32>
    %760 = arith.subf %722, %759 : vector<8x128xf32>
    %cst_149 = arith.constant dense<0xFF800000> : vector<128xf32>
    %761 = vector.multi_reduction <maximumf>, %723, %cst_149 [0] : vector<8x128xf32> to vector<128xf32>
    %762 = vector.shape_cast %761 : vector<128xf32> to vector<1x128xf32>
    %763 = vector.broadcast %762 : vector<1x128xf32> to vector<8x128xf32>
    %764 = arith.subf %723, %763 : vector<8x128xf32>
    %765 = math.exp %764 : vector<8x128xf32>
    %cst_150 = arith.constant dense<0.000000e+00> : vector<128xf32>
    %766 = vector.multi_reduction <add>, %765, %cst_150 [0] : vector<8x128xf32> to vector<128xf32>
    %767 = vector.shape_cast %766 : vector<128xf32> to vector<1x128xf32>
    %768 = math.log %767 : vector<1x128xf32>
    %769 = arith.addf %762, %768 : vector<1x128xf32>
    %770 = vector.broadcast %769 : vector<1x128xf32> to vector<8x128xf32>
    %771 = arith.subf %723, %770 : vector<8x128xf32>
    %cst_151 = arith.constant dense<0xFF800000> : vector<128xf32>
    %772 = vector.multi_reduction <maximumf>, %724, %cst_151 [0] : vector<8x128xf32> to vector<128xf32>
    %773 = vector.shape_cast %772 : vector<128xf32> to vector<1x128xf32>
    %774 = vector.broadcast %773 : vector<1x128xf32> to vector<8x128xf32>
    %775 = arith.subf %724, %774 : vector<8x128xf32>
    %776 = math.exp %775 : vector<8x128xf32>
    %cst_152 = arith.constant dense<0.000000e+00> : vector<128xf32>
    %777 = vector.multi_reduction <add>, %776, %cst_152 [0] : vector<8x128xf32> to vector<128xf32>
    %778 = vector.shape_cast %777 : vector<128xf32> to vector<1x128xf32>
    %779 = math.log %778 : vector<1x128xf32>
    %780 = arith.addf %773, %779 : vector<1x128xf32>
    %781 = vector.broadcast %780 : vector<1x128xf32> to vector<8x128xf32>
    %782 = arith.subf %724, %781 : vector<8x128xf32>
    %cst_153 = arith.constant dense<0xFF800000> : vector<128xf32>
    %783 = vector.multi_reduction <maximumf>, %725, %cst_153 [0] : vector<8x128xf32> to vector<128xf32>
    %784 = vector.shape_cast %783 : vector<128xf32> to vector<1x128xf32>
    %785 = vector.broadcast %784 : vector<1x128xf32> to vector<8x128xf32>
    %786 = arith.subf %725, %785 : vector<8x128xf32>
    %787 = math.exp %786 : vector<8x128xf32>
    %cst_154 = arith.constant dense<0.000000e+00> : vector<128xf32>
    %788 = vector.multi_reduction <add>, %787, %cst_154 [0] : vector<8x128xf32> to vector<128xf32>
    %789 = vector.shape_cast %788 : vector<128xf32> to vector<1x128xf32>
    %790 = math.log %789 : vector<1x128xf32>
    %791 = arith.addf %784, %790 : vector<1x128xf32>
    %792 = vector.broadcast %791 : vector<1x128xf32> to vector<8x128xf32>
    %793 = arith.subf %725, %792 : vector<8x128xf32>
    %cst_155 = arith.constant dense<0xFF800000> : vector<128xf32>
    %794 = vector.multi_reduction <maximumf>, %726, %cst_155 [0] : vector<8x128xf32> to vector<128xf32>
    %795 = vector.shape_cast %794 : vector<128xf32> to vector<1x128xf32>
    %796 = vector.broadcast %795 : vector<1x128xf32> to vector<8x128xf32>
    %797 = arith.subf %726, %796 : vector<8x128xf32>
    %798 = math.exp %797 : vector<8x128xf32>
    %cst_156 = arith.constant dense<0.000000e+00> : vector<128xf32>
    %799 = vector.multi_reduction <add>, %798, %cst_156 [0] : vector<8x128xf32> to vector<128xf32>
    %800 = vector.shape_cast %799 : vector<128xf32> to vector<1x128xf32>
    %801 = math.log %800 : vector<1x128xf32>
    %802 = arith.addf %795, %801 : vector<1x128xf32>
    %803 = vector.broadcast %802 : vector<1x128xf32> to vector<8x128xf32>
    %804 = arith.subf %726, %803 : vector<8x128xf32>
    %cst_157 = arith.constant dense<0xFF800000> : vector<128xf32>
    %805 = vector.multi_reduction <maximumf>, %727, %cst_157 [0] : vector<8x128xf32> to vector<128xf32>
    %806 = vector.shape_cast %805 : vector<128xf32> to vector<1x128xf32>
    %807 = vector.broadcast %806 : vector<1x128xf32> to vector<8x128xf32>
    %808 = arith.subf %727, %807 : vector<8x128xf32>
    %809 = math.exp %808 : vector<8x128xf32>
    %cst_158 = arith.constant dense<0.000000e+00> : vector<128xf32>
    %810 = vector.multi_reduction <add>, %809, %cst_158 [0] : vector<8x128xf32> to vector<128xf32>
    %811 = vector.shape_cast %810 : vector<128xf32> to vector<1x128xf32>
    %812 = math.log %811 : vector<1x128xf32>
    %813 = arith.addf %806, %812 : vector<1x128xf32>
    %814 = vector.broadcast %813 : vector<1x128xf32> to vector<8x128xf32>
    %815 = arith.subf %727, %814 : vector<8x128xf32>
    %816 = arith.maximumf %738, %749 : vector<8x128xf32>
    %817 = arith.maximumf %760, %771 : vector<8x128xf32>
    %818 = arith.maximumf %782, %793 : vector<8x128xf32>
    %819 = arith.maximumf %804, %815 : vector<8x128xf32>
    %820 = arith.maximumf %816, %817 : vector<8x128xf32>
    %821 = arith.maximumf %818, %819 : vector<8x128xf32>
    %822 = arith.maximumf %820, %821 : vector<8x128xf32>
    %823 = arith.subf %738, %822 : vector<8x128xf32>
    %824 = math.exp %823 : vector<8x128xf32>
    %825 = arith.subf %749, %822 : vector<8x128xf32>
    %826 = math.exp %825 : vector<8x128xf32>
    %827 = arith.subf %760, %822 : vector<8x128xf32>
    %828 = math.exp %827 : vector<8x128xf32>
    %829 = arith.subf %771, %822 : vector<8x128xf32>
    %830 = math.exp %829 : vector<8x128xf32>
    %831 = arith.subf %782, %822 : vector<8x128xf32>
    %832 = math.exp %831 : vector<8x128xf32>
    %833 = arith.subf %793, %822 : vector<8x128xf32>
    %834 = math.exp %833 : vector<8x128xf32>
    %835 = arith.subf %804, %822 : vector<8x128xf32>
    %836 = math.exp %835 : vector<8x128xf32>
    %837 = arith.subf %815, %822 : vector<8x128xf32>
    %838 = math.exp %837 : vector<8x128xf32>
    %839 = arith.addf %824, %826 : vector<8x128xf32>
    %840 = arith.addf %828, %830 : vector<8x128xf32>
    %841 = arith.addf %832, %834 : vector<8x128xf32>
    %842 = arith.addf %836, %838 : vector<8x128xf32>
    %843 = arith.addf %839, %840 : vector<8x128xf32>
    %844 = arith.addf %841, %842 : vector<8x128xf32>
    %845 = arith.addf %843, %844 : vector<8x128xf32>
    %846 = math.log %845 : vector<8x128xf32>
    %847 = arith.addf %822, %846 : vector<8x128xf32>
    %848 = arith.subf %738, %847 : vector<8x128xf32>
    %849 = arith.subf %749, %847 : vector<8x128xf32>
    %850 = arith.subf %760, %847 : vector<8x128xf32>
    %851 = arith.subf %771, %847 : vector<8x128xf32>
    %852 = arith.subf %782, %847 : vector<8x128xf32>
    %853 = arith.subf %793, %847 : vector<8x128xf32>
    %854 = arith.subf %804, %847 : vector<8x128xf32>
    %855 = arith.subf %815, %847 : vector<8x128xf32>
    %cst_159 = arith.constant dense<0xFF800000> : vector<128xf32>
    %856 = vector.multi_reduction <maximumf>, %848, %cst_159 [0] : vector<8x128xf32> to vector<128xf32>
    %857 = vector.shape_cast %856 : vector<128xf32> to vector<1x128xf32>
    %858 = vector.broadcast %857 : vector<1x128xf32> to vector<8x128xf32>
    %859 = arith.subf %848, %858 : vector<8x128xf32>
    %860 = math.exp %859 : vector<8x128xf32>
    %cst_160 = arith.constant dense<0.000000e+00> : vector<128xf32>
    %861 = vector.multi_reduction <add>, %860, %cst_160 [0] : vector<8x128xf32> to vector<128xf32>
    %862 = vector.shape_cast %861 : vector<128xf32> to vector<1x128xf32>
    %863 = math.log %862 : vector<1x128xf32>
    %864 = arith.addf %857, %863 : vector<1x128xf32>
    %865 = vector.broadcast %864 : vector<1x128xf32> to vector<8x128xf32>
    %866 = arith.subf %848, %865 : vector<8x128xf32>
    %cst_161 = arith.constant dense<0xFF800000> : vector<128xf32>
    %867 = vector.multi_reduction <maximumf>, %849, %cst_161 [0] : vector<8x128xf32> to vector<128xf32>
    %868 = vector.shape_cast %867 : vector<128xf32> to vector<1x128xf32>
    %869 = vector.broadcast %868 : vector<1x128xf32> to vector<8x128xf32>
    %870 = arith.subf %849, %869 : vector<8x128xf32>
    %871 = math.exp %870 : vector<8x128xf32>
    %cst_162 = arith.constant dense<0.000000e+00> : vector<128xf32>
    %872 = vector.multi_reduction <add>, %871, %cst_162 [0] : vector<8x128xf32> to vector<128xf32>
    %873 = vector.shape_cast %872 : vector<128xf32> to vector<1x128xf32>
    %874 = math.log %873 : vector<1x128xf32>
    %875 = arith.addf %868, %874 : vector<1x128xf32>
    %876 = vector.broadcast %875 : vector<1x128xf32> to vector<8x128xf32>
    %877 = arith.subf %849, %876 : vector<8x128xf32>
    %cst_163 = arith.constant dense<0xFF800000> : vector<128xf32>
    %878 = vector.multi_reduction <maximumf>, %850, %cst_163 [0] : vector<8x128xf32> to vector<128xf32>
    %879 = vector.shape_cast %878 : vector<128xf32> to vector<1x128xf32>
    %880 = vector.broadcast %879 : vector<1x128xf32> to vector<8x128xf32>
    %881 = arith.subf %850, %880 : vector<8x128xf32>
    %882 = math.exp %881 : vector<8x128xf32>
    %cst_164 = arith.constant dense<0.000000e+00> : vector<128xf32>
    %883 = vector.multi_reduction <add>, %882, %cst_164 [0] : vector<8x128xf32> to vector<128xf32>
    %884 = vector.shape_cast %883 : vector<128xf32> to vector<1x128xf32>
    %885 = math.log %884 : vector<1x128xf32>
    %886 = arith.addf %879, %885 : vector<1x128xf32>
    %887 = vector.broadcast %886 : vector<1x128xf32> to vector<8x128xf32>
    %888 = arith.subf %850, %887 : vector<8x128xf32>
    %cst_165 = arith.constant dense<0xFF800000> : vector<128xf32>
    %889 = vector.multi_reduction <maximumf>, %851, %cst_165 [0] : vector<8x128xf32> to vector<128xf32>
    %890 = vector.shape_cast %889 : vector<128xf32> to vector<1x128xf32>
    %891 = vector.broadcast %890 : vector<1x128xf32> to vector<8x128xf32>
    %892 = arith.subf %851, %891 : vector<8x128xf32>
    %893 = math.exp %892 : vector<8x128xf32>
    %cst_166 = arith.constant dense<0.000000e+00> : vector<128xf32>
    %894 = vector.multi_reduction <add>, %893, %cst_166 [0] : vector<8x128xf32> to vector<128xf32>
    %895 = vector.shape_cast %894 : vector<128xf32> to vector<1x128xf32>
    %896 = math.log %895 : vector<1x128xf32>
    %897 = arith.addf %890, %896 : vector<1x128xf32>
    %898 = vector.broadcast %897 : vector<1x128xf32> to vector<8x128xf32>
    %899 = arith.subf %851, %898 : vector<8x128xf32>
    %cst_167 = arith.constant dense<0xFF800000> : vector<128xf32>
    %900 = vector.multi_reduction <maximumf>, %852, %cst_167 [0] : vector<8x128xf32> to vector<128xf32>
    %901 = vector.shape_cast %900 : vector<128xf32> to vector<1x128xf32>
    %902 = vector.broadcast %901 : vector<1x128xf32> to vector<8x128xf32>
    %903 = arith.subf %852, %902 : vector<8x128xf32>
    %904 = math.exp %903 : vector<8x128xf32>
    %cst_168 = arith.constant dense<0.000000e+00> : vector<128xf32>
    %905 = vector.multi_reduction <add>, %904, %cst_168 [0] : vector<8x128xf32> to vector<128xf32>
    %906 = vector.shape_cast %905 : vector<128xf32> to vector<1x128xf32>
    %907 = math.log %906 : vector<1x128xf32>
    %908 = arith.addf %901, %907 : vector<1x128xf32>
    %909 = vector.broadcast %908 : vector<1x128xf32> to vector<8x128xf32>
    %910 = arith.subf %852, %909 : vector<8x128xf32>
    %cst_169 = arith.constant dense<0xFF800000> : vector<128xf32>
    %911 = vector.multi_reduction <maximumf>, %853, %cst_169 [0] : vector<8x128xf32> to vector<128xf32>
    %912 = vector.shape_cast %911 : vector<128xf32> to vector<1x128xf32>
    %913 = vector.broadcast %912 : vector<1x128xf32> to vector<8x128xf32>
    %914 = arith.subf %853, %913 : vector<8x128xf32>
    %915 = math.exp %914 : vector<8x128xf32>
    %cst_170 = arith.constant dense<0.000000e+00> : vector<128xf32>
    %916 = vector.multi_reduction <add>, %915, %cst_170 [0] : vector<8x128xf32> to vector<128xf32>
    %917 = vector.shape_cast %916 : vector<128xf32> to vector<1x128xf32>
    %918 = math.log %917 : vector<1x128xf32>
    %919 = arith.addf %912, %918 : vector<1x128xf32>
    %920 = vector.broadcast %919 : vector<1x128xf32> to vector<8x128xf32>
    %921 = arith.subf %853, %920 : vector<8x128xf32>
    %cst_171 = arith.constant dense<0xFF800000> : vector<128xf32>
    %922 = vector.multi_reduction <maximumf>, %854, %cst_171 [0] : vector<8x128xf32> to vector<128xf32>
    %923 = vector.shape_cast %922 : vector<128xf32> to vector<1x128xf32>
    %924 = vector.broadcast %923 : vector<1x128xf32> to vector<8x128xf32>
    %925 = arith.subf %854, %924 : vector<8x128xf32>
    %926 = math.exp %925 : vector<8x128xf32>
    %cst_172 = arith.constant dense<0.000000e+00> : vector<128xf32>
    %927 = vector.multi_reduction <add>, %926, %cst_172 [0] : vector<8x128xf32> to vector<128xf32>
    %928 = vector.shape_cast %927 : vector<128xf32> to vector<1x128xf32>
    %929 = math.log %928 : vector<1x128xf32>
    %930 = arith.addf %923, %929 : vector<1x128xf32>
    %931 = vector.broadcast %930 : vector<1x128xf32> to vector<8x128xf32>
    %932 = arith.subf %854, %931 : vector<8x128xf32>
    %cst_173 = arith.constant dense<0xFF800000> : vector<128xf32>
    %933 = vector.multi_reduction <maximumf>, %855, %cst_173 [0] : vector<8x128xf32> to vector<128xf32>
    %934 = vector.shape_cast %933 : vector<128xf32> to vector<1x128xf32>
    %935 = vector.broadcast %934 : vector<1x128xf32> to vector<8x128xf32>
    %936 = arith.subf %855, %935 : vector<8x128xf32>
    %937 = math.exp %936 : vector<8x128xf32>
    %cst_174 = arith.constant dense<0.000000e+00> : vector<128xf32>
    %938 = vector.multi_reduction <add>, %937, %cst_174 [0] : vector<8x128xf32> to vector<128xf32>
    %939 = vector.shape_cast %938 : vector<128xf32> to vector<1x128xf32>
    %940 = math.log %939 : vector<1x128xf32>
    %941 = arith.addf %934, %940 : vector<1x128xf32>
    %942 = vector.broadcast %941 : vector<1x128xf32> to vector<8x128xf32>
    %943 = arith.subf %855, %942 : vector<8x128xf32>
    %944 = arith.maximumf %866, %877 : vector<8x128xf32>
    %945 = arith.maximumf %888, %899 : vector<8x128xf32>
    %946 = arith.maximumf %910, %921 : vector<8x128xf32>
    %947 = arith.maximumf %932, %943 : vector<8x128xf32>
    %948 = arith.maximumf %944, %945 : vector<8x128xf32>
    %949 = arith.maximumf %946, %947 : vector<8x128xf32>
    %950 = arith.maximumf %948, %949 : vector<8x128xf32>
    %951 = arith.subf %866, %950 : vector<8x128xf32>
    %952 = math.exp %951 : vector<8x128xf32>
    %953 = arith.subf %877, %950 : vector<8x128xf32>
    %954 = math.exp %953 : vector<8x128xf32>
    %955 = arith.subf %888, %950 : vector<8x128xf32>
    %956 = math.exp %955 : vector<8x128xf32>
    %957 = arith.subf %899, %950 : vector<8x128xf32>
    %958 = math.exp %957 : vector<8x128xf32>
    %959 = arith.subf %910, %950 : vector<8x128xf32>
    %960 = math.exp %959 : vector<8x128xf32>
    %961 = arith.subf %921, %950 : vector<8x128xf32>
    %962 = math.exp %961 : vector<8x128xf32>
    %963 = arith.subf %932, %950 : vector<8x128xf32>
    %964 = math.exp %963 : vector<8x128xf32>
    %965 = arith.subf %943, %950 : vector<8x128xf32>
    %966 = math.exp %965 : vector<8x128xf32>
    %967 = arith.addf %952, %954 : vector<8x128xf32>
    %968 = arith.addf %956, %958 : vector<8x128xf32>
    %969 = arith.addf %960, %962 : vector<8x128xf32>
    %970 = arith.addf %964, %966 : vector<8x128xf32>
    %971 = arith.addf %967, %968 : vector<8x128xf32>
    %972 = arith.addf %969, %970 : vector<8x128xf32>
    %973 = arith.addf %971, %972 : vector<8x128xf32>
    %974 = math.log %973 : vector<8x128xf32>
    %975 = arith.addf %950, %974 : vector<8x128xf32>
    %976 = arith.subf %866, %975 : vector<8x128xf32>
    %977 = arith.subf %877, %975 : vector<8x128xf32>
    %978 = arith.subf %888, %975 : vector<8x128xf32>
    %979 = arith.subf %899, %975 : vector<8x128xf32>
    %980 = arith.subf %910, %975 : vector<8x128xf32>
    %981 = arith.subf %921, %975 : vector<8x128xf32>
    %982 = arith.subf %932, %975 : vector<8x128xf32>
    %983 = arith.subf %943, %975 : vector<8x128xf32>
    %cst_175 = arith.constant dense<0xFF800000> : vector<128xf32>
    %984 = vector.multi_reduction <maximumf>, %976, %cst_175 [0] : vector<8x128xf32> to vector<128xf32>
    %985 = vector.shape_cast %984 : vector<128xf32> to vector<1x128xf32>
    %986 = vector.broadcast %985 : vector<1x128xf32> to vector<8x128xf32>
    %987 = arith.subf %976, %986 : vector<8x128xf32>
    %988 = math.exp %987 : vector<8x128xf32>
    %cst_176 = arith.constant dense<0.000000e+00> : vector<128xf32>
    %989 = vector.multi_reduction <add>, %988, %cst_176 [0] : vector<8x128xf32> to vector<128xf32>
    %990 = vector.shape_cast %989 : vector<128xf32> to vector<1x128xf32>
    %991 = math.log %990 : vector<1x128xf32>
    %992 = arith.addf %985, %991 : vector<1x128xf32>
    %993 = vector.broadcast %992 : vector<1x128xf32> to vector<8x128xf32>
    %994 = arith.subf %976, %993 : vector<8x128xf32>
    %cst_177 = arith.constant dense<0xFF800000> : vector<128xf32>
    %995 = vector.multi_reduction <maximumf>, %977, %cst_177 [0] : vector<8x128xf32> to vector<128xf32>
    %996 = vector.shape_cast %995 : vector<128xf32> to vector<1x128xf32>
    %997 = vector.broadcast %996 : vector<1x128xf32> to vector<8x128xf32>
    %998 = arith.subf %977, %997 : vector<8x128xf32>
    %999 = math.exp %998 : vector<8x128xf32>
    %cst_178 = arith.constant dense<0.000000e+00> : vector<128xf32>
    %1000 = vector.multi_reduction <add>, %999, %cst_178 [0] : vector<8x128xf32> to vector<128xf32>
    %1001 = vector.shape_cast %1000 : vector<128xf32> to vector<1x128xf32>
    %1002 = math.log %1001 : vector<1x128xf32>
    %1003 = arith.addf %996, %1002 : vector<1x128xf32>
    %1004 = vector.broadcast %1003 : vector<1x128xf32> to vector<8x128xf32>
    %1005 = arith.subf %977, %1004 : vector<8x128xf32>
    %cst_179 = arith.constant dense<0xFF800000> : vector<128xf32>
    %1006 = vector.multi_reduction <maximumf>, %978, %cst_179 [0] : vector<8x128xf32> to vector<128xf32>
    %1007 = vector.shape_cast %1006 : vector<128xf32> to vector<1x128xf32>
    %1008 = vector.broadcast %1007 : vector<1x128xf32> to vector<8x128xf32>
    %1009 = arith.subf %978, %1008 : vector<8x128xf32>
    %1010 = math.exp %1009 : vector<8x128xf32>
    %cst_180 = arith.constant dense<0.000000e+00> : vector<128xf32>
    %1011 = vector.multi_reduction <add>, %1010, %cst_180 [0] : vector<8x128xf32> to vector<128xf32>
    %1012 = vector.shape_cast %1011 : vector<128xf32> to vector<1x128xf32>
    %1013 = math.log %1012 : vector<1x128xf32>
    %1014 = arith.addf %1007, %1013 : vector<1x128xf32>
    %1015 = vector.broadcast %1014 : vector<1x128xf32> to vector<8x128xf32>
    %1016 = arith.subf %978, %1015 : vector<8x128xf32>
    %cst_181 = arith.constant dense<0xFF800000> : vector<128xf32>
    %1017 = vector.multi_reduction <maximumf>, %979, %cst_181 [0] : vector<8x128xf32> to vector<128xf32>
    %1018 = vector.shape_cast %1017 : vector<128xf32> to vector<1x128xf32>
    %1019 = vector.broadcast %1018 : vector<1x128xf32> to vector<8x128xf32>
    %1020 = arith.subf %979, %1019 : vector<8x128xf32>
    %1021 = math.exp %1020 : vector<8x128xf32>
    %cst_182 = arith.constant dense<0.000000e+00> : vector<128xf32>
    %1022 = vector.multi_reduction <add>, %1021, %cst_182 [0] : vector<8x128xf32> to vector<128xf32>
    %1023 = vector.shape_cast %1022 : vector<128xf32> to vector<1x128xf32>
    %1024 = math.log %1023 : vector<1x128xf32>
    %1025 = arith.addf %1018, %1024 : vector<1x128xf32>
    %1026 = vector.broadcast %1025 : vector<1x128xf32> to vector<8x128xf32>
    %1027 = arith.subf %979, %1026 : vector<8x128xf32>
    %cst_183 = arith.constant dense<0xFF800000> : vector<128xf32>
    %1028 = vector.multi_reduction <maximumf>, %980, %cst_183 [0] : vector<8x128xf32> to vector<128xf32>
    %1029 = vector.shape_cast %1028 : vector<128xf32> to vector<1x128xf32>
    %1030 = vector.broadcast %1029 : vector<1x128xf32> to vector<8x128xf32>
    %1031 = arith.subf %980, %1030 : vector<8x128xf32>
    %1032 = math.exp %1031 : vector<8x128xf32>
    %cst_184 = arith.constant dense<0.000000e+00> : vector<128xf32>
    %1033 = vector.multi_reduction <add>, %1032, %cst_184 [0] : vector<8x128xf32> to vector<128xf32>
    %1034 = vector.shape_cast %1033 : vector<128xf32> to vector<1x128xf32>
    %1035 = math.log %1034 : vector<1x128xf32>
    %1036 = arith.addf %1029, %1035 : vector<1x128xf32>
    %1037 = vector.broadcast %1036 : vector<1x128xf32> to vector<8x128xf32>
    %1038 = arith.subf %980, %1037 : vector<8x128xf32>
    %cst_185 = arith.constant dense<0xFF800000> : vector<128xf32>
    %1039 = vector.multi_reduction <maximumf>, %981, %cst_185 [0] : vector<8x128xf32> to vector<128xf32>
    %1040 = vector.shape_cast %1039 : vector<128xf32> to vector<1x128xf32>
    %1041 = vector.broadcast %1040 : vector<1x128xf32> to vector<8x128xf32>
    %1042 = arith.subf %981, %1041 : vector<8x128xf32>
    %1043 = math.exp %1042 : vector<8x128xf32>
    %cst_186 = arith.constant dense<0.000000e+00> : vector<128xf32>
    %1044 = vector.multi_reduction <add>, %1043, %cst_186 [0] : vector<8x128xf32> to vector<128xf32>
    %1045 = vector.shape_cast %1044 : vector<128xf32> to vector<1x128xf32>
    %1046 = math.log %1045 : vector<1x128xf32>
    %1047 = arith.addf %1040, %1046 : vector<1x128xf32>
    %1048 = vector.broadcast %1047 : vector<1x128xf32> to vector<8x128xf32>
    %1049 = arith.subf %981, %1048 : vector<8x128xf32>
    %cst_187 = arith.constant dense<0xFF800000> : vector<128xf32>
    %1050 = vector.multi_reduction <maximumf>, %982, %cst_187 [0] : vector<8x128xf32> to vector<128xf32>
    %1051 = vector.shape_cast %1050 : vector<128xf32> to vector<1x128xf32>
    %1052 = vector.broadcast %1051 : vector<1x128xf32> to vector<8x128xf32>
    %1053 = arith.subf %982, %1052 : vector<8x128xf32>
    %1054 = math.exp %1053 : vector<8x128xf32>
    %cst_188 = arith.constant dense<0.000000e+00> : vector<128xf32>
    %1055 = vector.multi_reduction <add>, %1054, %cst_188 [0] : vector<8x128xf32> to vector<128xf32>
    %1056 = vector.shape_cast %1055 : vector<128xf32> to vector<1x128xf32>
    %1057 = math.log %1056 : vector<1x128xf32>
    %1058 = arith.addf %1051, %1057 : vector<1x128xf32>
    %1059 = vector.broadcast %1058 : vector<1x128xf32> to vector<8x128xf32>
    %1060 = arith.subf %982, %1059 : vector<8x128xf32>
    %cst_189 = arith.constant dense<0xFF800000> : vector<128xf32>
    %1061 = vector.multi_reduction <maximumf>, %983, %cst_189 [0] : vector<8x128xf32> to vector<128xf32>
    %1062 = vector.shape_cast %1061 : vector<128xf32> to vector<1x128xf32>
    %1063 = vector.broadcast %1062 : vector<1x128xf32> to vector<8x128xf32>
    %1064 = arith.subf %983, %1063 : vector<8x128xf32>
    %1065 = math.exp %1064 : vector<8x128xf32>
    %cst_190 = arith.constant dense<0.000000e+00> : vector<128xf32>
    %1066 = vector.multi_reduction <add>, %1065, %cst_190 [0] : vector<8x128xf32> to vector<128xf32>
    %1067 = vector.shape_cast %1066 : vector<128xf32> to vector<1x128xf32>
    %1068 = math.log %1067 : vector<1x128xf32>
    %1069 = arith.addf %1062, %1068 : vector<1x128xf32>
    %1070 = vector.broadcast %1069 : vector<1x128xf32> to vector<8x128xf32>
    %1071 = arith.subf %983, %1070 : vector<8x128xf32>
    %1072 = arith.maximumf %994, %1005 : vector<8x128xf32>
    %1073 = arith.maximumf %1016, %1027 : vector<8x128xf32>
    %1074 = arith.maximumf %1038, %1049 : vector<8x128xf32>
    %1075 = arith.maximumf %1060, %1071 : vector<8x128xf32>
    %1076 = arith.maximumf %1072, %1073 : vector<8x128xf32>
    %1077 = arith.maximumf %1074, %1075 : vector<8x128xf32>
    %1078 = arith.maximumf %1076, %1077 : vector<8x128xf32>
    %1079 = arith.subf %994, %1078 : vector<8x128xf32>
    %1080 = math.exp %1079 : vector<8x128xf32>
    %1081 = arith.subf %1005, %1078 : vector<8x128xf32>
    %1082 = math.exp %1081 : vector<8x128xf32>
    %1083 = arith.subf %1016, %1078 : vector<8x128xf32>
    %1084 = math.exp %1083 : vector<8x128xf32>
    %1085 = arith.subf %1027, %1078 : vector<8x128xf32>
    %1086 = math.exp %1085 : vector<8x128xf32>
    %1087 = arith.subf %1038, %1078 : vector<8x128xf32>
    %1088 = math.exp %1087 : vector<8x128xf32>
    %1089 = arith.subf %1049, %1078 : vector<8x128xf32>
    %1090 = math.exp %1089 : vector<8x128xf32>
    %1091 = arith.subf %1060, %1078 : vector<8x128xf32>
    %1092 = math.exp %1091 : vector<8x128xf32>
    %1093 = arith.subf %1071, %1078 : vector<8x128xf32>
    %1094 = math.exp %1093 : vector<8x128xf32>
    %1095 = arith.addf %1080, %1082 : vector<8x128xf32>
    %1096 = arith.addf %1084, %1086 : vector<8x128xf32>
    %1097 = arith.addf %1088, %1090 : vector<8x128xf32>
    %1098 = arith.addf %1092, %1094 : vector<8x128xf32>
    %1099 = arith.addf %1095, %1096 : vector<8x128xf32>
    %1100 = arith.addf %1097, %1098 : vector<8x128xf32>
    %1101 = arith.addf %1099, %1100 : vector<8x128xf32>
    %1102 = math.log %1101 : vector<8x128xf32>
    %1103 = arith.addf %1078, %1102 : vector<8x128xf32>
    %1104 = arith.subf %994, %1103 : vector<8x128xf32>
    %1105 = arith.subf %1005, %1103 : vector<8x128xf32>
    %1106 = arith.subf %1016, %1103 : vector<8x128xf32>
    %1107 = arith.subf %1027, %1103 : vector<8x128xf32>
    %1108 = arith.subf %1038, %1103 : vector<8x128xf32>
    %1109 = arith.subf %1049, %1103 : vector<8x128xf32>
    %1110 = arith.subf %1060, %1103 : vector<8x128xf32>
    %1111 = arith.subf %1071, %1103 : vector<8x128xf32>
    %cst_191 = arith.constant dense<0xFF800000> : vector<128xf32>
    %1112 = vector.multi_reduction <maximumf>, %1104, %cst_191 [0] : vector<8x128xf32> to vector<128xf32>
    %1113 = vector.shape_cast %1112 : vector<128xf32> to vector<1x128xf32>
    %1114 = vector.broadcast %1113 : vector<1x128xf32> to vector<8x128xf32>
    %1115 = arith.subf %1104, %1114 : vector<8x128xf32>
    %1116 = math.exp %1115 : vector<8x128xf32>
    %cst_192 = arith.constant dense<0.000000e+00> : vector<128xf32>
    %1117 = vector.multi_reduction <add>, %1116, %cst_192 [0] : vector<8x128xf32> to vector<128xf32>
    %1118 = vector.shape_cast %1117 : vector<128xf32> to vector<1x128xf32>
    %1119 = math.log %1118 : vector<1x128xf32>
    %1120 = arith.addf %1113, %1119 : vector<1x128xf32>
    %1121 = vector.broadcast %1120 : vector<1x128xf32> to vector<8x128xf32>
    %1122 = arith.subf %1104, %1121 : vector<8x128xf32>
    %cst_193 = arith.constant dense<0xFF800000> : vector<128xf32>
    %1123 = vector.multi_reduction <maximumf>, %1105, %cst_193 [0] : vector<8x128xf32> to vector<128xf32>
    %1124 = vector.shape_cast %1123 : vector<128xf32> to vector<1x128xf32>
    %1125 = vector.broadcast %1124 : vector<1x128xf32> to vector<8x128xf32>
    %1126 = arith.subf %1105, %1125 : vector<8x128xf32>
    %1127 = math.exp %1126 : vector<8x128xf32>
    %cst_194 = arith.constant dense<0.000000e+00> : vector<128xf32>
    %1128 = vector.multi_reduction <add>, %1127, %cst_194 [0] : vector<8x128xf32> to vector<128xf32>
    %1129 = vector.shape_cast %1128 : vector<128xf32> to vector<1x128xf32>
    %1130 = math.log %1129 : vector<1x128xf32>
    %1131 = arith.addf %1124, %1130 : vector<1x128xf32>
    %1132 = vector.broadcast %1131 : vector<1x128xf32> to vector<8x128xf32>
    %1133 = arith.subf %1105, %1132 : vector<8x128xf32>
    %cst_195 = arith.constant dense<0xFF800000> : vector<128xf32>
    %1134 = vector.multi_reduction <maximumf>, %1106, %cst_195 [0] : vector<8x128xf32> to vector<128xf32>
    %1135 = vector.shape_cast %1134 : vector<128xf32> to vector<1x128xf32>
    %1136 = vector.broadcast %1135 : vector<1x128xf32> to vector<8x128xf32>
    %1137 = arith.subf %1106, %1136 : vector<8x128xf32>
    %1138 = math.exp %1137 : vector<8x128xf32>
    %cst_196 = arith.constant dense<0.000000e+00> : vector<128xf32>
    %1139 = vector.multi_reduction <add>, %1138, %cst_196 [0] : vector<8x128xf32> to vector<128xf32>
    %1140 = vector.shape_cast %1139 : vector<128xf32> to vector<1x128xf32>
    %1141 = math.log %1140 : vector<1x128xf32>
    %1142 = arith.addf %1135, %1141 : vector<1x128xf32>
    %1143 = vector.broadcast %1142 : vector<1x128xf32> to vector<8x128xf32>
    %1144 = arith.subf %1106, %1143 : vector<8x128xf32>
    %cst_197 = arith.constant dense<0xFF800000> : vector<128xf32>
    %1145 = vector.multi_reduction <maximumf>, %1107, %cst_197 [0] : vector<8x128xf32> to vector<128xf32>
    %1146 = vector.shape_cast %1145 : vector<128xf32> to vector<1x128xf32>
    %1147 = vector.broadcast %1146 : vector<1x128xf32> to vector<8x128xf32>
    %1148 = arith.subf %1107, %1147 : vector<8x128xf32>
    %1149 = math.exp %1148 : vector<8x128xf32>
    %cst_198 = arith.constant dense<0.000000e+00> : vector<128xf32>
    %1150 = vector.multi_reduction <add>, %1149, %cst_198 [0] : vector<8x128xf32> to vector<128xf32>
    %1151 = vector.shape_cast %1150 : vector<128xf32> to vector<1x128xf32>
    %1152 = math.log %1151 : vector<1x128xf32>
    %1153 = arith.addf %1146, %1152 : vector<1x128xf32>
    %1154 = vector.broadcast %1153 : vector<1x128xf32> to vector<8x128xf32>
    %1155 = arith.subf %1107, %1154 : vector<8x128xf32>
    %cst_199 = arith.constant dense<0xFF800000> : vector<128xf32>
    %1156 = vector.multi_reduction <maximumf>, %1108, %cst_199 [0] : vector<8x128xf32> to vector<128xf32>
    %1157 = vector.shape_cast %1156 : vector<128xf32> to vector<1x128xf32>
    %1158 = vector.broadcast %1157 : vector<1x128xf32> to vector<8x128xf32>
    %1159 = arith.subf %1108, %1158 : vector<8x128xf32>
    %1160 = math.exp %1159 : vector<8x128xf32>
    %cst_200 = arith.constant dense<0.000000e+00> : vector<128xf32>
    %1161 = vector.multi_reduction <add>, %1160, %cst_200 [0] : vector<8x128xf32> to vector<128xf32>
    %1162 = vector.shape_cast %1161 : vector<128xf32> to vector<1x128xf32>
    %1163 = math.log %1162 : vector<1x128xf32>
    %1164 = arith.addf %1157, %1163 : vector<1x128xf32>
    %1165 = vector.broadcast %1164 : vector<1x128xf32> to vector<8x128xf32>
    %1166 = arith.subf %1108, %1165 : vector<8x128xf32>
    %cst_201 = arith.constant dense<0xFF800000> : vector<128xf32>
    %1167 = vector.multi_reduction <maximumf>, %1109, %cst_201 [0] : vector<8x128xf32> to vector<128xf32>
    %1168 = vector.shape_cast %1167 : vector<128xf32> to vector<1x128xf32>
    %1169 = vector.broadcast %1168 : vector<1x128xf32> to vector<8x128xf32>
    %1170 = arith.subf %1109, %1169 : vector<8x128xf32>
    %1171 = math.exp %1170 : vector<8x128xf32>
    %cst_202 = arith.constant dense<0.000000e+00> : vector<128xf32>
    %1172 = vector.multi_reduction <add>, %1171, %cst_202 [0] : vector<8x128xf32> to vector<128xf32>
    %1173 = vector.shape_cast %1172 : vector<128xf32> to vector<1x128xf32>
    %1174 = math.log %1173 : vector<1x128xf32>
    %1175 = arith.addf %1168, %1174 : vector<1x128xf32>
    %1176 = vector.broadcast %1175 : vector<1x128xf32> to vector<8x128xf32>
    %1177 = arith.subf %1109, %1176 : vector<8x128xf32>
    %cst_203 = arith.constant dense<0xFF800000> : vector<128xf32>
    %1178 = vector.multi_reduction <maximumf>, %1110, %cst_203 [0] : vector<8x128xf32> to vector<128xf32>
    %1179 = vector.shape_cast %1178 : vector<128xf32> to vector<1x128xf32>
    %1180 = vector.broadcast %1179 : vector<1x128xf32> to vector<8x128xf32>
    %1181 = arith.subf %1110, %1180 : vector<8x128xf32>
    %1182 = math.exp %1181 : vector<8x128xf32>
    %cst_204 = arith.constant dense<0.000000e+00> : vector<128xf32>
    %1183 = vector.multi_reduction <add>, %1182, %cst_204 [0] : vector<8x128xf32> to vector<128xf32>
    %1184 = vector.shape_cast %1183 : vector<128xf32> to vector<1x128xf32>
    %1185 = math.log %1184 : vector<1x128xf32>
    %1186 = arith.addf %1179, %1185 : vector<1x128xf32>
    %1187 = vector.broadcast %1186 : vector<1x128xf32> to vector<8x128xf32>
    %1188 = arith.subf %1110, %1187 : vector<8x128xf32>
    %cst_205 = arith.constant dense<0xFF800000> : vector<128xf32>
    %1189 = vector.multi_reduction <maximumf>, %1111, %cst_205 [0] : vector<8x128xf32> to vector<128xf32>
    %1190 = vector.shape_cast %1189 : vector<128xf32> to vector<1x128xf32>
    %1191 = vector.broadcast %1190 : vector<1x128xf32> to vector<8x128xf32>
    %1192 = arith.subf %1111, %1191 : vector<8x128xf32>
    %1193 = math.exp %1192 : vector<8x128xf32>
    %cst_206 = arith.constant dense<0.000000e+00> : vector<128xf32>
    %1194 = vector.multi_reduction <add>, %1193, %cst_206 [0] : vector<8x128xf32> to vector<128xf32>
    %1195 = vector.shape_cast %1194 : vector<128xf32> to vector<1x128xf32>
    %1196 = math.log %1195 : vector<1x128xf32>
    %1197 = arith.addf %1190, %1196 : vector<1x128xf32>
    %1198 = vector.broadcast %1197 : vector<1x128xf32> to vector<8x128xf32>
    %1199 = arith.subf %1111, %1198 : vector<8x128xf32>
    %1200 = arith.maximumf %1122, %1133 : vector<8x128xf32>
    %1201 = arith.maximumf %1144, %1155 : vector<8x128xf32>
    %1202 = arith.maximumf %1166, %1177 : vector<8x128xf32>
    %1203 = arith.maximumf %1188, %1199 : vector<8x128xf32>
    %1204 = arith.maximumf %1200, %1201 : vector<8x128xf32>
    %1205 = arith.maximumf %1202, %1203 : vector<8x128xf32>
    %1206 = arith.maximumf %1204, %1205 : vector<8x128xf32>
    %1207 = arith.subf %1122, %1206 : vector<8x128xf32>
    %1208 = math.exp %1207 : vector<8x128xf32>
    %1209 = arith.subf %1133, %1206 : vector<8x128xf32>
    %1210 = math.exp %1209 : vector<8x128xf32>
    %1211 = arith.subf %1144, %1206 : vector<8x128xf32>
    %1212 = math.exp %1211 : vector<8x128xf32>
    %1213 = arith.subf %1155, %1206 : vector<8x128xf32>
    %1214 = math.exp %1213 : vector<8x128xf32>
    %1215 = arith.subf %1166, %1206 : vector<8x128xf32>
    %1216 = math.exp %1215 : vector<8x128xf32>
    %1217 = arith.subf %1177, %1206 : vector<8x128xf32>
    %1218 = math.exp %1217 : vector<8x128xf32>
    %1219 = arith.subf %1188, %1206 : vector<8x128xf32>
    %1220 = math.exp %1219 : vector<8x128xf32>
    %1221 = arith.subf %1199, %1206 : vector<8x128xf32>
    %1222 = math.exp %1221 : vector<8x128xf32>
    %1223 = arith.addf %1208, %1210 : vector<8x128xf32>
    %1224 = arith.addf %1212, %1214 : vector<8x128xf32>
    %1225 = arith.addf %1216, %1218 : vector<8x128xf32>
    %1226 = arith.addf %1220, %1222 : vector<8x128xf32>
    %1227 = arith.addf %1223, %1224 : vector<8x128xf32>
    %1228 = arith.addf %1225, %1226 : vector<8x128xf32>
    %1229 = arith.addf %1227, %1228 : vector<8x128xf32>
    %1230 = math.log %1229 : vector<8x128xf32>
    %1231 = arith.addf %1206, %1230 : vector<8x128xf32>
    %1232 = arith.subf %1122, %1231 : vector<8x128xf32>
    %1233 = arith.subf %1133, %1231 : vector<8x128xf32>
    %1234 = arith.subf %1144, %1231 : vector<8x128xf32>
    %1235 = arith.subf %1155, %1231 : vector<8x128xf32>
    %1236 = arith.subf %1166, %1231 : vector<8x128xf32>
    %1237 = arith.subf %1177, %1231 : vector<8x128xf32>
    %1238 = arith.subf %1188, %1231 : vector<8x128xf32>
    %1239 = arith.subf %1199, %1231 : vector<8x128xf32>
    %cst_207 = arith.constant dense<0xFF800000> : vector<128xf32>
    %1240 = vector.multi_reduction <maximumf>, %1232, %cst_207 [0] : vector<8x128xf32> to vector<128xf32>
    %1241 = vector.shape_cast %1240 : vector<128xf32> to vector<1x128xf32>
    %1242 = vector.broadcast %1241 : vector<1x128xf32> to vector<8x128xf32>
    %1243 = arith.subf %1232, %1242 : vector<8x128xf32>
    %1244 = math.exp %1243 : vector<8x128xf32>
    %cst_208 = arith.constant dense<0.000000e+00> : vector<128xf32>
    %1245 = vector.multi_reduction <add>, %1244, %cst_208 [0] : vector<8x128xf32> to vector<128xf32>
    %1246 = vector.shape_cast %1245 : vector<128xf32> to vector<1x128xf32>
    %1247 = math.log %1246 : vector<1x128xf32>
    %1248 = arith.addf %1241, %1247 : vector<1x128xf32>
    %1249 = vector.broadcast %1248 : vector<1x128xf32> to vector<8x128xf32>
    %1250 = arith.subf %1232, %1249 : vector<8x128xf32>
    %cst_209 = arith.constant dense<0xFF800000> : vector<128xf32>
    %1251 = vector.multi_reduction <maximumf>, %1233, %cst_209 [0] : vector<8x128xf32> to vector<128xf32>
    %1252 = vector.shape_cast %1251 : vector<128xf32> to vector<1x128xf32>
    %1253 = vector.broadcast %1252 : vector<1x128xf32> to vector<8x128xf32>
    %1254 = arith.subf %1233, %1253 : vector<8x128xf32>
    %1255 = math.exp %1254 : vector<8x128xf32>
    %cst_210 = arith.constant dense<0.000000e+00> : vector<128xf32>
    %1256 = vector.multi_reduction <add>, %1255, %cst_210 [0] : vector<8x128xf32> to vector<128xf32>
    %1257 = vector.shape_cast %1256 : vector<128xf32> to vector<1x128xf32>
    %1258 = math.log %1257 : vector<1x128xf32>
    %1259 = arith.addf %1252, %1258 : vector<1x128xf32>
    %1260 = vector.broadcast %1259 : vector<1x128xf32> to vector<8x128xf32>
    %1261 = arith.subf %1233, %1260 : vector<8x128xf32>
    %cst_211 = arith.constant dense<0xFF800000> : vector<128xf32>
    %1262 = vector.multi_reduction <maximumf>, %1234, %cst_211 [0] : vector<8x128xf32> to vector<128xf32>
    %1263 = vector.shape_cast %1262 : vector<128xf32> to vector<1x128xf32>
    %1264 = vector.broadcast %1263 : vector<1x128xf32> to vector<8x128xf32>
    %1265 = arith.subf %1234, %1264 : vector<8x128xf32>
    %1266 = math.exp %1265 : vector<8x128xf32>
    %cst_212 = arith.constant dense<0.000000e+00> : vector<128xf32>
    %1267 = vector.multi_reduction <add>, %1266, %cst_212 [0] : vector<8x128xf32> to vector<128xf32>
    %1268 = vector.shape_cast %1267 : vector<128xf32> to vector<1x128xf32>
    %1269 = math.log %1268 : vector<1x128xf32>
    %1270 = arith.addf %1263, %1269 : vector<1x128xf32>
    %1271 = vector.broadcast %1270 : vector<1x128xf32> to vector<8x128xf32>
    %1272 = arith.subf %1234, %1271 : vector<8x128xf32>
    %cst_213 = arith.constant dense<0xFF800000> : vector<128xf32>
    %1273 = vector.multi_reduction <maximumf>, %1235, %cst_213 [0] : vector<8x128xf32> to vector<128xf32>
    %1274 = vector.shape_cast %1273 : vector<128xf32> to vector<1x128xf32>
    %1275 = vector.broadcast %1274 : vector<1x128xf32> to vector<8x128xf32>
    %1276 = arith.subf %1235, %1275 : vector<8x128xf32>
    %1277 = math.exp %1276 : vector<8x128xf32>
    %cst_214 = arith.constant dense<0.000000e+00> : vector<128xf32>
    %1278 = vector.multi_reduction <add>, %1277, %cst_214 [0] : vector<8x128xf32> to vector<128xf32>
    %1279 = vector.shape_cast %1278 : vector<128xf32> to vector<1x128xf32>
    %1280 = math.log %1279 : vector<1x128xf32>
    %1281 = arith.addf %1274, %1280 : vector<1x128xf32>
    %1282 = vector.broadcast %1281 : vector<1x128xf32> to vector<8x128xf32>
    %1283 = arith.subf %1235, %1282 : vector<8x128xf32>
    %cst_215 = arith.constant dense<0xFF800000> : vector<128xf32>
    %1284 = vector.multi_reduction <maximumf>, %1236, %cst_215 [0] : vector<8x128xf32> to vector<128xf32>
    %1285 = vector.shape_cast %1284 : vector<128xf32> to vector<1x128xf32>
    %1286 = vector.broadcast %1285 : vector<1x128xf32> to vector<8x128xf32>
    %1287 = arith.subf %1236, %1286 : vector<8x128xf32>
    %1288 = math.exp %1287 : vector<8x128xf32>
    %cst_216 = arith.constant dense<0.000000e+00> : vector<128xf32>
    %1289 = vector.multi_reduction <add>, %1288, %cst_216 [0] : vector<8x128xf32> to vector<128xf32>
    %1290 = vector.shape_cast %1289 : vector<128xf32> to vector<1x128xf32>
    %1291 = math.log %1290 : vector<1x128xf32>
    %1292 = arith.addf %1285, %1291 : vector<1x128xf32>
    %1293 = vector.broadcast %1292 : vector<1x128xf32> to vector<8x128xf32>
    %1294 = arith.subf %1236, %1293 : vector<8x128xf32>
    %cst_217 = arith.constant dense<0xFF800000> : vector<128xf32>
    %1295 = vector.multi_reduction <maximumf>, %1237, %cst_217 [0] : vector<8x128xf32> to vector<128xf32>
    %1296 = vector.shape_cast %1295 : vector<128xf32> to vector<1x128xf32>
    %1297 = vector.broadcast %1296 : vector<1x128xf32> to vector<8x128xf32>
    %1298 = arith.subf %1237, %1297 : vector<8x128xf32>
    %1299 = math.exp %1298 : vector<8x128xf32>
    %cst_218 = arith.constant dense<0.000000e+00> : vector<128xf32>
    %1300 = vector.multi_reduction <add>, %1299, %cst_218 [0] : vector<8x128xf32> to vector<128xf32>
    %1301 = vector.shape_cast %1300 : vector<128xf32> to vector<1x128xf32>
    %1302 = math.log %1301 : vector<1x128xf32>
    %1303 = arith.addf %1296, %1302 : vector<1x128xf32>
    %1304 = vector.broadcast %1303 : vector<1x128xf32> to vector<8x128xf32>
    %1305 = arith.subf %1237, %1304 : vector<8x128xf32>
    %cst_219 = arith.constant dense<0xFF800000> : vector<128xf32>
    %1306 = vector.multi_reduction <maximumf>, %1238, %cst_219 [0] : vector<8x128xf32> to vector<128xf32>
    %1307 = vector.shape_cast %1306 : vector<128xf32> to vector<1x128xf32>
    %1308 = vector.broadcast %1307 : vector<1x128xf32> to vector<8x128xf32>
    %1309 = arith.subf %1238, %1308 : vector<8x128xf32>
    %1310 = math.exp %1309 : vector<8x128xf32>
    %cst_220 = arith.constant dense<0.000000e+00> : vector<128xf32>
    %1311 = vector.multi_reduction <add>, %1310, %cst_220 [0] : vector<8x128xf32> to vector<128xf32>
    %1312 = vector.shape_cast %1311 : vector<128xf32> to vector<1x128xf32>
    %1313 = math.log %1312 : vector<1x128xf32>
    %1314 = arith.addf %1307, %1313 : vector<1x128xf32>
    %1315 = vector.broadcast %1314 : vector<1x128xf32> to vector<8x128xf32>
    %1316 = arith.subf %1238, %1315 : vector<8x128xf32>
    %cst_221 = arith.constant dense<0xFF800000> : vector<128xf32>
    %1317 = vector.multi_reduction <maximumf>, %1239, %cst_221 [0] : vector<8x128xf32> to vector<128xf32>
    %1318 = vector.shape_cast %1317 : vector<128xf32> to vector<1x128xf32>
    %1319 = vector.broadcast %1318 : vector<1x128xf32> to vector<8x128xf32>
    %1320 = arith.subf %1239, %1319 : vector<8x128xf32>
    %1321 = math.exp %1320 : vector<8x128xf32>
    %cst_222 = arith.constant dense<0.000000e+00> : vector<128xf32>
    %1322 = vector.multi_reduction <add>, %1321, %cst_222 [0] : vector<8x128xf32> to vector<128xf32>
    %1323 = vector.shape_cast %1322 : vector<128xf32> to vector<1x128xf32>
    %1324 = math.log %1323 : vector<1x128xf32>
    %1325 = arith.addf %1318, %1324 : vector<1x128xf32>
    %1326 = vector.broadcast %1325 : vector<1x128xf32> to vector<8x128xf32>
    %1327 = arith.subf %1239, %1326 : vector<8x128xf32>
    %1328 = arith.maximumf %1250, %1261 : vector<8x128xf32>
    %1329 = arith.maximumf %1272, %1283 : vector<8x128xf32>
    %1330 = arith.maximumf %1294, %1305 : vector<8x128xf32>
    %1331 = arith.maximumf %1316, %1327 : vector<8x128xf32>
    %1332 = arith.maximumf %1328, %1329 : vector<8x128xf32>
    %1333 = arith.maximumf %1330, %1331 : vector<8x128xf32>
    %1334 = arith.maximumf %1332, %1333 : vector<8x128xf32>
    %1335 = arith.subf %1250, %1334 : vector<8x128xf32>
    %1336 = math.exp %1335 : vector<8x128xf32>
    %1337 = arith.subf %1261, %1334 : vector<8x128xf32>
    %1338 = math.exp %1337 : vector<8x128xf32>
    %1339 = arith.subf %1272, %1334 : vector<8x128xf32>
    %1340 = math.exp %1339 : vector<8x128xf32>
    %1341 = arith.subf %1283, %1334 : vector<8x128xf32>
    %1342 = math.exp %1341 : vector<8x128xf32>
    %1343 = arith.subf %1294, %1334 : vector<8x128xf32>
    %1344 = math.exp %1343 : vector<8x128xf32>
    %1345 = arith.subf %1305, %1334 : vector<8x128xf32>
    %1346 = math.exp %1345 : vector<8x128xf32>
    %1347 = arith.subf %1316, %1334 : vector<8x128xf32>
    %1348 = math.exp %1347 : vector<8x128xf32>
    %1349 = arith.subf %1327, %1334 : vector<8x128xf32>
    %1350 = math.exp %1349 : vector<8x128xf32>
    %1351 = arith.addf %1336, %1338 : vector<8x128xf32>
    %1352 = arith.addf %1340, %1342 : vector<8x128xf32>
    %1353 = arith.addf %1344, %1346 : vector<8x128xf32>
    %1354 = arith.addf %1348, %1350 : vector<8x128xf32>
    %1355 = arith.addf %1351, %1352 : vector<8x128xf32>
    %1356 = arith.addf %1353, %1354 : vector<8x128xf32>
    %1357 = arith.addf %1355, %1356 : vector<8x128xf32>
    %1358 = math.log %1357 : vector<8x128xf32>
    %1359 = arith.addf %1334, %1358 : vector<8x128xf32>
    %1360 = arith.subf %1250, %1359 : vector<8x128xf32>
    %1361 = arith.subf %1261, %1359 : vector<8x128xf32>
    %1362 = arith.subf %1272, %1359 : vector<8x128xf32>
    %1363 = arith.subf %1283, %1359 : vector<8x128xf32>
    %1364 = arith.subf %1294, %1359 : vector<8x128xf32>
    %1365 = arith.subf %1305, %1359 : vector<8x128xf32>
    %1366 = arith.subf %1316, %1359 : vector<8x128xf32>
    %1367 = arith.subf %1327, %1359 : vector<8x128xf32>
    %1368 = tpu.iota {dimensions = array<i32: 0>} : vector<8x128xi32>
    %cst_223 = arith.constant dense<0xFF800000> : vector<128xf32>
    %1369 = vector.multi_reduction <maximumf>, %1360, %cst_223 [0] : vector<8x128xf32> to vector<128xf32>
    %1370 = vector.shape_cast %1369 : vector<128xf32> to vector<1x128xf32>
    %1371 = vector.broadcast %1370 : vector<1x128xf32> to vector<8x128xf32>
    %1372 = arith.cmpf oge, %1360, %1371 : vector<8x128xf32>
    %c8_i32 = arith.constant 8 : i32
    %1373 = vector.broadcast %c8_i32 : i32 to vector<8x128xi32>
    %1374 = arith.select %1372, %1368, %1373 : vector<8x128xi1>, vector<8x128xi32>
    %cst_224 = arith.constant dense<2147483647> : vector<128xi32>
    %1375 = vector.multi_reduction <minsi>, %1374, %cst_224 [0] : vector<8x128xi32> to vector<128xi32>
    %1376 = vector.shape_cast %1375 : vector<128xi32> to vector<1x128xi32>
    %cst_225 = arith.constant dense<0xFF800000> : vector<128xf32>
    %1377 = vector.multi_reduction <maximumf>, %1361, %cst_225 [0] : vector<8x128xf32> to vector<128xf32>
    %1378 = vector.shape_cast %1377 : vector<128xf32> to vector<1x128xf32>
    %1379 = vector.broadcast %1378 : vector<1x128xf32> to vector<8x128xf32>
    %1380 = arith.cmpf oge, %1361, %1379 : vector<8x128xf32>
    %c8_i32_226 = arith.constant 8 : i32
    %1381 = vector.broadcast %c8_i32_226 : i32 to vector<8x128xi32>
    %1382 = arith.select %1380, %1368, %1381 : vector<8x128xi1>, vector<8x128xi32>
    %cst_227 = arith.constant dense<2147483647> : vector<128xi32>
    %1383 = vector.multi_reduction <minsi>, %1382, %cst_227 [0] : vector<8x128xi32> to vector<128xi32>
    %1384 = vector.shape_cast %1383 : vector<128xi32> to vector<1x128xi32>
    %cst_228 = arith.constant dense<0xFF800000> : vector<128xf32>
    %1385 = vector.multi_reduction <maximumf>, %1362, %cst_228 [0] : vector<8x128xf32> to vector<128xf32>
    %1386 = vector.shape_cast %1385 : vector<128xf32> to vector<1x128xf32>
    %1387 = vector.broadcast %1386 : vector<1x128xf32> to vector<8x128xf32>
    %1388 = arith.cmpf oge, %1362, %1387 : vector<8x128xf32>
    %c8_i32_229 = arith.constant 8 : i32
    %1389 = vector.broadcast %c8_i32_229 : i32 to vector<8x128xi32>
    %1390 = arith.select %1388, %1368, %1389 : vector<8x128xi1>, vector<8x128xi32>
    %cst_230 = arith.constant dense<2147483647> : vector<128xi32>
    %1391 = vector.multi_reduction <minsi>, %1390, %cst_230 [0] : vector<8x128xi32> to vector<128xi32>
    %1392 = vector.shape_cast %1391 : vector<128xi32> to vector<1x128xi32>
    %cst_231 = arith.constant dense<0xFF800000> : vector<128xf32>
    %1393 = vector.multi_reduction <maximumf>, %1363, %cst_231 [0] : vector<8x128xf32> to vector<128xf32>
    %1394 = vector.shape_cast %1393 : vector<128xf32> to vector<1x128xf32>
    %1395 = vector.broadcast %1394 : vector<1x128xf32> to vector<8x128xf32>
    %1396 = arith.cmpf oge, %1363, %1395 : vector<8x128xf32>
    %c8_i32_232 = arith.constant 8 : i32
    %1397 = vector.broadcast %c8_i32_232 : i32 to vector<8x128xi32>
    %1398 = arith.select %1396, %1368, %1397 : vector<8x128xi1>, vector<8x128xi32>
    %cst_233 = arith.constant dense<2147483647> : vector<128xi32>
    %1399 = vector.multi_reduction <minsi>, %1398, %cst_233 [0] : vector<8x128xi32> to vector<128xi32>
    %1400 = vector.shape_cast %1399 : vector<128xi32> to vector<1x128xi32>
    %cst_234 = arith.constant dense<0xFF800000> : vector<128xf32>
    %1401 = vector.multi_reduction <maximumf>, %1364, %cst_234 [0] : vector<8x128xf32> to vector<128xf32>
    %1402 = vector.shape_cast %1401 : vector<128xf32> to vector<1x128xf32>
    %1403 = vector.broadcast %1402 : vector<1x128xf32> to vector<8x128xf32>
    %1404 = arith.cmpf oge, %1364, %1403 : vector<8x128xf32>
    %c8_i32_235 = arith.constant 8 : i32
    %1405 = vector.broadcast %c8_i32_235 : i32 to vector<8x128xi32>
    %1406 = arith.select %1404, %1368, %1405 : vector<8x128xi1>, vector<8x128xi32>
    %cst_236 = arith.constant dense<2147483647> : vector<128xi32>
    %1407 = vector.multi_reduction <minsi>, %1406, %cst_236 [0] : vector<8x128xi32> to vector<128xi32>
    %1408 = vector.shape_cast %1407 : vector<128xi32> to vector<1x128xi32>
    %cst_237 = arith.constant dense<0xFF800000> : vector<128xf32>
    %1409 = vector.multi_reduction <maximumf>, %1365, %cst_237 [0] : vector<8x128xf32> to vector<128xf32>
    %1410 = vector.shape_cast %1409 : vector<128xf32> to vector<1x128xf32>
    %1411 = vector.broadcast %1410 : vector<1x128xf32> to vector<8x128xf32>
    %1412 = arith.cmpf oge, %1365, %1411 : vector<8x128xf32>
    %c8_i32_238 = arith.constant 8 : i32
    %1413 = vector.broadcast %c8_i32_238 : i32 to vector<8x128xi32>
    %1414 = arith.select %1412, %1368, %1413 : vector<8x128xi1>, vector<8x128xi32>
    %cst_239 = arith.constant dense<2147483647> : vector<128xi32>
    %1415 = vector.multi_reduction <minsi>, %1414, %cst_239 [0] : vector<8x128xi32> to vector<128xi32>
    %1416 = vector.shape_cast %1415 : vector<128xi32> to vector<1x128xi32>
    %cst_240 = arith.constant dense<0xFF800000> : vector<128xf32>
    %1417 = vector.multi_reduction <maximumf>, %1366, %cst_240 [0] : vector<8x128xf32> to vector<128xf32>
    %1418 = vector.shape_cast %1417 : vector<128xf32> to vector<1x128xf32>
    %1419 = vector.broadcast %1418 : vector<1x128xf32> to vector<8x128xf32>
    %1420 = arith.cmpf oge, %1366, %1419 : vector<8x128xf32>
    %c8_i32_241 = arith.constant 8 : i32
    %1421 = vector.broadcast %c8_i32_241 : i32 to vector<8x128xi32>
    %1422 = arith.select %1420, %1368, %1421 : vector<8x128xi1>, vector<8x128xi32>
    %cst_242 = arith.constant dense<2147483647> : vector<128xi32>
    %1423 = vector.multi_reduction <minsi>, %1422, %cst_242 [0] : vector<8x128xi32> to vector<128xi32>
    %1424 = vector.shape_cast %1423 : vector<128xi32> to vector<1x128xi32>
    %cst_243 = arith.constant dense<0xFF800000> : vector<128xf32>
    %1425 = vector.multi_reduction <maximumf>, %1367, %cst_243 [0] : vector<8x128xf32> to vector<128xf32>
    %1426 = vector.shape_cast %1425 : vector<128xf32> to vector<1x128xf32>
    %1427 = vector.broadcast %1426 : vector<1x128xf32> to vector<8x128xf32>
    %1428 = arith.cmpf oge, %1367, %1427 : vector<8x128xf32>
    %c8_i32_244 = arith.constant 8 : i32
    %1429 = vector.broadcast %c8_i32_244 : i32 to vector<8x128xi32>
    %1430 = arith.select %1428, %1368, %1429 : vector<8x128xi1>, vector<8x128xi32>
    %cst_245 = arith.constant dense<2147483647> : vector<128xi32>
    %1431 = vector.multi_reduction <minsi>, %1430, %cst_245 [0] : vector<8x128xi32> to vector<128xi32>
    %1432 = vector.shape_cast %1431 : vector<128xi32> to vector<1x128xi32>
    %1433 = tpu.concatenate %1376, %1384, %1392, %1400, %1408, %1416, %1424, %1432 in 0 : vector<1x128xi32>, vector<1x128xi32>, vector<1x128xi32>, vector<1x128xi32>, vector<1x128xi32>, vector<1x128xi32>, vector<1x128xi32>, vector<1x128xi32> -> vector<8x128xi32>
    %c0_246 = arith.constant 0 : index
    %c0_247 = arith.constant 0 : index
    %c0_248 = arith.constant 0 : index
    %1434 = vector.load %arg7[%c0_246, %c0_247, %c0_248] : memref<1x8x128xi32, #tpu.memory_space<vmem>>, vector<1x8x128xi32>
    %1435 = vector.shape_cast %1434 : vector<1x8x128xi32> to vector<8x128xi32>
    %1436 = vector.shape_cast %1433 : vector<8x128xi32> to vector<1x8x128xi32>
    tpu.vector_store %arg7[%c0_246, %c0_247, %c0_248], %1436 {strides = array<i32>} : memref<1x8x128xi32, #tpu.memory_space<vmem>>, vector<1x8x128xi32>,
    %cst_249 = arith.constant 0.000000e+00 : f32
    %1437 = vector.broadcast %cst_249 : f32 to vector<64x128xf32>
    %c0_i32 = arith.constant 0 : i32
    %1438 = vector.broadcast %c0_i32 : i32 to vector<1x128xi32>
    %1439 = arith.cmpi eq, %1376, %1438 : vector<1x128xi32>
    %c0_250 = arith.constant 0 : index
    %c0_251 = arith.constant 0 : index
    %c0_252 = arith.constant 0 : index
    %c0_253 = arith.constant 0 : index
    %1440 = vector.load %arg1[%c0_250, %c0_251, %c0_252, %c0_253] : memref<1x8x64x128xf32, #tpu.memory_space<vmem>>, vector<1x1x64x128xf32>
    %1441 = vector.shape_cast %1440 : vector<1x1x64x128xf32> to vector<64x128xf32>
    %1442 = vector.shape_cast %1439 : vector<1x128xi1> to vector<1x128xi1>
    %1443 = vector.broadcast %1442 : vector<1x128xi1> to vector<64x128xi1>
    %1444 = arith.select %1443, %1441, %1437 : vector<64x128xi1>, vector<64x128xf32>
    %c0_i32_254 = arith.constant 0 : i32
    %1445 = vector.broadcast %c0_i32_254 : i32 to vector<1x128xi32>
    %1446 = arith.cmpi eq, %1384, %1445 : vector<1x128xi32>
    %c0_255 = arith.constant 0 : index
    %c1_256 = arith.constant 1 : index
    %c0_257 = arith.constant 0 : index
    %c0_258 = arith.constant 0 : index
    %1447 = vector.load %arg1[%c0_255, %c1_256, %c0_257, %c0_258] : memref<1x8x64x128xf32, #tpu.memory_space<vmem>>, vector<1x1x64x128xf32>
    %1448 = vector.shape_cast %1447 : vector<1x1x64x128xf32> to vector<64x128xf32>
    %1449 = vector.shape_cast %1446 : vector<1x128xi1> to vector<1x128xi1>
    %1450 = vector.broadcast %1449 : vector<1x128xi1> to vector<64x128xi1>
    %1451 = arith.select %1450, %1448, %1444 : vector<64x128xi1>, vector<64x128xf32>
    %c0_i32_259 = arith.constant 0 : i32
    %1452 = vector.broadcast %c0_i32_259 : i32 to vector<1x128xi32>
    %1453 = arith.cmpi eq, %1392, %1452 : vector<1x128xi32>
    %c0_260 = arith.constant 0 : index
    %c2_261 = arith.constant 2 : index
    %c0_262 = arith.constant 0 : index
    %c0_263 = arith.constant 0 : index
    %1454 = vector.load %arg1[%c0_260, %c2_261, %c0_262, %c0_263] : memref<1x8x64x128xf32, #tpu.memory_space<vmem>>, vector<1x1x64x128xf32>
    %1455 = vector.shape_cast %1454 : vector<1x1x64x128xf32> to vector<64x128xf32>
    %1456 = vector.shape_cast %1453 : vector<1x128xi1> to vector<1x128xi1>
    %1457 = vector.broadcast %1456 : vector<1x128xi1> to vector<64x128xi1>
    %1458 = arith.select %1457, %1455, %1451 : vector<64x128xi1>, vector<64x128xf32>
    %c0_i32_264 = arith.constant 0 : i32
    %1459 = vector.broadcast %c0_i32_264 : i32 to vector<1x128xi32>
    %1460 = arith.cmpi eq, %1400, %1459 : vector<1x128xi32>
    %c0_265 = arith.constant 0 : index
    %c3_266 = arith.constant 3 : index
    %c0_267 = arith.constant 0 : index
    %c0_268 = arith.constant 0 : index
    %1461 = vector.load %arg1[%c0_265, %c3_266, %c0_267, %c0_268] : memref<1x8x64x128xf32, #tpu.memory_space<vmem>>, vector<1x1x64x128xf32>
    %1462 = vector.shape_cast %1461 : vector<1x1x64x128xf32> to vector<64x128xf32>
    %1463 = vector.shape_cast %1460 : vector<1x128xi1> to vector<1x128xi1>
    %1464 = vector.broadcast %1463 : vector<1x128xi1> to vector<64x128xi1>
    %1465 = arith.select %1464, %1462, %1458 : vector<64x128xi1>, vector<64x128xf32>
    %c0_i32_269 = arith.constant 0 : i32
    %1466 = vector.broadcast %c0_i32_269 : i32 to vector<1x128xi32>
    %1467 = arith.cmpi eq, %1408, %1466 : vector<1x128xi32>
    %c0_270 = arith.constant 0 : index
    %c4_271 = arith.constant 4 : index
    %c0_272 = arith.constant 0 : index
    %c0_273 = arith.constant 0 : index
    %1468 = vector.load %arg1[%c0_270, %c4_271, %c0_272, %c0_273] : memref<1x8x64x128xf32, #tpu.memory_space<vmem>>, vector<1x1x64x128xf32>
    %1469 = vector.shape_cast %1468 : vector<1x1x64x128xf32> to vector<64x128xf32>
    %1470 = vector.shape_cast %1467 : vector<1x128xi1> to vector<1x128xi1>
    %1471 = vector.broadcast %1470 : vector<1x128xi1> to vector<64x128xi1>
    %1472 = arith.select %1471, %1469, %1465 : vector<64x128xi1>, vector<64x128xf32>
    %c0_i32_274 = arith.constant 0 : i32
    %1473 = vector.broadcast %c0_i32_274 : i32 to vector<1x128xi32>
    %1474 = arith.cmpi eq, %1416, %1473 : vector<1x128xi32>
    %c0_275 = arith.constant 0 : index
    %c5_276 = arith.constant 5 : index
    %c0_277 = arith.constant 0 : index
    %c0_278 = arith.constant 0 : index
    %1475 = vector.load %arg1[%c0_275, %c5_276, %c0_277, %c0_278] : memref<1x8x64x128xf32, #tpu.memory_space<vmem>>, vector<1x1x64x128xf32>
    %1476 = vector.shape_cast %1475 : vector<1x1x64x128xf32> to vector<64x128xf32>
    %1477 = vector.shape_cast %1474 : vector<1x128xi1> to vector<1x128xi1>
    %1478 = vector.broadcast %1477 : vector<1x128xi1> to vector<64x128xi1>
    %1479 = arith.select %1478, %1476, %1472 : vector<64x128xi1>, vector<64x128xf32>
    %c0_i32_279 = arith.constant 0 : i32
    %1480 = vector.broadcast %c0_i32_279 : i32 to vector<1x128xi32>
    %1481 = arith.cmpi eq, %1424, %1480 : vector<1x128xi32>
    %c0_280 = arith.constant 0 : index
    %c6_281 = arith.constant 6 : index
    %c0_282 = arith.constant 0 : index
    %c0_283 = arith.constant 0 : index
    %1482 = vector.load %arg1[%c0_280, %c6_281, %c0_282, %c0_283] : memref<1x8x64x128xf32, #tpu.memory_space<vmem>>, vector<1x1x64x128xf32>
    %1483 = vector.shape_cast %1482 : vector<1x1x64x128xf32> to vector<64x128xf32>
    %1484 = vector.shape_cast %1481 : vector<1x128xi1> to vector<1x128xi1>
    %1485 = vector.broadcast %1484 : vector<1x128xi1> to vector<64x128xi1>
    %1486 = arith.select %1485, %1483, %1479 : vector<64x128xi1>, vector<64x128xf32>
    %c0_i32_284 = arith.constant 0 : i32
    %1487 = vector.broadcast %c0_i32_284 : i32 to vector<1x128xi32>
    %1488 = arith.cmpi eq, %1432, %1487 : vector<1x128xi32>
    %c0_285 = arith.constant 0 : index
    %c7_286 = arith.constant 7 : index
    %c0_287 = arith.constant 0 : index
    %c0_288 = arith.constant 0 : index
    %1489 = vector.load %arg1[%c0_285, %c7_286, %c0_287, %c0_288] : memref<1x8x64x128xf32, #tpu.memory_space<vmem>>, vector<1x1x64x128xf32>
    %1490 = vector.shape_cast %1489 : vector<1x1x64x128xf32> to vector<64x128xf32>
    %1491 = vector.shape_cast %1488 : vector<1x128xi1> to vector<1x128xi1>
    %1492 = vector.broadcast %1491 : vector<1x128xi1> to vector<64x128xi1>
    %1493 = arith.select %1492, %1490, %1486 : vector<64x128xi1>, vector<64x128xf32>
    %c0_289 = arith.constant 0 : index
    %c0_290 = arith.constant 0 : index
    %c0_291 = arith.constant 0 : index
    %c0_292 = arith.constant 0 : index
    %1494 = vector.load %arg6[%c0_289, %c0_290, %c0_291, %c0_292] : memref<1x8x64x128xf32, #tpu.memory_space<vmem>>, vector<1x1x64x128xf32>
    %1495 = vector.shape_cast %1494 : vector<1x1x64x128xf32> to vector<64x128xf32>
    %1496 = vector.shape_cast %1493 : vector<64x128xf32> to vector<1x1x64x128xf32>
    tpu.vector_store %arg6[%c0_289, %c0_290, %c0_291, %c0_292], %1496 {strides = array<i32>} : memref<1x8x64x128xf32, #tpu.memory_space<vmem>>, vector<1x1x64x128xf32>,
    %c1_i32 = arith.constant 1 : i32
    %1497 = vector.broadcast %c1_i32 : i32 to vector<1x128xi32>
    %1498 = arith.cmpi eq, %1376, %1497 : vector<1x128xi32>
    %c0_293 = arith.constant 0 : index
    %c0_294 = arith.constant 0 : index
    %c0_295 = arith.constant 0 : index
    %c0_296 = arith.constant 0 : index
    %1499 = vector.load %arg1[%c0_293, %c0_294, %c0_295, %c0_296] : memref<1x8x64x128xf32, #tpu.memory_space<vmem>>, vector<1x1x64x128xf32>
    %1500 = vector.shape_cast %1499 : vector<1x1x64x128xf32> to vector<64x128xf32>
    %1501 = vector.shape_cast %1498 : vector<1x128xi1> to vector<1x128xi1>
    %1502 = vector.broadcast %1501 : vector<1x128xi1> to vector<64x128xi1>
    %1503 = arith.select %1502, %1500, %1437 : vector<64x128xi1>, vector<64x128xf32>
    %c1_i32_297 = arith.constant 1 : i32
    %1504 = vector.broadcast %c1_i32_297 : i32 to vector<1x128xi32>
    %1505 = arith.cmpi eq, %1384, %1504 : vector<1x128xi32>
    %c0_298 = arith.constant 0 : index
    %c1_299 = arith.constant 1 : index
    %c0_300 = arith.constant 0 : index
    %c0_301 = arith.constant 0 : index
    %1506 = vector.load %arg1[%c0_298, %c1_299, %c0_300, %c0_301] : memref<1x8x64x128xf32, #tpu.memory_space<vmem>>, vector<1x1x64x128xf32>
    %1507 = vector.shape_cast %1506 : vector<1x1x64x128xf32> to vector<64x128xf32>
    %1508 = vector.shape_cast %1505 : vector<1x128xi1> to vector<1x128xi1>
    %1509 = vector.broadcast %1508 : vector<1x128xi1> to vector<64x128xi1>
    %1510 = arith.select %1509, %1507, %1503 : vector<64x128xi1>, vector<64x128xf32>
    %c1_i32_302 = arith.constant 1 : i32
    %1511 = vector.broadcast %c1_i32_302 : i32 to vector<1x128xi32>
    %1512 = arith.cmpi eq, %1392, %1511 : vector<1x128xi32>
    %c0_303 = arith.constant 0 : index
    %c2_304 = arith.constant 2 : index
    %c0_305 = arith.constant 0 : index
    %c0_306 = arith.constant 0 : index
    %1513 = vector.load %arg1[%c0_303, %c2_304, %c0_305, %c0_306] : memref<1x8x64x128xf32, #tpu.memory_space<vmem>>, vector<1x1x64x128xf32>
    %1514 = vector.shape_cast %1513 : vector<1x1x64x128xf32> to vector<64x128xf32>
    %1515 = vector.shape_cast %1512 : vector<1x128xi1> to vector<1x128xi1>
    %1516 = vector.broadcast %1515 : vector<1x128xi1> to vector<64x128xi1>
    %1517 = arith.select %1516, %1514, %1510 : vector<64x128xi1>, vector<64x128xf32>
    %c1_i32_307 = arith.constant 1 : i32
    %1518 = vector.broadcast %c1_i32_307 : i32 to vector<1x128xi32>
    %1519 = arith.cmpi eq, %1400, %1518 : vector<1x128xi32>
    %c0_308 = arith.constant 0 : index
    %c3_309 = arith.constant 3 : index
    %c0_310 = arith.constant 0 : index
    %c0_311 = arith.constant 0 : index
    %1520 = vector.load %arg1[%c0_308, %c3_309, %c0_310, %c0_311] : memref<1x8x64x128xf32, #tpu.memory_space<vmem>>, vector<1x1x64x128xf32>
    %1521 = vector.shape_cast %1520 : vector<1x1x64x128xf32> to vector<64x128xf32>
    %1522 = vector.shape_cast %1519 : vector<1x128xi1> to vector<1x128xi1>
    %1523 = vector.broadcast %1522 : vector<1x128xi1> to vector<64x128xi1>
    %1524 = arith.select %1523, %1521, %1517 : vector<64x128xi1>, vector<64x128xf32>
    %c1_i32_312 = arith.constant 1 : i32
    %1525 = vector.broadcast %c1_i32_312 : i32 to vector<1x128xi32>
    %1526 = arith.cmpi eq, %1408, %1525 : vector<1x128xi32>
    %c0_313 = arith.constant 0 : index
    %c4_314 = arith.constant 4 : index
    %c0_315 = arith.constant 0 : index
    %c0_316 = arith.constant 0 : index
    %1527 = vector.load %arg1[%c0_313, %c4_314, %c0_315, %c0_316] : memref<1x8x64x128xf32, #tpu.memory_space<vmem>>, vector<1x1x64x128xf32>
    %1528 = vector.shape_cast %1527 : vector<1x1x64x128xf32> to vector<64x128xf32>
    %1529 = vector.shape_cast %1526 : vector<1x128xi1> to vector<1x128xi1>
    %1530 = vector.broadcast %1529 : vector<1x128xi1> to vector<64x128xi1>
    %1531 = arith.select %1530, %1528, %1524 : vector<64x128xi1>, vector<64x128xf32>
    %c1_i32_317 = arith.constant 1 : i32
    %1532 = vector.broadcast %c1_i32_317 : i32 to vector<1x128xi32>
    %1533 = arith.cmpi eq, %1416, %1532 : vector<1x128xi32>
    %c0_318 = arith.constant 0 : index
    %c5_319 = arith.constant 5 : index
    %c0_320 = arith.constant 0 : index
    %c0_321 = arith.constant 0 : index
    %1534 = vector.load %arg1[%c0_318, %c5_319, %c0_320, %c0_321] : memref<1x8x64x128xf32, #tpu.memory_space<vmem>>, vector<1x1x64x128xf32>
    %1535 = vector.shape_cast %1534 : vector<1x1x64x128xf32> to vector<64x128xf32>
    %1536 = vector.shape_cast %1533 : vector<1x128xi1> to vector<1x128xi1>
    %1537 = vector.broadcast %1536 : vector<1x128xi1> to vector<64x128xi1>
    %1538 = arith.select %1537, %1535, %1531 : vector<64x128xi1>, vector<64x128xf32>
    %c1_i32_322 = arith.constant 1 : i32
    %1539 = vector.broadcast %c1_i32_322 : i32 to vector<1x128xi32>
    %1540 = arith.cmpi eq, %1424, %1539 : vector<1x128xi32>
    %c0_323 = arith.constant 0 : index
    %c6_324 = arith.constant 6 : index
    %c0_325 = arith.constant 0 : index
    %c0_326 = arith.constant 0 : index
    %1541 = vector.load %arg1[%c0_323, %c6_324, %c0_325, %c0_326] : memref<1x8x64x128xf32, #tpu.memory_space<vmem>>, vector<1x1x64x128xf32>
    %1542 = vector.shape_cast %1541 : vector<1x1x64x128xf32> to vector<64x128xf32>
    %1543 = vector.shape_cast %1540 : vector<1x128xi1> to vector<1x128xi1>
    %1544 = vector.broadcast %1543 : vector<1x128xi1> to vector<64x128xi1>
    %1545 = arith.select %1544, %1542, %1538 : vector<64x128xi1>, vector<64x128xf32>
    %c1_i32_327 = arith.constant 1 : i32
    %1546 = vector.broadcast %c1_i32_327 : i32 to vector<1x128xi32>
    %1547 = arith.cmpi eq, %1432, %1546 : vector<1x128xi32>
    %c0_328 = arith.constant 0 : index
    %c7_329 = arith.constant 7 : index
    %c0_330 = arith.constant 0 : index
    %c0_331 = arith.constant 0 : index
    %1548 = vector.load %arg1[%c0_328, %c7_329, %c0_330, %c0_331] : memref<1x8x64x128xf32, #tpu.memory_space<vmem>>, vector<1x1x64x128xf32>
    %1549 = vector.shape_cast %1548 : vector<1x1x64x128xf32> to vector<64x128xf32>
    %1550 = vector.shape_cast %1547 : vector<1x128xi1> to vector<1x128xi1>
    %1551 = vector.broadcast %1550 : vector<1x128xi1> to vector<64x128xi1>
    %1552 = arith.select %1551, %1549, %1545 : vector<64x128xi1>, vector<64x128xf32>
    %c0_332 = arith.constant 0 : index
    %c1_333 = arith.constant 1 : index
    %c0_334 = arith.constant 0 : index
    %c0_335 = arith.constant 0 : index
    %1553 = vector.load %arg6[%c0_332, %c1_333, %c0_334, %c0_335] : memref<1x8x64x128xf32, #tpu.memory_space<vmem>>, vector<1x1x64x128xf32>
    %1554 = vector.shape_cast %1553 : vector<1x1x64x128xf32> to vector<64x128xf32>
    %1555 = vector.shape_cast %1552 : vector<64x128xf32> to vector<1x1x64x128xf32>
    tpu.vector_store %arg6[%c0_332, %c1_333, %c0_334, %c0_335], %1555 {strides = array<i32>} : memref<1x8x64x128xf32, #tpu.memory_space<vmem>>, vector<1x1x64x128xf32>,
    %c2_i32 = arith.constant 2 : i32
    %1556 = vector.broadcast %c2_i32 : i32 to vector<1x128xi32>
    %1557 = arith.cmpi eq, %1376, %1556 : vector<1x128xi32>
    %c0_336 = arith.constant 0 : index
    %c0_337 = arith.constant 0 : index
    %c0_338 = arith.constant 0 : index
    %c0_339 = arith.constant 0 : index
    %1558 = vector.load %arg1[%c0_336, %c0_337, %c0_338, %c0_339] : memref<1x8x64x128xf32, #tpu.memory_space<vmem>>, vector<1x1x64x128xf32>
    %1559 = vector.shape_cast %1558 : vector<1x1x64x128xf32> to vector<64x128xf32>
    %1560 = vector.shape_cast %1557 : vector<1x128xi1> to vector<1x128xi1>
    %1561 = vector.broadcast %1560 : vector<1x128xi1> to vector<64x128xi1>
    %1562 = arith.select %1561, %1559, %1437 : vector<64x128xi1>, vector<64x128xf32>
    %c2_i32_340 = arith.constant 2 : i32
    %1563 = vector.broadcast %c2_i32_340 : i32 to vector<1x128xi32>
    %1564 = arith.cmpi eq, %1384, %1563 : vector<1x128xi32>
    %c0_341 = arith.constant 0 : index
    %c1_342 = arith.constant 1 : index
    %c0_343 = arith.constant 0 : index
    %c0_344 = arith.constant 0 : index
    %1565 = vector.load %arg1[%c0_341, %c1_342, %c0_343, %c0_344] : memref<1x8x64x128xf32, #tpu.memory_space<vmem>>, vector<1x1x64x128xf32>
    %1566 = vector.shape_cast %1565 : vector<1x1x64x128xf32> to vector<64x128xf32>
    %1567 = vector.shape_cast %1564 : vector<1x128xi1> to vector<1x128xi1>
    %1568 = vector.broadcast %1567 : vector<1x128xi1> to vector<64x128xi1>
    %1569 = arith.select %1568, %1566, %1562 : vector<64x128xi1>, vector<64x128xf32>
    %c2_i32_345 = arith.constant 2 : i32
    %1570 = vector.broadcast %c2_i32_345 : i32 to vector<1x128xi32>
    %1571 = arith.cmpi eq, %1392, %1570 : vector<1x128xi32>
    %c0_346 = arith.constant 0 : index
    %c2_347 = arith.constant 2 : index
    %c0_348 = arith.constant 0 : index
    %c0_349 = arith.constant 0 : index
    %1572 = vector.load %arg1[%c0_346, %c2_347, %c0_348, %c0_349] : memref<1x8x64x128xf32, #tpu.memory_space<vmem>>, vector<1x1x64x128xf32>
    %1573 = vector.shape_cast %1572 : vector<1x1x64x128xf32> to vector<64x128xf32>
    %1574 = vector.shape_cast %1571 : vector<1x128xi1> to vector<1x128xi1>
    %1575 = vector.broadcast %1574 : vector<1x128xi1> to vector<64x128xi1>
    %1576 = arith.select %1575, %1573, %1569 : vector<64x128xi1>, vector<64x128xf32>
    %c2_i32_350 = arith.constant 2 : i32
    %1577 = vector.broadcast %c2_i32_350 : i32 to vector<1x128xi32>
    %1578 = arith.cmpi eq, %1400, %1577 : vector<1x128xi32>
    %c0_351 = arith.constant 0 : index
    %c3_352 = arith.constant 3 : index
    %c0_353 = arith.constant 0 : index
    %c0_354 = arith.constant 0 : index
    %1579 = vector.load %arg1[%c0_351, %c3_352, %c0_353, %c0_354] : memref<1x8x64x128xf32, #tpu.memory_space<vmem>>, vector<1x1x64x128xf32>
    %1580 = vector.shape_cast %1579 : vector<1x1x64x128xf32> to vector<64x128xf32>
    %1581 = vector.shape_cast %1578 : vector<1x128xi1> to vector<1x128xi1>
    %1582 = vector.broadcast %1581 : vector<1x128xi1> to vector<64x128xi1>
    %1583 = arith.select %1582, %1580, %1576 : vector<64x128xi1>, vector<64x128xf32>
    %c2_i32_355 = arith.constant 2 : i32
    %1584 = vector.broadcast %c2_i32_355 : i32 to vector<1x128xi32>
    %1585 = arith.cmpi eq, %1408, %1584 : vector<1x128xi32>
    %c0_356 = arith.constant 0 : index
    %c4_357 = arith.constant 4 : index
    %c0_358 = arith.constant 0 : index
    %c0_359 = arith.constant 0 : index
    %1586 = vector.load %arg1[%c0_356, %c4_357, %c0_358, %c0_359] : memref<1x8x64x128xf32, #tpu.memory_space<vmem>>, vector<1x1x64x128xf32>
    %1587 = vector.shape_cast %1586 : vector<1x1x64x128xf32> to vector<64x128xf32>
    %1588 = vector.shape_cast %1585 : vector<1x128xi1> to vector<1x128xi1>
    %1589 = vector.broadcast %1588 : vector<1x128xi1> to vector<64x128xi1>
    %1590 = arith.select %1589, %1587, %1583 : vector<64x128xi1>, vector<64x128xf32>
    %c2_i32_360 = arith.constant 2 : i32
    %1591 = vector.broadcast %c2_i32_360 : i32 to vector<1x128xi32>
    %1592 = arith.cmpi eq, %1416, %1591 : vector<1x128xi32>
    %c0_361 = arith.constant 0 : index
    %c5_362 = arith.constant 5 : index
    %c0_363 = arith.constant 0 : index
    %c0_364 = arith.constant 0 : index
    %1593 = vector.load %arg1[%c0_361, %c5_362, %c0_363, %c0_364] : memref<1x8x64x128xf32, #tpu.memory_space<vmem>>, vector<1x1x64x128xf32>
    %1594 = vector.shape_cast %1593 : vector<1x1x64x128xf32> to vector<64x128xf32>
    %1595 = vector.shape_cast %1592 : vector<1x128xi1> to vector<1x128xi1>
    %1596 = vector.broadcast %1595 : vector<1x128xi1> to vector<64x128xi1>
    %1597 = arith.select %1596, %1594, %1590 : vector<64x128xi1>, vector<64x128xf32>
    %c2_i32_365 = arith.constant 2 : i32
    %1598 = vector.broadcast %c2_i32_365 : i32 to vector<1x128xi32>
    %1599 = arith.cmpi eq, %1424, %1598 : vector<1x128xi32>
    %c0_366 = arith.constant 0 : index
    %c6_367 = arith.constant 6 : index
    %c0_368 = arith.constant 0 : index
    %c0_369 = arith.constant 0 : index
    %1600 = vector.load %arg1[%c0_366, %c6_367, %c0_368, %c0_369] : memref<1x8x64x128xf32, #tpu.memory_space<vmem>>, vector<1x1x64x128xf32>
    %1601 = vector.shape_cast %1600 : vector<1x1x64x128xf32> to vector<64x128xf32>
    %1602 = vector.shape_cast %1599 : vector<1x128xi1> to vector<1x128xi1>
    %1603 = vector.broadcast %1602 : vector<1x128xi1> to vector<64x128xi1>
    %1604 = arith.select %1603, %1601, %1597 : vector<64x128xi1>, vector<64x128xf32>
    %c2_i32_370 = arith.constant 2 : i32
    %1605 = vector.broadcast %c2_i32_370 : i32 to vector<1x128xi32>
    %1606 = arith.cmpi eq, %1432, %1605 : vector<1x128xi32>
    %c0_371 = arith.constant 0 : index
    %c7_372 = arith.constant 7 : index
    %c0_373 = arith.constant 0 : index
    %c0_374 = arith.constant 0 : index
    %1607 = vector.load %arg1[%c0_371, %c7_372, %c0_373, %c0_374] : memref<1x8x64x128xf32, #tpu.memory_space<vmem>>, vector<1x1x64x128xf32>
    %1608 = vector.shape_cast %1607 : vector<1x1x64x128xf32> to vector<64x128xf32>
    %1609 = vector.shape_cast %1606 : vector<1x128xi1> to vector<1x128xi1>
    %1610 = vector.broadcast %1609 : vector<1x128xi1> to vector<64x128xi1>
    %1611 = arith.select %1610, %1608, %1604 : vector<64x128xi1>, vector<64x128xf32>
    %c0_375 = arith.constant 0 : index
    %c2_376 = arith.constant 2 : index
    %c0_377 = arith.constant 0 : index
    %c0_378 = arith.constant 0 : index
    %1612 = vector.load %arg6[%c0_375, %c2_376, %c0_377, %c0_378] : memref<1x8x64x128xf32, #tpu.memory_space<vmem>>, vector<1x1x64x128xf32>
    %1613 = vector.shape_cast %1612 : vector<1x1x64x128xf32> to vector<64x128xf32>
    %1614 = vector.shape_cast %1611 : vector<64x128xf32> to vector<1x1x64x128xf32>
    tpu.vector_store %arg6[%c0_375, %c2_376, %c0_377, %c0_378], %1614 {strides = array<i32>} : memref<1x8x64x128xf32, #tpu.memory_space<vmem>>, vector<1x1x64x128xf32>,
    %c3_i32 = arith.constant 3 : i32
    %1615 = vector.broadcast %c3_i32 : i32 to vector<1x128xi32>
    %1616 = arith.cmpi eq, %1376, %1615 : vector<1x128xi32>
    %c0_379 = arith.constant 0 : index
    %c0_380 = arith.constant 0 : index
    %c0_381 = arith.constant 0 : index
    %c0_382 = arith.constant 0 : index
    %1617 = vector.load %arg1[%c0_379, %c0_380, %c0_381, %c0_382] : memref<1x8x64x128xf32, #tpu.memory_space<vmem>>, vector<1x1x64x128xf32>
    %1618 = vector.shape_cast %1617 : vector<1x1x64x128xf32> to vector<64x128xf32>
    %1619 = vector.shape_cast %1616 : vector<1x128xi1> to vector<1x128xi1>
    %1620 = vector.broadcast %1619 : vector<1x128xi1> to vector<64x128xi1>
    %1621 = arith.select %1620, %1618, %1437 : vector<64x128xi1>, vector<64x128xf32>
    %c3_i32_383 = arith.constant 3 : i32
    %1622 = vector.broadcast %c3_i32_383 : i32 to vector<1x128xi32>
    %1623 = arith.cmpi eq, %1384, %1622 : vector<1x128xi32>
    %c0_384 = arith.constant 0 : index
    %c1_385 = arith.constant 1 : index
    %c0_386 = arith.constant 0 : index
    %c0_387 = arith.constant 0 : index
    %1624 = vector.load %arg1[%c0_384, %c1_385, %c0_386, %c0_387] : memref<1x8x64x128xf32, #tpu.memory_space<vmem>>, vector<1x1x64x128xf32>
    %1625 = vector.shape_cast %1624 : vector<1x1x64x128xf32> to vector<64x128xf32>
    %1626 = vector.shape_cast %1623 : vector<1x128xi1> to vector<1x128xi1>
    %1627 = vector.broadcast %1626 : vector<1x128xi1> to vector<64x128xi1>
    %1628 = arith.select %1627, %1625, %1621 : vector<64x128xi1>, vector<64x128xf32>
    %c3_i32_388 = arith.constant 3 : i32
    %1629 = vector.broadcast %c3_i32_388 : i32 to vector<1x128xi32>
    %1630 = arith.cmpi eq, %1392, %1629 : vector<1x128xi32>
    %c0_389 = arith.constant 0 : index
    %c2_390 = arith.constant 2 : index
    %c0_391 = arith.constant 0 : index
    %c0_392 = arith.constant 0 : index
    %1631 = vector.load %arg1[%c0_389, %c2_390, %c0_391, %c0_392] : memref<1x8x64x128xf32, #tpu.memory_space<vmem>>, vector<1x1x64x128xf32>
    %1632 = vector.shape_cast %1631 : vector<1x1x64x128xf32> to vector<64x128xf32>
    %1633 = vector.shape_cast %1630 : vector<1x128xi1> to vector<1x128xi1>
    %1634 = vector.broadcast %1633 : vector<1x128xi1> to vector<64x128xi1>
    %1635 = arith.select %1634, %1632, %1628 : vector<64x128xi1>, vector<64x128xf32>
    %c3_i32_393 = arith.constant 3 : i32
    %1636 = vector.broadcast %c3_i32_393 : i32 to vector<1x128xi32>
    %1637 = arith.cmpi eq, %1400, %1636 : vector<1x128xi32>
    %c0_394 = arith.constant 0 : index
    %c3_395 = arith.constant 3 : index
    %c0_396 = arith.constant 0 : index
    %c0_397 = arith.constant 0 : index
    %1638 = vector.load %arg1[%c0_394, %c3_395, %c0_396, %c0_397] : memref<1x8x64x128xf32, #tpu.memory_space<vmem>>, vector<1x1x64x128xf32>
    %1639 = vector.shape_cast %1638 : vector<1x1x64x128xf32> to vector<64x128xf32>
    %1640 = vector.shape_cast %1637 : vector<1x128xi1> to vector<1x128xi1>
    %1641 = vector.broadcast %1640 : vector<1x128xi1> to vector<64x128xi1>
    %1642 = arith.select %1641, %1639, %1635 : vector<64x128xi1>, vector<64x128xf32>
    %c3_i32_398 = arith.constant 3 : i32
    %1643 = vector.broadcast %c3_i32_398 : i32 to vector<1x128xi32>
    %1644 = arith.cmpi eq, %1408, %1643 : vector<1x128xi32>
    %c0_399 = arith.constant 0 : index
    %c4_400 = arith.constant 4 : index
    %c0_401 = arith.constant 0 : index
    %c0_402 = arith.constant 0 : index
    %1645 = vector.load %arg1[%c0_399, %c4_400, %c0_401, %c0_402] : memref<1x8x64x128xf32, #tpu.memory_space<vmem>>, vector<1x1x64x128xf32>
    %1646 = vector.shape_cast %1645 : vector<1x1x64x128xf32> to vector<64x128xf32>
    %1647 = vector.shape_cast %1644 : vector<1x128xi1> to vector<1x128xi1>
    %1648 = vector.broadcast %1647 : vector<1x128xi1> to vector<64x128xi1>
    %1649 = arith.select %1648, %1646, %1642 : vector<64x128xi1>, vector<64x128xf32>
    %c3_i32_403 = arith.constant 3 : i32
    %1650 = vector.broadcast %c3_i32_403 : i32 to vector<1x128xi32>
    %1651 = arith.cmpi eq, %1416, %1650 : vector<1x128xi32>
    %c0_404 = arith.constant 0 : index
    %c5_405 = arith.constant 5 : index
    %c0_406 = arith.constant 0 : index
    %c0_407 = arith.constant 0 : index
    %1652 = vector.load %arg1[%c0_404, %c5_405, %c0_406, %c0_407] : memref<1x8x64x128xf32, #tpu.memory_space<vmem>>, vector<1x1x64x128xf32>
    %1653 = vector.shape_cast %1652 : vector<1x1x64x128xf32> to vector<64x128xf32>
    %1654 = vector.shape_cast %1651 : vector<1x128xi1> to vector<1x128xi1>
    %1655 = vector.broadcast %1654 : vector<1x128xi1> to vector<64x128xi1>
    %1656 = arith.select %1655, %1653, %1649 : vector<64x128xi1>, vector<64x128xf32>
    %c3_i32_408 = arith.constant 3 : i32
    %1657 = vector.broadcast %c3_i32_408 : i32 to vector<1x128xi32>
    %1658 = arith.cmpi eq, %1424, %1657 : vector<1x128xi32>
    %c0_409 = arith.constant 0 : index
    %c6_410 = arith.constant 6 : index
    %c0_411 = arith.constant 0 : index
    %c0_412 = arith.constant 0 : index
    %1659 = vector.load %arg1[%c0_409, %c6_410, %c0_411, %c0_412] : memref<1x8x64x128xf32, #tpu.memory_space<vmem>>, vector<1x1x64x128xf32>
    %1660 = vector.shape_cast %1659 : vector<1x1x64x128xf32> to vector<64x128xf32>
    %1661 = vector.shape_cast %1658 : vector<1x128xi1> to vector<1x128xi1>
    %1662 = vector.broadcast %1661 : vector<1x128xi1> to vector<64x128xi1>
    %1663 = arith.select %1662, %1660, %1656 : vector<64x128xi1>, vector<64x128xf32>
    %c3_i32_413 = arith.constant 3 : i32
    %1664 = vector.broadcast %c3_i32_413 : i32 to vector<1x128xi32>
    %1665 = arith.cmpi eq, %1432, %1664 : vector<1x128xi32>
    %c0_414 = arith.constant 0 : index
    %c7_415 = arith.constant 7 : index
    %c0_416 = arith.constant 0 : index
    %c0_417 = arith.constant 0 : index
    %1666 = vector.load %arg1[%c0_414, %c7_415, %c0_416, %c0_417] : memref<1x8x64x128xf32, #tpu.memory_space<vmem>>, vector<1x1x64x128xf32>
    %1667 = vector.shape_cast %1666 : vector<1x1x64x128xf32> to vector<64x128xf32>
    %1668 = vector.shape_cast %1665 : vector<1x128xi1> to vector<1x128xi1>
    %1669 = vector.broadcast %1668 : vector<1x128xi1> to vector<64x128xi1>
    %1670 = arith.select %1669, %1667, %1663 : vector<64x128xi1>, vector<64x128xf32>
    %c0_418 = arith.constant 0 : index
    %c3_419 = arith.constant 3 : index
    %c0_420 = arith.constant 0 : index
    %c0_421 = arith.constant 0 : index
    %1671 = vector.load %arg6[%c0_418, %c3_419, %c0_420, %c0_421] : memref<1x8x64x128xf32, #tpu.memory_space<vmem>>, vector<1x1x64x128xf32>
    %1672 = vector.shape_cast %1671 : vector<1x1x64x128xf32> to vector<64x128xf32>
    %1673 = vector.shape_cast %1670 : vector<64x128xf32> to vector<1x1x64x128xf32>
    tpu.vector_store %arg6[%c0_418, %c3_419, %c0_420, %c0_421], %1673 {strides = array<i32>} : memref<1x8x64x128xf32, #tpu.memory_space<vmem>>, vector<1x1x64x128xf32>,
    %c4_i32 = arith.constant 4 : i32
    %1674 = vector.broadcast %c4_i32 : i32 to vector<1x128xi32>
    %1675 = arith.cmpi eq, %1376, %1674 : vector<1x128xi32>
    %c0_422 = arith.constant 0 : index
    %c0_423 = arith.constant 0 : index
    %c0_424 = arith.constant 0 : index
    %c0_425 = arith.constant 0 : index
    %1676 = vector.load %arg1[%c0_422, %c0_423, %c0_424, %c0_425] : memref<1x8x64x128xf32, #tpu.memory_space<vmem>>, vector<1x1x64x128xf32>
    %1677 = vector.shape_cast %1676 : vector<1x1x64x128xf32> to vector<64x128xf32>
    %1678 = vector.shape_cast %1675 : vector<1x128xi1> to vector<1x128xi1>
    %1679 = vector.broadcast %1678 : vector<1x128xi1> to vector<64x128xi1>
    %1680 = arith.select %1679, %1677, %1437 : vector<64x128xi1>, vector<64x128xf32>
    %c4_i32_426 = arith.constant 4 : i32
    %1681 = vector.broadcast %c4_i32_426 : i32 to vector<1x128xi32>
    %1682 = arith.cmpi eq, %1384, %1681 : vector<1x128xi32>
    %c0_427 = arith.constant 0 : index
    %c1_428 = arith.constant 1 : index
    %c0_429 = arith.constant 0 : index
    %c0_430 = arith.constant 0 : index
    %1683 = vector.load %arg1[%c0_427, %c1_428, %c0_429, %c0_430] : memref<1x8x64x128xf32, #tpu.memory_space<vmem>>, vector<1x1x64x128xf32>
    %1684 = vector.shape_cast %1683 : vector<1x1x64x128xf32> to vector<64x128xf32>
    %1685 = vector.shape_cast %1682 : vector<1x128xi1> to vector<1x128xi1>
    %1686 = vector.broadcast %1685 : vector<1x128xi1> to vector<64x128xi1>
    %1687 = arith.select %1686, %1684, %1680 : vector<64x128xi1>, vector<64x128xf32>
    %c4_i32_431 = arith.constant 4 : i32
    %1688 = vector.broadcast %c4_i32_431 : i32 to vector<1x128xi32>
    %1689 = arith.cmpi eq, %1392, %1688 : vector<1x128xi32>
    %c0_432 = arith.constant 0 : index
    %c2_433 = arith.constant 2 : index
    %c0_434 = arith.constant 0 : index
    %c0_435 = arith.constant 0 : index
    %1690 = vector.load %arg1[%c0_432, %c2_433, %c0_434, %c0_435] : memref<1x8x64x128xf32, #tpu.memory_space<vmem>>, vector<1x1x64x128xf32>
    %1691 = vector.shape_cast %1690 : vector<1x1x64x128xf32> to vector<64x128xf32>
    %1692 = vector.shape_cast %1689 : vector<1x128xi1> to vector<1x128xi1>
    %1693 = vector.broadcast %1692 : vector<1x128xi1> to vector<64x128xi1>
    %1694 = arith.select %1693, %1691, %1687 : vector<64x128xi1>, vector<64x128xf32>
    %c4_i32_436 = arith.constant 4 : i32
    %1695 = vector.broadcast %c4_i32_436 : i32 to vector<1x128xi32>
    %1696 = arith.cmpi eq, %1400, %1695 : vector<1x128xi32>
    %c0_437 = arith.constant 0 : index
    %c3_438 = arith.constant 3 : index
    %c0_439 = arith.constant 0 : index
    %c0_440 = arith.constant 0 : index
    %1697 = vector.load %arg1[%c0_437, %c3_438, %c0_439, %c0_440] : memref<1x8x64x128xf32, #tpu.memory_space<vmem>>, vector<1x1x64x128xf32>
    %1698 = vector.shape_cast %1697 : vector<1x1x64x128xf32> to vector<64x128xf32>
    %1699 = vector.shape_cast %1696 : vector<1x128xi1> to vector<1x128xi1>
    %1700 = vector.broadcast %1699 : vector<1x128xi1> to vector<64x128xi1>
    %1701 = arith.select %1700, %1698, %1694 : vector<64x128xi1>, vector<64x128xf32>
    %c4_i32_441 = arith.constant 4 : i32
    %1702 = vector.broadcast %c4_i32_441 : i32 to vector<1x128xi32>
    %1703 = arith.cmpi eq, %1408, %1702 : vector<1x128xi32>
    %c0_442 = arith.constant 0 : index
    %c4_443 = arith.constant 4 : index
    %c0_444 = arith.constant 0 : index
    %c0_445 = arith.constant 0 : index
    %1704 = vector.load %arg1[%c0_442, %c4_443, %c0_444, %c0_445] : memref<1x8x64x128xf32, #tpu.memory_space<vmem>>, vector<1x1x64x128xf32>
    %1705 = vector.shape_cast %1704 : vector<1x1x64x128xf32> to vector<64x128xf32>
    %1706 = vector.shape_cast %1703 : vector<1x128xi1> to vector<1x128xi1>
    %1707 = vector.broadcast %1706 : vector<1x128xi1> to vector<64x128xi1>
    %1708 = arith.select %1707, %1705, %1701 : vector<64x128xi1>, vector<64x128xf32>
    %c4_i32_446 = arith.constant 4 : i32
    %1709 = vector.broadcast %c4_i32_446 : i32 to vector<1x128xi32>
    %1710 = arith.cmpi eq, %1416, %1709 : vector<1x128xi32>
    %c0_447 = arith.constant 0 : index
    %c5_448 = arith.constant 5 : index
    %c0_449 = arith.constant 0 : index
    %c0_450 = arith.constant 0 : index
    %1711 = vector.load %arg1[%c0_447, %c5_448, %c0_449, %c0_450] : memref<1x8x64x128xf32, #tpu.memory_space<vmem>>, vector<1x1x64x128xf32>
    %1712 = vector.shape_cast %1711 : vector<1x1x64x128xf32> to vector<64x128xf32>
    %1713 = vector.shape_cast %1710 : vector<1x128xi1> to vector<1x128xi1>
    %1714 = vector.broadcast %1713 : vector<1x128xi1> to vector<64x128xi1>
    %1715 = arith.select %1714, %1712, %1708 : vector<64x128xi1>, vector<64x128xf32>
    %c4_i32_451 = arith.constant 4 : i32
    %1716 = vector.broadcast %c4_i32_451 : i32 to vector<1x128xi32>
    %1717 = arith.cmpi eq, %1424, %1716 : vector<1x128xi32>
    %c0_452 = arith.constant 0 : index
    %c6_453 = arith.constant 6 : index
    %c0_454 = arith.constant 0 : index
    %c0_455 = arith.constant 0 : index
    %1718 = vector.load %arg1[%c0_452, %c6_453, %c0_454, %c0_455] : memref<1x8x64x128xf32, #tpu.memory_space<vmem>>, vector<1x1x64x128xf32>
    %1719 = vector.shape_cast %1718 : vector<1x1x64x128xf32> to vector<64x128xf32>
    %1720 = vector.shape_cast %1717 : vector<1x128xi1> to vector<1x128xi1>
    %1721 = vector.broadcast %1720 : vector<1x128xi1> to vector<64x128xi1>
    %1722 = arith.select %1721, %1719, %1715 : vector<64x128xi1>, vector<64x128xf32>
    %c4_i32_456 = arith.constant 4 : i32
    %1723 = vector.broadcast %c4_i32_456 : i32 to vector<1x128xi32>
    %1724 = arith.cmpi eq, %1432, %1723 : vector<1x128xi32>
    %c0_457 = arith.constant 0 : index
    %c7_458 = arith.constant 7 : index
    %c0_459 = arith.constant 0 : index
    %c0_460 = arith.constant 0 : index
    %1725 = vector.load %arg1[%c0_457, %c7_458, %c0_459, %c0_460] : memref<1x8x64x128xf32, #tpu.memory_space<vmem>>, vector<1x1x64x128xf32>
    %1726 = vector.shape_cast %1725 : vector<1x1x64x128xf32> to vector<64x128xf32>
    %1727 = vector.shape_cast %1724 : vector<1x128xi1> to vector<1x128xi1>
    %1728 = vector.broadcast %1727 : vector<1x128xi1> to vector<64x128xi1>
    %1729 = arith.select %1728, %1726, %1722 : vector<64x128xi1>, vector<64x128xf32>
    %c0_461 = arith.constant 0 : index
    %c4_462 = arith.constant 4 : index
    %c0_463 = arith.constant 0 : index
    %c0_464 = arith.constant 0 : index
    %1730 = vector.load %arg6[%c0_461, %c4_462, %c0_463, %c0_464] : memref<1x8x64x128xf32, #tpu.memory_space<vmem>>, vector<1x1x64x128xf32>
    %1731 = vector.shape_cast %1730 : vector<1x1x64x128xf32> to vector<64x128xf32>
    %1732 = vector.shape_cast %1729 : vector<64x128xf32> to vector<1x1x64x128xf32>
    tpu.vector_store %arg6[%c0_461, %c4_462, %c0_463, %c0_464], %1732 {strides = array<i32>} : memref<1x8x64x128xf32, #tpu.memory_space<vmem>>, vector<1x1x64x128xf32>,
    %c5_i32 = arith.constant 5 : i32
    %1733 = vector.broadcast %c5_i32 : i32 to vector<1x128xi32>
    %1734 = arith.cmpi eq, %1376, %1733 : vector<1x128xi32>
    %c0_465 = arith.constant 0 : index
    %c0_466 = arith.constant 0 : index
    %c0_467 = arith.constant 0 : index
    %c0_468 = arith.constant 0 : index
    %1735 = vector.load %arg1[%c0_465, %c0_466, %c0_467, %c0_468] : memref<1x8x64x128xf32, #tpu.memory_space<vmem>>, vector<1x1x64x128xf32>
    %1736 = vector.shape_cast %1735 : vector<1x1x64x128xf32> to vector<64x128xf32>
    %1737 = vector.shape_cast %1734 : vector<1x128xi1> to vector<1x128xi1>
    %1738 = vector.broadcast %1737 : vector<1x128xi1> to vector<64x128xi1>
    %1739 = arith.select %1738, %1736, %1437 : vector<64x128xi1>, vector<64x128xf32>
    %c5_i32_469 = arith.constant 5 : i32
    %1740 = vector.broadcast %c5_i32_469 : i32 to vector<1x128xi32>
    %1741 = arith.cmpi eq, %1384, %1740 : vector<1x128xi32>
    %c0_470 = arith.constant 0 : index
    %c1_471 = arith.constant 1 : index
    %c0_472 = arith.constant 0 : index
    %c0_473 = arith.constant 0 : index
    %1742 = vector.load %arg1[%c0_470, %c1_471, %c0_472, %c0_473] : memref<1x8x64x128xf32, #tpu.memory_space<vmem>>, vector<1x1x64x128xf32>
    %1743 = vector.shape_cast %1742 : vector<1x1x64x128xf32> to vector<64x128xf32>
    %1744 = vector.shape_cast %1741 : vector<1x128xi1> to vector<1x128xi1>
    %1745 = vector.broadcast %1744 : vector<1x128xi1> to vector<64x128xi1>
    %1746 = arith.select %1745, %1743, %1739 : vector<64x128xi1>, vector<64x128xf32>
    %c5_i32_474 = arith.constant 5 : i32
    %1747 = vector.broadcast %c5_i32_474 : i32 to vector<1x128xi32>
    %1748 = arith.cmpi eq, %1392, %1747 : vector<1x128xi32>
    %c0_475 = arith.constant 0 : index
    %c2_476 = arith.constant 2 : index
    %c0_477 = arith.constant 0 : index
    %c0_478 = arith.constant 0 : index
    %1749 = vector.load %arg1[%c0_475, %c2_476, %c0_477, %c0_478] : memref<1x8x64x128xf32, #tpu.memory_space<vmem>>, vector<1x1x64x128xf32>
    %1750 = vector.shape_cast %1749 : vector<1x1x64x128xf32> to vector<64x128xf32>
    %1751 = vector.shape_cast %1748 : vector<1x128xi1> to vector<1x128xi1>
    %1752 = vector.broadcast %1751 : vector<1x128xi1> to vector<64x128xi1>
    %1753 = arith.select %1752, %1750, %1746 : vector<64x128xi1>, vector<64x128xf32>
    %c5_i32_479 = arith.constant 5 : i32
    %1754 = vector.broadcast %c5_i32_479 : i32 to vector<1x128xi32>
    %1755 = arith.cmpi eq, %1400, %1754 : vector<1x128xi32>
    %c0_480 = arith.constant 0 : index
    %c3_481 = arith.constant 3 : index
    %c0_482 = arith.constant 0 : index
    %c0_483 = arith.constant 0 : index
    %1756 = vector.load %arg1[%c0_480, %c3_481, %c0_482, %c0_483] : memref<1x8x64x128xf32, #tpu.memory_space<vmem>>, vector<1x1x64x128xf32>
    %1757 = vector.shape_cast %1756 : vector<1x1x64x128xf32> to vector<64x128xf32>
    %1758 = vector.shape_cast %1755 : vector<1x128xi1> to vector<1x128xi1>
    %1759 = vector.broadcast %1758 : vector<1x128xi1> to vector<64x128xi1>
    %1760 = arith.select %1759, %1757, %1753 : vector<64x128xi1>, vector<64x128xf32>
    %c5_i32_484 = arith.constant 5 : i32
    %1761 = vector.broadcast %c5_i32_484 : i32 to vector<1x128xi32>
    %1762 = arith.cmpi eq, %1408, %1761 : vector<1x128xi32>
    %c0_485 = arith.constant 0 : index
    %c4_486 = arith.constant 4 : index
    %c0_487 = arith.constant 0 : index
    %c0_488 = arith.constant 0 : index
    %1763 = vector.load %arg1[%c0_485, %c4_486, %c0_487, %c0_488] : memref<1x8x64x128xf32, #tpu.memory_space<vmem>>, vector<1x1x64x128xf32>
    %1764 = vector.shape_cast %1763 : vector<1x1x64x128xf32> to vector<64x128xf32>
    %1765 = vector.shape_cast %1762 : vector<1x128xi1> to vector<1x128xi1>
    %1766 = vector.broadcast %1765 : vector<1x128xi1> to vector<64x128xi1>
    %1767 = arith.select %1766, %1764, %1760 : vector<64x128xi1>, vector<64x128xf32>
    %c5_i32_489 = arith.constant 5 : i32
    %1768 = vector.broadcast %c5_i32_489 : i32 to vector<1x128xi32>
    %1769 = arith.cmpi eq, %1416, %1768 : vector<1x128xi32>
    %c0_490 = arith.constant 0 : index
    %c5_491 = arith.constant 5 : index
    %c0_492 = arith.constant 0 : index
    %c0_493 = arith.constant 0 : index
    %1770 = vector.load %arg1[%c0_490, %c5_491, %c0_492, %c0_493] : memref<1x8x64x128xf32, #tpu.memory_space<vmem>>, vector<1x1x64x128xf32>
    %1771 = vector.shape_cast %1770 : vector<1x1x64x128xf32> to vector<64x128xf32>
    %1772 = vector.shape_cast %1769 : vector<1x128xi1> to vector<1x128xi1>
    %1773 = vector.broadcast %1772 : vector<1x128xi1> to vector<64x128xi1>
    %1774 = arith.select %1773, %1771, %1767 : vector<64x128xi1>, vector<64x128xf32>
    %c5_i32_494 = arith.constant 5 : i32
    %1775 = vector.broadcast %c5_i32_494 : i32 to vector<1x128xi32>
    %1776 = arith.cmpi eq, %1424, %1775 : vector<1x128xi32>
    %c0_495 = arith.constant 0 : index
    %c6_496 = arith.constant 6 : index
    %c0_497 = arith.constant 0 : index
    %c0_498 = arith.constant 0 : index
    %1777 = vector.load %arg1[%c0_495, %c6_496, %c0_497, %c0_498] : memref<1x8x64x128xf32, #tpu.memory_space<vmem>>, vector<1x1x64x128xf32>
    %1778 = vector.shape_cast %1777 : vector<1x1x64x128xf32> to vector<64x128xf32>
    %1779 = vector.shape_cast %1776 : vector<1x128xi1> to vector<1x128xi1>
    %1780 = vector.broadcast %1779 : vector<1x128xi1> to vector<64x128xi1>
    %1781 = arith.select %1780, %1778, %1774 : vector<64x128xi1>, vector<64x128xf32>
    %c5_i32_499 = arith.constant 5 : i32
    %1782 = vector.broadcast %c5_i32_499 : i32 to vector<1x128xi32>
    %1783 = arith.cmpi eq, %1432, %1782 : vector<1x128xi32>
    %c0_500 = arith.constant 0 : index
    %c7_501 = arith.constant 7 : index
    %c0_502 = arith.constant 0 : index
    %c0_503 = arith.constant 0 : index
    %1784 = vector.load %arg1[%c0_500, %c7_501, %c0_502, %c0_503] : memref<1x8x64x128xf32, #tpu.memory_space<vmem>>, vector<1x1x64x128xf32>
    %1785 = vector.shape_cast %1784 : vector<1x1x64x128xf32> to vector<64x128xf32>
    %1786 = vector.shape_cast %1783 : vector<1x128xi1> to vector<1x128xi1>
    %1787 = vector.broadcast %1786 : vector<1x128xi1> to vector<64x128xi1>
    %1788 = arith.select %1787, %1785, %1781 : vector<64x128xi1>, vector<64x128xf32>
    %c0_504 = arith.constant 0 : index
    %c5_505 = arith.constant 5 : index
    %c0_506 = arith.constant 0 : index
    %c0_507 = arith.constant 0 : index
    %1789 = vector.load %arg6[%c0_504, %c5_505, %c0_506, %c0_507] : memref<1x8x64x128xf32, #tpu.memory_space<vmem>>, vector<1x1x64x128xf32>
    %1790 = vector.shape_cast %1789 : vector<1x1x64x128xf32> to vector<64x128xf32>
    %1791 = vector.shape_cast %1788 : vector<64x128xf32> to vector<1x1x64x128xf32>
    tpu.vector_store %arg6[%c0_504, %c5_505, %c0_506, %c0_507], %1791 {strides = array<i32>} : memref<1x8x64x128xf32, #tpu.memory_space<vmem>>, vector<1x1x64x128xf32>,
    %c6_i32 = arith.constant 6 : i32
    %1792 = vector.broadcast %c6_i32 : i32 to vector<1x128xi32>
    %1793 = arith.cmpi eq, %1376, %1792 : vector<1x128xi32>
    %c0_508 = arith.constant 0 : index
    %c0_509 = arith.constant 0 : index
    %c0_510 = arith.constant 0 : index
    %c0_511 = arith.constant 0 : index
    %1794 = vector.load %arg1[%c0_508, %c0_509, %c0_510, %c0_511] : memref<1x8x64x128xf32, #tpu.memory_space<vmem>>, vector<1x1x64x128xf32>
    %1795 = vector.shape_cast %1794 : vector<1x1x64x128xf32> to vector<64x128xf32>
    %1796 = vector.shape_cast %1793 : vector<1x128xi1> to vector<1x128xi1>
    %1797 = vector.broadcast %1796 : vector<1x128xi1> to vector<64x128xi1>
    %1798 = arith.select %1797, %1795, %1437 : vector<64x128xi1>, vector<64x128xf32>
    %c6_i32_512 = arith.constant 6 : i32
    %1799 = vector.broadcast %c6_i32_512 : i32 to vector<1x128xi32>
    %1800 = arith.cmpi eq, %1384, %1799 : vector<1x128xi32>
    %c0_513 = arith.constant 0 : index
    %c1_514 = arith.constant 1 : index
    %c0_515 = arith.constant 0 : index
    %c0_516 = arith.constant 0 : index
    %1801 = vector.load %arg1[%c0_513, %c1_514, %c0_515, %c0_516] : memref<1x8x64x128xf32, #tpu.memory_space<vmem>>, vector<1x1x64x128xf32>
    %1802 = vector.shape_cast %1801 : vector<1x1x64x128xf32> to vector<64x128xf32>
    %1803 = vector.shape_cast %1800 : vector<1x128xi1> to vector<1x128xi1>
    %1804 = vector.broadcast %1803 : vector<1x128xi1> to vector<64x128xi1>
    %1805 = arith.select %1804, %1802, %1798 : vector<64x128xi1>, vector<64x128xf32>
    %c6_i32_517 = arith.constant 6 : i32
    %1806 = vector.broadcast %c6_i32_517 : i32 to vector<1x128xi32>
    %1807 = arith.cmpi eq, %1392, %1806 : vector<1x128xi32>
    %c0_518 = arith.constant 0 : index
    %c2_519 = arith.constant 2 : index
    %c0_520 = arith.constant 0 : index
    %c0_521 = arith.constant 0 : index
    %1808 = vector.load %arg1[%c0_518, %c2_519, %c0_520, %c0_521] : memref<1x8x64x128xf32, #tpu.memory_space<vmem>>, vector<1x1x64x128xf32>
    %1809 = vector.shape_cast %1808 : vector<1x1x64x128xf32> to vector<64x128xf32>
    %1810 = vector.shape_cast %1807 : vector<1x128xi1> to vector<1x128xi1>
    %1811 = vector.broadcast %1810 : vector<1x128xi1> to vector<64x128xi1>
    %1812 = arith.select %1811, %1809, %1805 : vector<64x128xi1>, vector<64x128xf32>
    %c6_i32_522 = arith.constant 6 : i32
    %1813 = vector.broadcast %c6_i32_522 : i32 to vector<1x128xi32>
    %1814 = arith.cmpi eq, %1400, %1813 : vector<1x128xi32>
    %c0_523 = arith.constant 0 : index
    %c3_524 = arith.constant 3 : index
    %c0_525 = arith.constant 0 : index
    %c0_526 = arith.constant 0 : index
    %1815 = vector.load %arg1[%c0_523, %c3_524, %c0_525, %c0_526] : memref<1x8x64x128xf32, #tpu.memory_space<vmem>>, vector<1x1x64x128xf32>
    %1816 = vector.shape_cast %1815 : vector<1x1x64x128xf32> to vector<64x128xf32>
    %1817 = vector.shape_cast %1814 : vector<1x128xi1> to vector<1x128xi1>
    %1818 = vector.broadcast %1817 : vector<1x128xi1> to vector<64x128xi1>
    %1819 = arith.select %1818, %1816, %1812 : vector<64x128xi1>, vector<64x128xf32>
    %c6_i32_527 = arith.constant 6 : i32
    %1820 = vector.broadcast %c6_i32_527 : i32 to vector<1x128xi32>
    %1821 = arith.cmpi eq, %1408, %1820 : vector<1x128xi32>
    %c0_528 = arith.constant 0 : index
    %c4_529 = arith.constant 4 : index
    %c0_530 = arith.constant 0 : index
    %c0_531 = arith.constant 0 : index
    %1822 = vector.load %arg1[%c0_528, %c4_529, %c0_530, %c0_531] : memref<1x8x64x128xf32, #tpu.memory_space<vmem>>, vector<1x1x64x128xf32>
    %1823 = vector.shape_cast %1822 : vector<1x1x64x128xf32> to vector<64x128xf32>
    %1824 = vector.shape_cast %1821 : vector<1x128xi1> to vector<1x128xi1>
    %1825 = vector.broadcast %1824 : vector<1x128xi1> to vector<64x128xi1>
    %1826 = arith.select %1825, %1823, %1819 : vector<64x128xi1>, vector<64x128xf32>
    %c6_i32_532 = arith.constant 6 : i32
    %1827 = vector.broadcast %c6_i32_532 : i32 to vector<1x128xi32>
    %1828 = arith.cmpi eq, %1416, %1827 : vector<1x128xi32>
    %c0_533 = arith.constant 0 : index
    %c5_534 = arith.constant 5 : index
    %c0_535 = arith.constant 0 : index
    %c0_536 = arith.constant 0 : index
    %1829 = vector.load %arg1[%c0_533, %c5_534, %c0_535, %c0_536] : memref<1x8x64x128xf32, #tpu.memory_space<vmem>>, vector<1x1x64x128xf32>
    %1830 = vector.shape_cast %1829 : vector<1x1x64x128xf32> to vector<64x128xf32>
    %1831 = vector.shape_cast %1828 : vector<1x128xi1> to vector<1x128xi1>
    %1832 = vector.broadcast %1831 : vector<1x128xi1> to vector<64x128xi1>
    %1833 = arith.select %1832, %1830, %1826 : vector<64x128xi1>, vector<64x128xf32>
    %c6_i32_537 = arith.constant 6 : i32
    %1834 = vector.broadcast %c6_i32_537 : i32 to vector<1x128xi32>
    %1835 = arith.cmpi eq, %1424, %1834 : vector<1x128xi32>
    %c0_538 = arith.constant 0 : index
    %c6_539 = arith.constant 6 : index
    %c0_540 = arith.constant 0 : index
    %c0_541 = arith.constant 0 : index
    %1836 = vector.load %arg1[%c0_538, %c6_539, %c0_540, %c0_541] : memref<1x8x64x128xf32, #tpu.memory_space<vmem>>, vector<1x1x64x128xf32>
    %1837 = vector.shape_cast %1836 : vector<1x1x64x128xf32> to vector<64x128xf32>
    %1838 = vector.shape_cast %1835 : vector<1x128xi1> to vector<1x128xi1>
    %1839 = vector.broadcast %1838 : vector<1x128xi1> to vector<64x128xi1>
    %1840 = arith.select %1839, %1837, %1833 : vector<64x128xi1>, vector<64x128xf32>
    %c6_i32_542 = arith.constant 6 : i32
    %1841 = vector.broadcast %c6_i32_542 : i32 to vector<1x128xi32>
    %1842 = arith.cmpi eq, %1432, %1841 : vector<1x128xi32>
    %c0_543 = arith.constant 0 : index
    %c7_544 = arith.constant 7 : index
    %c0_545 = arith.constant 0 : index
    %c0_546 = arith.constant 0 : index
    %1843 = vector.load %arg1[%c0_543, %c7_544, %c0_545, %c0_546] : memref<1x8x64x128xf32, #tpu.memory_space<vmem>>, vector<1x1x64x128xf32>
    %1844 = vector.shape_cast %1843 : vector<1x1x64x128xf32> to vector<64x128xf32>
    %1845 = vector.shape_cast %1842 : vector<1x128xi1> to vector<1x128xi1>
    %1846 = vector.broadcast %1845 : vector<1x128xi1> to vector<64x128xi1>
    %1847 = arith.select %1846, %1844, %1840 : vector<64x128xi1>, vector<64x128xf32>
    %c0_547 = arith.constant 0 : index
    %c6_548 = arith.constant 6 : index
    %c0_549 = arith.constant 0 : index
    %c0_550 = arith.constant 0 : index
    %1848 = vector.load %arg6[%c0_547, %c6_548, %c0_549, %c0_550] : memref<1x8x64x128xf32, #tpu.memory_space<vmem>>, vector<1x1x64x128xf32>
    %1849 = vector.shape_cast %1848 : vector<1x1x64x128xf32> to vector<64x128xf32>
    %1850 = vector.shape_cast %1847 : vector<64x128xf32> to vector<1x1x64x128xf32>
    tpu.vector_store %arg6[%c0_547, %c6_548, %c0_549, %c0_550], %1850 {strides = array<i32>} : memref<1x8x64x128xf32, #tpu.memory_space<vmem>>, vector<1x1x64x128xf32>,
    %c7_i32 = arith.constant 7 : i32
    %1851 = vector.broadcast %c7_i32 : i32 to vector<1x128xi32>
    %1852 = arith.cmpi eq, %1376, %1851 : vector<1x128xi32>
    %c0_551 = arith.constant 0 : index
    %c0_552 = arith.constant 0 : index
    %c0_553 = arith.constant 0 : index
    %c0_554 = arith.constant 0 : index
    %1853 = vector.load %arg1[%c0_551, %c0_552, %c0_553, %c0_554] : memref<1x8x64x128xf32, #tpu.memory_space<vmem>>, vector<1x1x64x128xf32>
    %1854 = vector.shape_cast %1853 : vector<1x1x64x128xf32> to vector<64x128xf32>
    %1855 = vector.shape_cast %1852 : vector<1x128xi1> to vector<1x128xi1>
    %1856 = vector.broadcast %1855 : vector<1x128xi1> to vector<64x128xi1>
    %1857 = arith.select %1856, %1854, %1437 : vector<64x128xi1>, vector<64x128xf32>
    %c7_i32_555 = arith.constant 7 : i32
    %1858 = vector.broadcast %c7_i32_555 : i32 to vector<1x128xi32>
    %1859 = arith.cmpi eq, %1384, %1858 : vector<1x128xi32>
    %c0_556 = arith.constant 0 : index
    %c1_557 = arith.constant 1 : index
    %c0_558 = arith.constant 0 : index
    %c0_559 = arith.constant 0 : index
    %1860 = vector.load %arg1[%c0_556, %c1_557, %c0_558, %c0_559] : memref<1x8x64x128xf32, #tpu.memory_space<vmem>>, vector<1x1x64x128xf32>
    %1861 = vector.shape_cast %1860 : vector<1x1x64x128xf32> to vector<64x128xf32>
    %1862 = vector.shape_cast %1859 : vector<1x128xi1> to vector<1x128xi1>
    %1863 = vector.broadcast %1862 : vector<1x128xi1> to vector<64x128xi1>
    %1864 = arith.select %1863, %1861, %1857 : vector<64x128xi1>, vector<64x128xf32>
    %c7_i32_560 = arith.constant 7 : i32
    %1865 = vector.broadcast %c7_i32_560 : i32 to vector<1x128xi32>
    %1866 = arith.cmpi eq, %1392, %1865 : vector<1x128xi32>
    %c0_561 = arith.constant 0 : index
    %c2_562 = arith.constant 2 : index
    %c0_563 = arith.constant 0 : index
    %c0_564 = arith.constant 0 : index
    %1867 = vector.load %arg1[%c0_561, %c2_562, %c0_563, %c0_564] : memref<1x8x64x128xf32, #tpu.memory_space<vmem>>, vector<1x1x64x128xf32>
    %1868 = vector.shape_cast %1867 : vector<1x1x64x128xf32> to vector<64x128xf32>
    %1869 = vector.shape_cast %1866 : vector<1x128xi1> to vector<1x128xi1>
    %1870 = vector.broadcast %1869 : vector<1x128xi1> to vector<64x128xi1>
    %1871 = arith.select %1870, %1868, %1864 : vector<64x128xi1>, vector<64x128xf32>
    %c7_i32_565 = arith.constant 7 : i32
    %1872 = vector.broadcast %c7_i32_565 : i32 to vector<1x128xi32>
    %1873 = arith.cmpi eq, %1400, %1872 : vector<1x128xi32>
    %c0_566 = arith.constant 0 : index
    %c3_567 = arith.constant 3 : index
    %c0_568 = arith.constant 0 : index
    %c0_569 = arith.constant 0 : index
    %1874 = vector.load %arg1[%c0_566, %c3_567, %c0_568, %c0_569] : memref<1x8x64x128xf32, #tpu.memory_space<vmem>>, vector<1x1x64x128xf32>
    %1875 = vector.shape_cast %1874 : vector<1x1x64x128xf32> to vector<64x128xf32>
    %1876 = vector.shape_cast %1873 : vector<1x128xi1> to vector<1x128xi1>
    %1877 = vector.broadcast %1876 : vector<1x128xi1> to vector<64x128xi1>
    %1878 = arith.select %1877, %1875, %1871 : vector<64x128xi1>, vector<64x128xf32>
    %c7_i32_570 = arith.constant 7 : i32
    %1879 = vector.broadcast %c7_i32_570 : i32 to vector<1x128xi32>
    %1880 = arith.cmpi eq, %1408, %1879 : vector<1x128xi32>
    %c0_571 = arith.constant 0 : index
    %c4_572 = arith.constant 4 : index
    %c0_573 = arith.constant 0 : index
    %c0_574 = arith.constant 0 : index
    %1881 = vector.load %arg1[%c0_571, %c4_572, %c0_573, %c0_574] : memref<1x8x64x128xf32, #tpu.memory_space<vmem>>, vector<1x1x64x128xf32>
    %1882 = vector.shape_cast %1881 : vector<1x1x64x128xf32> to vector<64x128xf32>
    %1883 = vector.shape_cast %1880 : vector<1x128xi1> to vector<1x128xi1>
    %1884 = vector.broadcast %1883 : vector<1x128xi1> to vector<64x128xi1>
    %1885 = arith.select %1884, %1882, %1878 : vector<64x128xi1>, vector<64x128xf32>
    %c7_i32_575 = arith.constant 7 : i32
    %1886 = vector.broadcast %c7_i32_575 : i32 to vector<1x128xi32>
    %1887 = arith.cmpi eq, %1416, %1886 : vector<1x128xi32>
    %c0_576 = arith.constant 0 : index
    %c5_577 = arith.constant 5 : index
    %c0_578 = arith.constant 0 : index
    %c0_579 = arith.constant 0 : index
    %1888 = vector.load %arg1[%c0_576, %c5_577, %c0_578, %c0_579] : memref<1x8x64x128xf32, #tpu.memory_space<vmem>>, vector<1x1x64x128xf32>
    %1889 = vector.shape_cast %1888 : vector<1x1x64x128xf32> to vector<64x128xf32>
    %1890 = vector.shape_cast %1887 : vector<1x128xi1> to vector<1x128xi1>
    %1891 = vector.broadcast %1890 : vector<1x128xi1> to vector<64x128xi1>
    %1892 = arith.select %1891, %1889, %1885 : vector<64x128xi1>, vector<64x128xf32>
    %c7_i32_580 = arith.constant 7 : i32
    %1893 = vector.broadcast %c7_i32_580 : i32 to vector<1x128xi32>
    %1894 = arith.cmpi eq, %1424, %1893 : vector<1x128xi32>
    %c0_581 = arith.constant 0 : index
    %c6_582 = arith.constant 6 : index
    %c0_583 = arith.constant 0 : index
    %c0_584 = arith.constant 0 : index
    %1895 = vector.load %arg1[%c0_581, %c6_582, %c0_583, %c0_584] : memref<1x8x64x128xf32, #tpu.memory_space<vmem>>, vector<1x1x64x128xf32>
    %1896 = vector.shape_cast %1895 : vector<1x1x64x128xf32> to vector<64x128xf32>
    %1897 = vector.shape_cast %1894 : vector<1x128xi1> to vector<1x128xi1>
    %1898 = vector.broadcast %1897 : vector<1x128xi1> to vector<64x128xi1>
    %1899 = arith.select %1898, %1896, %1892 : vector<64x128xi1>, vector<64x128xf32>
    %c7_i32_585 = arith.constant 7 : i32
    %1900 = vector.broadcast %c7_i32_585 : i32 to vector<1x128xi32>
    %1901 = arith.cmpi eq, %1432, %1900 : vector<1x128xi32>
    %c0_586 = arith.constant 0 : index
    %c7_587 = arith.constant 7 : index
    %c0_588 = arith.constant 0 : index
    %c0_589 = arith.constant 0 : index
    %1902 = vector.load %arg1[%c0_586, %c7_587, %c0_588, %c0_589] : memref<1x8x64x128xf32, #tpu.memory_space<vmem>>, vector<1x1x64x128xf32>
    %1903 = vector.shape_cast %1902 : vector<1x1x64x128xf32> to vector<64x128xf32>
    %1904 = vector.shape_cast %1901 : vector<1x128xi1> to vector<1x128xi1>
    %1905 = vector.broadcast %1904 : vector<1x128xi1> to vector<64x128xi1>
    %1906 = arith.select %1905, %1903, %1899 : vector<64x128xi1>, vector<64x128xf32>
    %c0_590 = arith.constant 0 : index
    %c7_591 = arith.constant 7 : index
    %c0_592 = arith.constant 0 : index
    %c0_593 = arith.constant 0 : index
    %1907 = vector.load %arg6[%c0_590, %c7_591, %c0_592, %c0_593] : memref<1x8x64x128xf32, #tpu.memory_space<vmem>>, vector<1x1x64x128xf32>
    %1908 = vector.shape_cast %1907 : vector<1x1x64x128xf32> to vector<64x128xf32>
    %1909 = vector.shape_cast %1906 : vector<64x128xf32> to vector<1x1x64x128xf32>
    tpu.vector_store %arg6[%c0_590, %c7_591, %c0_592, %c0_593], %1909 {strides = array<i32>} : memref<1x8x64x128xf32, #tpu.memory_space<vmem>>, vector<1x1x64x128xf32>,
    return
  }
  func.func @transform_0(%arg0: i32) -> (i32, i32, i32, i32) {
    %c0_i32 = arith.constant 0 : i32
    %c0_i32_0 = arith.constant 0 : i32
    %c0_i32_1 = arith.constant 0 : i32
    %c0_i32_2 = arith.constant 0 : i32
    return %arg0, %c0_i32, %c0_i32_0, %c0_i32_1 : i32, i32, i32, i32
  }
  func.func @transform_1(%arg0: i32) -> (i32, i32) {
    %c0_i32 = arith.constant 0 : i32
    %c0_i32_0 = arith.constant 0 : i32
    %c0_i32_1 = arith.constant 0 : i32
    return %c0_i32, %c0_i32_0 : i32, i32
  }
  func.func @transform_2(%arg0: i32) -> (i32, i32) {
    %c0_i32 = arith.constant 0 : i32
    %c0_i32_0 = arith.constant 0 : i32
    %c0_i32_1 = arith.constant 0 : i32
    return %c0_i32, %c0_i32_0 : i32, i32
  }
  func.func @transform_3(%arg0: i32) -> (i32, i32) {
    %c0_i32 = arith.constant 0 : i32
    %c0_i32_0 = arith.constant 0 : i32
    %c0_i32_1 = arith.constant 0 : i32
    return %c0_i32, %c0_i32_0 : i32, i32
  }
  func.func @transform_4(%arg0: i32) -> (i32, i32) {
    %c0_i32 = arith.constant 0 : i32
    %c0_i32_0 = arith.constant 0 : i32
    %c0_i32_1 = arith.constant 0 : i32
    return %c0_i32, %c0_i32_0 : i32, i32
  }
  func.func @transform_5(%arg0: i32) -> (i32, i32, i32, i32) {
    %c0_i32 = arith.constant 0 : i32
    %c0_i32_0 = arith.constant 0 : i32
    %c0_i32_1 = arith.constant 0 : i32
    %c0_i32_2 = arith.constant 0 : i32
    return %arg0, %c0_i32, %c0_i32_0, %c0_i32_1 : i32, i32, i32, i32
  }
  func.func @transform_6(%arg0: i32) -> (i32, i32, i32) {
    %c0_i32 = arith.constant 0 : i32
    %c0_i32_0 = arith.constant 0 : i32
    %c0_i32_1 = arith.constant 0 : i32
    return %arg0, %c0_i32, %c0_i32_0 : i32, i32, i32
  }
}

</mosaic_0001>

<bundles_post_ra>
// kernel: _lambda_.1
= control target key start
LH: loop header
LB: loop body
LE: loop exit
PB: predicated region body
PF: predicated region fallthrough
CT: control target
= control target key end

     0   :  { %12 = vsyncpa [#allocation3], 0  ;;  %s10724_s0 = inlined_call_operand.vmem [shape: f32[2,8,64,128], index: 0, kind: input, shape index: {}]   ;;  %s10725_s1 = inlined_call_operand.vmem [shape: f32[64,32], index: 1, kind: input, shape index: {}]   ;;  %s10726_s2 = inlined_call_operand.vmem [shape: f32[64,1], index: 2, kind: input, shape index: {}]   ;;  %s10727_s3 = inlined_call_operand.vmem [shape: f32[8,64], index: 3, kind: input, shape index: {}]   ;;  %s10728_s4 = inlined_call_operand.vmem [shape: f32[8,1], index: 4, kind: input, shape index: {}]   ;;  %s10729_s5 = inlined_call_operand.vmem [shape: f32[2,8,64,128], index: 5, kind: output, shape index: {0}]   ;;  %s10730_s6 = inlined_call_operand.hbm [shape: s32[2,8,128], index: 6, kind: output, shape index: {1}]  }
   0x1   :  { %14 = vsyncpa [#allocation3 + $0x1], 0  ;;  %s7330_s21 = smov 0   ;;  %s7332_s22 = smov 0  }
   0x2   :  { %s7334_s23 = smov 0   ;;  %s7336_s24 = smov 0  }
   0x3 LB: > { %s7351_s25 = sadd.s32 4294967295, %s7288_s24   ;;  %s5422_s26 = sadd.s32 4294967294, %s7288_s24   ;;  %s7288_s24 = sphi %s7336_s24, %s11076_s24   ;;  %s7284_s23 = sphi %s7334_s23, %s11075_s23   ;;  %s7280_s22 = sphi %s7332_s22, %s11074_s22   ;;  %s7276_s21 = sphi %s7330_s21, %s11073_s21  }
   0x4   : > { %s7355_s27 = sadd.s32 1, %s7288_s24   ;;  %s163_s28 = sadd.s32 1, %s7284_s23 }
   0x5   : > { %s160_s29 = ssub.s32 %s7288_s24, %s7355_s27  ;;  %p173_p0 = scmp.ne.s32.totalorder %s7284_s23, %s7280_s22 }
   0x6   : > { %p161_p1 = scmp.eq.s32.totalorder %s160_s29, 0  ;;  %p174_p2 = scmp.eq.s32.totalorder %s7351_s25, 1 }
   0x7   : > { %p179_p3 = scmp.ne.s32.totalorder %s7280_s22, %s7276_s21  ;;  %p180_p4 = scmp.eq.s32.totalorder %s5422_s26, 1 }
   0x8   : > { %s7366_s30 = scalar_select %p161_p1, %s7284_s23, %s163_s28  }
   0x9   : > { %p7368_p5 = por %p174_p2, %p173_p0  ;;  %p7372_p6 = por %p180_p4, %p179_p3 }
   0xa   : > { %p5425_p7 = scmp.ge.s32.totalorder %s7288_s24, 1  ;;  %p218_p8 = scmp.lt.s32.totalorder %s7288_s24, 3 }
   0xc   : > { %p219_p9 = pnand %p5425_p7, %p218_p8 }
   0xe   : > { %222 = sbr.rel (%p219_p9) target bundleno = 1936 (0x790), region = 40 }
  0x15   : > { %p253_p10 = scmp.lt.s32.totalorder %s7351_s25, 1  ;;  %v7382_v0 = vld [vmem:[%s10725_s1] sm:$0xff]  ;;  %vm330_vm0 = vcmask 261120   ;;  %v7290_v1 = vmov 0   ;;  %v274_v3 = vld [vmem:[%s10726_s2 + $0x10] sm:$0xff]  ;;  %v273_v4 = vld [vmem:[%s10726_s2 + $0x8] sm:$0xff] }
  0x16   : > { %6217 = vmatprep.mubr.msk.f32.mxu0 %vm330_vm0, %v7382_v0  ;;  %6724 = vset.pattern.permute.xlu0 %v7290_v1  ;;  %v272_v2 = vld [vmem:[%s10726_s2] sm:$0xff]  ;;  %v275_v5 = vld [vmem:[%s10726_s2 + $0x18] sm:$0xff]  ;;  %v277_v15 = vld [vmem:[%s10726_s2 + $0x28] sm:$0xff]  ;;  %v7291_v63 = vmov 0.0|0.0   ;;  %vm7292_vm1 = vmmov 0   ;;  %vm468_vm2 = vcmask 523264  }
  0x17   : > { %s7387_s11 = scalar_select %p253_p10, %s7351_s25, 1  ;;  %6725 = vset.pattern.permute.xlu1 %v7290_v1  ;;  %282 = vperm.xlu0 %6724, %v272_v2   ;;  %v276_v14 = vld [vmem:[%s10726_s2 + $0x20] sm:$0xff]  ;;  %v278_v19 = vld [vmem:[%s10726_s2 + $0x30] sm:$0xff]  ;;  %v279_v20 = vld [vmem:[%s10726_s2 + $0x38] sm:$0xff]  ;;  %vm4014_vm15 = vcmask 1040384  }
  0x18   : > { %292 = vperm.xlu1 %6725, %v274_v3   ;;  %v7432_v21 = vld [vmem:[%s10725_s1 + $0x8] sm:$0xff]  ;;  %v7437_v22 = vld [vmem:[%s10725_s1 + $0x10] sm:$0xff]  ;;  %v320_v26 = vld [vmem:[%s10728_s4] sm:$0xff]  ;;  %6529 = vmatprep.subr.bf16.mxu1 %v7291_v63  ;;  %s250_s12 = sand.u32 1, %s7280_s22   ;;  %s7294_s9 = smov [#allocation2]  }
  0x19   : > { %s6039_s16 = sshll.u32 %s7387_s11, 9  ;;  %v7451_v27 = vld [vmem:[%s10725_s1 + $0x18] sm:$0xff]  ;;  %v7456_v28 = vld [vmem:[%s10725_s1 + $0x20] sm:$0xff]  ;;  %v7465_v30 = vld [vmem:[%s10725_s1 + $0x28] sm:$0xff]  ;;  %s8845_s13 = sshll.u32 %s250_s12, 3 }
  0x1a   : > { %s7404_s26 = scalar_lea.vmem %s10724_s0, %s6039_s16  ;;  %v7470_v31 = vld [vmem:[%s10725_s1 + $0x30] sm:$0xff]  ;;  %v7479_v32 = vld [vmem:[%s10725_s1 + $0x38] sm:$0xff]  ;;  %s252_s14 = scalar_lea.vmem [#allocation2], %s8845_s13 }
  0x1b   : > { %v326_v6 = vld [vmem:[%s7404_s26] sm:$0xff]  ;;  %v327_v7 = vld [vmem:[%s7404_s26 + $0x8] sm:$0xff]  ;;  %v328_v8 = vld [vmem:[%s7404_s26 + $0x10] sm:$0xff]  ;;  %287 = vperm.xlu0 %6724, %v273_v4   ;;  %v7293_v4 = vmov 0.0   ;;  %s9152_s18 = scalar_lea.vmem %s10729_s5, %s6039_s16  ;;  %s6036_s11 = sshll.u32 %s7351_s25, 7 }
  0x1c   : > { %v6521_v9 = vpack.c.bf16 %v327_v7, %v326_v6  ;;  %v329_v10 = vld [vmem:[%s7404_s26 + $0x18] sm:$0xff]  ;;  %v5440_v12 = vld [vmem:[%s7404_s26 + $0x40] sm:$0xff]  ;;  %v5441_v13 = vld [vmem:[%s7404_s26 + $0x48] sm:$0xff]  ;;  %297 = vperm.xlu1 %6725, %v275_v5   ;;  %6245 = vmatprep.mubr.msk.f32.mxu1 %vm7292_vm1, %v7293_v4  ;;  %s9219_s19 = scalar_lea.hbm %s10730_s6, %s6036_s11  ;;  %s5338_s20 = sshll.u32 %s252_s14, 4  ;;  %s9239_s20 = int_to_ptr.vmem [resolvable:$true] %s5338_s20 }
  0x1d   : > { %v6525_v11 = vpack.c.bf16 %v329_v10, %v328_v8  ;;  %v6541_v16 = vpack.c.bf16 %v5441_v13, %v5440_v12  ;;  %v5442_v17 = vld [vmem:[%s7404_s26 + $0x50] sm:$0xff]  ;;  %v5443_v18 = vld [vmem:[%s7404_s26 + $0x58] sm:$0xff]  ;;  %v5453_v24 = vld [vmem:[%s7404_s26 + $0x80] sm:$0xff]  ;;  %s5322_s28 = scalar_lea.sflag [#allocation3], %s250_s12  ;;  %s7226_s29 = scalar_lea.vmem %s9239_s20, 128 }
  0x1e   : > { %6522 = vmatprep.subr.bf16.mxu0 %v6521_v9  ;;  %v6545_v23 = vpack.c.bf16 %v5443_v18, %v5442_v17  ;;  %v5454_v25 = vld [vmem:[%s7404_s26 + $0x88] sm:$0xff]  ;;  %v5455_v33 = vld [vmem:[%s7404_s26 + $0x90] sm:$0xff]  ;;  %v5456_v34 = vld [vmem:[%s7404_s26 + $0x98] sm:$0xff]  ;;  %p7227_p11 = scmp.ne.s32.totalorder %s9239_s20, %s7226_s29  ;;  %s7230_s10 = sshll.u32 %s7294_s9, 4  ;;  %s7231_s10 = int_to_ptr.vmem [resolvable:$false] %s7230_s10 }
  0x1f   : > { %6524 = vmatpush3.bf16.msra.mxu0 %v6521_v9  ;;  %302 = vperm.xlu0 %6724, %v276_v14   ;;  %v6561_v29 = vpack.c.bf16 %v5454_v25, %v5453_v24  ;;  %v6565_v35 = vpack.c.bf16 %v5456_v34, %v5455_v33  ;;  %v5466_v36 = vld [vmem:[%s7404_s26 + $0xc0] sm:$0xff]  ;;  %v5467_v37 = vld [vmem:[%s7404_s26 + $0xc8] sm:$0xff]  ;;  %v5468_v39 = vld [vmem:[%s7404_s26 + $0xd0] sm:$0xff]  ;;  %s7232_s13 = scalar_lea.vmem %s7231_s10, 256  ;;  %p7233_p0 = scmp.lt.s32.totalorder %s9239_s20, %s7231_s10 }
  0x20   : > { %6526 = vmatprep.subr.bf16.mxu0 %v6525_v11  ;;  %307 = vperm.xlu1 %6725, %v277_v15   ;;  %v6581_v38 = vpack.c.bf16 %v5467_v37, %v5466_v36  ;;  %v5469_v40 = vld [vmem:[%s7404_s26 + $0xd8] sm:$0xff]  ;;  %v5479_v42 = vld [vmem:[%s7404_s26 + $0x100] sm:$0xff]  ;;  %v5480_v43 = vld [vmem:[%s7404_s26 + $0x108] sm:$0xff]  ;;  %p7228_p12 = pnand %p7227_p11, %p7368_p5  ;;  %p7234_p1 = scmp.lt.s32.totalorder %s7232_s13, %s7226_s29 }
  0x21   : > { %v6585_v41 = vpack.c.bf16 %v5469_v40, %v5468_v39  ;;  %v6601_v44 = vpack.c.bf16 %v5480_v43, %v5479_v42  ;;  %v5481_v45 = vld [vmem:[%s7404_s26 + $0x110] sm:$0xff]  ;;  %v5482_v46 = vld [vmem:[%s7404_s26 + $0x118] sm:$0xff]  ;;  %v5492_v48 = vld [vmem:[%s7404_s26 + $0x140] sm:$0xff] }
  0x22   : > { %v6605_v47 = vpack.c.bf16 %v5482_v46, %v5481_v45  ;;  %v5493_v49 = vld [vmem:[%s7404_s26 + $0x148] sm:$0xff]  ;;  %v5494_v51 = vld [vmem:[%s7404_s26 + $0x150] sm:$0xff]  ;;  %v5495_v52 = vld [vmem:[%s7404_s26 + $0x158] sm:$0xff]  ;;  %p7229_p13 = pneg %p7228_p12  ;;  %p7235_p2 = por %p7234_p1, %p7233_p0 }
  0x23   : > { %6528 = vmatpush3.bf16.msra.mxu0 %v6525_v11  ;;  %312 = vperm.xlu0 %6724, %v278_v19   ;;  %v6621_v50 = vpack.c.bf16 %v5493_v49, %v5492_v48  ;;  %v6625_v53 = vpack.c.bf16 %v5495_v52, %v5494_v51  ;;  %v5505_v54 = vld [vmem:[%s7404_s26 + $0x180] sm:$0xff]  ;;  %v5506_v55 = vld [vmem:[%s7404_s26 + $0x188] sm:$0xff]  ;;  %v5507_v57 = vld [vmem:[%s7404_s26 + $0x190] sm:$0xff] }
  0x24   : > { %6542 = vmatprep.subr.bf16.mxu0 %v6541_v16  ;;  %317 = vperm.xlu1 %6725, %v279_v20   ;;  %v6641_v56 = vpack.c.bf16 %v5506_v55, %v5505_v54  ;;  %v5508_v58 = vld [vmem:[%s7404_s26 + $0x198] sm:$0xff]  ;;  %v5518_v60 = vld [vmem:[%s7404_s26 + $0x1c0] sm:$0xff]  ;;  %v5519_v61 = vld [vmem:[%s7404_s26 + $0x1c8] sm:$0xff]  ;;  %p7236_p3 = pnand %p7235_p2, %p7229_p13 }
  0x25   : > { %v6645_v59 = vpack.c.bf16 %v5508_v58, %v5507_v57  ;;  %v6661_v62 = vpack.c.bf16 %v5519_v61, %v5518_v60  ;;  %v5520_v1 = vld [vmem:[%s7404_s26 + $0x1d0] sm:$0xff]  ;;  %v5521_v2 = vld [vmem:[%s7404_s26 + $0x1d8] sm:$0xff] }
  0x26   : > { %6218 = vmatmul.mubr.msk.f32.vlgmr.msra.gmra.mrb[0].mxu0 %vm330_vm0, %v7432_v21  ;;  %v6665_v3 = vpack.c.bf16 %v5521_v2, %v5520_v1 }
  0x27   : > { %6544 = vmatpush3.bf16.msra.mxu0 %v6541_v16  ;;  %6220 = vmatprep.mubr.msk.f32.mxu0 %vm330_vm0, %v7437_v22 }
  0x28   : > { %6546 = vmatprep.subr.bf16.mxu0 %v6545_v23  ;;  %323 = vperm.xlu0 %6724, %v320_v26  }
  0x2a   : > { %6221 = vmatmul.mubr.msk.f32.gmra.mrb[2].mxu0 %vm330_vm0, %v7451_v27 }
  0x2b   : > { %6223 = vmatprep.mubr.msk.f32.mxu0 %vm330_vm0, %v7456_v28  ;;  %6548 = vmatpush3.bf16.msra.mxu0 %v6545_v23 }
  0x2c   : > { %6562 = vmatprep.subr.bf16.mxu0 %v6561_v29 }
  0x2e   : > { %6224 = vmatmul.mubr.msk.f32.gmra.mrb[4].mxu0 %vm330_vm0, %v7465_v30 }
  0x2f   : > { %6226 = vmatprep.mubr.msk.f32.mxu0 %vm330_vm0, %v7470_v31 }
  0x32   : > { %6227 = vmatmul.mubr.msk.f32.gmra.mrb[6].mxu0 %vm330_vm0, %v7479_v32 }
  0x33   : > { %6256 = vmatprep.mubr.msk.f32.mxu0 %vm330_vm0, %v7382_v0 }
  0x36   : > { %6257 = vmatmul.mubr.msk.f32.vlgmr.msra.gmra.mrb[8].mxu0 %vm330_vm0, %v7432_v21 }
  0x37   : > { %6564 = vmatpush3.bf16.msra.mxu0 %v6561_v29  ;;  %6259 = vmatprep.mubr.msk.f32.mxu0 %vm330_vm0, %v7437_v22 }
  0x38   : > { %6566 = vmatprep.subr.bf16.mxu0 %v6565_v35 }
  0x3a   : > { %6260 = vmatmul.mubr.msk.f32.gmra.mrb[10].mxu0 %vm330_vm0, %v7451_v27 }
  0x3b   : > { %6262 = vmatprep.mubr.msk.f32.mxu0 %vm330_vm0, %v7456_v28  ;;  %6568 = vmatpush3.bf16.msra.mxu0 %v6565_v35 }
  0x3c   : > { %6582 = vmatprep.subr.bf16.mxu0 %v6581_v38 }
  0x3e   : > { %6263 = vmatmul.mubr.msk.f32.gmra.mrb[12].mxu0 %vm330_vm0, %v7465_v30 }
  0x3f   : > { %6265 = vmatprep.mubr.msk.f32.mxu0 %vm330_vm0, %v7470_v31 }
  0x42   : > { %6266 = vmatmul.mubr.msk.f32.gmra.mrb[14].mxu0 %vm330_vm0, %v7479_v32 }
  0x43   : > { %6295 = vmatprep.mubr.msk.f32.mxu0 %vm330_vm0, %v7382_v0 }
  0x46   : > { %6296 = vmatmul.mubr.msk.f32.vlgmr.msra.gmra.mrb[16].mxu0 %vm330_vm0, %v7432_v21 }
  0x47   : > { %6584 = vmatpush3.bf16.msra.mxu0 %v6581_v38  ;;  %6298 = vmatprep.mubr.msk.f32.mxu0 %vm330_vm0, %v7437_v22 }
  0x48   : > { %6586 = vmatprep.subr.bf16.mxu0 %v6585_v41 }
  0x4a   : > { %6299 = vmatmul.mubr.msk.f32.gmra.mrb[18].mxu0 %vm330_vm0, %v7451_v27 }
  0x4b   : > { %6301 = vmatprep.mubr.msk.f32.mxu0 %vm330_vm0, %v7456_v28  ;;  %6588 = vmatpush3.bf16.msra.mxu0 %v6585_v41 }
  0x4c   : > { %6602 = vmatprep.subr.bf16.mxu0 %v6601_v44 }
  0x4e   : > { %6302 = vmatmul.mubr.msk.f32.gmra.mrb[20].mxu0 %vm330_vm0, %v7465_v30 }
  0x4f   : > { %6304 = vmatprep.mubr.msk.f32.mxu0 %vm330_vm0, %v7470_v31 }
  0x52   : > { %6305 = vmatmul.mubr.msk.f32.gmra.mrb[22].mxu0 %vm330_vm0, %v7479_v32 }
  0x53   : > { %6334 = vmatprep.mubr.msk.f32.mxu0 %vm330_vm0, %v7382_v0 }
  0x56   : > { %6335 = vmatmul.mubr.msk.f32.vlgmr.msra.gmra.mrb[24].mxu0 %vm330_vm0, %v7432_v21 }
  0x57   : > { %6604 = vmatpush3.bf16.msra.mxu0 %v6601_v44  ;;  %6337 = vmatprep.mubr.msk.f32.mxu0 %vm330_vm0, %v7437_v22 }
  0x58   : > { %6606 = vmatprep.subr.bf16.mxu0 %v6605_v47 }
  0x5a   : > { %6338 = vmatmul.mubr.msk.f32.gmra.mrb[26].mxu0 %vm330_vm0, %v7451_v27 }
  0x5b   : > { %6340 = vmatprep.mubr.msk.f32.mxu0 %vm330_vm0, %v7456_v28  ;;  %6608 = vmatpush3.bf16.msra.mxu0 %v6605_v47  ;;  %v7652_v47 = vld [vmem:[%s10727_s3] sm:$0xff] }
  0x5c   : > { %6622 = vmatprep.subr.bf16.mxu0 %v6621_v50 }
  0x5e   : > { %6341 = vmatmul.mubr.msk.f32.gmra.mrb[28].mxu0 %vm330_vm0, %v7465_v30 }
  0x5f   : > { %6343 = vmatprep.mubr.msk.f32.mxu0 %vm330_vm0, %v7470_v31 }
  0x62   : > { %6344 = vmatmul.mubr.msk.f32.gmra.mrb[30].mxu0 %vm330_vm0, %v7479_v32 }
  0x63   : > { %6373 = vmatprep.mubr.msk.f32.mxu0 %vm330_vm0, %v7382_v0 }
  0x66   : > { %6374 = vmatmul.mubr.msk.f32.vlgmr.msra.gmra.mrb[32].mxu0 %vm330_vm0, %v7432_v21 }
  0x67   : > { %6624 = vmatpush3.bf16.msra.mxu0 %v6621_v50  ;;  %6376 = vmatprep.mubr.msk.f32.mxu0 %vm330_vm0, %v7437_v22 }
  0x68   : > { %6626 = vmatprep.subr.bf16.mxu0 %v6625_v53 }
  0x6a   : > { %6377 = vmatmul.mubr.msk.f32.gmra.mrb[34].mxu0 %vm330_vm0, %v7451_v27 }
  0x6b   : > { %6379 = vmatprep.mubr.msk.f32.mxu0 %vm330_vm0, %v7456_v28  ;;  %6628 = vmatpush3.bf16.msra.mxu0 %v6625_v53 }
  0x6c   : > { %6642 = vmatprep.subr.bf16.mxu0 %v6641_v56 }
  0x6e   : > { %6380 = vmatmul.mubr.msk.f32.gmra.mrb[36].mxu0 %vm330_vm0, %v7465_v30 }
  0x6f   : > { %6382 = vmatprep.mubr.msk.f32.mxu0 %vm330_vm0, %v7470_v31 }
  0x72   : > { %6383 = vmatmul.mubr.msk.f32.gmra.mrb[38].mxu0 %vm330_vm0, %v7479_v32 }
  0x73   : > { %6412 = vmatprep.mubr.msk.f32.mxu0 %vm330_vm0, %v7382_v0 }
  0x76   : > { %6413 = vmatmul.mubr.msk.f32.vlgmr.msra.gmra.mrb[40].mxu0 %vm330_vm0, %v7432_v21 }
  0x77   : > { %6644 = vmatpush3.bf16.msra.mxu0 %v6641_v56  ;;  %6415 = vmatprep.mubr.msk.f32.mxu0 %vm330_vm0, %v7437_v22 }
  0x78   : > { %6646 = vmatprep.subr.bf16.mxu0 %v6645_v59 }
  0x7a   : > { %6416 = vmatmul.mubr.msk.f32.gmra.mrb[42].mxu0 %vm330_vm0, %v7451_v27 }
  0x7b   : > { %6418 = vmatprep.mubr.msk.f32.mxu0 %vm330_vm0, %v7456_v28  ;;  %6648 = vmatpush3.bf16.msra.mxu0 %v6645_v59 }
  0x7c   : > { %6662 = vmatprep.subr.bf16.mxu0 %v6661_v62 }
  0x7e   : > { %6419 = vmatmul.mubr.msk.f32.gmra.mrb[44].mxu0 %vm330_vm0, %v7465_v30 }
  0x7f   : > { %6421 = vmatprep.mubr.msk.f32.mxu0 %vm330_vm0, %v7470_v31 }
  0x82   : > { %6422 = vmatmul.mubr.msk.f32.gmra.mrb[46].mxu0 %vm330_vm0, %v7479_v32 }
  0x83   : > { %6451 = vmatprep.mubr.msk.f32.mxu0 %vm330_vm0, %v7382_v0 }
  0x86   : > { %6452 = vmatmul.mubr.msk.f32.vlgmr.msra.gmra.mrb[48].mxu0 %vm330_vm0, %v7432_v21 }
  0x87   : > { %6664 = vmatpush3.bf16.msra.mxu0 %v6661_v62  ;;  %6454 = vmatprep.mubr.msk.f32.mxu0 %vm330_vm0, %v7437_v22 }
  0x88   : > { %6666 = vmatprep.subr.bf16.mxu0 %v6665_v3 }
  0x8a   : > { %6455 = vmatmul.mubr.msk.f32.gmra.mrb[50].mxu0 %vm330_vm0, %v7451_v27 }
  0x8b   : > { %6457 = vmatprep.mubr.msk.f32.mxu0 %vm330_vm0, %v7456_v28  ;;  %6668 = vmatpush3.bf16.msra.mxu0 %v6665_v3 }
  0x8e   : > { %6458 = vmatmul.mubr.msk.f32.gmra.mrb[52].mxu0 %vm330_vm0, %v7465_v30 }
  0x8f   : > { %6460 = vmatprep.mubr.msk.f32.mxu0 %vm330_vm0, %v7470_v31 }
  0x92   : > { %6461 = vmatmul.mubr.msk.f32.gmra.mrb[54].mxu0 %vm330_vm0, %v7479_v32 }
  0x93   : > { %6490 = vmatprep.mubr.msk.f32.mxu0 %vm330_vm0, %v7382_v0 }
  0x96   : > { %6491 = vmatmul.mubr.msk.f32.vlgmr.msra.gmra.mrb[56].mxu0 %vm330_vm0, %v7432_v21  ;;  %v7620_v0 = vpop.permute.xlu0 %282 }
  0x97   : > { %6493 = vmatprep.mubr.msk.f32.mxu0 %vm330_vm0, %v7437_v22  ;;  %v7622_v5 = vpop.permute.xlu1 %292 }
  0x9a   : > { %6494 = vmatmul.mubr.msk.f32.gmra.mrb[58].mxu0 %vm330_vm0, %v7451_v27  ;;  %v7624_v6 = vpop.permute.xlu0 %287 }
  0x9b   : > { %6496 = vmatprep.mubr.msk.f32.mxu0 %vm330_vm0, %v7456_v28  ;;  %v7626_v7 = vpop.permute.xlu1 %297 }
  0x9e   : > { %6497 = vmatmul.mubr.msk.f32.gmra.mrb[60].mxu0 %vm330_vm0, %v7465_v30  ;;  %v7634_v20 = vpop.permute.xlu0 %302 }
  0x9f   : > { %6499 = vmatprep.mubr.msk.f32.mxu0 %vm330_vm0, %v7470_v31  ;;  %v7631_v17 = vpop.permute.xlu1 %307 }
  0xa2   : > { %6500 = vmatmul.mubr.msk.f32.gmra.mrb[62].mxu0 %vm330_vm0, %v7479_v32  ;;  %v7641_v32 = vpop.permute.xlu0 %312 }
  0xa3   : > { %v7639_v29 = vpop.permute.xlu1 %317 }
  0xf9   : > { %v6219_v8 = vpop.f32.mrb[0].mxu0 }
  0xfa   : > { %v427_v9 = vadd.f32 %v6219_v8, %v7624_v6  ;;  %v421_v10 = vpop.f32.mrb[1].mxu0 }
  0xfb   : > { %v422_v11 = vadd.f32 %v421_v10, %v7620_v0 }
  0xfc   : > { %v461_v12 = vmax.f32 %v427_v9, 0.0 }
  0xfd   : > { %v460_v13 = vmax.f32 %v422_v11, 0.0  ;;  %v6222_v14 = vpop.f32.mrb[2].mxu0 }
  0xfe   : > { %v437_v15 = vadd.f32 %v6222_v14, %v7626_v7  ;;  %v431_v16 = vpop.f32.mrb[3].mxu0 }
  0xff   : > { %v432_v18 = vadd.f32 %v431_v16, %v7622_v5  ;;  %v6530_v19 = vpack.c.bf16 %v461_v12, %v460_v13 }
 0x100   : > { %v463_v21 = vmax.f32 %v437_v15, 0.0 }
 0x101   : > { %v462_v22 = vmax.f32 %v432_v18, 0.0  ;;  %v6225_v23 = vpop.f32.mrb[4].mxu0  ;;  %6531 = vmatpush3.bf16.msra.mxu1 %v6530_v19 }
 0x102   : > { %v447_v24 = vadd.f32 %v6225_v23, %v7631_v17  ;;  %v441_v25 = vpop.f32.mrb[5].mxu0  ;;  %6532 = vmatprep.subr.bf16.mxu1 %v7291_v63 }
 0x103   : > { %v6533_v26 = vpack.c.bf16 %v463_v21, %v462_v22  ;;  %v442_v27 = vadd.f32 %v441_v25, %v7634_v20 }
 0x104   : > { %v465_v28 = vmax.f32 %v447_v24, 0.0 }
 0x105   : > { %v464_v30 = vmax.f32 %v442_v27, 0.0  ;;  %v6228_v31 = vpop.f32.mrb[6].mxu0  ;;  %6534 = vmatpush3.bf16.msra.mxu1 %v6533_v26 }
 0x106   : > { %v457_v33 = vadd.f32 %v6228_v31, %v7639_v29  ;;  %v451_v34 = vpop.f32.mrb[7].mxu0  ;;  %6535 = vmatprep.subr.bf16.mxu1 %v7291_v63 }
 0x107   : > { %v6536_v35 = vpack.c.bf16 %v465_v28, %v464_v30  ;;  %v452_v36 = vadd.f32 %v451_v34, %v7641_v32 }
 0x108   : > { %v467_v37 = vmax.f32 %v457_v33, 0.0 }
 0x109   : > { %v466_v38 = vmax.f32 %v452_v36, 0.0  ;;  %6537 = vmatpush3.bf16.msra.mxu1 %v6536_v35  ;;  %v6258_v39 = vpop.f32.mrb[8].mxu0 }
 0x10a   : > { %v620_v40 = vadd.f32 %v6258_v39, %v7624_v6  ;;  %v614_v41 = vpop.f32.mrb[9].mxu0  ;;  %6538 = vmatprep.subr.bf16.mxu1 %v7291_v63 }
 0x10b   : > { %v6539_v42 = vpack.c.bf16 %v467_v37, %v466_v38  ;;  %v615_v43 = vadd.f32 %v614_v41, %v7620_v0 }
 0x10c   : > { %v654_v44 = vmax.f32 %v620_v40, 0.0 }
 0x10d   : > { %v653_v45 = vmax.f32 %v615_v43, 0.0  ;;  %6540 = vmatpush3.bf16.msra.mxu1 %v6539_v42  ;;  %v6261_v46 = vpop.f32.mrb[10].mxu0 }
 0x10e   : > { %v630_v48 = vadd.f32 %v6261_v46, %v7626_v7  ;;  %v624_v49 = vpop.f32.mrb[11].mxu0  ;;  %6549 = vmatprep.subr.bf16.mxu1 %v7291_v63 }
 0x10f   : > { %v6550_v50 = vpack.c.bf16 %v654_v44, %v653_v45  ;;  %v625_v51 = vadd.f32 %v624_v49, %v7622_v5 }
 0x110   : > { %v656_v52 = vmax.f32 %v630_v48, 0.0  ;;  %6246 = vmatmul.mubr.msk.f32.vlgmr.msra.gmra.mrb[0].mxu1 %vm468_vm2, %v7652_v47 }
 0x111   : > { %v655_v53 = vmax.f32 %v625_v51, 0.0  ;;  %v6264_v54 = vpop.f32.mrb[12].mxu0  ;;  %6551 = vmatpush3.bf16.msra.mxu1 %v6550_v50  ;;  %6284 = vmatprep.mubr.msk.f32.mxu1 %vm7292_vm1, %v7293_v4 }
 0x112   : > { %v640_v55 = vadd.f32 %v6264_v54, %v7631_v17  ;;  %v634_v56 = vpop.f32.mrb[13].mxu0  ;;  %6552 = vmatprep.subr.bf16.mxu1 %v7291_v63 }
 0x113   : > { %v6553_v57 = vpack.c.bf16 %v656_v52, %v655_v53  ;;  %v635_v58 = vadd.f32 %v634_v56, %v7634_v20 }
 0x114   : > { %v658_v59 = vmax.f32 %v640_v55, 0.0 }
 0x115   : > { %v657_v60 = vmax.f32 %v635_v58, 0.0  ;;  %v6267_v61 = vpop.f32.mrb[14].mxu0  ;;  %6554 = vmatpush3.bf16.msra.mxu1 %v6553_v57 }
 0x116   : > { %v650_v62 = vadd.f32 %v6267_v61, %v7639_v29  ;;  %v644_v1 = vpop.f32.mrb[15].mxu0  ;;  %6555 = vmatprep.subr.bf16.mxu1 %v7291_v63 }
 0x117   : > { %v6556_v2 = vpack.c.bf16 %v658_v59, %v657_v60  ;;  %v645_v3 = vadd.f32 %v644_v1, %v7641_v32 }
 0x118   : > { %v660_v8 = vmax.f32 %v650_v62, 0.0 }
 0x119   : > { %v659_v9 = vmax.f32 %v645_v3, 0.0  ;;  %6557 = vmatpush3.bf16.msra.mxu1 %v6556_v2  ;;  %v6297_v10 = vpop.f32.mrb[16].mxu0 }
 0x11a   : > { %v809_v11 = vadd.f32 %v6297_v10, %v7624_v6  ;;  %v803_v12 = vpop.f32.mrb[17].mxu0  ;;  %6558 = vmatprep.subr.bf16.mxu1 %v7291_v63 }
 0x11b   : > { %v6559_v13 = vpack.c.bf16 %v660_v8, %v659_v9  ;;  %v804_v14 = vadd.f32 %v803_v12, %v7620_v0 }
 0x11c   : > { %v843_v15 = vmax.f32 %v809_v11, 0.0 }
 0x11d   : > { %v842_v16 = vmax.f32 %v804_v14, 0.0  ;;  %6560 = vmatpush3.bf16.msra.mxu1 %v6559_v13  ;;  %v6300_v18 = vpop.f32.mrb[18].mxu0 }
 0x11e   : > { %v819_v19 = vadd.f32 %v6300_v18, %v7626_v7  ;;  %v813_v21 = vpop.f32.mrb[19].mxu0  ;;  %6569 = vmatprep.subr.bf16.mxu1 %v7291_v63 }
 0x11f   : > { %v6570_v22 = vpack.c.bf16 %v843_v15, %v842_v16  ;;  %v814_v23 = vadd.f32 %v813_v21, %v7622_v5 }
 0x120   : > { %v845_v24 = vmax.f32 %v819_v19, 0.0  ;;  %6285 = vmatmul.mubr.msk.f32.vlgmr.msra.gmra.mrb[2].mxu1 %vm468_vm2, %v7652_v47 }
 0x121   : > { %v844_v25 = vmax.f32 %v814_v23, 0.0  ;;  %v6303_v26 = vpop.f32.mrb[20].mxu0  ;;  %6571 = vmatpush3.bf16.msra.mxu1 %v6570_v22  ;;  %6323 = vmatprep.mubr.msk.f32.mxu1 %vm7292_vm1, %v7293_v4 }
 0x122   : > { %v829_v27 = vadd.f32 %v6303_v26, %v7631_v17  ;;  %v823_v28 = vpop.f32.mrb[21].mxu0  ;;  %6572 = vmatprep.subr.bf16.mxu1 %v7291_v63 }
 0x123   : > { %v6573_v30 = vpack.c.bf16 %v845_v24, %v844_v25  ;;  %v824_v31 = vadd.f32 %v823_v28, %v7634_v20 }
 0x124   : > { %v847_v33 = vmax.f32 %v829_v27, 0.0 }
 0x125   : > { %v846_v34 = vmax.f32 %v824_v31, 0.0  ;;  %v6306_v35 = vpop.f32.mrb[22].mxu0  ;;  %6574 = vmatpush3.bf16.msra.mxu1 %v6573_v30 }
 0x126   : > { %v839_v36 = vadd.f32 %v6306_v35, %v7639_v29  ;;  %v833_v37 = vpop.f32.mrb[23].mxu0  ;;  %6575 = vmatprep.subr.bf16.mxu1 %v7291_v63 }
 0x127   : > { %v6576_v38 = vpack.c.bf16 %v847_v33, %v846_v34  ;;  %v834_v39 = vadd.f32 %v833_v37, %v7641_v32 }
 0x128   : > { %v849_v40 = vmax.f32 %v839_v36, 0.0 }
 0x129   : > { %v848_v41 = vmax.f32 %v834_v39, 0.0  ;;  %6577 = vmatpush3.bf16.msra.mxu1 %v6576_v38  ;;  %v6336_v42 = vpop.f32.mrb[24].mxu0 }
 0x12a   : > { %v998_v43 = vadd.f32 %v6336_v42, %v7624_v6  ;;  %v992_v44 = vpop.f32.mrb[25].mxu0  ;;  %6578 = vmatprep.subr.bf16.mxu1 %v7291_v63 }
 0x12b   : > { %v6579_v45 = vpack.c.bf16 %v849_v40, %v848_v41  ;;  %v993_v46 = vadd.f32 %v992_v44, %v7620_v0 }
 0x12c   : > { %v1032_v48 = vmax.f32 %v998_v43, 0.0 }
 0x12d   : > { %v1031_v49 = vmax.f32 %v993_v46, 0.0  ;;  %6580 = vmatpush3.bf16.msra.mxu1 %v6579_v45  ;;  %v6339_v50 = vpop.f32.mrb[26].mxu0 }
 0x12e   : > { %v1008_v51 = vadd.f32 %v6339_v50, %v7626_v7  ;;  %v1002_v52 = vpop.f32.mrb[27].mxu0  ;;  %6589 = vmatprep.subr.bf16.mxu1 %v7291_v63 }
 0x12f   : > { %v6590_v53 = vpack.c.bf16 %v1032_v48, %v1031_v49  ;;  %v1003_v54 = vadd.f32 %v1002_v52, %v7622_v5 }
 0x130   : > { %v1034_v55 = vmax.f32 %v1008_v51, 0.0  ;;  %6324 = vmatmul.mubr.msk.f32.vlgmr.msra.gmra.mrb[4].mxu1 %vm468_vm2, %v7652_v47 }
 0x131   : > { %v1033_v56 = vmax.f32 %v1003_v54, 0.0  ;;  %v6342_v57 = vpop.f32.mrb[28].mxu0  ;;  %6591 = vmatpush3.bf16.msra.mxu1 %v6590_v53  ;;  %6362 = vmatprep.mubr.msk.f32.mxu1 %vm7292_vm1, %v7293_v4 }
 0x132   : > { %v1018_v58 = vadd.f32 %v6342_v57, %v7631_v17  ;;  %v1012_v59 = vpop.f32.mrb[29].mxu0  ;;  %6592 = vmatprep.subr.bf16.mxu1 %v7291_v63 }
 0x133   : > { %v6593_v60 = vpack.c.bf16 %v1034_v55, %v1033_v56  ;;  %v1013_v61 = vadd.f32 %v1012_v59, %v7634_v20 }
 0x134   : > { %v1036_v62 = vmax.f32 %v1018_v58, 0.0 }
 0x135   : > { %v1035_v1 = vmax.f32 %v1013_v61, 0.0  ;;  %v6345_v2 = vpop.f32.mrb[30].mxu0  ;;  %6594 = vmatpush3.bf16.msra.mxu1 %v6593_v60 }
 0x136   : > { %v1028_v3 = vadd.f32 %v6345_v2, %v7639_v29  ;;  %v1022_v8 = vpop.f32.mrb[31].mxu0  ;;  %6595 = vmatprep.subr.bf16.mxu1 %v7291_v63 }
 0x137   : > { %v6596_v9 = vpack.c.bf16 %v1036_v62, %v1035_v1  ;;  %v1023_v10 = vadd.f32 %v1022_v8, %v7641_v32 }
 0x138   : > { %v1038_v11 = vmax.f32 %v1028_v3, 0.0 }
 0x139   : > { %v1037_v12 = vmax.f32 %v1023_v10, 0.0  ;;  %6597 = vmatpush3.bf16.msra.mxu1 %v6596_v9  ;;  %v6375_v13 = vpop.f32.mrb[32].mxu0 }
 0x13a   : > { %v1187_v14 = vadd.f32 %v6375_v13, %v7624_v6  ;;  %v1181_v15 = vpop.f32.mrb[33].mxu0  ;;  %6598 = vmatprep.subr.bf16.mxu1 %v7291_v63 }
 0x13b   : > { %v6599_v16 = vpack.c.bf16 %v1038_v11, %v1037_v12  ;;  %v1182_v18 = vadd.f32 %v1181_v15, %v7620_v0 }
 0x13c   : > { %v1221_v19 = vmax.f32 %v1187_v14, 0.0 }
 0x13d   : > { %v1220_v21 = vmax.f32 %v1182_v18, 0.0  ;;  %6600 = vmatpush3.bf16.msra.mxu1 %v6599_v16  ;;  %v6378_v22 = vpop.f32.mrb[34].mxu0 }
 0x13e   : > { %v1197_v23 = vadd.f32 %v6378_v22, %v7626_v7  ;;  %v1191_v24 = vpop.f32.mrb[35].mxu0  ;;  %6609 = vmatprep.subr.bf16.mxu1 %v7291_v63 }
 0x13f   : > { %v6610_v25 = vpack.c.bf16 %v1221_v19, %v1220_v21  ;;  %v1192_v26 = vadd.f32 %v1191_v24, %v7622_v5 }
 0x140   : > { %v1223_v27 = vmax.f32 %v1197_v23, 0.0  ;;  %6363 = vmatmul.mubr.msk.f32.vlgmr.msra.gmra.mrb[6].mxu1 %vm468_vm2, %v7652_v47 }
 0x141   : > { %v1222_v28 = vmax.f32 %v1192_v26, 0.0  ;;  %v6381_v30 = vpop.f32.mrb[36].mxu0  ;;  %6611 = vmatpush3.bf16.msra.mxu1 %v6610_v25  ;;  %6401 = vmatprep.mubr.msk.f32.mxu1 %vm7292_vm1, %v7293_v4 }
 0x142   : > { %v1207_v31 = vadd.f32 %v6381_v30, %v7631_v17  ;;  %v1201_v33 = vpop.f32.mrb[37].mxu0  ;;  %6612 = vmatprep.subr.bf16.mxu1 %v7291_v63 }
 0x143   : > { %v6613_v34 = vpack.c.bf16 %v1223_v27, %v1222_v28  ;;  %v1202_v35 = vadd.f32 %v1201_v33, %v7634_v20 }
 0x144   : > { %v1225_v36 = vmax.f32 %v1207_v31, 0.0 }
 0x145   : > { %v1224_v37 = vmax.f32 %v1202_v35, 0.0  ;;  %v6384_v38 = vpop.f32.mrb[38].mxu0  ;;  %6614 = vmatpush3.bf16.msra.mxu1 %v6613_v34 }
 0x146   : > { %v1217_v39 = vadd.f32 %v6384_v38, %v7639_v29  ;;  %v1211_v40 = vpop.f32.mrb[39].mxu0  ;;  %6615 = vmatprep.subr.bf16.mxu1 %v7291_v63 }
 0x147   : > { %v6616_v41 = vpack.c.bf16 %v1225_v36, %v1224_v37  ;;  %v1212_v42 = vadd.f32 %v1211_v40, %v7641_v32 }
 0x148   : > { %v1227_v43 = vmax.f32 %v1217_v39, 0.0 }
 0x149   : > { %v1226_v44 = vmax.f32 %v1212_v42, 0.0  ;;  %6617 = vmatpush3.bf16.msra.mxu1 %v6616_v41  ;;  %v6414_v45 = vpop.f32.mrb[40].mxu0 }
 0x14a   : > { %v1376_v46 = vadd.f32 %v6414_v45, %v7624_v6  ;;  %v1370_v48 = vpop.f32.mrb[41].mxu0  ;;  %6618 = vmatprep.subr.bf16.mxu1 %v7291_v63 }
 0x14b   : > { %v6619_v49 = vpack.c.bf16 %v1227_v43, %v1226_v44  ;;  %v1371_v50 = vadd.f32 %v1370_v48, %v7620_v0 }
 0x14c   : > { %v1410_v51 = vmax.f32 %v1376_v46, 0.0 }
 0x14d   : > { %v1409_v52 = vmax.f32 %v1371_v50, 0.0  ;;  %6620 = vmatpush3.bf16.msra.mxu1 %v6619_v49  ;;  %v6417_v53 = vpop.f32.mrb[42].mxu0 }
 0x14e   : > { %v1386_v54 = vadd.f32 %v6417_v53, %v7626_v7  ;;  %v1380_v55 = vpop.f32.mrb[43].mxu0  ;;  %6629 = vmatprep.subr.bf16.mxu1 %v7291_v63 }
 0x14f   : > { %v6630_v56 = vpack.c.bf16 %v1410_v51, %v1409_v52  ;;  %v1381_v57 = vadd.f32 %v1380_v55, %v7622_v5 }
 0x150   : > { %v1412_v58 = vmax.f32 %v1386_v54, 0.0  ;;  %6402 = vmatmul.mubr.msk.f32.vlgmr.msra.gmra.mrb[8].mxu1 %vm468_vm2, %v7652_v47 }
 0x151   : > { %v1411_v59 = vmax.f32 %v1381_v57, 0.0  ;;  %v6420_v60 = vpop.f32.mrb[44].mxu0  ;;  %6631 = vmatpush3.bf16.msra.mxu1 %v6630_v56  ;;  %6440 = vmatprep.mubr.msk.f32.mxu1 %vm7292_vm1, %v7293_v4 }
 0x152   : > { %v1396_v61 = vadd.f32 %v6420_v60, %v7631_v17  ;;  %v1390_v62 = vpop.f32.mrb[45].mxu0  ;;  %6632 = vmatprep.subr.bf16.mxu1 %v7291_v63 }
 0x153   : > { %v6633_v1 = vpack.c.bf16 %v1412_v58, %v1411_v59  ;;  %v1391_v2 = vadd.f32 %v1390_v62, %v7634_v20 }
 0x154   : > { %v1414_v3 = vmax.f32 %v1396_v61, 0.0 }
 0x155   : > { %v1413_v8 = vmax.f32 %v1391_v2, 0.0  ;;  %v6423_v9 = vpop.f32.mrb[46].mxu0  ;;  %6634 = vmatpush3.bf16.msra.mxu1 %v6633_v1 }
 0x156   : > { %v1406_v10 = vadd.f32 %v6423_v9, %v7639_v29  ;;  %v1400_v11 = vpop.f32.mrb[47].mxu0  ;;  %6635 = vmatprep.subr.bf16.mxu1 %v7291_v63 }
 0x157   : > { %v6636_v12 = vpack.c.bf16 %v1414_v3, %v1413_v8  ;;  %v1401_v13 = vadd.f32 %v1400_v11, %v7641_v32 }
 0x158   : > { %v1416_v14 = vmax.f32 %v1406_v10, 0.0 }
 0x159   : > { %v1415_v15 = vmax.f32 %v1401_v13, 0.0  ;;  %6637 = vmatpush3.bf16.msra.mxu1 %v6636_v12  ;;  %v6453_v16 = vpop.f32.mrb[48].mxu0 }
 0x15a   : > { %v1565_v18 = vadd.f32 %v6453_v16, %v7624_v6  ;;  %v1559_v19 = vpop.f32.mrb[49].mxu0  ;;  %6638 = vmatprep.subr.bf16.mxu1 %v7291_v63 }
 0x15b   : > { %v6639_v21 = vpack.c.bf16 %v1416_v14, %v1415_v15  ;;  %v1560_v22 = vadd.f32 %v1559_v19, %v7620_v0 }
 0x15c   : > { %v1599_v23 = vmax.f32 %v1565_v18, 0.0 }
 0x15d   : > { %v1598_v24 = vmax.f32 %v1560_v22, 0.0  ;;  %6640 = vmatpush3.bf16.msra.mxu1 %v6639_v21  ;;  %v6456_v25 = vpop.f32.mrb[50].mxu0 }
 0x15e   : > { %v1575_v26 = vadd.f32 %v6456_v25, %v7626_v7  ;;  %v1569_v27 = vpop.f32.mrb[51].mxu0  ;;  %6649 = vmatprep.subr.bf16.mxu1 %v7291_v63 }
 0x15f   : > { %v6650_v28 = vpack.c.bf16 %v1599_v23, %v1598_v24  ;;  %v1570_v30 = vadd.f32 %v1569_v27, %v7622_v5 }
 0x160   : > { %v1601_v31 = vmax.f32 %v1575_v26, 0.0  ;;  %6441 = vmatmul.mubr.msk.f32.vlgmr.msra.gmra.mrb[10].mxu1 %vm468_vm2, %v7652_v47 }
 0x161   : > { %v1600_v33 = vmax.f32 %v1570_v30, 0.0  ;;  %v6459_v34 = vpop.f32.mrb[52].mxu0  ;;  %6651 = vmatpush3.bf16.msra.mxu1 %v6650_v28  ;;  %6479 = vmatprep.mubr.msk.f32.mxu1 %vm7292_vm1, %v7293_v4 }
 0x162   : > { %v1585_v35 = vadd.f32 %v6459_v34, %v7631_v17  ;;  %v1579_v36 = vpop.f32.mrb[53].mxu0  ;;  %6652 = vmatprep.subr.bf16.mxu1 %v7291_v63 }
 0x163   : > { %v6653_v37 = vpack.c.bf16 %v1601_v31, %v1600_v33  ;;  %v1580_v38 = vadd.f32 %v1579_v36, %v7634_v20 }
 0x164   : > { %v1603_v39 = vmax.f32 %v1585_v35, 0.0 }
 0x165   : > { %v1602_v40 = vmax.f32 %v1580_v38, 0.0  ;;  %v6462_v41 = vpop.f32.mrb[54].mxu0  ;;  %6654 = vmatpush3.bf16.msra.mxu1 %v6653_v37 }
 0x166   : > { %v1595_v42 = vadd.f32 %v6462_v41, %v7639_v29  ;;  %v1589_v43 = vpop.f32.mrb[55].mxu0  ;;  %6655 = vmatprep.subr.bf16.mxu1 %v7291_v63 }
 0x167   : > { %v6656_v44 = vpack.c.bf16 %v1603_v39, %v1602_v40  ;;  %v1590_v45 = vadd.f32 %v1589_v43, %v7641_v32 }
 0x168   : > { %v1605_v46 = vmax.f32 %v1595_v42, 0.0 }
 0x169   : > { %v1604_v48 = vmax.f32 %v1590_v45, 0.0  ;;  %6657 = vmatpush3.bf16.msra.mxu1 %v6656_v44  ;;  %v6492_v49 = vpop.f32.mrb[56].mxu0 }
 0x16a   : > { %v1754_v50 = vadd.f32 %v6492_v49, %v7624_v6  ;;  %v1748_v51 = vpop.f32.mrb[57].mxu0  ;;  %6658 = vmatprep.subr.bf16.mxu1 %v7291_v63 }
 0x16b   : > { %v6659_v52 = vpack.c.bf16 %v1605_v46, %v1604_v48  ;;  %v1749_v53 = vadd.f32 %v1748_v51, %v7620_v0 }
 0x16c   : > { %v1788_v54 = vmax.f32 %v1754_v50, 0.0 }
 0x16d   : > { %v1787_v55 = vmax.f32 %v1749_v53, 0.0  ;;  %6660 = vmatpush3.bf16.msra.mxu1 %v6659_v52  ;;  %v6495_v56 = vpop.f32.mrb[58].mxu0 }
 0x16e   : > { %v1764_v57 = vadd.f32 %v6495_v56, %v7626_v7  ;;  %v1758_v58 = vpop.f32.mrb[59].mxu0  ;;  %6669 = vmatprep.subr.bf16.mxu1 %v7291_v63 }
 0x16f   : > { %v6670_v59 = vpack.c.bf16 %v1788_v54, %v1787_v55  ;;  %v1759_v60 = vadd.f32 %v1758_v58, %v7622_v5 }
 0x170   : > { %v1790_v61 = vmax.f32 %v1764_v57, 0.0  ;;  %6480 = vmatmul.mubr.msk.f32.vlgmr.msra.gmra.mrb[12].mxu1 %vm468_vm2, %v7652_v47 }
 0x171   : > { %v1789_v6 = vmax.f32 %v1759_v60, 0.0  ;;  %v6498_v62 = vpop.f32.mrb[60].mxu0  ;;  %6671 = vmatpush3.bf16.msra.mxu1 %v6670_v59  ;;  %6518 = vmatprep.mubr.msk.f32.mxu1 %vm7292_vm1, %v7293_v4 }
 0x172   : > { %v1774_v0 = vadd.f32 %v6498_v62, %v7631_v17  ;;  %v1768_v1 = vpop.f32.mrb[61].mxu0  ;;  %6672 = vmatprep.subr.bf16.mxu1 %v7291_v63 }
 0x173   : > { %v6673_v7 = vpack.c.bf16 %v1790_v61, %v1789_v6  ;;  %v1769_v2 = vadd.f32 %v1768_v1, %v7634_v20  ;;  %v7766_v20 = vpop.permute.xlu0 %323 }
 0x174   : > { %v1792_v3 = vmax.f32 %v1774_v0, 0.0 }
 0x175   : > { %v1791_v5 = vmax.f32 %v1769_v2, 0.0  ;;  %v6501_v8 = vpop.f32.mrb[62].mxu0  ;;  %6674 = vmatpush3.bf16.msra.mxu1 %v6673_v7 }
 0x176   : > { %v1784_v9 = vadd.f32 %v6501_v8, %v7639_v29  ;;  %v1778_v10 = vpop.f32.mrb[63].mxu0  ;;  %6675 = vmatprep.subr.bf16.mxu1 %v7291_v63 }
 0x177   : > { %v6676_v11 = vpack.c.bf16 %v1792_v3, %v1791_v5  ;;  %v1779_v4 = vadd.f32 %v1778_v10, %v7641_v32 }
 0x178   : > { %v1794_v12 = vmax.f32 %v1784_v9, 0.0 }
 0x179   : > { %v1793_v17 = vmax.f32 %v1779_v4, 0.0  ;;  %6677 = vmatpush3.bf16.msra.mxu1 %v6676_v11 }
 0x17a   : > { %6678 = vmatprep.subr.bf16.mxu1 %v7291_v63 }
 0x17b   : > { %v6679_v13 = vpack.c.bf16 %v1794_v12, %v1793_v17 }
 0x17d   : > { %6680 = vmatpush3.bf16.msra.mxu1 %v6679_v13 }
 0x180   : > { %6519 = vmatmul.mubr.msk.f32.vlgmr.msra.gmra.mrb[14].mxu1 %vm468_vm2, %v7652_v47 }
 0x1e3   : > { %v538_v14 = vpop.f32.mrb[0].mxu1 }
 0x1e4   : > { %v539_v29 = vadd.f32 %v538_v14, %v7766_v20  ;;  %v6247_v15 = vpop.f32.mrb[1].mxu1 }
 0x1e6   : > { %v7769_v16 = vmul.f32 10.0, %v539_v29 }
 0x1e8   : > { %v1866_v32 = vrot.slane %v7769_v16, 4 }
 0x1ea   : > { %v1867_v18 = vmax.f32 %v7769_v16, %v1866_v32 }
 0x1ec   : > { %v1868_v19 = vrot.slane %v1867_v18, 2 }
 0x1ee   : > { %v1869_v21 = vmax.f32 %v1867_v18, %v1868_v19 }
 0x1f0   : > { %v1870_v63 = vrot.slane %v1869_v21, 1 }
 0x1f2   : > { %v7773_v22 = vmax.f32 %v1869_v21, %v1870_v63 }
 0x1f3   : > { %v727_v23 = vpop.f32.mrb[2].mxu1 }
 0x1f4   : > { %v1872_v47 = vsub.f32 %v7769_v16, %v7773_v22  ;;  %v728_v24 = vadd.f32 %v727_v23, %v7766_v20  ;;  %v6286_v25 = vpop.f32.mrb[3].mxu1 }
 0x1f6   : > { %v1873_v26 = vmul.f32 1.442695, %v1872_v47  ;;  %v7778_v27 = vmul.f32 10.0, %v728_v24 }
 0x1f8   : > { %6726 = vpow2.f32 %v1873_v26  ;;  %v1885_v28 = vrot.slane %v7778_v27, 4 }
 0x1fa   : > { %v1886_v30 = vmax.f32 %v7778_v27, %v1885_v28 }
 0x1fc   : > { %v1887_v31 = vrot.slane %v1886_v30, 2 }
 0x1fe   : > { %v1888_v33 = vmax.f32 %v1886_v30, %v1887_v31 }
 0x200   : > { %v1889_v34 = vrot.slane %v1888_v33, 1 }
 0x202   : > { %v6727_v35 = vpop.eup %6726  ;;  %v1890_v36 = vmax.f32 %v1888_v33, %v1889_v34 }
 0x203   : > { %v1875_v37 = vrot.slane %v6727_v35, 4  ;;  %v916_v38 = vpop.f32.mrb[4].mxu1 }
 0x204   : > { %v1891_v39 = vsub.f32 %v7778_v27, %v1890_v36  ;;  %v917_v40 = vadd.f32 %v916_v38, %v7766_v20  ;;  %v6325_v41 = vpop.f32.mrb[5].mxu1 }
 0x205   : > { %v1876_v42 = vadd.f32 %v6727_v35, %v1875_v37 }
 0x206   : > { %v1892_v43 = vmul.f32 1.442695, %v1891_v39  ;;  %v7784_v44 = vmul.f32 10.0, %v917_v40 }
 0x207   : > { %v1877_v46 = vrot.slane %v1876_v42, 2 }
 0x208   : > { %6728 = vpow2.f32 %v1892_v43  ;;  %v1904_v45 = vrot.slane %v7784_v44, 4 }
 0x209   : > { %v1878_v50 = vadd.f32 %v1877_v46, %v1876_v42 }
 0x20a   : > { %v1905_v48 = vmax.f32 %v7784_v44, %v1904_v45 }
 0x20b   : > { %v1879_v53 = vrot.slane %v1878_v50, 1 }
 0x20c   : > { %v1906_v49 = vrot.slane %v1905_v48, 2 }
 0x20d   : > { %v1880_v61 = vadd.f32 %v1879_v53, %v1878_v50 }
 0x20e   : > { %v1907_v51 = vmax.f32 %v1905_v48, %v1906_v49 }
 0x210   : > { %v1908_v52 = vrot.slane %v1907_v51, 1 }
 0x212   : > { %v6729_v54 = vpop.eup %6728  ;;  %v7788_v55 = vmax.f32 %v1907_v51, %v1908_v52 }
 0x213   : > { %v1894_v56 = vrot.slane %v6729_v54, 4  ;;  %v1105_v57 = vpop.f32.mrb[6].mxu1 }
 0x214   : > { %v1910_v58 = vsub.f32 %v7784_v44, %v7788_v55  ;;  %v1106_v59 = vadd.f32 %v1105_v57, %v7766_v20  ;;  %v6364_v60 = vpop.f32.mrb[7].mxu1 }
 0x215   : > { %v1895_v6 = vadd.f32 %v6729_v54, %v1894_v56 }
 0x216   : > { %v1911_v62 = vmul.f32 1.442695, %v1910_v58  ;;  %v7793_v0 = vmul.f32 10.0, %v1106_v59 }
 0x217   : > { %v1896_v1 = vrot.slane %v1895_v6, 2 }
 0x218   : > { %6730 = vpow2.f32 %v1911_v62  ;;  %v1923_v7 = vrot.slane %v7793_v0, 4 }
 0x219   : > { %6732 = vlog2.f32 %v1880_v61  ;;  %v1897_v2 = vadd.f32 %v1896_v1, %v1895_v6 }
 0x21a   : > { %v1924_v3 = vmax.f32 %v7793_v0, %v1923_v7 }
 0x21b   : > { %v1898_v5 = vrot.slane %v1897_v2, 1 }
 0x21c   : > { %v1925_v8 = vrot.slane %v1924_v3, 2 }
 0x21d   : > { %v1899_v9 = vadd.f32 %v1898_v5, %v1897_v2 }
 0x21e   : > { %v1926_v10 = vmax.f32 %v1924_v3, %v1925_v8 }
 0x21f   : > { %6734 = vlog2.f32 %v1899_v9 }
 0x220   : > { %v1927_v11 = vrot.slane %v1926_v10, 1 }
 0x222   : > { %v6731_v4 = vpop.eup %6730  ;;  %v7797_v12 = vmax.f32 %v1926_v10, %v1927_v11 }
 0x223   : > { %v6733_v17 = vpop.eup %6732  ;;  %v1913_v13 = vrot.slane %v6731_v4, 4  ;;  %v1294_v14 = vpop.f32.mrb[8].mxu1 }
 0x224   : > { %v1929_v29 = vsub.f32 %v7793_v0, %v7797_v12  ;;  %v1295_v15 = vadd.f32 %v1294_v14, %v7766_v20  ;;  %v6403_v32 = vpop.f32.mrb[9].mxu1  ;;  %v1882_v19 = vmul.f32 0.6931472, %v6733_v17 }
 0x225   : > { %v1914_v18 = vadd.f32 %v6731_v4, %v1913_v13 }
 0x226   : > { %v1930_v21 = vmul.f32 1.442695, %v1929_v29  ;;  %v7802_v63 = vmul.f32 10.0, %v1295_v15  ;;  %v1883_v25 = vadd.f32 %v1882_v19, %v7773_v22 }
 0x227   : > { %v1915_v24 = vrot.slane %v1914_v18, 2 }
 0x228   : > { %6736 = vpow2.f32 %v1930_v21  ;;  %v1942_v23 = vrot.slane %v7802_v63, 4  ;;  %v7808_v34 = vsub.f32 %v7769_v16, %v1883_v25 }
 0x229   : > { %v6735_v47 = vpop.eup %6734  ;;  %v1916_v33 = vadd.f32 %v1915_v24, %v1914_v18 }
 0x22a   : > { %v1901_v26 = vmul.f32 0.6931472, %v6735_v47  ;;  %v1943_v28 = vmax.f32 %v7802_v63, %v1942_v23 }
 0x22b   : > { %v1917_v40 = vrot.slane %v1916_v33, 1 }
 0x22c   : > { %v1902_v30 = vadd.f32 %v1901_v26, %v1890_v36  ;;  %v1944_v31 = vrot.slane %v1943_v28, 2 }
 0x22d   : > { %v1918_v46 = vadd.f32 %v1917_v40, %v1916_v33 }
 0x22e   : > { %v7811_v35 = vsub.f32 %v7778_v27, %v1902_v30  ;;  %v1945_v37 = vmax.f32 %v1943_v28, %v1944_v31 }
 0x230   : > { %v2018_v38 = vmax.f32 %v7808_v34, %v7811_v35  ;;  %v1946_v39 = vrot.slane %v1945_v37, 1 }
 0x232   : > { %v6737_v41 = vpop.eup %6736  ;;  %v7815_v22 = vmax.f32 %v1945_v37, %v1946_v39 }
 0x233   : > { %v1932_v42 = vrot.slane %v6737_v41, 4  ;;  %v1483_v43 = vpop.f32.mrb[10].mxu1 }
 0x234   : > { %v1948_v36 = vsub.f32 %v7802_v63, %v7815_v22  ;;  %v1484_v16 = vadd.f32 %v1483_v43, %v7766_v20  ;;  %v6442_v45 = vpop.f32.mrb[11].mxu1 }
 0x235   : > { %v1933_v27 = vadd.f32 %v6737_v41, %v1932_v42 }
 0x236   : > { %v1949_v48 = vmul.f32 1.442695, %v1948_v36  ;;  %v7820_v49 = vmul.f32 10.0, %v1484_v16 }
 0x237   : > { %v1934_v50 = vrot.slane %v1933_v27, 2 }
 0x238   : > { %6738 = vpow2.f32 %v1949_v48  ;;  %v1961_v51 = vrot.slane %v7820_v49, 4 }
 0x239   : > { %6740 = vlog2.f32 %v1918_v46  ;;  %v1935_v52 = vadd.f32 %v1934_v50, %v1933_v27 }
 0x23a   : > { %v1962_v53 = vmax.f32 %v7820_v49, %v1961_v51 }
 0x23b   : > { %v1936_v54 = vrot.slane %v1935_v52, 1 }
 0x23c   : > { %v1963_v56 = vrot.slane %v1962_v53, 2 }
 0x23d   : > { %v1937_v57 = vadd.f32 %v1936_v54, %v1935_v52 }
 0x23e   : > { %v1964_v58 = vmax.f32 %v1962_v53, %v1963_v56 }
 0x23f   : > { %6742 = vlog2.f32 %v1937_v57 }
 0x240   : > { %v1965_v59 = vrot.slane %v1964_v58, 1 }
 0x242   : > { %v6739_v60 = vpop.eup %6738  ;;  %v7824_v61 = vmax.f32 %v1964_v58, %v1965_v59 }
 0x243   : > { %v6741_v6 = vpop.eup %6740  ;;  %v1951_v62 = vrot.slane %v6739_v60, 4  ;;  %v1672_v1 = vpop.f32.mrb[12].mxu1 }
 0x244   : > { %v1967_v7 = vsub.f32 %v7820_v49, %v7824_v61  ;;  %v1673_v2 = vadd.f32 %v1672_v1, %v7766_v20  ;;  %v6481_v3 = vpop.f32.mrb[13].mxu1  ;;  %v1920_v8 = vmul.f32 0.6931472, %v6741_v6 }
 0x245   : > { %v1952_v5 = vadd.f32 %v6739_v60, %v1951_v62 }
 0x246   : > { %v1968_v9 = vmul.f32 1.442695, %v1967_v7  ;;  %v7829_v10 = vmul.f32 10.0, %v1673_v2  ;;  %v1921_v13 = vadd.f32 %v1920_v8, %v7788_v55 }
 0x247   : > { %v1953_v17 = vrot.slane %v1952_v5, 2 }
 0x248   : > { %6744 = vpow2.f32 %v1968_v9  ;;  %v1980_v11 = vrot.slane %v7829_v10, 4  ;;  %v7836_v19 = vsub.f32 %v7784_v44, %v1921_v13 }
 0x249   : > { %v6743_v4 = vpop.eup %6742  ;;  %v1954_v18 = vadd.f32 %v1953_v17, %v1952_v5 }
 0x24a   : > { %v1939_v14 = vmul.f32 0.6931472, %v6743_v4  ;;  %v1981_v29 = vmax.f32 %v7829_v10, %v1980_v11 }
 0x24b   : > { %v1955_v25 = vrot.slane %v1954_v18, 1 }
 0x24c   : > { %v1940_v15 = vadd.f32 %v1939_v14, %v7797_v12  ;;  %v1982_v32 = vrot.slane %v1981_v29, 2 }
 0x24d   : > { %v1956_v37 = vadd.f32 %v1955_v25, %v1954_v18 }
 0x24e   : > { %v7839_v21 = vsub.f32 %v7793_v0, %v1940_v15  ;;  %v1983_v23 = vmax.f32 %v1981_v29, %v1982_v32 }
 0x250   : > { %v2019_v47 = vmax.f32 %v7836_v19, %v7839_v21  ;;  %v1984_v24 = vrot.slane %v1983_v23, 1 }
 0x252   : > { %v6745_v55 = vpop.eup %6744  ;;  %v2022_v26 = vmax.f32 %v2018_v38, %v2019_v47  ;;  %v1985_v28 = vmax.f32 %v1983_v23, %v1984_v24 }
 0x253   : > { %v1970_v30 = vrot.slane %v6745_v55, 4  ;;  %v1861_v31 = vpop.f32.mrb[14].mxu1 }
 0x254   : > { %v1986_v12 = vsub.f32 %v7829_v10, %v1985_v28  ;;  %v1862_v33 = vadd.f32 %v1861_v31, %v7766_v20  ;;  %v6520_v44 = vpop.f32.mrb[15].mxu1 }
 0x255   : > { %v1971_v39 = vadd.f32 %v6745_v55, %v1970_v30 }
 0x256   : > { %v1987_v0 = vmul.f32 1.442695, %v1986_v12  ;;  %v1865_v40 = vmul.f32 10.0, %v1862_v33 }
 0x257   : > { %v1972_v41 = vrot.slane %v1971_v39, 2 }
 0x258   : > { %6746 = vpow2.f32 %v1987_v0  ;;  %v1999_v42 = vrot.slane %v1865_v40, 4 }
 0x259   : > { %6748 = vlog2.f32 %v1956_v37  ;;  %v1973_v43 = vadd.f32 %v1972_v41, %v1971_v39 }
 0x25a   : > { %v2000_v36 = vmax.f32 %v1865_v40, %v1999_v42 }
 0x25b   : > { %v1974_v16 = vrot.slane %v1973_v43, 1 }
 0x25c   : > { %v2001_v38 = vrot.slane %v2000_v36, 2 }
 0x25d   : > { %v1975_v45 = vadd.f32 %v1974_v16, %v1973_v43 }
 0x25e   : > { %v2002_v46 = vmax.f32 %v2000_v36, %v2001_v38 }
 0x25f   : > { %6750 = vlog2.f32 %v1975_v45 }
 0x260   : > { %v2003_v27 = vrot.slane %v2002_v46, 1 }
 0x262   : > { %v6747_v48 = vpop.eup %6746  ;;  %v2004_v50 = vmax.f32 %v2002_v46, %v2003_v27 }
 0x263   : > { %v6749_v20 = vpop.eup %6748  ;;  %v1989_v51 = vrot.slane %v6747_v48, 4 }
 0x264   : > { %v2005_v52 = vsub.f32 %v1865_v40, %v2004_v50  ;;  %v1958_v54 = vmul.f32 0.6931472, %v6749_v20 }
 0x265   : > { %v1990_v53 = vadd.f32 %v6747_v48, %v1989_v51 }
 0x266   : > { %v2006_v56 = vmul.f32 1.442695, %v2005_v52  ;;  %v1959_v59 = vadd.f32 %v1958_v54, %v7815_v22 }
 0x267   : > { %v1991_v58 = vrot.slane %v1990_v53, 2 }
 0x268   : > { %6752 = vpow2.f32 %v2006_v56  ;;  %v7848_v1 = vsub.f32 %v7802_v63, %v1959_v59 }
 0x269   : > { %v6751_v57 = vpop.eup %6750  ;;  %v1992_v62 = vadd.f32 %v1991_v58, %v1990_v53 }
 0x26a   : > { %v1977_v60 = vmul.f32 0.6931472, %v6751_v57 }
 0x26b   : > { %v1993_v3 = vrot.slane %v1992_v62, 1 }
 0x26c   : > { %v1978_v6 = vadd.f32 %v1977_v60, %v7824_v61 }
 0x26d   : > { %v1994_v9 = vadd.f32 %v1993_v3, %v1992_v62 }
 0x26e   : > { %v7851_v7 = vsub.f32 %v7820_v49, %v1978_v6 }
 0x26f   : > { %6754 = vlog2.f32 %v1994_v9 }
 0x270   : > { %v2020_v2 = vmax.f32 %v7848_v1, %v7851_v7 }
 0x272   : > { %v6753_v5 = vpop.eup %6752 }
 0x273   : > { %v2008_v8 = vrot.slane %v6753_v5, 4 }
 0x275   : > { %v2009_v11 = vadd.f32 %v6753_v5, %v2008_v8 }
 0x277   : > { %v2010_v4 = vrot.slane %v2009_v11, 2 }
 0x279   : > { %v2011_v22 = vadd.f32 %v2010_v4, %v2009_v11  ;;  %v6755_v13 = vpop.eup %6754 }
 0x27a   : > { %v1996_v63 = vmul.f32 0.6931472, %v6755_v13 }
 0x27b   : > { %v2012_v17 = vrot.slane %v2011_v22, 1 }
 0x27c   : > { %v1997_v29 = vadd.f32 %v1996_v63, %v1985_v28 }
 0x27d   : > { %v2013_v61 = vadd.f32 %v2012_v17, %v2011_v22 }
 0x27e   : > { %v1998_v32 = vsub.f32 %v7829_v10, %v1997_v29 }
 0x27f   : > { %6756 = vlog2.f32 %v2013_v61 }
 0x289   : > { %v6757_v14 = vpop.eup %6756 }
 0x28a   : > { %v2015_v49 = vmul.f32 0.6931472, %v6757_v14 }
 0x28c   : > { %v2016_v15 = vadd.f32 %v2015_v49, %v2004_v50 }
 0x28e   : > { %v2017_v18 = vsub.f32 %v1865_v40, %v2016_v15 }
 0x290   : > { %v2021_v23 = vmax.f32 %v1998_v32, %v2017_v18 }
 0x292   : > { %v2023_v47 = vmax.f32 %v2020_v2, %v2021_v23 }
 0x294   : > { %v2024_v24 = vmax.f32 %v2022_v26, %v2023_v47 }
 0x296   : > { %v2025_v25 = vsub.f32 %v7808_v34, %v2024_v24  ;;  %v2028_v55 = vsub.f32 %v7811_v35, %v2024_v24  ;;  %v2031_v30 = vsub.f32 %v7836_v19, %v2024_v24  ;;  %v2034_v31 = vsub.f32 %v7839_v21, %v2024_v24 }
 0x297   : > { %v2037_v12 = vsub.f32 %v7848_v1, %v2024_v24  ;;  %v2040_v28 = vsub.f32 %v7851_v7, %v2024_v24  ;;  %v2043_v33 = vsub.f32 %v1998_v32, %v2024_v24  ;;  %v2046_v44 = vsub.f32 %v2017_v18, %v2024_v24 }
 0x298   : > { %v2026_v37 = vmul.f32 1.442695, %v2025_v25  ;;  %v2029_v10 = vmul.f32 1.442695, %v2028_v55  ;;  %v2032_v39 = vmul.f32 1.442695, %v2031_v30 }
 0x299   : > { %v2035_v0 = vmul.f32 1.442695, %v2034_v31  ;;  %v2038_v26 = vmul.f32 1.442695, %v2037_v12  ;;  %v2041_v40 = vmul.f32 1.442695, %v2040_v28 }
 0x29a   : > { %6758 = vpow2.f32 %v2026_v37  ;;  %v2044_v41 = vmul.f32 1.442695, %v2043_v33  ;;  %v2047_v42 = vmul.f32 1.442695, %v2046_v44 }
 0x29b   : > { %6760 = vpow2.f32 %v2029_v10 }
 0x29c   : > { %6762 = vpow2.f32 %v2032_v39 }
 0x29d   : > { %6764 = vpow2.f32 %v2035_v0 }
 0x29e   : > { %6766 = vpow2.f32 %v2038_v26 }
 0x29f   : > { %6768 = vpow2.f32 %v2041_v40 }
 0x2a0   : > { %6770 = vpow2.f32 %v2044_v41 }
 0x2a1   : > { %6772 = vpow2.f32 %v2047_v42 }
 0x2a4   : > { %v6759_v43 = vpop.eup %6758 }
 0x2a5   : > { %v6761_v36 = vpop.eup %6760 }
 0x2a6   : > { %v6763_v16 = vpop.eup %6762  ;;  %v2049_v38 = vadd.f32 %v6761_v36, %v6759_v43 }
 0x2a7   : > { %v6765_v45 = vpop.eup %6764 }
 0x2a8   : > { %v6767_v46 = vpop.eup %6766  ;;  %v2050_v27 = vadd.f32 %v6765_v45, %v6763_v16 }
 0x2a9   : > { %v6769_v48 = vpop.eup %6768 }
 0x2aa   : > { %v6771_v50 = vpop.eup %6770  ;;  %v2051_v20 = vadd.f32 %v6769_v48, %v6767_v46  ;;  %v2053_v51 = vadd.f32 %v2050_v27, %v2049_v38 }
 0x2ab   : > { %v6773_v52 = vpop.eup %6772 }
 0x2ac   : > { %v2052_v53 = vadd.f32 %v6773_v52, %v6771_v50 }
 0x2ae   : > { %v2054_v54 = vadd.f32 %v2052_v53, %v2051_v20 }
 0x2b0   : > { %v2055_v56 = vadd.f32 %v2054_v54, %v2053_v51 }
 0x2b2   : > { %6774 = vlog2.f32 %v2055_v56 }
 0x2bc   : > { %v6775_v57 = vpop.eup %6774 }
 0x2bd   : > { %v2057_v58 = vmul.f32 0.6931472, %v6775_v57 }
 0x2bf   : > { %v2058_v59 = vadd.f32 %v2057_v58, %v2024_v24 }
 0x2c1   : > { %v7863_v60 = vsub.f32 %v7808_v34, %v2058_v59  ;;  %v7866_v6 = vsub.f32 %v7811_v35, %v2058_v59  ;;  %v7869_v62 = vsub.f32 %v7836_v19, %v2058_v59  ;;  %v7872_v2 = vsub.f32 %v7839_v21, %v2058_v59 }
 0x2c2   : > { %v7875_v3 = vsub.f32 %v7848_v1, %v2058_v59  ;;  %v7878_v5 = vsub.f32 %v7851_v7, %v2058_v59  ;;  %v7880_v8 = vsub.f32 %v1998_v32, %v2058_v59  ;;  %v7882_v9 = vsub.f32 %v2017_v18, %v2058_v59 }
 0x2c3   : > { %v2067_v34 = vrot.slane %v7863_v60, 4  ;;  %v2086_v35 = vrot.slane %v7866_v6, 4  ;;  %v2105_v19 = vrot.slane %v7869_v62, 4  ;;  %v2124_v11 = vrot.slane %v7872_v2, 4 }
 0x2c4   : > { %v2143_v21 = vrot.slane %v7875_v3, 4  ;;  %v2162_v1 = vrot.slane %v7878_v5, 4  ;;  %v2181_v4 = vrot.slane %v7880_v8, 4  ;;  %v2200_v7 = vrot.slane %v7882_v9, 4 }
 0x2c5   : > { %v2068_v22 = vmax.f32 %v7863_v60, %v2067_v34  ;;  %v2087_v17 = vmax.f32 %v7866_v6, %v2086_v35  ;;  %v2106_v61 = vmax.f32 %v7869_v62, %v2105_v19  ;;  %v2125_v13 = vmax.f32 %v7872_v2, %v2124_v11 }
 0x2c6   : > { %v2144_v63 = vmax.f32 %v7875_v3, %v2143_v21  ;;  %v2163_v14 = vmax.f32 %v7878_v5, %v2162_v1  ;;  %v2182_v29 = vmax.f32 %v7880_v8, %v2181_v4  ;;  %v2201_v49 = vmax.f32 %v7882_v9, %v2200_v7 }
 0x2c7   : > { %v2069_v15 = vrot.slane %v2068_v22, 2  ;;  %v2088_v32 = vrot.slane %v2087_v17, 2  ;;  %v2107_v18 = vrot.slane %v2106_v61, 2  ;;  %v2126_v23 = vrot.slane %v2125_v13, 2 }
 0x2c8   : > { %v2145_v47 = vrot.slane %v2144_v63, 2  ;;  %v2164_v24 = vrot.slane %v2163_v14, 2  ;;  %v2183_v25 = vrot.slane %v2182_v29, 2  ;;  %v2202_v55 = vrot.slane %v2201_v49, 2 }
 0x2c9   : > { %v2070_v30 = vmax.f32 %v2068_v22, %v2069_v15  ;;  %v2089_v31 = vmax.f32 %v2087_v17, %v2088_v32  ;;  %v2108_v12 = vmax.f32 %v2106_v61, %v2107_v18  ;;  %v2127_v28 = vmax.f32 %v2125_v13, %v2126_v23 }
 0x2ca   : > { %v2146_v33 = vmax.f32 %v2144_v63, %v2145_v47  ;;  %v2165_v44 = vmax.f32 %v2163_v14, %v2164_v24  ;;  %v2184_v37 = vmax.f32 %v2182_v29, %v2183_v25  ;;  %v2203_v10 = vmax.f32 %v2201_v49, %v2202_v55 }
 0x2cb   : > { %v2071_v39 = vrot.slane %v2070_v30, 1  ;;  %v2090_v0 = vrot.slane %v2089_v31, 1  ;;  %v2109_v26 = vrot.slane %v2108_v12, 1  ;;  %v2128_v40 = vrot.slane %v2127_v28, 1 }
 0x2cc   : > { %v2147_v41 = vrot.slane %v2146_v33, 1  ;;  %v2166_v42 = vrot.slane %v2165_v44, 1  ;;  %v2185_v43 = vrot.slane %v2184_v37, 1  ;;  %v2204_v36 = vrot.slane %v2203_v10, 1 }
 0x2cd   : > { %v7900_v16 = vmax.f32 %v2070_v30, %v2071_v39  ;;  %v7902_v38 = vmax.f32 %v2089_v31, %v2090_v0  ;;  %v7904_v45 = vmax.f32 %v2108_v12, %v2109_v26  ;;  %v7906_v46 = vmax.f32 %v2127_v28, %v2128_v40 }
 0x2ce   : > { %v7908_v27 = vmax.f32 %v2146_v33, %v2147_v41  ;;  %v7910_v48 = vmax.f32 %v2165_v44, %v2166_v42  ;;  %v7912_v50 = vmax.f32 %v2184_v37, %v2185_v43  ;;  %v7914_v20 = vmax.f32 %v2203_v10, %v2204_v36 }
 0x2cf   : > { %v2073_v51 = vsub.f32 %v7863_v60, %v7900_v16  ;;  %v2092_v52 = vsub.f32 %v7866_v6, %v7902_v38  ;;  %v2111_v53 = vsub.f32 %v7869_v62, %v7904_v45  ;;  %v2130_v54 = vsub.f32 %v7872_v2, %v7906_v46 }
 0x2d0   : > { %v2149_v56 = vsub.f32 %v7875_v3, %v7908_v27  ;;  %v2168_v57 = vsub.f32 %v7878_v5, %v7910_v48  ;;  %v2187_v35 = vsub.f32 %v7880_v8, %v7912_v50  ;;  %v2206_v11 = vsub.f32 %v7882_v9, %v7914_v20 }
 0x2d1   : > { %v2074_v58 = vmul.f32 1.442695, %v2073_v51  ;;  %v2093_v59 = vmul.f32 1.442695, %v2092_v52  ;;  %v2112_v34 = vmul.f32 1.442695, %v2111_v53 }
 0x2d2   : > { %v2131_v19 = vmul.f32 1.442695, %v2130_v54  ;;  %v2150_v21 = vmul.f32 1.442695, %v2149_v56  ;;  %v2169_v1 = vmul.f32 1.442695, %v2168_v57 }
 0x2d3   : > { %6776 = vpow2.f32 %v2074_v58  ;;  %v2188_v4 = vmul.f32 1.442695, %v2187_v35  ;;  %v2207_v7 = vmul.f32 1.442695, %v2206_v11 }
 0x2d4   : > { %6778 = vpow2.f32 %v2093_v59 }
 0x2d5   : > { %6780 = vpow2.f32 %v2112_v34 }
 0x2d6   : > { %6782 = vpow2.f32 %v2131_v19 }
 0x2d7   : > { %6784 = vpow2.f32 %v2150_v21 }
 0x2d8   : > { %6786 = vpow2.f32 %v2169_v1 }
 0x2d9   : > { %6788 = vpow2.f32 %v2188_v4 }
 0x2da   : > { %6790 = vpow2.f32 %v2207_v7 }
 0x2dd   : > { %v6777_v22 = vpop.eup %6776 }
 0x2de   : > { %v6779_v17 = vpop.eup %6778  ;;  %v2076_v61 = vrot.slane %v6777_v22, 4 }
 0x2df   : > { %v6781_v13 = vpop.eup %6780  ;;  %v2095_v63 = vrot.slane %v6779_v17, 4 }
 0x2e0   : > { %v6783_v14 = vpop.eup %6782  ;;  %v2077_v29 = vadd.f32 %v6777_v22, %v2076_v61  ;;  %v2114_v49 = vrot.slane %v6781_v13, 4 }
 0x2e1   : > { %v6785_v15 = vpop.eup %6784  ;;  %v2096_v32 = vadd.f32 %v6779_v17, %v2095_v63  ;;  %v2133_v18 = vrot.slane %v6783_v14, 4 }
 0x2e2   : > { %v6787_v23 = vpop.eup %6786  ;;  %v2078_v47 = vrot.slane %v2077_v29, 2  ;;  %v2115_v24 = vadd.f32 %v6781_v13, %v2114_v49  ;;  %v2152_v25 = vrot.slane %v6785_v15, 4 }
 0x2e3   : > { %v6789_v55 = vpop.eup %6788  ;;  %v2097_v30 = vrot.slane %v2096_v32, 2  ;;  %v2134_v31 = vadd.f32 %v6783_v14, %v2133_v18  ;;  %v2171_v12 = vrot.slane %v6787_v23, 4 }
 0x2e4   : > { %v6791_v28 = vpop.eup %6790  ;;  %v2079_v33 = vadd.f32 %v2078_v47, %v2077_v29  ;;  %v2116_v44 = vrot.slane %v2115_v24, 2  ;;  %v2153_v37 = vadd.f32 %v6785_v15, %v2152_v25  ;;  %v2190_v10 = vrot.slane %v6789_v55, 4 }
 0x2e5   : > { %v2098_v39 = vadd.f32 %v2097_v30, %v2096_v32  ;;  %v2135_v0 = vrot.slane %v2134_v31, 2  ;;  %v2172_v26 = vadd.f32 %v6787_v23, %v2171_v12  ;;  %v2209_v40 = vrot.slane %v6791_v28, 4 }
 0x2e6   : > { %v2080_v41 = vrot.slane %v2079_v33, 1  ;;  %v2117_v42 = vadd.f32 %v2116_v44, %v2115_v24  ;;  %v2154_v43 = vrot.slane %v2153_v37, 2  ;;  %v2191_v36 = vadd.f32 %v6789_v55, %v2190_v10 }
 0x2e7   : > { %v2099_v51 = vrot.slane %v2098_v39, 1  ;;  %v2136_v52 = vadd.f32 %v2135_v0, %v2134_v31  ;;  %v2173_v53 = vrot.slane %v2172_v26, 2  ;;  %v2210_v54 = vadd.f32 %v6791_v28, %v2209_v40 }
 0x2e8   : > { %v2081_v56 = vadd.f32 %v2080_v41, %v2079_v33  ;;  %v2118_v57 = vrot.slane %v2117_v42, 1  ;;  %v2155_v58 = vadd.f32 %v2154_v43, %v2153_v37  ;;  %v2192_v59 = vrot.slane %v2191_v36, 2 }
 0x2e9   : > { %v2100_v34 = vadd.f32 %v2099_v51, %v2098_v39  ;;  %v2137_v35 = vrot.slane %v2136_v52, 1  ;;  %v2174_v19 = vadd.f32 %v2173_v53, %v2172_v26  ;;  %v2211_v11 = vrot.slane %v2210_v54, 2 }
 0x2ea   : > { %6792 = vlog2.f32 %v2081_v56  ;;  %v2119_v21 = vadd.f32 %v2118_v57, %v2117_v42  ;;  %v2156_v1 = vrot.slane %v2155_v58, 1  ;;  %v2193_v4 = vadd.f32 %v2192_v59, %v2191_v36 }
 0x2eb   : > { %6794 = vlog2.f32 %v2100_v34  ;;  %v2138_v7 = vadd.f32 %v2137_v35, %v2136_v52  ;;  %v2175_v22 = vrot.slane %v2174_v19, 1  ;;  %v2212_v17 = vadd.f32 %v2211_v11, %v2210_v54 }
 0x2ec   : > { %6796 = vlog2.f32 %v2119_v21  ;;  %v2157_v61 = vadd.f32 %v2156_v1, %v2155_v58  ;;  %v2194_v13 = vrot.slane %v2193_v4, 1 }
 0x2ed   : > { %6798 = vlog2.f32 %v2138_v7  ;;  %v2176_v63 = vadd.f32 %v2175_v22, %v2174_v19  ;;  %v2213_v14 = vrot.slane %v2212_v17, 1 }
 0x2ee   : > { %6800 = vlog2.f32 %v2157_v61  ;;  %v2195_v29 = vadd.f32 %v2194_v13, %v2193_v4 }
 0x2ef   : > { %6802 = vlog2.f32 %v2176_v63  ;;  %v2214_v49 = vadd.f32 %v2213_v14, %v2212_v17 }
 0x2f0   : > { %6804 = vlog2.f32 %v2195_v29 }
 0x2f1   : > { %6806 = vlog2.f32 %v2214_v49 }
 0x2f4   : > { %v6793_v15 = vpop.eup %6792 }
 0x2f5   : > { %v6795_v32 = vpop.eup %6794  ;;  %v2083_v18 = vmul.f32 0.6931472, %v6793_v15 }
 0x2f6   : > { %v6797_v23 = vpop.eup %6796  ;;  %v2102_v47 = vmul.f32 0.6931472, %v6795_v32 }
 0x2f7   : > { %v6799_v24 = vpop.eup %6798  ;;  %v2084_v25 = vadd.f32 %v2083_v18, %v7900_v16  ;;  %v2121_v55 = vmul.f32 0.6931472, %v6797_v23 }
 0x2f8   : > { %v6801_v30 = vpop.eup %6800  ;;  %v2103_v31 = vadd.f32 %v2102_v47, %v7902_v38  ;;  %v2140_v12 = vmul.f32 0.6931472, %v6799_v24 }
 0x2f9   : > { %v6803_v28 = vpop.eup %6802  ;;  %v7935_v33 = vsub.f32 %v7863_v60, %v2084_v25  ;;  %v2122_v44 = vadd.f32 %v2121_v55, %v7904_v45  ;;  %v2159_v37 = vmul.f32 0.6931472, %v6801_v30 }
 0x2fa   : > { %v6805_v10 = vpop.eup %6804  ;;  %v7939_v39 = vsub.f32 %v7866_v6, %v2103_v31  ;;  %v2141_v0 = vadd.f32 %v2140_v12, %v7906_v46  ;;  %v2178_v26 = vmul.f32 0.6931472, %v6803_v28 }
 0x2fb   : > { %v6807_v16 = vpop.eup %6806  ;;  %v7943_v40 = vsub.f32 %v7869_v62, %v2122_v44  ;;  %v2160_v38 = vadd.f32 %v2159_v37, %v7908_v27  ;;  %v2197_v41 = vmul.f32 0.6931472, %v6805_v10 }
 0x2fc   : > { %v2142_v60 = vsub.f32 %v7872_v2, %v2141_v0  ;;  %v2179_v42 = vadd.f32 %v2178_v26, %v7910_v48  ;;  %v2216_v45 = vmul.f32 0.6931472, %v6807_v16  ;;  %v2219_v43 = vmax.f32 %v7935_v33, %v7939_v39 }
 0x2fd   : > { %v2161_v6 = vsub.f32 %v7875_v3, %v2160_v38  ;;  %v2198_v46 = vadd.f32 %v2197_v41, %v7912_v50 }
 0x2fe   : > { %v2180_v36 = vsub.f32 %v7878_v5, %v2179_v42  ;;  %v2217_v62 = vadd.f32 %v2216_v45, %v7914_v20  ;;  %v2220_v51 = vmax.f32 %v7943_v40, %v2142_v60 }
 0x2ff   : > { %v2199_v27 = vsub.f32 %v7880_v8, %v2198_v46 }
 0x300   : > { %v2218_v2 = vsub.f32 %v7882_v9, %v2217_v62  ;;  %v2221_v52 = vmax.f32 %v2161_v6, %v2180_v36  ;;  %v2223_v48 = vmax.f32 %v2219_v43, %v2220_v51 }
 0x302   : > { %v2222_v53 = vmax.f32 %v2199_v27, %v2218_v2 }
 0x304   : > { %v2224_v54 = vmax.f32 %v2221_v52, %v2222_v53 }
 0x306   : > { %v2225_v56 = vmax.f32 %v2223_v48, %v2224_v54 }
 0x308   : > { %v2226_v57 = vsub.f32 %v7935_v33, %v2225_v56  ;;  %v2229_v3 = vsub.f32 %v7939_v39, %v2225_v56  ;;  %v2232_v50 = vsub.f32 %v7943_v40, %v2225_v56  ;;  %v2235_v5 = vsub.f32 %v2142_v60, %v2225_v56 }
 0x309   : > { %v2238_v58 = vsub.f32 %v2161_v6, %v2225_v56  ;;  %v2241_v20 = vsub.f32 %v2180_v36, %v2225_v56  ;;  %v2244_v59 = vsub.f32 %v2199_v27, %v2225_v56  ;;  %v2247_v34 = vsub.f32 %v2218_v2, %v2225_v56 }
 0x30a   : > { %v2227_v35 = vmul.f32 1.442695, %v2226_v57  ;;  %v2230_v8 = vmul.f32 1.442695, %v2229_v3  ;;  %v2233_v19 = vmul.f32 1.442695, %v2232_v50 }
 0x30b   : > { %v2236_v9 = vmul.f32 1.442695, %v2235_v5  ;;  %v2239_v11 = vmul.f32 1.442695, %v2238_v58  ;;  %v2242_v21 = vmul.f32 1.442695, %v2241_v20 }
 0x30c   : > { %6808 = vpow2.f32 %v2227_v35  ;;  %v2245_v1 = vmul.f32 1.442695, %v2244_v59  ;;  %v2248_v4 = vmul.f32 1.442695, %v2247_v34 }
 0x30d   : > { %6810 = vpow2.f32 %v2230_v8 }
 0x30e   : > { %6812 = vpow2.f32 %v2233_v19 }
 0x30f   : > { %6814 = vpow2.f32 %v2236_v9 }
 0x310   : > { %6816 = vpow2.f32 %v2239_v11 }
 0x311   : > { %6818 = vpow2.f32 %v2242_v21 }
 0x312   : > { %6820 = vpow2.f32 %v2245_v1 }
 0x313   : > { %6822 = vpow2.f32 %v2248_v4 }
 0x316   : > { %v6809_v7 = vpop.eup %6808 }
 0x317   : > { %v6811_v22 = vpop.eup %6810 }
 0x318   : > { %v6813_v17 = vpop.eup %6812  ;;  %v2250_v61 = vadd.f32 %v6811_v22, %v6809_v7 }
 0x319   : > { %v6815_v13 = vpop.eup %6814 }
 0x31a   : > { %v6817_v63 = vpop.eup %6816  ;;  %v2251_v14 = vadd.f32 %v6815_v13, %v6813_v17 }
 0x31b   : > { %v6819_v29 = vpop.eup %6818 }
 0x31c   : > { %v6821_v49 = vpop.eup %6820  ;;  %v2252_v15 = vadd.f32 %v6819_v29, %v6817_v63  ;;  %v2254_v32 = vadd.f32 %v2251_v14, %v2250_v61 }
 0x31d   : > { %v6823_v18 = vpop.eup %6822 }
 0x31e   : > { %v2253_v23 = vadd.f32 %v6823_v18, %v6821_v49 }
 0x320   : > { %v2255_v47 = vadd.f32 %v2253_v23, %v2252_v15 }
 0x322   : > { %v2256_v24 = vadd.f32 %v2255_v47, %v2254_v32 }
 0x324   : > { %6824 = vlog2.f32 %v2256_v24 }
 0x32e   : > { %v6825_v25 = vpop.eup %6824 }
 0x32f   : > { %v2258_v55 = vmul.f32 0.6931472, %v6825_v25 }
 0x331   : > { %v2259_v30 = vadd.f32 %v2258_v55, %v2225_v56 }
 0x333   : > { %v7961_v31 = vsub.f32 %v7935_v33, %v2259_v30  ;;  %v7964_v12 = vsub.f32 %v7939_v39, %v2259_v30  ;;  %v7967_v28 = vsub.f32 %v7943_v40, %v2259_v30  ;;  %v7969_v44 = vsub.f32 %v2142_v60, %v2259_v30 }
 0x334   : > { %v7971_v37 = vsub.f32 %v2161_v6, %v2259_v30  ;;  %v7973_v10 = vsub.f32 %v2180_v36, %v2259_v30  ;;  %v7975_v0 = vsub.f32 %v2199_v27, %v2259_v30  ;;  %v7977_v26 = vsub.f32 %v2218_v2, %v2259_v30 }
 0x335   : > { %v2268_v16 = vrot.slane %v7961_v31, 4  ;;  %v2287_v33 = vrot.slane %v7964_v12, 4  ;;  %v2306_v39 = vrot.slane %v7967_v28, 4  ;;  %v2325_v38 = vrot.slane %v7969_v44, 4 }
 0x336   : > { %v2344_v40 = vrot.slane %v7971_v37, 4  ;;  %v2363_v41 = vrot.slane %v7973_v10, 4  ;;  %v2382_v60 = vrot.slane %v7975_v0, 4  ;;  %v2401_v42 = vrot.slane %v7977_v26, 4 }
 0x337   : > { %v2269_v45 = vmax.f32 %v7961_v31, %v2268_v16  ;;  %v2288_v43 = vmax.f32 %v7964_v12, %v2287_v33  ;;  %v2307_v6 = vmax.f32 %v7967_v28, %v2306_v39  ;;  %v2326_v46 = vmax.f32 %v7969_v44, %v2325_v38 }
 0x338   : > { %v2345_v36 = vmax.f32 %v7971_v37, %v2344_v40  ;;  %v2364_v62 = vmax.f32 %v7973_v10, %v2363_v41  ;;  %v2383_v51 = vmax.f32 %v7975_v0, %v2382_v60  ;;  %v2402_v27 = vmax.f32 %v7977_v26, %v2401_v42 }
 0x339   : > { %v2270_v2 = vrot.slane %v2269_v45, 2  ;;  %v2289_v52 = vrot.slane %v2288_v43, 2  ;;  %v2308_v48 = vrot.slane %v2307_v6, 2  ;;  %v2327_v53 = vrot.slane %v2326_v46, 2 }
 0x33a   : > { %v2346_v54 = vrot.slane %v2345_v36, 2  ;;  %v2365_v56 = vrot.slane %v2364_v62, 2  ;;  %v2384_v57 = vrot.slane %v2383_v51, 2  ;;  %v2403_v3 = vrot.slane %v2402_v27, 2 }
 0x33b   : > { %v2271_v50 = vmax.f32 %v2269_v45, %v2270_v2  ;;  %v2290_v5 = vmax.f32 %v2288_v43, %v2289_v52  ;;  %v2309_v58 = vmax.f32 %v2307_v6, %v2308_v48  ;;  %v2328_v20 = vmax.f32 %v2326_v46, %v2327_v53 }
 0x33c   : > { %v2347_v59 = vmax.f32 %v2345_v36, %v2346_v54  ;;  %v2366_v34 = vmax.f32 %v2364_v62, %v2365_v56  ;;  %v2385_v35 = vmax.f32 %v2383_v51, %v2384_v57  ;;  %v2404_v8 = vmax.f32 %v2402_v27, %v2403_v3 }
 0x33d   : > { %v2272_v19 = vrot.slane %v2271_v50, 1  ;;  %v2291_v9 = vrot.slane %v2290_v5, 1  ;;  %v2310_v11 = vrot.slane %v2309_v58, 1  ;;  %v2329_v21 = vrot.slane %v2328_v20, 1 }
 0x33e   : > { %v2348_v1 = vrot.slane %v2347_v59, 1  ;;  %v2367_v4 = vrot.slane %v2366_v34, 1  ;;  %v2386_v7 = vrot.slane %v2385_v35, 1  ;;  %v2405_v22 = vrot.slane %v2404_v8, 1 }
 0x33f   : > { %v7995_v17 = vmax.f32 %v2271_v50, %v2272_v19  ;;  %v7997_v61 = vmax.f32 %v2290_v5, %v2291_v9  ;;  %v7999_v13 = vmax.f32 %v2309_v58, %v2310_v11  ;;  %v8001_v63 = vmax.f32 %v2328_v20, %v2329_v21 }
 0x340   : > { %v8003_v14 = vmax.f32 %v2347_v59, %v2348_v1  ;;  %v8005_v29 = vmax.f32 %v2366_v34, %v2367_v4  ;;  %v8007_v49 = vmax.f32 %v2385_v35, %v2386_v7  ;;  %v8009_v15 = vmax.f32 %v2404_v8, %v2405_v22 }
 0x341   : > { %v2274_v32 = vsub.f32 %v7961_v31, %v7995_v17  ;;  %v2293_v18 = vsub.f32 %v7964_v12, %v7997_v61  ;;  %v2312_v23 = vsub.f32 %v7967_v28, %v7999_v13  ;;  %v2331_v47 = vsub.f32 %v7969_v44, %v8001_v63 }
 0x342   : > { %v2350_v24 = vsub.f32 %v7971_v37, %v8003_v14  ;;  %v2369_v25 = vsub.f32 %v7973_v10, %v8005_v29  ;;  %v2388_v33 = vsub.f32 %v7975_v0, %v8007_v49  ;;  %v2407_v38 = vsub.f32 %v7977_v26, %v8009_v15 }
 0x343   : > { %v2275_v55 = vmul.f32 1.442695, %v2274_v32  ;;  %v2294_v30 = vmul.f32 1.442695, %v2293_v18  ;;  %v2313_v16 = vmul.f32 1.442695, %v2312_v23 }
 0x344   : > { %v2332_v39 = vmul.f32 1.442695, %v2331_v47  ;;  %v2351_v40 = vmul.f32 1.442695, %v2350_v24  ;;  %v2370_v41 = vmul.f32 1.442695, %v2369_v25 }
 0x345   : > { %6826 = vpow2.f32 %v2275_v55  ;;  %v2389_v60 = vmul.f32 1.442695, %v2388_v33  ;;  %v2408_v42 = vmul.f32 1.442695, %v2407_v38 }
 0x346   : > { %6828 = vpow2.f32 %v2294_v30 }
 0x347   : > { %6830 = vpow2.f32 %v2313_v16 }
 0x348   : > { %6832 = vpow2.f32 %v2332_v39 }
 0x349   : > { %6834 = vpow2.f32 %v2351_v40 }
 0x34a   : > { %6836 = vpow2.f32 %v2370_v41 }
 0x34b   : > { %6838 = vpow2.f32 %v2389_v60 }
 0x34c   : > { %6840 = vpow2.f32 %v2408_v42 }
 0x34f   : > { %v6827_v45 = vpop.eup %6826 }
 0x350   : > { %v6829_v43 = vpop.eup %6828  ;;  %v2277_v6 = vrot.slane %v6827_v45, 4 }
 0x351   : > { %v6831_v46 = vpop.eup %6830  ;;  %v2296_v36 = vrot.slane %v6829_v43, 4 }
 0x352   : > { %v6833_v62 = vpop.eup %6832  ;;  %v2278_v51 = vadd.f32 %v6827_v45, %v2277_v6  ;;  %v2315_v27 = vrot.slane %v6831_v46, 4 }
 0x353   : > { %v6835_v2 = vpop.eup %6834  ;;  %v2297_v52 = vadd.f32 %v6829_v43, %v2296_v36  ;;  %v2334_v48 = vrot.slane %v6833_v62, 4 }
 0x354   : > { %v6837_v53 = vpop.eup %6836  ;;  %v2279_v54 = vrot.slane %v2278_v51, 2  ;;  %v2316_v56 = vadd.f32 %v6831_v46, %v2315_v27  ;;  %v2353_v57 = vrot.slane %v6835_v2, 4 }
 0x355   : > { %v6839_v3 = vpop.eup %6838  ;;  %v2298_v50 = vrot.slane %v2297_v52, 2  ;;  %v2335_v5 = vadd.f32 %v6833_v62, %v2334_v48  ;;  %v2372_v58 = vrot.slane %v6837_v53, 4 }
 0x356   : > { %v6841_v20 = vpop.eup %6840  ;;  %v2280_v59 = vadd.f32 %v2279_v54, %v2278_v51  ;;  %v2317_v34 = vrot.slane %v2316_v56, 2  ;;  %v2354_v35 = vadd.f32 %v6835_v2, %v2353_v57  ;;  %v2391_v8 = vrot.slane %v6839_v3, 4 }
 0x357   : > { %v2299_v19 = vadd.f32 %v2298_v50, %v2297_v52  ;;  %v2336_v9 = vrot.slane %v2335_v5, 2  ;;  %v2373_v11 = vadd.f32 %v6837_v53, %v2372_v58  ;;  %v2410_v21 = vrot.slane %v6841_v20, 4 }
 0x358   : > { %v2281_v1 = vrot.slane %v2280_v59, 1  ;;  %v2318_v4 = vadd.f32 %v2317_v34, %v2316_v56  ;;  %v2355_v7 = vrot.slane %v2354_v35, 2  ;;  %v2392_v22 = vadd.f32 %v6839_v3, %v2391_v8 }
 0x359   : > { %v2300_v32 = vrot.slane %v2299_v19, 1  ;;  %v2337_v18 = vadd.f32 %v2336_v9, %v2335_v5  ;;  %v2374_v23 = vrot.slane %v2373_v11, 2  ;;  %v2411_v47 = vadd.f32 %v6841_v20, %v2410_v21 }
 0x35a   : > { %v2282_v24 = vadd.f32 %v2281_v1, %v2280_v59  ;;  %v2319_v25 = vrot.slane %v2318_v4, 1  ;;  %v2356_v55 = vadd.f32 %v2355_v7, %v2354_v35  ;;  %v2393_v30 = vrot.slane %v2392_v22, 2 }
 0x35b   : > { %v2301_v16 = vadd.f32 %v2300_v32, %v2299_v19  ;;  %v2338_v33 = vrot.slane %v2337_v18, 1  ;;  %v2375_v39 = vadd.f32 %v2374_v23, %v2373_v11  ;;  %v2412_v38 = vrot.slane %v2411_v47, 2 }
 0x35c   : > { %6842 = vlog2.f32 %v2282_v24  ;;  %v2320_v40 = vadd.f32 %v2319_v25, %v2318_v4  ;;  %v2357_v41 = vrot.slane %v2356_v55, 1  ;;  %v2394_v60 = vadd.f32 %v2393_v30, %v2392_v22 }
 0x35d   : > { %6844 = vlog2.f32 %v2301_v16  ;;  %v2339_v42 = vadd.f32 %v2338_v33, %v2337_v18  ;;  %v2376_v45 = vrot.slane %v2375_v39, 1  ;;  %v2413_v43 = vadd.f32 %v2412_v38, %v2411_v47 }
 0x35e   : > { %6846 = vlog2.f32 %v2320_v40  ;;  %v2358_v6 = vadd.f32 %v2357_v41, %v2356_v55  ;;  %v2395_v46 = vrot.slane %v2394_v60, 1 }
 0x35f   : > { %6848 = vlog2.f32 %v2339_v42  ;;  %v2377_v36 = vadd.f32 %v2376_v45, %v2375_v39  ;;  %v2414_v62 = vrot.slane %v2413_v43, 1 }
 0x360   : > { %6850 = vlog2.f32 %v2358_v6  ;;  %v2396_v51 = vadd.f32 %v2395_v46, %v2394_v60 }
 0x361   : > { %6852 = vlog2.f32 %v2377_v36  ;;  %v2415_v27 = vadd.f32 %v2414_v62, %v2413_v43 }
 0x362   : > { %6854 = vlog2.f32 %v2396_v51 }
 0x363   : > { %6856 = vlog2.f32 %v2415_v27 }
 0x366   : > { %v6843_v2 = vpop.eup %6842 }
 0x367   : > { %v6845_v52 = vpop.eup %6844  ;;  %v2284_v48 = vmul.f32 0.6931472, %v6843_v2 }
 0x368   : > { %v6847_v53 = vpop.eup %6846  ;;  %v2303_v54 = vmul.f32 0.6931472, %v6845_v52 }
 0x369   : > { %v6849_v56 = vpop.eup %6848  ;;  %v2285_v57 = vadd.f32 %v2284_v48, %v7995_v17  ;;  %v2322_v3 = vmul.f32 0.6931472, %v6847_v53 }
 0x36a   : > { %v6851_v50 = vpop.eup %6850  ;;  %v2304_v5 = vadd.f32 %v2303_v54, %v7997_v61  ;;  %v2341_v58 = vmul.f32 0.6931472, %v6849_v56 }
 0x36b   : > { %v6853_v20 = vpop.eup %6852  ;;  %v8030_v59 = vsub.f32 %v7961_v31, %v2285_v57  ;;  %v2323_v34 = vadd.f32 %v2322_v3, %v7999_v13  ;;  %v2360_v35 = vmul.f32 0.6931472, %v6851_v50 }
 0x36c   : > { %v6855_v8 = vpop.eup %6854  ;;  %v8034_v19 = vsub.f32 %v7964_v12, %v2304_v5  ;;  %v2342_v9 = vadd.f32 %v2341_v58, %v8001_v63  ;;  %v2379_v11 = vmul.f32 0.6931472, %v6853_v20 }
 0x36d   : > { %v6857_v17 = vpop.eup %6856  ;;  %v8038_v21 = vsub.f32 %v7967_v28, %v2323_v34  ;;  %v2361_v61 = vadd.f32 %v2360_v35, %v8003_v14  ;;  %v2398_v1 = vmul.f32 0.6931472, %v6855_v8 }
 0x36e   : > { %v2343_v31 = vsub.f32 %v7969_v44, %v2342_v9  ;;  %v2380_v4 = vadd.f32 %v2379_v11, %v8005_v29  ;;  %v2417_v13 = vmul.f32 0.6931472, %v6857_v17  ;;  %v2420_v7 = vmax.f32 %v8030_v59, %v8034_v19 }
 0x36f   : > { %v2362_v12 = vsub.f32 %v7971_v37, %v2361_v61  ;;  %v2399_v63 = vadd.f32 %v2398_v1, %v8007_v49 }
 0x370   : > { %v2381_v22 = vsub.f32 %v7973_v10, %v2380_v4  ;;  %v2418_v28 = vadd.f32 %v2417_v13, %v8009_v15  ;;  %v2421_v32 = vmax.f32 %v8038_v21, %v2343_v31 }
 0x371   : > { %v2400_v14 = vsub.f32 %v7975_v0, %v2399_v63 }
 0x372   : > { %v2419_v44 = vsub.f32 %v7977_v26, %v2418_v28  ;;  %v2422_v18 = vmax.f32 %v2362_v12, %v2381_v22  ;;  %v2424_v29 = vmax.f32 %v2420_v7, %v2421_v32 }
 0x374   : > { %v2423_v23 = vmax.f32 %v2400_v14, %v2419_v44 }
 0x376   : > { %v2425_v47 = vmax.f32 %v2422_v18, %v2423_v23 }
 0x378   : > { %v2426_v24 = vmax.f32 %v2424_v29, %v2425_v47 }
 0x37a   : > { %v2427_v25 = vsub.f32 %v8030_v59, %v2426_v24  ;;  %v2430_v37 = vsub.f32 %v8034_v19, %v2426_v24  ;;  %v2433_v49 = vsub.f32 %v8038_v21, %v2426_v24  ;;  %v2436_v10 = vsub.f32 %v2343_v31, %v2426_v24 }
 0x37b   : > { %v2439_v55 = vsub.f32 %v2362_v12, %v2426_v24  ;;  %v2442_v15 = vsub.f32 %v2381_v22, %v2426_v24  ;;  %v2445_v30 = vsub.f32 %v2400_v14, %v2426_v24  ;;  %v2448_v16 = vsub.f32 %v2419_v44, %v2426_v24 }
 0x37c   : > { %v2428_v33 = vmul.f32 1.442695, %v2427_v25  ;;  %v2431_v0 = vmul.f32 1.442695, %v2430_v37  ;;  %v2434_v39 = vmul.f32 1.442695, %v2433_v49 }
 0x37d   : > { %v2437_v26 = vmul.f32 1.442695, %v2436_v10  ;;  %v2440_v38 = vmul.f32 1.442695, %v2439_v55  ;;  %v2443_v40 = vmul.f32 1.442695, %v2442_v15 }
 0x37e   : > { %6858 = vpow2.f32 %v2428_v33  ;;  %v2446_v41 = vmul.f32 1.442695, %v2445_v30  ;;  %v2449_v60 = vmul.f32 1.442695, %v2448_v16 }
 0x37f   : > { %6860 = vpow2.f32 %v2431_v0 }
 0x380   : > { %6862 = vpow2.f32 %v2434_v39 }
 0x381   : > { %6864 = vpow2.f32 %v2437_v26 }
 0x382   : > { %6866 = vpow2.f32 %v2440_v38 }
 0x383   : > { %6868 = vpow2.f32 %v2443_v40 }
 0x384   : > { %6870 = vpow2.f32 %v2446_v41 }
 0x385   : > { %6872 = vpow2.f32 %v2449_v60 }
 0x388   : > { %v6859_v42 = vpop.eup %6858 }
 0x389   : > { %v6861_v45 = vpop.eup %6860 }
 0x38a   : > { %v6863_v43 = vpop.eup %6862  ;;  %v2451_v6 = vadd.f32 %v6861_v45, %v6859_v42 }
 0x38b   : > { %v6865_v46 = vpop.eup %6864 }
 0x38c   : > { %v6867_v36 = vpop.eup %6866  ;;  %v2452_v62 = vadd.f32 %v6865_v46, %v6863_v43 }
 0x38d   : > { %v6869_v51 = vpop.eup %6868 }
 0x38e   : > { %v6871_v27 = vpop.eup %6870  ;;  %v2453_v2 = vadd.f32 %v6869_v51, %v6867_v36  ;;  %v2455_v52 = vadd.f32 %v2452_v62, %v2451_v6 }
 0x38f   : > { %v6873_v48 = vpop.eup %6872 }
 0x390   : > { %v2454_v53 = vadd.f32 %v6873_v48, %v6871_v27 }
 0x392   : > { %v2456_v54 = vadd.f32 %v2454_v53, %v2453_v2 }
 0x394   : > { %v2457_v56 = vadd.f32 %v2456_v54, %v2455_v52 }
 0x396   : > { %6874 = vlog2.f32 %v2457_v56 }
 0x3a0   : > { %v6875_v57 = vpop.eup %6874 }
 0x3a1   : > { %v2459_v3 = vmul.f32 0.6931472, %v6875_v57 }
 0x3a3   : > { %v2460_v50 = vadd.f32 %v2459_v3, %v2426_v24 }
 0x3a5   : > { %v8056_v5 = vsub.f32 %v8030_v59, %v2460_v50  ;;  %v8059_v58 = vsub.f32 %v8034_v19, %v2460_v50  ;;  %v8062_v20 = vsub.f32 %v8038_v21, %v2460_v50  ;;  %v8064_v34 = vsub.f32 %v2343_v31, %v2460_v50 }
 0x3a6   : > { %v8066_v35 = vsub.f32 %v2362_v12, %v2460_v50  ;;  %v8068_v8 = vsub.f32 %v2381_v22, %v2460_v50  ;;  %v8070_v9 = vsub.f32 %v2400_v14, %v2460_v50  ;;  %v8072_v11 = vsub.f32 %v2419_v44, %v2460_v50 }
 0x3a7   : > { %v2469_v17 = vrot.slane %v8056_v5, 4  ;;  %v2488_v59 = vrot.slane %v8059_v58, 4  ;;  %v2507_v19 = vrot.slane %v8062_v20, 4  ;;  %v2526_v61 = vrot.slane %v8064_v34, 4 }
 0x3a8   : > { %v2545_v21 = vrot.slane %v8066_v35, 4  ;;  %v2564_v1 = vrot.slane %v8068_v8, 4  ;;  %v2583_v31 = vrot.slane %v8070_v9, 4  ;;  %v2602_v4 = vrot.slane %v8072_v11, 4 }
 0x3a9   : > { %v2470_v13 = vmax.f32 %v8056_v5, %v2469_v17  ;;  %v2489_v7 = vmax.f32 %v8059_v58, %v2488_v59  ;;  %v2508_v12 = vmax.f32 %v8062_v20, %v2507_v19  ;;  %v2527_v63 = vmax.f32 %v8064_v34, %v2526_v61 }
 0x3aa   : > { %v2546_v22 = vmax.f32 %v8066_v35, %v2545_v21  ;;  %v2565_v28 = vmax.f32 %v8068_v8, %v2564_v1  ;;  %v2584_v32 = vmax.f32 %v8070_v9, %v2583_v31  ;;  %v2603_v14 = vmax.f32 %v8072_v11, %v2602_v4 }
 0x3ab   : > { %v2471_v44 = vrot.slane %v2470_v13, 2  ;;  %v2490_v18 = vrot.slane %v2489_v7, 2  ;;  %v2509_v29 = vrot.slane %v2508_v12, 2  ;;  %v2528_v23 = vrot.slane %v2527_v63, 2 }
 0x3ac   : > { %v2547_v47 = vrot.slane %v2546_v22, 2  ;;  %v2566_v24 = vrot.slane %v2565_v28, 2  ;;  %v2585_v25 = vrot.slane %v2584_v32, 2  ;;  %v2604_v37 = vrot.slane %v2603_v14, 2 }
 0x3ad   : > { %v2472_v49 = vmax.f32 %v2470_v13, %v2471_v44  ;;  %v2491_v10 = vmax.f32 %v2489_v7, %v2490_v18  ;;  %v2510_v55 = vmax.f32 %v2508_v12, %v2509_v29  ;;  %v2529_v15 = vmax.f32 %v2527_v63, %v2528_v23 }
 0x3ae   : > { %v2548_v30 = vmax.f32 %v2546_v22, %v2547_v47  ;;  %v2567_v16 = vmax.f32 %v2565_v28, %v2566_v24  ;;  %v2586_v33 = vmax.f32 %v2584_v32, %v2585_v25  ;;  %v2605_v0 = vmax.f32 %v2603_v14, %v2604_v37 }
 0x3af   : > { %v2473_v39 = vrot.slane %v2472_v49, 1  ;;  %v2492_v26 = vrot.slane %v2491_v10, 1  ;;  %v2511_v38 = vrot.slane %v2510_v55, 1  ;;  %v2530_v40 = vrot.slane %v2529_v15, 1 }
 0x3b0   : > { %v2549_v41 = vrot.slane %v2548_v30, 1  ;;  %v2568_v60 = vrot.slane %v2567_v16, 1  ;;  %v2587_v42 = vrot.slane %v2586_v33, 1  ;;  %v2606_v45 = vrot.slane %v2605_v0, 1 }
 0x3b1   : > { %v8090_v43 = vmax.f32 %v2472_v49, %v2473_v39  ;;  %v8092_v6 = vmax.f32 %v2491_v10, %v2492_v26  ;;  %v8094_v46 = vmax.f32 %v2510_v55, %v2511_v38  ;;  %v8096_v36 = vmax.f32 %v2529_v15, %v2530_v40 }
 0x3b2   : > { %v8098_v62 = vmax.f32 %v2548_v30, %v2549_v41  ;;  %v8100_v51 = vmax.f32 %v2567_v16, %v2568_v60  ;;  %v8102_v27 = vmax.f32 %v2586_v33, %v2587_v42  ;;  %v8104_v2 = vmax.f32 %v2605_v0, %v2606_v45 }
 0x3b3   : > { %v2475_v52 = vsub.f32 %v8056_v5, %v8090_v43  ;;  %v2494_v48 = vsub.f32 %v8059_v58, %v8092_v6  ;;  %v2513_v53 = vsub.f32 %v8062_v20, %v8094_v46  ;;  %v2532_v54 = vsub.f32 %v8064_v34, %v8096_v36 }
 0x3b4   : > { %v2551_v56 = vsub.f32 %v8066_v35, %v8098_v62  ;;  %v2570_v57 = vsub.f32 %v8068_v8, %v8100_v51  ;;  %v2589_v59 = vsub.f32 %v8070_v9, %v8102_v27  ;;  %v2608_v61 = vsub.f32 %v8072_v11, %v8104_v2 }
 0x3b5   : > { %v2476_v3 = vmul.f32 1.442695, %v2475_v52  ;;  %v2495_v50 = vmul.f32 1.442695, %v2494_v48  ;;  %v2514_v17 = vmul.f32 1.442695, %v2513_v53 }
 0x3b6   : > { %v2533_v19 = vmul.f32 1.442695, %v2532_v54  ;;  %v2552_v21 = vmul.f32 1.442695, %v2551_v56  ;;  %v2571_v1 = vmul.f32 1.442695, %v2570_v57 }
 0x3b7   : > { %6876 = vpow2.f32 %v2476_v3  ;;  %v2590_v31 = vmul.f32 1.442695, %v2589_v59  ;;  %v2609_v4 = vmul.f32 1.442695, %v2608_v61 }
 0x3b8   : > { %6878 = vpow2.f32 %v2495_v50 }
 0x3b9   : > { %6880 = vpow2.f32 %v2514_v17 }
 0x3ba   : > { %6882 = vpow2.f32 %v2533_v19 }
 0x3bb   : > { %6884 = vpow2.f32 %v2552_v21 }
 0x3bc   : > { %6886 = vpow2.f32 %v2571_v1 }
 0x3bd   : > { %6888 = vpow2.f32 %v2590_v31 }
 0x3be   : > { %6890 = vpow2.f32 %v2609_v4 }
 0x3c1   : > { %v6877_v13 = vpop.eup %6876 }
 0x3c2   : > { %v6879_v7 = vpop.eup %6878  ;;  %v2478_v12 = vrot.slane %v6877_v13, 4 }
 0x3c3   : > { %v6881_v63 = vpop.eup %6880  ;;  %v2497_v22 = vrot.slane %v6879_v7, 4 }
 0x3c4   : > { %v6883_v28 = vpop.eup %6882  ;;  %v2479_v32 = vadd.f32 %v6877_v13, %v2478_v12  ;;  %v2516_v14 = vrot.slane %v6881_v63, 4 }
 0x3c5   : > { %v6885_v44 = vpop.eup %6884  ;;  %v2498_v18 = vadd.f32 %v6879_v7, %v2497_v22  ;;  %v2535_v29 = vrot.slane %v6883_v28, 4 }
 0x3c6   : > { %v6887_v23 = vpop.eup %6886  ;;  %v2480_v47 = vrot.slane %v2479_v32, 2  ;;  %v2517_v24 = vadd.f32 %v6881_v63, %v2516_v14  ;;  %v2554_v25 = vrot.slane %v6885_v44, 4 }
 0x3c7   : > { %v6889_v37 = vpop.eup %6888  ;;  %v2499_v49 = vrot.slane %v2498_v18, 2  ;;  %v2536_v10 = vadd.f32 %v6883_v28, %v2535_v29  ;;  %v2573_v55 = vrot.slane %v6887_v23, 4 }
 0x3c8   : > { %v6891_v15 = vpop.eup %6890  ;;  %v2481_v30 = vadd.f32 %v2480_v47, %v2479_v32  ;;  %v2518_v16 = vrot.slane %v2517_v24, 2  ;;  %v2555_v33 = vadd.f32 %v6885_v44, %v2554_v25  ;;  %v2592_v0 = vrot.slane %v6889_v37, 4 }
 0x3c9   : > { %v2500_v39 = vadd.f32 %v2499_v49, %v2498_v18  ;;  %v2537_v26 = vrot.slane %v2536_v10, 2  ;;  %v2574_v38 = vadd.f32 %v6887_v23, %v2573_v55  ;;  %v2611_v40 = vrot.slane %v6891_v15, 4 }
 0x3ca   : > { %v2482_v41 = vrot.slane %v2481_v30, 1  ;;  %v2519_v60 = vadd.f32 %v2518_v16, %v2517_v24  ;;  %v2556_v42 = vrot.slane %v2555_v33, 2  ;;  %v2593_v45 = vadd.f32 %v6889_v37, %v2592_v0 }
 0x3cb   : > { %v2501_v52 = vrot.slane %v2500_v39, 1  ;;  %v2538_v48 = vadd.f32 %v2537_v26, %v2536_v10  ;;  %v2575_v53 = vrot.slane %v2574_v38, 2  ;;  %v2612_v54 = vadd.f32 %v6891_v15, %v2611_v40 }
 0x3cc   : > { %v2483_v56 = vadd.f32 %v2482_v41, %v2481_v30  ;;  %v2520_v57 = vrot.slane %v2519_v60, 1  ;;  %v2557_v3 = vadd.f32 %v2556_v42, %v2555_v33  ;;  %v2594_v50 = vrot.slane %v2593_v45, 2 }
 0x3cd   : > { %v2502_v17 = vadd.f32 %v2501_v52, %v2500_v39  ;;  %v2539_v59 = vrot.slane %v2538_v48, 1  ;;  %v2576_v19 = vadd.f32 %v2575_v53, %v2574_v38  ;;  %v2613_v61 = vrot.slane %v2612_v54, 2 }
 0x3ce   : > { %6892 = vlog2.f32 %v2483_v56  ;;  %v2521_v21 = vadd.f32 %v2520_v57, %v2519_v60  ;;  %v2558_v1 = vrot.slane %v2557_v3, 1  ;;  %v2595_v31 = vadd.f32 %v2594_v50, %v2593_v45 }
 0x3cf   : > { %6894 = vlog2.f32 %v2502_v17  ;;  %v2540_v4 = vadd.f32 %v2539_v59, %v2538_v48  ;;  %v2577_v13 = vrot.slane %v2576_v19, 1  ;;  %v2614_v7 = vadd.f32 %v2613_v61, %v2612_v54 }
 0x3d0   : > { %6896 = vlog2.f32 %v2521_v21  ;;  %v2559_v12 = vadd.f32 %v2558_v1, %v2557_v3  ;;  %v2596_v63 = vrot.slane %v2595_v31, 1 }
 0x3d1   : > { %6898 = vlog2.f32 %v2540_v4  ;;  %v2578_v22 = vadd.f32 %v2577_v13, %v2576_v19  ;;  %v2615_v28 = vrot.slane %v2614_v7, 1 }
 0x3d2   : > { %6900 = vlog2.f32 %v2559_v12  ;;  %v2597_v32 = vadd.f32 %v2596_v63, %v2595_v31 }
 0x3d3   : > { %6902 = vlog2.f32 %v2578_v22  ;;  %v2616_v14 = vadd.f32 %v2615_v28, %v2614_v7 }
 0x3d4   : > { %6904 = vlog2.f32 %v2597_v32 }
 0x3d5   : > { %6906 = vlog2.f32 %v2616_v14 }
 0x3d8   : > { %v6893_v44 = vpop.eup %6892 }
 0x3d9   : > { %v6895_v18 = vpop.eup %6894  ;;  %v2485_v29 = vmul.f32 0.6931472, %v6893_v44 }
 0x3da   : > { %v6897_v23 = vpop.eup %6896  ;;  %v2504_v47 = vmul.f32 0.6931472, %v6895_v18 }
 0x3db   : > { %v6899_v24 = vpop.eup %6898  ;;  %v2486_v25 = vadd.f32 %v2485_v29, %v8090_v43  ;;  %v2523_v37 = vmul.f32 0.6931472, %v6897_v23 }
 0x3dc   : > { %v6901_v49 = vpop.eup %6900  ;;  %v2505_v10 = vadd.f32 %v2504_v47, %v8092_v6  ;;  %v2542_v55 = vmul.f32 0.6931472, %v6899_v24 }
 0x3dd   : > { %v6903_v15 = vpop.eup %6902  ;;  %v8125_v30 = vsub.f32 %v8056_v5, %v2486_v25  ;;  %v2524_v16 = vadd.f32 %v2523_v37, %v8094_v46  ;;  %v2561_v33 = vmul.f32 0.6931472, %v6901_v49 }
 0x3de   : > { %v6905_v0 = vpop.eup %6904  ;;  %v8129_v39 = vsub.f32 %v8059_v58, %v2505_v10  ;;  %v2543_v26 = vadd.f32 %v2542_v55, %v8096_v36  ;;  %v2580_v38 = vmul.f32 0.6931472, %v6903_v15 }
 0x3df   : > { %v6907_v43 = vpop.eup %6906  ;;  %v8133_v40 = vsub.f32 %v8062_v20, %v2524_v16  ;;  %v2562_v6 = vadd.f32 %v2561_v33, %v8098_v62  ;;  %v2599_v41 = vmul.f32 0.6931472, %v6905_v0 }
 0x3e0   : > { %v2544_v5 = vsub.f32 %v8064_v34, %v2543_v26  ;;  %v2581_v60 = vadd.f32 %v2580_v38, %v8100_v51  ;;  %v2618_v46 = vmul.f32 0.6931472, %v6907_v43  ;;  %v2621_v42 = vmax.f32 %v8125_v30, %v8129_v39 }
 0x3e1   : > { %v2563_v58 = vsub.f32 %v8066_v35, %v2562_v6  ;;  %v2600_v36 = vadd.f32 %v2599_v41, %v8102_v27 }
 0x3e2   : > { %v2582_v45 = vsub.f32 %v8068_v8, %v2581_v60  ;;  %v2619_v20 = vadd.f32 %v2618_v46, %v8104_v2  ;;  %v2622_v52 = vmax.f32 %v8133_v40, %v2544_v5 }
 0x3e3   : > { %v2601_v62 = vsub.f32 %v8070_v9, %v2600_v36 }
 0x3e4   : > { %v2620_v34 = vsub.f32 %v8072_v11, %v2619_v20  ;;  %v2623_v48 = vmax.f32 %v2563_v58, %v2582_v45  ;;  %v2625_v51 = vmax.f32 %v2621_v42, %v2622_v52 }
 0x3e6   : > { %v2624_v53 = vmax.f32 %v2601_v62, %v2620_v34 }
 0x3e8   : > { %v2626_v54 = vmax.f32 %v2623_v48, %v2624_v53 }
 0x3ea   : > { %v2627_v56 = vmax.f32 %v2625_v51, %v2626_v54 }
 0x3ec   : > { %v2628_v57 = vsub.f32 %v8125_v30, %v2627_v56  ;;  %v2631_v35 = vsub.f32 %v8129_v39, %v2627_v56  ;;  %v2634_v27 = vsub.f32 %v8133_v40, %v2627_v56  ;;  %v2637_v8 = vsub.f32 %v2544_v5, %v2627_v56 }
 0x3ed   : > { %v2640_v3 = vsub.f32 %v2563_v58, %v2627_v56  ;;  %v2643_v2 = vsub.f32 %v2582_v45, %v2627_v56  ;;  %v2646_v50 = vsub.f32 %v2601_v62, %v2627_v56  ;;  %v2649_v17 = vsub.f32 %v2620_v34, %v2627_v56 }
 0x3ee   : > { %v2629_v59 = vmul.f32 1.442695, %v2628_v57  ;;  %v2632_v9 = vmul.f32 1.442695, %v2631_v35  ;;  %v2635_v19 = vmul.f32 1.442695, %v2634_v27 }
 0x3ef   : > { %v2638_v11 = vmul.f32 1.442695, %v2637_v8  ;;  %v2641_v61 = vmul.f32 1.442695, %v2640_v3  ;;  %v2644_v21 = vmul.f32 1.442695, %v2643_v2 }
 0x3f0   : > { %6908 = vpow2.f32 %v2629_v59  ;;  %v2647_v1 = vmul.f32 1.442695, %v2646_v50  ;;  %v2650_v31 = vmul.f32 1.442695, %v2649_v17 }
 0x3f1   : > { %6910 = vpow2.f32 %v2632_v9 }
 0x3f2   : > { %6912 = vpow2.f32 %v2635_v19 }
 0x3f3   : > { %6914 = vpow2.f32 %v2638_v11 }
 0x3f4   : > { %6916 = vpow2.f32 %v2641_v61 }
 0x3f5   : > { %6918 = vpow2.f32 %v2644_v21 }
 0x3f6   : > { %6920 = vpow2.f32 %v2647_v1 }
 0x3f7   : > { %6922 = vpow2.f32 %v2650_v31 }
 0x3fa   : > { %v6909_v4 = vpop.eup %6908 }
 0x3fb   : > { %v6911_v13 = vpop.eup %6910 }
 0x3fc   : > { %v6913_v7 = vpop.eup %6912  ;;  %v2652_v12 = vadd.f32 %v6911_v13, %v6909_v4 }
 0x3fd   : > { %v6915_v63 = vpop.eup %6914 }
 0x3fe   : > { %v6917_v22 = vpop.eup %6916  ;;  %v2653_v28 = vadd.f32 %v6915_v63, %v6913_v7 }
 0x3ff   : > { %v6919_v32 = vpop.eup %6918 }
 0x400   : > { %v6921_v14 = vpop.eup %6920  ;;  %v2654_v44 = vadd.f32 %v6919_v32, %v6917_v22  ;;  %v2656_v18 = vadd.f32 %v2653_v28, %v2652_v12 }
 0x401   : > { %v6923_v29 = vpop.eup %6922 }
 0x402   : > { %v2655_v23 = vadd.f32 %v6923_v29, %v6921_v14 }
 0x404   : > { %v2657_v47 = vadd.f32 %v2655_v23, %v2654_v44 }
 0x406   : > { %v2658_v24 = vadd.f32 %v2657_v47, %v2656_v18 }
 0x408   : > { %6924 = vlog2.f32 %v2658_v24 }
 0x412   : > { %v6925_v25 = vpop.eup %6924 }
 0x413   : > { %v2660_v37 = vmul.f32 0.6931472, %v6925_v25 }
 0x415   : > { %v2661_v49 = vadd.f32 %v2660_v37, %v2627_v56 }
 0x417   : > { %v8151_v10 = vsub.f32 %v8125_v30, %v2661_v49  ;;  %v8154_v55 = vsub.f32 %v8129_v39, %v2661_v49  ;;  %v8157_v15 = vsub.f32 %v8133_v40, %v2661_v49  ;;  %v8159_v16 = vsub.f32 %v2544_v5, %v2661_v49 }
 0x418   : > { %v8161_v33 = vsub.f32 %v2563_v58, %v2661_v49  ;;  %v8163_v0 = vsub.f32 %v2582_v45, %v2661_v49  ;;  %v8165_v26 = vsub.f32 %v2601_v62, %v2661_v49  ;;  %v8167_v38 = vsub.f32 %v2620_v34, %v2661_v49 }
 0x419   : > { %v2670_v43 = vrot.slane %v8151_v10, 4  ;;  %v2689_v30 = vrot.slane %v8154_v55, 4  ;;  %v2708_v39 = vrot.slane %v8157_v15, 4  ;;  %v2727_v6 = vrot.slane %v8159_v16, 4 }
 0x41a   : > { %v2746_v40 = vrot.slane %v8161_v33, 4  ;;  %v2765_v41 = vrot.slane %v8163_v0, 4  ;;  %v2784_v5 = vrot.slane %v8165_v26, 4  ;;  %v2803_v60 = vrot.slane %v8167_v38, 4 }
 0x41b   : > { %v2671_v46 = vmax.f32 %v8151_v10, %v2670_v43  ;;  %v2690_v42 = vmax.f32 %v8154_v55, %v2689_v30  ;;  %v2709_v58 = vmax.f32 %v8157_v15, %v2708_v39  ;;  %v2728_v36 = vmax.f32 %v8159_v16, %v2727_v6 }
 0x41c   : > { %v2747_v45 = vmax.f32 %v8161_v33, %v2746_v40  ;;  %v2766_v20 = vmax.f32 %v8163_v0, %v2765_v41  ;;  %v2785_v52 = vmax.f32 %v8165_v26, %v2784_v5  ;;  %v2804_v62 = vmax.f32 %v8167_v38, %v2803_v60 }
 0x41d   : > { %v2672_v34 = vrot.slane %v2671_v46, 2  ;;  %v2691_v48 = vrot.slane %v2690_v42, 2  ;;  %v2710_v51 = vrot.slane %v2709_v58, 2  ;;  %v2729_v53 = vrot.slane %v2728_v36, 2 }
 0x41e   : > { %v2748_v54 = vrot.slane %v2747_v45, 2  ;;  %v2767_v56 = vrot.slane %v2766_v20, 2  ;;  %v2786_v57 = vrot.slane %v2785_v52, 2  ;;  %v2805_v35 = vrot.slane %v2804_v62, 2 }
 0x41f   : > { %v2673_v27 = vmax.f32 %v2671_v46, %v2672_v34  ;;  %v2692_v8 = vmax.f32 %v2690_v42, %v2691_v48  ;;  %v2711_v3 = vmax.f32 %v2709_v58, %v2710_v51  ;;  %v2730_v2 = vmax.f32 %v2728_v36, %v2729_v53 }
 0x420   : > { %v2749_v50 = vmax.f32 %v2747_v45, %v2748_v54  ;;  %v2768_v17 = vmax.f32 %v2766_v20, %v2767_v56  ;;  %v2787_v59 = vmax.f32 %v2785_v52, %v2786_v57  ;;  %v2806_v9 = vmax.f32 %v2804_v62, %v2805_v35 }
 0x421   : > { %v2674_v19 = vrot.slane %v2673_v27, 1  ;;  %v2693_v11 = vrot.slane %v2692_v8, 1  ;;  %v2712_v61 = vrot.slane %v2711_v3, 1  ;;  %v2731_v21 = vrot.slane %v2730_v2, 1 }
 0x422   : > { %v2750_v1 = vrot.slane %v2749_v50, 1  ;;  %v2769_v31 = vrot.slane %v2768_v17, 1  ;;  %v2788_v4 = vrot.slane %v2787_v59, 1  ;;  %v2807_v13 = vrot.slane %v2806_v9, 1 }
 0x423   : > { %v8185_v7 = vmax.f32 %v2673_v27, %v2674_v19  ;;  %v8187_v12 = vmax.f32 %v2692_v8, %v2693_v11  ;;  %v8189_v63 = vmax.f32 %v2711_v3, %v2712_v61  ;;  %v8191_v22 = vmax.f32 %v2730_v2, %v2731_v21 }
 0x424   : > { %v8193_v28 = vmax.f32 %v2749_v50, %v2750_v1  ;;  %v8195_v32 = vmax.f32 %v2768_v17, %v2769_v31  ;;  %v8197_v14 = vmax.f32 %v2787_v59, %v2788_v4  ;;  %v8199_v44 = vmax.f32 %v2806_v9, %v2807_v13 }
 0x425   : > { %v2676_v18 = vsub.f32 %v8151_v10, %v8185_v7  ;;  %v2695_v29 = vsub.f32 %v8154_v55, %v8187_v12  ;;  %v2714_v23 = vsub.f32 %v8157_v15, %v8189_v63  ;;  %v2733_v47 = vsub.f32 %v8159_v16, %v8191_v22 }
 0x426   : > { %v2752_v24 = vsub.f32 %v8161_v33, %v8193_v28  ;;  %v2771_v25 = vsub.f32 %v8163_v0, %v8195_v32  ;;  %v2790_v30 = vsub.f32 %v8165_v26, %v8197_v14  ;;  %v2809_v6 = vsub.f32 %v8167_v38, %v8199_v44 }
 0x427   : > { %v2677_v37 = vmul.f32 1.442695, %v2676_v18  ;;  %v2696_v49 = vmul.f32 1.442695, %v2695_v29  ;;  %v2715_v43 = vmul.f32 1.442695, %v2714_v23 }
 0x428   : > { %v2734_v39 = vmul.f32 1.442695, %v2733_v47  ;;  %v2753_v40 = vmul.f32 1.442695, %v2752_v24  ;;  %v2772_v41 = vmul.f32 1.442695, %v2771_v25 }
 0x429   : > { %6926 = vpow2.f32 %v2677_v37  ;;  %v2791_v5 = vmul.f32 1.442695, %v2790_v30  ;;  %v2810_v60 = vmul.f32 1.442695, %v2809_v6 }
 0x42a   : > { %6928 = vpow2.f32 %v2696_v49 }
 0x42b   : > { %6930 = vpow2.f32 %v2715_v43 }
 0x42c   : > { %6932 = vpow2.f32 %v2734_v39 }
 0x42d   : > { %6934 = vpow2.f32 %v2753_v40 }
 0x42e   : > { %6936 = vpow2.f32 %v2772_v41 }
 0x42f   : > { %6938 = vpow2.f32 %v2791_v5 }
 0x430   : > { %6940 = vpow2.f32 %v2810_v60 }
 0x433   : > { %v6927_v46 = vpop.eup %6926 }
 0x434   : > { %v6929_v42 = vpop.eup %6928  ;;  %v2679_v58 = vrot.slane %v6927_v46, 4 }
 0x435   : > { %v6931_v36 = vpop.eup %6930  ;;  %v2698_v45 = vrot.slane %v6929_v42, 4 }
 0x436   : > { %v6933_v20 = vpop.eup %6932  ;;  %v2680_v52 = vadd.f32 %v6927_v46, %v2679_v58  ;;  %v2717_v62 = vrot.slane %v6931_v36, 4 }
 0x437   : > { %v6935_v34 = vpop.eup %6934  ;;  %v2699_v48 = vadd.f32 %v6929_v42, %v2698_v45  ;;  %v2736_v51 = vrot.slane %v6933_v20, 4 }
 0x438   : > { %v6937_v53 = vpop.eup %6936  ;;  %v2681_v54 = vrot.slane %v2680_v52, 2  ;;  %v2718_v56 = vadd.f32 %v6931_v36, %v2717_v62  ;;  %v2755_v57 = vrot.slane %v6935_v34, 4 }
 0x439   : > { %v6939_v35 = vpop.eup %6938  ;;  %v2700_v27 = vrot.slane %v2699_v48, 2  ;;  %v2737_v8 = vadd.f32 %v6933_v20, %v2736_v51  ;;  %v2774_v3 = vrot.slane %v6937_v53, 4 }
 0x43a   : > { %v6941_v2 = vpop.eup %6940  ;;  %v2682_v50 = vadd.f32 %v2681_v54, %v2680_v52  ;;  %v2719_v17 = vrot.slane %v2718_v56, 2  ;;  %v2756_v59 = vadd.f32 %v6935_v34, %v2755_v57  ;;  %v2793_v9 = vrot.slane %v6939_v35, 4 }
 0x43b   : > { %v2701_v19 = vadd.f32 %v2700_v27, %v2699_v48  ;;  %v2738_v11 = vrot.slane %v2737_v8, 2  ;;  %v2775_v61 = vadd.f32 %v6937_v53, %v2774_v3  ;;  %v2812_v21 = vrot.slane %v6941_v2, 4 }
 0x43c   : > { %v2683_v1 = vrot.slane %v2682_v50, 1  ;;  %v2720_v31 = vadd.f32 %v2719_v17, %v2718_v56  ;;  %v2757_v4 = vrot.slane %v2756_v59, 2  ;;  %v2794_v13 = vadd.f32 %v6939_v35, %v2793_v9 }
 0x43d   : > { %v2702_v18 = vrot.slane %v2701_v19, 1  ;;  %v2739_v29 = vadd.f32 %v2738_v11, %v2737_v8  ;;  %v2776_v23 = vrot.slane %v2775_v61, 2  ;;  %v2813_v47 = vadd.f32 %v6941_v2, %v2812_v21 }
 0x43e   : > { %v2684_v24 = vadd.f32 %v2683_v1, %v2682_v50  ;;  %v2721_v25 = vrot.slane %v2720_v31, 1  ;;  %v2758_v37 = vadd.f32 %v2757_v4, %v2756_v59  ;;  %v2795_v49 = vrot.slane %v2794_v13, 2 }
 0x43f   : > { %v2703_v43 = vadd.f32 %v2702_v18, %v2701_v19  ;;  %v2740_v30 = vrot.slane %v2739_v29, 1  ;;  %v2777_v39 = vadd.f32 %v2776_v23, %v2775_v61  ;;  %v2814_v6 = vrot.slane %v2813_v47, 2 }
 0x440   : > { %6942 = vlog2.f32 %v2684_v24  ;;  %v2722_v40 = vadd.f32 %v2721_v25, %v2720_v31  ;;  %v2759_v41 = vrot.slane %v2758_v37, 1  ;;  %v2796_v5 = vadd.f32 %v2795_v49, %v2794_v13 }
 0x441   : > { %6944 = vlog2.f32 %v2703_v43  ;;  %v2741_v60 = vadd.f32 %v2740_v30, %v2739_v29  ;;  %v2778_v46 = vrot.slane %v2777_v39, 1  ;;  %v2815_v42 = vadd.f32 %v2814_v6, %v2813_v47 }
 0x442   : > { %6946 = vlog2.f32 %v2722_v40  ;;  %v2760_v58 = vadd.f32 %v2759_v41, %v2758_v37  ;;  %v2797_v36 = vrot.slane %v2796_v5, 1 }
 0x443   : > { %6948 = vlog2.f32 %v2741_v60  ;;  %v2779_v45 = vadd.f32 %v2778_v46, %v2777_v39  ;;  %v2816_v20 = vrot.slane %v2815_v42, 1 }
 0x444   : > { %6950 = vlog2.f32 %v2760_v58  ;;  %v2798_v52 = vadd.f32 %v2797_v36, %v2796_v5 }
 0x445   : > { %6952 = vlog2.f32 %v2779_v45  ;;  %v2817_v62 = vadd.f32 %v2816_v20, %v2815_v42 }
 0x446   : > { %6954 = vlog2.f32 %v2798_v52 }
 0x447   : > { %6956 = vlog2.f32 %v2817_v62 }
 0x44a   : > { %v6943_v34 = vpop.eup %6942 }
 0x44b   : > { %v6945_v48 = vpop.eup %6944  ;;  %v2686_v51 = vmul.f32 0.6931472, %v6943_v34 }
 0x44c   : > { %v6947_v53 = vpop.eup %6946  ;;  %v2705_v54 = vmul.f32 0.6931472, %v6945_v48 }
 0x44d   : > { %v6949_v56 = vpop.eup %6948  ;;  %v2687_v57 = vadd.f32 %v2686_v51, %v8185_v7  ;;  %v2724_v35 = vmul.f32 0.6931472, %v6947_v53 }
 0x44e   : > { %v6951_v27 = vpop.eup %6950  ;;  %v2706_v8 = vadd.f32 %v2705_v54, %v8187_v12  ;;  %v2743_v3 = vmul.f32 0.6931472, %v6949_v56 }
 0x44f   : > { %v6953_v2 = vpop.eup %6952  ;;  %v8220_v50 = vsub.f32 %v8151_v10, %v2687_v57  ;;  %v2725_v17 = vadd.f32 %v2724_v35, %v8189_v63  ;;  %v2762_v59 = vmul.f32 0.6931472, %v6951_v27 }
 0x450   : > { %v6955_v9 = vpop.eup %6954  ;;  %v8224_v19 = vsub.f32 %v8154_v55, %v2706_v8  ;;  %v2744_v11 = vadd.f32 %v2743_v3, %v8191_v22  ;;  %v2781_v61 = vmul.f32 0.6931472, %v6953_v2 }
 0x451   : > { %v6957_v7 = vpop.eup %6956  ;;  %v8228_v21 = vsub.f32 %v8157_v15, %v2725_v17  ;;  %v2763_v12 = vadd.f32 %v2762_v59, %v8193_v28  ;;  %v2800_v1 = vmul.f32 0.6931472, %v6955_v9 }
 0x452   : > { %v2745_v10 = vsub.f32 %v8159_v16, %v2744_v11  ;;  %v2782_v31 = vadd.f32 %v2781_v61, %v8195_v32  ;;  %v2819_v63 = vmul.f32 0.6931472, %v6957_v7  ;;  %v2822_v4 = vmax.f32 %v8220_v50, %v8224_v19 }
 0x453   : > { %v2764_v55 = vsub.f32 %v8161_v33, %v2763_v12  ;;  %v2801_v22 = vadd.f32 %v2800_v1, %v8197_v14 }
 0x454   : > { %v2783_v13 = vsub.f32 %v8163_v0, %v2782_v31  ;;  %v2820_v15 = vadd.f32 %v2819_v63, %v8199_v44  ;;  %v2823_v18 = vmax.f32 %v8228_v21, %v2745_v10 }
 0x455   : > { %v2802_v28 = vsub.f32 %v8165_v26, %v2801_v22 }
 0x456   : > { %v2821_v16 = vsub.f32 %v8167_v38, %v2820_v15  ;;  %v2824_v29 = vmax.f32 %v2764_v55, %v2783_v13  ;;  %v2826_v32 = vmax.f32 %v2822_v4, %v2823_v18 }
 0x458   : > { %v2825_v23 = vmax.f32 %v2802_v28, %v2821_v16 }
 0x45a   : > { %v2827_v47 = vmax.f32 %v2824_v29, %v2825_v23 }
 0x45c   : > { %v2828_v24 = vmax.f32 %v2826_v32, %v2827_v47 }
 0x45e   : > { %v2829_v25 = vsub.f32 %v8220_v50, %v2828_v24  ;;  %v2832_v33 = vsub.f32 %v8224_v19, %v2828_v24  ;;  %v2835_v14 = vsub.f32 %v8228_v21, %v2828_v24  ;;  %v2838_v0 = vsub.f32 %v2745_v10, %v2828_v24 }
 0x45f   : > { %v2841_v37 = vsub.f32 %v2764_v55, %v2828_v24  ;;  %v2844_v44 = vsub.f32 %v2783_v13, %v2828_v24  ;;  %v2847_v49 = vsub.f32 %v2802_v28, %v2828_v24  ;;  %v2850_v43 = vsub.f32 %v2821_v16, %v2828_v24 }
 0x460   : > { %v2830_v30 = vmul.f32 1.442695, %v2829_v25  ;;  %v2833_v26 = vmul.f32 1.442695, %v2832_v33  ;;  %v2836_v39 = vmul.f32 1.442695, %v2835_v14 }
 0x461   : > { %v2839_v38 = vmul.f32 1.442695, %v2838_v0  ;;  %v2842_v6 = vmul.f32 1.442695, %v2841_v37  ;;  %v2845_v40 = vmul.f32 1.442695, %v2844_v44 }
 0x462   : > { %6958 = vpow2.f32 %v2830_v30  ;;  %v2848_v41 = vmul.f32 1.442695, %v2847_v49  ;;  %v2851_v5 = vmul.f32 1.442695, %v2850_v43 }
 0x463   : > { %6960 = vpow2.f32 %v2833_v26 }
 0x464   : > { %6962 = vpow2.f32 %v2836_v39 }
 0x465   : > { %6964 = vpow2.f32 %v2839_v38 }
 0x466   : > { %6966 = vpow2.f32 %v2842_v6 }
 0x467   : > { %6968 = vpow2.f32 %v2845_v40 }
 0x468   : > { %6970 = vpow2.f32 %v2848_v41 }
 0x469   : > { %6972 = vpow2.f32 %v2851_v5 }
 0x46c   : > { %v6959_v60 = vpop.eup %6958 }
 0x46d   : > { %v6961_v46 = vpop.eup %6960 }
 0x46e   : > { %v6963_v42 = vpop.eup %6962  ;;  %v2853_v58 = vadd.f32 %v6961_v46, %v6959_v60 }
 0x46f   : > { %v6965_v36 = vpop.eup %6964 }
 0x470   : > { %v6967_v45 = vpop.eup %6966  ;;  %v2854_v20 = vadd.f32 %v6965_v36, %v6963_v42 }
 0x471   : > { %v6969_v52 = vpop.eup %6968 }
 0x472   : > { %v6971_v62 = vpop.eup %6970  ;;  %v2855_v34 = vadd.f32 %v6969_v52, %v6967_v45  ;;  %v2857_v48 = vadd.f32 %v2854_v20, %v2853_v58 }
 0x473   : > { %v6973_v51 = vpop.eup %6972 }
 0x474   : > { %v2856_v53 = vadd.f32 %v6973_v51, %v6971_v62 }
 0x476   : > { %v2858_v54 = vadd.f32 %v2856_v53, %v2855_v34 }
 0x478   : > { %v2859_v56 = vadd.f32 %v2858_v54, %v2857_v48 }
 0x47a   : > { %6974 = vlog2.f32 %v2859_v56 }
 0x484   : > { %v6975_v57 = vpop.eup %6974 }
 0x485   : > { %v2861_v35 = vmul.f32 0.6931472, %v6975_v57 }
 0x487   : > { %v2862_v27 = vadd.f32 %v2861_v35, %v2828_v24 }
 0x489   : > { %v8246_v8 = vsub.f32 %v8220_v50, %v2862_v27  ;;  %v8249_v3 = vsub.f32 %v8224_v19, %v2862_v27  ;;  %v8252_v2 = vsub.f32 %v8228_v21, %v2862_v27  ;;  %v8254_v17 = vsub.f32 %v2745_v10, %v2862_v27 }
 0x48a   : > { %v8256_v59 = vsub.f32 %v2764_v55, %v2862_v27  ;;  %v8258_v9 = vsub.f32 %v2783_v13, %v2862_v27  ;;  %v8260_v11 = vsub.f32 %v2802_v28, %v2862_v27  ;;  %v8262_v61 = vsub.f32 %v2821_v16, %v2862_v27 }
 0x48b   : > { %v2871_v7 = vrot.slane %v8246_v8, 4  ;;  %v2890_v50 = vrot.slane %v8249_v3, 4  ;;  %v2909_v19 = vrot.slane %v8252_v2, 4  ;;  %v2928_v12 = vrot.slane %v8254_v17, 4 }
 0x48c   : > { %v2947_v21 = vrot.slane %v8256_v59, 4  ;;  %v2966_v1 = vrot.slane %v8258_v9, 4  ;;  %v2985_v10 = vrot.slane %v8260_v11, 4  ;;  %v3004_v31 = vrot.slane %v8262_v61, 4 }
 0x48d   : > { %v2872_v63 = vmax.f32 %v8246_v8, %v2871_v7  ;;  %v2891_v4 = vmax.f32 %v8249_v3, %v2890_v50  ;;  %v2910_v55 = vmax.f32 %v8252_v2, %v2909_v19  ;;  %v2929_v22 = vmax.f32 %v8254_v17, %v2928_v12 }
 0x48e   : > { %v2948_v13 = vmax.f32 %v8256_v59, %v2947_v21  ;;  %v2967_v15 = vmax.f32 %v8258_v9, %v2966_v1  ;;  %v2986_v18 = vmax.f32 %v8260_v11, %v2985_v10  ;;  %v3005_v28 = vmax.f32 %v8262_v61, %v3004_v31 }
 0x48f   : > { %v2873_v16 = vrot.slane %v2872_v63, 2  ;;  %v2892_v29 = vrot.slane %v2891_v4, 2  ;;  %v2911_v32 = vrot.slane %v2910_v55, 2  ;;  %v2930_v23 = vrot.slane %v2929_v22, 2 }
 0x490   : > { %v2949_v47 = vrot.slane %v2948_v13, 2  ;;  %v2968_v24 = vrot.slane %v2967_v15, 2  ;;  %v2987_v25 = vrot.slane %v2986_v18, 2  ;;  %v3006_v33 = vrot.slane %v3005_v28, 2 }
 0x491   : > { %v2874_v14 = vmax.f32 %v2872_v63, %v2873_v16  ;;  %v2893_v0 = vmax.f32 %v2891_v4, %v2892_v29  ;;  %v2912_v37 = vmax.f32 %v2910_v55, %v2911_v32  ;;  %v2931_v44 = vmax.f32 %v2929_v22, %v2930_v23 }
 0x492   : > { %v2950_v49 = vmax.f32 %v2948_v13, %v2949_v47  ;;  %v2969_v43 = vmax.f32 %v2967_v15, %v2968_v24  ;;  %v2988_v30 = vmax.f32 %v2986_v18, %v2987_v25  ;;  %v3007_v26 = vmax.f32 %v3005_v28, %v3006_v33 }
 0x493   : > { %v2875_v39 = vrot.slane %v2874_v14, 1  ;;  %v2894_v38 = vrot.slane %v2893_v0, 1  ;;  %v2913_v6 = vrot.slane %v2912_v37, 1  ;;  %v2932_v40 = vrot.slane %v2931_v44, 1 }
 0x494   : > { %v2951_v41 = vrot.slane %v2950_v49, 1  ;;  %v2970_v5 = vrot.slane %v2969_v43, 1  ;;  %v2989_v60 = vrot.slane %v2988_v30, 1  ;;  %v3008_v46 = vrot.slane %v3007_v26, 1 }
 0x495   : > { %v8280_v42 = vmax.f32 %v2874_v14, %v2875_v39  ;;  %v8282_v58 = vmax.f32 %v2893_v0, %v2894_v38  ;;  %v8284_v36 = vmax.f32 %v2912_v37, %v2913_v6  ;;  %v8286_v45 = vmax.f32 %v2931_v44, %v2932_v40 }
 0x496   : > { %v8288_v20 = vmax.f32 %v2950_v49, %v2951_v41  ;;  %v8290_v52 = vmax.f32 %v2969_v43, %v2970_v5  ;;  %v8292_v62 = vmax.f32 %v2988_v30, %v2989_v60  ;;  %v8294_v34 = vmax.f32 %v3007_v26, %v3008_v46 }
 0x497   : > { %v2877_v48 = vsub.f32 %v8246_v8, %v8280_v42  ;;  %v2896_v51 = vsub.f32 %v8249_v3, %v8282_v58  ;;  %v2915_v53 = vsub.f32 %v8252_v2, %v8284_v36  ;;  %v2934_v54 = vsub.f32 %v8254_v17, %v8286_v45 }
 0x498   : > { %v2953_v56 = vsub.f32 %v8256_v59, %v8288_v20  ;;  %v2972_v57 = vsub.f32 %v8258_v9, %v8290_v52  ;;  %v2991_v50 = vsub.f32 %v8260_v11, %v8292_v62  ;;  %v3010_v12 = vsub.f32 %v8262_v61, %v8294_v34 }
 0x499   : > { %v2878_v35 = vmul.f32 1.442695, %v2877_v48  ;;  %v2897_v27 = vmul.f32 1.442695, %v2896_v51  ;;  %v2916_v7 = vmul.f32 1.442695, %v2915_v53 }
 0x49a   : > { %v2935_v19 = vmul.f32 1.442695, %v2934_v54  ;;  %v2954_v21 = vmul.f32 1.442695, %v2953_v56  ;;  %v2973_v1 = vmul.f32 1.442695, %v2972_v57 }
 0x49b   : > { %6976 = vpow2.f32 %v2878_v35  ;;  %v2992_v10 = vmul.f32 1.442695, %v2991_v50  ;;  %v3011_v31 = vmul.f32 1.442695, %v3010_v12 }
 0x49c   : > { %6978 = vpow2.f32 %v2897_v27 }
 0x49d   : > { %6980 = vpow2.f32 %v2916_v7 }
 0x49e   : > { %6982 = vpow2.f32 %v2935_v19 }
 0x49f   : > { %6984 = vpow2.f32 %v2954_v21 }
 0x4a0   : > { %6986 = vpow2.f32 %v2973_v1 }
 0x4a1   : > { %6988 = vpow2.f32 %v2992_v10 }
 0x4a2   : > { %6990 = vpow2.f32 %v3011_v31 }
 0x4a5   : > { %v6977_v63 = vpop.eup %6976 }
 0x4a6   : > { %v6979_v4 = vpop.eup %6978  ;;  %v2880_v55 = vrot.slane %v6977_v63, 4 }
 0x4a7   : > { %v6981_v22 = vpop.eup %6980  ;;  %v2899_v13 = vrot.slane %v6979_v4, 4 }
 0x4a8   : > { %v6983_v15 = vpop.eup %6982  ;;  %v2881_v18 = vadd.f32 %v6977_v63, %v2880_v55  ;;  %v2918_v28 = vrot.slane %v6981_v22, 4 }
 0x4a9   : > { %v6985_v16 = vpop.eup %6984  ;;  %v2900_v29 = vadd.f32 %v6979_v4, %v2899_v13  ;;  %v2937_v32 = vrot.slane %v6983_v15, 4 }
 0x4aa   : > { %v6987_v23 = vpop.eup %6986  ;;  %v2882_v47 = vrot.slane %v2881_v18, 2  ;;  %v2919_v24 = vadd.f32 %v6981_v22, %v2918_v28  ;;  %v2956_v25 = vrot.slane %v6985_v16, 4 }
 0x4ab   : > { %v6989_v33 = vpop.eup %6988  ;;  %v2901_v14 = vrot.slane %v2900_v29, 2  ;;  %v2938_v0 = vadd.f32 %v6983_v15, %v2937_v32  ;;  %v2975_v37 = vrot.slane %v6987_v23, 4 }
 0x4ac   : > { %v6991_v44 = vpop.eup %6990  ;;  %v2883_v49 = vadd.f32 %v2882_v47, %v2881_v18  ;;  %v2920_v43 = vrot.slane %v2919_v24, 2  ;;  %v2957_v30 = vadd.f32 %v6985_v16, %v2956_v25  ;;  %v2994_v26 = vrot.slane %v6989_v33, 4 }
 0x4ad   : > { %v2902_v39 = vadd.f32 %v2901_v14, %v2900_v29  ;;  %v2939_v38 = vrot.slane %v2938_v0, 2  ;;  %v2976_v6 = vadd.f32 %v6987_v23, %v2975_v37  ;;  %v3013_v40 = vrot.slane %v6991_v44, 4 }
 0x4ae   : > { %v2884_v41 = vrot.slane %v2883_v49, 1  ;;  %v2921_v5 = vadd.f32 %v2920_v43, %v2919_v24  ;;  %v2958_v60 = vrot.slane %v2957_v30, 2  ;;  %v2995_v46 = vadd.f32 %v6989_v33, %v2994_v26 }
 0x4af   : > { %v2903_v48 = vrot.slane %v2902_v39, 1  ;;  %v2940_v51 = vadd.f32 %v2939_v38, %v2938_v0  ;;  %v2977_v53 = vrot.slane %v2976_v6, 2  ;;  %v3014_v54 = vadd.f32 %v6991_v44, %v3013_v40 }
 0x4b0   : > { %v2885_v56 = vadd.f32 %v2884_v41, %v2883_v49  ;;  %v2922_v57 = vrot.slane %v2921_v5, 1  ;;  %v2959_v35 = vadd.f32 %v2958_v60, %v2957_v30  ;;  %v2996_v27 = vrot.slane %v2995_v46, 2 }
 0x4b1   : > { %v2904_v7 = vadd.f32 %v2903_v48, %v2902_v39  ;;  %v2941_v50 = vrot.slane %v2940_v51, 1  ;;  %v2978_v19 = vadd.f32 %v2977_v53, %v2976_v6  ;;  %v3015_v12 = vrot.slane %v3014_v54, 2 }
 0x4b2   : > { %6992 = vlog2.f32 %v2885_v56  ;;  %v2923_v21 = vadd.f32 %v2922_v57, %v2921_v5  ;;  %v2960_v1 = vrot.slane %v2959_v35, 1  ;;  %v2997_v10 = vadd.f32 %v2996_v27, %v2995_v46 }
 0x4b3   : > { %6994 = vlog2.f32 %v2904_v7  ;;  %v2942_v31 = vadd.f32 %v2941_v50, %v2940_v51  ;;  %v2979_v63 = vrot.slane %v2978_v19, 1  ;;  %v3016_v4 = vadd.f32 %v3015_v12, %v3014_v54 }
 0x4b4   : > { %6996 = vlog2.f32 %v2923_v21  ;;  %v2961_v55 = vadd.f32 %v2960_v1, %v2959_v35  ;;  %v2998_v22 = vrot.slane %v2997_v10, 1 }
 0x4b5   : > { %6998 = vlog2.f32 %v2942_v31  ;;  %v2980_v13 = vadd.f32 %v2979_v63, %v2978_v19  ;;  %v3017_v15 = vrot.slane %v3016_v4, 1 }
 0x4b6   : > { %7000 = vlog2.f32 %v2961_v55  ;;  %v2999_v18 = vadd.f32 %v2998_v22, %v2997_v10 }
 0x4b7   : > { %7002 = vlog2.f32 %v2980_v13  ;;  %v3018_v28 = vadd.f32 %v3017_v15, %v3016_v4 }
 0x4b8   : > { %7004 = vlog2.f32 %v2999_v18 }
 0x4b9   : > { %7006 = vlog2.f32 %v3018_v28 }
 0x4bc   : > { %v6993_v16 = vpop.eup %6992 }
 0x4bd   : > { %v6995_v29 = vpop.eup %6994  ;;  %v2887_v32 = vmul.f32 0.6931472, %v6993_v16 }
 0x4be   : > { %v6997_v23 = vpop.eup %6996  ;;  %v2906_v47 = vmul.f32 0.6931472, %v6995_v29 }
 0x4bf   : > { %v6999_v24 = vpop.eup %6998  ;;  %v2888_v25 = vadd.f32 %v2887_v32, %v8280_v42  ;;  %v2925_v33 = vmul.f32 0.6931472, %v6997_v23 }
 0x4c0   : > { %v7001_v14 = vpop.eup %7000  ;;  %v2907_v0 = vadd.f32 %v2906_v47, %v8282_v58  ;;  %v2944_v37 = vmul.f32 0.6931472, %v6999_v24 }
 0x4c1   : > { %v7003_v44 = vpop.eup %7002  ;;  %v8315_v49 = vsub.f32 %v8246_v8, %v2888_v25  ;;  %v2926_v43 = vadd.f32 %v2925_v33, %v8284_v36  ;;  %v2963_v30 = vmul.f32 0.6931472, %v7001_v14 }
 0x4c2   : > { %v7005_v26 = vpop.eup %7004  ;;  %v8319_v39 = vsub.f32 %v8249_v3, %v2907_v0  ;;  %v2945_v38 = vadd.f32 %v2944_v37, %v8286_v45  ;;  %v2982_v6 = vmul.f32 0.6931472, %v7003_v44 }
 0x4c3   : > { %v7007_v42 = vpop.eup %7006  ;;  %v8323_v40 = vsub.f32 %v8252_v2, %v2926_v43  ;;  %v2964_v58 = vadd.f32 %v2963_v30, %v8288_v20  ;;  %v3001_v41 = vmul.f32 0.6931472, %v7005_v26 }
 0x4c4   : > { %v2946_v8 = vsub.f32 %v8254_v17, %v2945_v38  ;;  %v2983_v5 = vadd.f32 %v2982_v6, %v8290_v52  ;;  %v3020_v36 = vmul.f32 0.6931472, %v7007_v42  ;;  %v3023_v60 = vmax.f32 %v8315_v49, %v8319_v39 }
 0x4c5   : > { %v2965_v3 = vsub.f32 %v8256_v59, %v2964_v58  ;;  %v3002_v45 = vadd.f32 %v3001_v41, %v8292_v62 }
 0x4c6   : > { %v2984_v46 = vsub.f32 %v8258_v9, %v2983_v5  ;;  %v3021_v2 = vadd.f32 %v3020_v36, %v8294_v34  ;;  %v3024_v48 = vmax.f32 %v8323_v40, %v2946_v8 }
 0x4c7   : > { %v3003_v20 = vsub.f32 %v8260_v11, %v3002_v45 }
 0x4c8   : > { %v3022_v17 = vsub.f32 %v8262_v61, %v3021_v2  ;;  %v3025_v51 = vmax.f32 %v2965_v3, %v2984_v46  ;;  %v3027_v52 = vmax.f32 %v3023_v60, %v3024_v48 }
 0x4ca   : > { %v3026_v53 = vmax.f32 %v3003_v20, %v3022_v17 }
 0x4cc   : > { %v3028_v54 = vmax.f32 %v3025_v51, %v3026_v53 }
 0x4ce   : > { %v3029_v56 = vmax.f32 %v3027_v52, %v3028_v54 }
 0x4d0   : > { %v3030_v57 = vsub.f32 %v8315_v49, %v3029_v56  ;;  %v3033_v59 = vsub.f32 %v8319_v39, %v3029_v56  ;;  %v3036_v62 = vsub.f32 %v8323_v40, %v3029_v56  ;;  %v3039_v9 = vsub.f32 %v2946_v8, %v3029_v56 }
 0x4d1   : > { %v3042_v35 = vsub.f32 %v2965_v3, %v3029_v56  ;;  %v3045_v34 = vsub.f32 %v2984_v46, %v3029_v56  ;;  %v3048_v27 = vsub.f32 %v3003_v20, %v3029_v56  ;;  %v3051_v7 = vsub.f32 %v3022_v17, %v3029_v56 }
 0x4d2   : > { %v3031_v50 = vmul.f32 1.442695, %v3030_v57  ;;  %v3034_v11 = vmul.f32 1.442695, %v3033_v59  ;;  %v3037_v19 = vmul.f32 1.442695, %v3036_v62 }
 0x4d3   : > { %v3040_v61 = vmul.f32 1.442695, %v3039_v9  ;;  %v3043_v12 = vmul.f32 1.442695, %v3042_v35  ;;  %v3046_v21 = vmul.f32 1.442695, %v3045_v34 }
 0x4d4   : > { %7008 = vpow2.f32 %v3031_v50  ;;  %v3049_v1 = vmul.f32 1.442695, %v3048_v27  ;;  %v3052_v10 = vmul.f32 1.442695, %v3051_v7 }
 0x4d5   : > { %7010 = vpow2.f32 %v3034_v11 }
 0x4d6   : > { %7012 = vpow2.f32 %v3037_v19 }
 0x4d7   : > { %7014 = vpow2.f32 %v3040_v61 }
 0x4d8   : > { %7016 = vpow2.f32 %v3043_v12 }
 0x4d9   : > { %7018 = vpow2.f32 %v3046_v21 }
 0x4da   : > { %7020 = vpow2.f32 %v3049_v1 }
 0x4db   : > { %7022 = vpow2.f32 %v3052_v10 }
 0x4de   : > { %v7009_v31 = vpop.eup %7008 }
 0x4df   : > { %v7011_v63 = vpop.eup %7010 }
 0x4e0   : > { %v7013_v4 = vpop.eup %7012  ;;  %v3054_v55 = vadd.f32 %v7011_v63, %v7009_v31 }
 0x4e1   : > { %v7015_v22 = vpop.eup %7014 }
 0x4e2   : > { %v7017_v13 = vpop.eup %7016  ;;  %v3055_v15 = vadd.f32 %v7015_v22, %v7013_v4 }
 0x4e3   : > { %v7019_v18 = vpop.eup %7018 }
 0x4e4   : > { %v7021_v28 = vpop.eup %7020  ;;  %v3056_v16 = vadd.f32 %v7019_v18, %v7017_v13  ;;  %v3058_v29 = vadd.f32 %v3055_v15, %v3054_v55 }
 0x4e5   : > { %v7023_v32 = vpop.eup %7022 }
 0x4e6   : > { %v3057_v23 = vadd.f32 %v7023_v32, %v7021_v28 }
 0x4e8   : > { %v3059_v47 = vadd.f32 %v3057_v23, %v3056_v16 }
 0x4ea   : > { %v3060_v24 = vadd.f32 %v3059_v47, %v3058_v29 }
 0x4ec   : > { %7024 = vlog2.f32 %v3060_v24 }
 0x4f6   : > { %v7025_v25 = vpop.eup %7024 }
 0x4f7   : > { %v3062_v33 = vmul.f32 0.6931472, %v7025_v25 }
 0x4f9   : > { %v3063_v14 = vadd.f32 %v3062_v33, %v3029_v56 }
 0x4fb   : > { %v8341_v0 = vsub.f32 %v8315_v49, %v3063_v14  ;;  %v8344_v37 = vsub.f32 %v8319_v39, %v3063_v14  ;;  %v8347_v44 = vsub.f32 %v8323_v40, %v3063_v14  ;;  %v8349_v43 = vsub.f32 %v2946_v8, %v3063_v14 }
 0x4fc   : > { %v8351_v30 = vsub.f32 %v2965_v3, %v3063_v14  ;;  %v8353_v26 = vsub.f32 %v2984_v46, %v3063_v14  ;;  %v8355_v38 = vsub.f32 %v3003_v20, %v3063_v14  ;;  %v8357_v6 = vsub.f32 %v3022_v17, %v3063_v14 }
 0x4fd   : > { %v3072_v42 = vrot.slane %v8341_v0, 4  ;;  %v3091_v49 = vrot.slane %v8344_v37, 4  ;;  %v3110_v39 = vrot.slane %v8347_v44, 4  ;;  %v3129_v58 = vrot.slane %v8349_v43, 4 }
 0x4fe   : > { %v3205_v40 = vrot.slane %v8357_v6, 4  ;;  %v3148_v41 = vrot.slane %v8351_v30, 4  ;;  %v3167_v8 = vrot.slane %v8353_v26, 4  ;;  %v3186_v5 = vrot.slane %v8355_v38, 4 }
 0x4ff   : > { %v3073_v36 = vmax.f32 %v8341_v0, %v3072_v42  ;;  %v3092_v60 = vmax.f32 %v8344_v37, %v3091_v49  ;;  %v3111_v3 = vmax.f32 %v8347_v44, %v3110_v39  ;;  %v3130_v45 = vmax.f32 %v8349_v43, %v3129_v58 }
 0x500   : > { %v3206_v46 = vmax.f32 %v8357_v6, %v3205_v40  ;;  %v3149_v2 = vmax.f32 %v8351_v30, %v3148_v41  ;;  %v3168_v48 = vmax.f32 %v8353_v26, %v3167_v8  ;;  %v3187_v20 = vmax.f32 %v8355_v38, %v3186_v5 }
 0x501   : > { %v3074_v17 = vrot.slane %v3073_v36, 2  ;;  %v3093_v51 = vrot.slane %v3092_v60, 2  ;;  %v3112_v52 = vrot.slane %v3111_v3, 2  ;;  %v3131_v53 = vrot.slane %v3130_v45, 2 }
 0x502   : > { %v3207_v54 = vrot.slane %v3206_v46, 2  ;;  %v3150_v56 = vrot.slane %v3149_v2, 2  ;;  %v3169_v57 = vrot.slane %v3168_v48, 2  ;;  %v3188_v59 = vrot.slane %v3187_v20, 2 }
 0x503   : > { %v3075_v62 = vmax.f32 %v3073_v36, %v3074_v17  ;;  %v3094_v9 = vmax.f32 %v3092_v60, %v3093_v51  ;;  %v3113_v35 = vmax.f32 %v3111_v3, %v3112_v52  ;;  %v3132_v34 = vmax.f32 %v3130_v45, %v3131_v53 }
 0x504   : > { %v3151_v27 = vmax.f32 %v3149_v2, %v3150_v56  ;;  %v3170_v7 = vmax.f32 %v3168_v48, %v3169_v57  ;;  %v3189_v50 = vmax.f32 %v3187_v20, %v3188_v59  ;;  %v3208_v11 = vmax.f32 %v3206_v46, %v3207_v54 }
 0x505   : > { %v3076_v19 = vrot.slane %v3075_v62, 1  ;;  %v3095_v61 = vrot.slane %v3094_v9, 1  ;;  %v3114_v12 = vrot.slane %v3113_v35, 1  ;;  %v3133_v21 = vrot.slane %v3132_v34, 1 }
 0x506   : > { %v3152_v1 = vrot.slane %v3151_v27, 1  ;;  %v3171_v10 = vrot.slane %v3170_v7, 1  ;;  %v3190_v31 = vrot.slane %v3189_v50, 1  ;;  %v3209_v63 = vrot.slane %v3208_v11, 1 }
 0x507   : > { %v8375_v4 = vmax.f32 %v3075_v62, %v3076_v19  ;;  %v8377_v55 = vmax.f32 %v3094_v9, %v3095_v61  ;;  %v8379_v22 = vmax.f32 %v3113_v35, %v3114_v12  ;;  %v8381_v13 = vmax.f32 %v3132_v34, %v3133_v21 }
 0x508   : > { %v8383_v15 = vmax.f32 %v3151_v27, %v3152_v1  ;;  %v8385_v18 = vmax.f32 %v3170_v7, %v3171_v10  ;;  %v8387_v28 = vmax.f32 %v3189_v50, %v3190_v31  ;;  %v8389_v16 = vmax.f32 %v3208_v11, %v3209_v63 }
 0x509   : > { %v3078_v29 = vsub.f32 %v8341_v0, %v8375_v4  ;;  %v3097_v32 = vsub.f32 %v8344_v37, %v8377_v55  ;;  %v3116_v23 = vsub.f32 %v8347_v44, %v8379_v22  ;;  %v3135_v47 = vsub.f32 %v8349_v43, %v8381_v13 }
 0x50a   : > { %v3154_v24 = vsub.f32 %v8351_v30, %v8383_v15  ;;  %v3173_v25 = vsub.f32 %v8353_v26, %v8385_v18  ;;  %v3192_v49 = vsub.f32 %v8355_v38, %v8387_v28  ;;  %v3211_v58 = vsub.f32 %v8357_v6, %v8389_v16 }
 0x50b   : > { %v3079_v33 = vmul.f32 1.442695, %v3078_v29  ;;  %v3098_v14 = vmul.f32 1.442695, %v3097_v32  ;;  %v3117_v42 = vmul.f32 1.442695, %v3116_v23 }
 0x50c   : > { %v3136_v39 = vmul.f32 1.442695, %v3135_v47  ;;  %v3155_v40 = vmul.f32 1.442695, %v3154_v24  ;;  %v3174_v41 = vmul.f32 1.442695, %v3173_v25 }
 0x50d   : > { %7026 = vpow2.f32 %v3079_v33  ;;  %v3193_v8 = vmul.f32 1.442695, %v3192_v49  ;;  %v3212_v5 = vmul.f32 1.442695, %v3211_v58 }
 0x50e   : > { %7028 = vpow2.f32 %v3098_v14 }
 0x50f   : > { %7030 = vpow2.f32 %v3117_v42 }
 0x510   : > { %7032 = vpow2.f32 %v3136_v39 }
 0x511   : > { %7034 = vpow2.f32 %v3155_v40 }
 0x512   : > { %7036 = vpow2.f32 %v3174_v41 }
 0x513   : > { %7038 = vpow2.f32 %v3193_v8 }
 0x514   : > { %7040 = vpow2.f32 %v3212_v5 }
 0x517   : > { %v7027_v36 = vpop.eup %7026 }
 0x518   : > { %v7029_v60 = vpop.eup %7028  ;;  %v3081_v3 = vrot.slane %v7027_v36, 4 }
 0x519   : > { %v7031_v45 = vpop.eup %7030  ;;  %v3100_v46 = vrot.slane %v7029_v60, 4 }
 0x51a   : > { %v7033_v2 = vpop.eup %7032  ;;  %v3082_v48 = vadd.f32 %v7027_v36, %v3081_v3  ;;  %v3119_v20 = vrot.slane %v7031_v45, 4 }
 0x51b   : > { %v7035_v17 = vpop.eup %7034  ;;  %v3101_v51 = vadd.f32 %v7029_v60, %v3100_v46  ;;  %v3138_v52 = vrot.slane %v7033_v2, 4 }
 0x51c   : > { %v7037_v53 = vpop.eup %7036  ;;  %v3083_v54 = vrot.slane %v3082_v48, 2  ;;  %v3120_v56 = vadd.f32 %v7031_v45, %v3119_v20  ;;  %v3157_v57 = vrot.slane %v7035_v17, 4 }
 0x51d   : > { %v7039_v59 = vpop.eup %7038  ;;  %v3102_v62 = vrot.slane %v3101_v51, 2  ;;  %v3139_v9 = vadd.f32 %v7033_v2, %v3138_v52  ;;  %v3176_v35 = vrot.slane %v7037_v53, 4 }
 0x51e   : > { %v7041_v34 = vpop.eup %7040  ;;  %v3084_v27 = vadd.f32 %v3083_v54, %v3082_v48  ;;  %v3121_v7 = vrot.slane %v3120_v56, 2  ;;  %v3158_v50 = vadd.f32 %v7035_v17, %v3157_v57  ;;  %v3195_v11 = vrot.slane %v7039_v59, 4 }
 0x51f   : > { %v3103_v19 = vadd.f32 %v3102_v62, %v3101_v51  ;;  %v3140_v61 = vrot.slane %v3139_v9, 2  ;;  %v3177_v12 = vadd.f32 %v7037_v53, %v3176_v35  ;;  %v3214_v21 = vrot.slane %v7041_v34, 4 }
 0x520   : > { %v3085_v1 = vrot.slane %v3084_v27, 1  ;;  %v3122_v10 = vadd.f32 %v3121_v7, %v3120_v56  ;;  %v3159_v31 = vrot.slane %v3158_v50, 2  ;;  %v3196_v63 = vadd.f32 %v7039_v59, %v3195_v11 }
 0x521   : > { %v3104_v29 = vrot.slane %v3103_v19, 1  ;;  %v3141_v32 = vadd.f32 %v3140_v61, %v3139_v9  ;;  %v3178_v23 = vrot.slane %v3177_v12, 2  ;;  %v3215_v47 = vadd.f32 %v7041_v34, %v3214_v21 }
 0x522   : > { %v3086_v24 = vadd.f32 %v3085_v1, %v3084_v27  ;;  %v3123_v25 = vrot.slane %v3122_v10, 1  ;;  %v3160_v33 = vadd.f32 %v3159_v31, %v3158_v50  ;;  %v3197_v14 = vrot.slane %v3196_v63, 2 }
 0x523   : > { %v3105_v42 = vadd.f32 %v3104_v29, %v3103_v19  ;;  %v3142_v49 = vrot.slane %v3141_v32, 1  ;;  %v3179_v39 = vadd.f32 %v3178_v23, %v3177_v12  ;;  %v3216_v58 = vrot.slane %v3215_v47, 2 }
 0x524   : > { %7042 = vlog2.f32 %v3086_v24  ;;  %v3124_v40 = vadd.f32 %v3123_v25, %v3122_v10  ;;  %v3161_v41 = vrot.slane %v3160_v33, 1  ;;  %v3198_v8 = vadd.f32 %v3197_v14, %v3196_v63 }
 0x525   : > { %7044 = vlog2.f32 %v3105_v42  ;;  %v3143_v5 = vadd.f32 %v3142_v49, %v3141_v32  ;;  %v3180_v36 = vrot.slane %v3179_v39, 1  ;;  %v3217_v60 = vadd.f32 %v3216_v58, %v3215_v47 }
 0x526   : > { %7046 = vlog2.f32 %v3124_v40  ;;  %v3162_v3 = vadd.f32 %v3161_v41, %v3160_v33  ;;  %v3199_v45 = vrot.slane %v3198_v8, 1 }
 0x527   : > { %7048 = vlog2.f32 %v3143_v5  ;;  %v3181_v46 = vadd.f32 %v3180_v36, %v3179_v39  ;;  %v3218_v2 = vrot.slane %v3217_v60, 1 }
 0x528   : > { %7050 = vlog2.f32 %v3162_v3  ;;  %v3200_v48 = vadd.f32 %v3199_v45, %v3198_v8 }
 0x529   : > { %7052 = vlog2.f32 %v3181_v46  ;;  %v3219_v20 = vadd.f32 %v3218_v2, %v3217_v60 }
 0x52a   : > { %7054 = vlog2.f32 %v3200_v48 }
 0x52b   : > { %7056 = vlog2.f32 %v3219_v20 }
 0x52e   : > { %v7043_v17 = vpop.eup %7042 }
 0x52f   : > { %v7045_v51 = vpop.eup %7044  ;;  %v3088_v52 = vmul.f32 0.6931472, %v7043_v17 }
 0x530   : > { %v7047_v53 = vpop.eup %7046  ;;  %v3107_v54 = vmul.f32 0.6931472, %v7045_v51 }
 0x531   : > { %v7049_v56 = vpop.eup %7048  ;;  %v3089_v57 = vadd.f32 %v3088_v52, %v8375_v4  ;;  %v3126_v59 = vmul.f32 0.6931472, %v7047_v53 }
 0x532   : > { %v7051_v62 = vpop.eup %7050  ;;  %v3108_v9 = vadd.f32 %v3107_v54, %v8377_v55  ;;  %v3145_v35 = vmul.f32 0.6931472, %v7049_v56 }
 0x533   : > { %v7053_v34 = vpop.eup %7052  ;;  %v8410_v27 = vsub.f32 %v8341_v0, %v3089_v57  ;;  %v3127_v7 = vadd.f32 %v3126_v59, %v8379_v22  ;;  %v3164_v50 = vmul.f32 0.6931472, %v7051_v62 }
 0x534   : > { %v7055_v11 = vpop.eup %7054  ;;  %v8414_v19 = vsub.f32 %v8344_v37, %v3108_v9  ;;  %v3146_v61 = vadd.f32 %v3145_v35, %v8381_v13  ;;  %v3183_v12 = vmul.f32 0.6931472, %v7053_v34 }
 0x535   : > { %v7057_v4 = vpop.eup %7056  ;;  %v8418_v21 = vsub.f32 %v8347_v44, %v3127_v7  ;;  %v3165_v55 = vadd.f32 %v3164_v50, %v8383_v15  ;;  %v3202_v1 = vmul.f32 0.6931472, %v7055_v11 }
 0x536   : > { %v3147_v0 = vsub.f32 %v8349_v43, %v3146_v61  ;;  %v3184_v10 = vadd.f32 %v3183_v12, %v8385_v18  ;;  %v3221_v22 = vmul.f32 0.6931472, %v7057_v4  ;;  %v3224_v31 = vmax.f32 %v8410_v27, %v8414_v19 }
 0x537   : > { %v3166_v37 = vsub.f32 %v8351_v30, %v3165_v55  ;;  %v3203_v13 = vadd.f32 %v3202_v1, %v8387_v28 }
 0x538   : > { %v3185_v63 = vsub.f32 %v8353_v26, %v3184_v10  ;;  %v3222_v44 = vadd.f32 %v3221_v22, %v8389_v16  ;;  %v3225_v29 = vmax.f32 %v8418_v21, %v3147_v0 }
 0x539   : > { %v3204_v15 = vsub.f32 %v8355_v38, %v3203_v13 }
 0x53a   : > { %v3223_v43 = vsub.f32 %v8357_v6, %v3222_v44  ;;  %v3226_v32 = vmax.f32 %v3166_v37, %v3185_v63  ;;  %v3228_v18 = vmax.f32 %v3224_v31, %v3225_v29 }
 0x53c   : > { %v3227_v23 = vmax.f32 %v3204_v15, %v3223_v43 }
 0x53e   : > { %v3229_v47 = vmax.f32 %v3226_v32, %v3227_v23 }
 0x540   : > { %v3230_v24 = vmax.f32 %v3228_v18, %v3229_v47 }
 0x542   : > { %v3231_v25 = vsub.f32 %v8410_v27, %v3230_v24  ;;  %v3234_v30 = vsub.f32 %v8414_v19, %v3230_v24  ;;  %v3237_v28 = vsub.f32 %v8418_v21, %v3230_v24  ;;  %v3240_v26 = vsub.f32 %v3147_v0, %v3230_v24 }
 0x543   : > { %v3243_v33 = vsub.f32 %v3166_v37, %v3230_v24  ;;  %v3246_v16 = vsub.f32 %v3185_v63, %v3230_v24  ;;  %v3249_v14 = vsub.f32 %v3204_v15, %v3230_v24  ;;  %v3252_v42 = vsub.f32 %v3223_v43, %v3230_v24 }
 0x544   : > { %v3232_v49 = vmul.f32 1.442695, %v3231_v25  ;;  %v3235_v38 = vmul.f32 1.442695, %v3234_v30  ;;  %v3238_v39 = vmul.f32 1.442695, %v3237_v28 }
 0x545   : > { %v3241_v6 = vmul.f32 1.442695, %v3240_v26  ;;  %v3244_v58 = vmul.f32 1.442695, %v3243_v33  ;;  %v3247_v40 = vmul.f32 1.442695, %v3246_v16 }
 0x546   : > { %7058 = vpow2.f32 %v3232_v49  ;;  %v3250_v41 = vmul.f32 1.442695, %v3249_v14  ;;  %v3253_v8 = vmul.f32 1.442695, %v3252_v42 }
 0x547   : > { %7060 = vpow2.f32 %v3235_v38 }
 0x548   : > { %7062 = vpow2.f32 %v3238_v39 }
 0x549   : > { %7064 = vpow2.f32 %v3241_v6 }
 0x54a   : > { %7066 = vpow2.f32 %v3244_v58 }
 0x54b   : > { %7068 = vpow2.f32 %v3247_v40 }
 0x54c   : > { %7070 = vpow2.f32 %v3250_v41 }
 0x54d   : > { %7072 = vpow2.f32 %v3253_v8 }
 0x550   : > { %v7059_v5 = vpop.eup %7058 }
 0x551   : > { %v7061_v36 = vpop.eup %7060 }
 0x552   : > { %v7063_v60 = vpop.eup %7062  ;;  %v3255_v3 = vadd.f32 %v7061_v36, %v7059_v5 }
 0x553   : > { %v7065_v45 = vpop.eup %7064 }
 0x554   : > { %v7067_v46 = vpop.eup %7066  ;;  %v3256_v2 = vadd.f32 %v7065_v45, %v7063_v60 }
 0x555   : > { %v7069_v48 = vpop.eup %7068 }
 0x556   : > { %v7071_v20 = vpop.eup %7070  ;;  %v3257_v17 = vadd.f32 %v7069_v48, %v7067_v46  ;;  %v3259_v51 = vadd.f32 %v3256_v2, %v3255_v3 }
 0x557   : > { %v7073_v52 = vpop.eup %7072 }
 0x558   : > { %v3258_v53 = vadd.f32 %v7073_v52, %v7071_v20 }
 0x55a   : > { %v3260_v54 = vadd.f32 %v3258_v53, %v3257_v17 }
 0x55c   : > { %v3261_v56 = vadd.f32 %v3260_v54, %v3259_v51 }
 0x55e   : > { %7074 = vlog2.f32 %v3261_v56 }
 0x568   : > { %v7075_v57 = vpop.eup %7074 }
 0x569   : > { %v3263_v59 = vmul.f32 0.6931472, %v7075_v57 }
 0x56b   : > { %v3264_v62 = vadd.f32 %v3263_v59, %v3230_v24 }
 0x56d   : > { %v8436_v9 = vsub.f32 %v8410_v27, %v3264_v62  ;;  %v8439_v35 = vsub.f32 %v8414_v19, %v3264_v62  ;;  %v8442_v34 = vsub.f32 %v8418_v21, %v3264_v62  ;;  %v8444_v7 = vsub.f32 %v3147_v0, %v3264_v62 }
 0x56e   : > { %v8446_v50 = vsub.f32 %v3166_v37, %v3264_v62  ;;  %v8448_v11 = vsub.f32 %v3185_v63, %v3264_v62  ;;  %v8450_v61 = vsub.f32 %v3204_v15, %v3264_v62  ;;  %v8452_v12 = vsub.f32 %v3223_v43, %v3264_v62 }
 0x56f   : > { %v3273_v4 = vrot.slane %v8436_v9, 4  ;;  %v3292_v27 = vrot.slane %v8439_v35, 4  ;;  %v3311_v19 = vrot.slane %v8442_v34, 4  ;;  %v3330_v55 = vrot.slane %v8444_v7, 4 }
 0x570   : > { %v3349_v21 = vrot.slane %v8446_v50, 4  ;;  %v3368_v1 = vrot.slane %v8448_v11, 4  ;;  %v3387_v0 = vrot.slane %v8450_v61, 4  ;;  %v3406_v10 = vrot.slane %v8452_v12, 4 }
 0x571   : > { %v3274_v22 = vmax.f32 %v8436_v9, %v3273_v4  ;;  %v3293_v31 = vmax.f32 %v8439_v35, %v3292_v27  ;;  %v3312_v37 = vmax.f32 %v8442_v34, %v3311_v19  ;;  %v3331_v13 = vmax.f32 %v8444_v7, %v3330_v55 }
 0x572   : > { %v3350_v63 = vmax.f32 %v8446_v50, %v3349_v21  ;;  %v3369_v44 = vmax.f32 %v8448_v11, %v3368_v1  ;;  %v3388_v29 = vmax.f32 %v8450_v61, %v3387_v0  ;;  %v3407_v15 = vmax.f32 %v8452_v12, %v3406_v10 }
 0x573   : > { %v3275_v43 = vrot.slane %v3274_v22, 2  ;;  %v3294_v32 = vrot.slane %v3293_v31, 2  ;;  %v3313_v18 = vrot.slane %v3312_v37, 2  ;;  %v3332_v23 = vrot.slane %v3331_v13, 2 }
 0x574   : > { %v3351_v47 = vrot.slane %v3350_v63, 2  ;;  %v3370_v24 = vrot.slane %v3369_v44, 2  ;;  %v3389_v25 = vrot.slane %v3388_v29, 2  ;;  %v3408_v30 = vrot.slane %v3407_v15, 2 }
 0x575   : > { %v3276_v28 = vmax.f32 %v3274_v22, %v3275_v43  ;;  %v3295_v26 = vmax.f32 %v3293_v31, %v3294_v32  ;;  %v3314_v33 = vmax.f32 %v3312_v37, %v3313_v18  ;;  %v3333_v16 = vmax.f32 %v3331_v13, %v3332_v23 }
 0x576   : > { %v3352_v14 = vmax.f32 %v3350_v63, %v3351_v47  ;;  %v3371_v42 = vmax.f32 %v3369_v44, %v3370_v24  ;;  %v3390_v49 = vmax.f32 %v3388_v29, %v3389_v25  ;;  %v3409_v38 = vmax.f32 %v3407_v15, %v3408_v30 }
 0x577   : > { %v3277_v39 = vrot.slane %v3276_v28, 1  ;;  %v3296_v6 = vrot.slane %v3295_v26, 1  ;;  %v3315_v58 = vrot.slane %v3314_v33, 1  ;;  %v3334_v40 = vrot.slane %v3333_v16, 1 }
 0x578   : > { %v3353_v41 = vrot.slane %v3352_v14, 1  ;;  %v3372_v8 = vrot.slane %v3371_v42, 1  ;;  %v3391_v5 = vrot.slane %v3390_v49, 1  ;;  %v3410_v36 = vrot.slane %v3409_v38, 1 }
 0x579   : > { %v8470_v60 = vmax.f32 %v3276_v28, %v3277_v39  ;;  %v8472_v3 = vmax.f32 %v3295_v26, %v3296_v6  ;;  %v8474_v45 = vmax.f32 %v3314_v33, %v3315_v58  ;;  %v8476_v46 = vmax.f32 %v3333_v16, %v3334_v40 }
 0x57a   : > { %v8478_v2 = vmax.f32 %v3352_v14, %v3353_v41  ;;  %v8480_v48 = vmax.f32 %v3371_v42, %v3372_v8  ;;  %v8482_v20 = vmax.f32 %v3390_v49, %v3391_v5  ;;  %v8484_v17 = vmax.f32 %v3409_v38, %v3410_v36 }
 0x57b   : > { %v3279_v51 = vsub.f32 %v8436_v9, %v8470_v60  ;;  %v3298_v52 = vsub.f32 %v8439_v35, %v8472_v3  ;;  %v3317_v53 = vsub.f32 %v8442_v34, %v8474_v45  ;;  %v3336_v54 = vsub.f32 %v8444_v7, %v8476_v46 }
 0x57c   : > { %v3355_v56 = vsub.f32 %v8446_v50, %v8478_v2  ;;  %v3374_v57 = vsub.f32 %v8448_v11, %v8480_v48  ;;  %v3393_v27 = vsub.f32 %v8450_v61, %v8482_v20  ;;  %v3412_v55 = vsub.f32 %v8452_v12, %v8484_v17 }
 0x57d   : > { %v3280_v59 = vmul.f32 1.442695, %v3279_v51  ;;  %v3299_v62 = vmul.f32 1.442695, %v3298_v52  ;;  %v3318_v4 = vmul.f32 1.442695, %v3317_v53 }
 0x57e   : > { %v3337_v19 = vmul.f32 1.442695, %v3336_v54  ;;  %v3356_v21 = vmul.f32 1.442695, %v3355_v56  ;;  %v3375_v1 = vmul.f32 1.442695, %v3374_v57 }
 0x57f   : > { %7076 = vpow2.f32 %v3280_v59  ;;  %v3394_v0 = vmul.f32 1.442695, %v3393_v27  ;;  %v3413_v10 = vmul.f32 1.442695, %v3412_v55 }
 0x580   : > { %7078 = vpow2.f32 %v3299_v62 }
 0x581   : > { %7080 = vpow2.f32 %v3318_v4 }
 0x582   : > { %7082 = vpow2.f32 %v3337_v19 }
 0x583   : > { %7084 = vpow2.f32 %v3356_v21 }
 0x584   : > { %7086 = vpow2.f32 %v3375_v1 }
 0x585   : > { %7088 = vpow2.f32 %v3394_v0 }
 0x586   : > { %7090 = vpow2.f32 %v3413_v10 }
 0x589   : > { %v7077_v22 = vpop.eup %7076 }
 0x58a   : > { %v7079_v31 = vpop.eup %7078  ;;  %v3282_v37 = vrot.slane %v7077_v22, 4 }
 0x58b   : > { %v7081_v13 = vpop.eup %7080  ;;  %v3301_v63 = vrot.slane %v7079_v31, 4 }
 0x58c   : > { %v7083_v44 = vpop.eup %7082  ;;  %v3283_v29 = vadd.f32 %v7077_v22, %v3282_v37  ;;  %v3320_v15 = vrot.slane %v7081_v13, 4 }
 0x58d   : > { %v7085_v43 = vpop.eup %7084  ;;  %v3302_v32 = vadd.f32 %v7079_v31, %v3301_v63  ;;  %v3339_v18 = vrot.slane %v7083_v44, 4 }
 0x58e   : > { %v7087_v23 = vpop.eup %7086  ;;  %v3284_v47 = vrot.slane %v3283_v29, 2  ;;  %v3321_v24 = vadd.f32 %v7081_v13, %v3320_v15  ;;  %v3358_v25 = vrot.slane %v7085_v43, 4 }
 0x58f   : > { %v7089_v30 = vpop.eup %7088  ;;  %v3303_v28 = vrot.slane %v3302_v32, 2  ;;  %v3340_v26 = vadd.f32 %v7083_v44, %v3339_v18  ;;  %v3377_v33 = vrot.slane %v7087_v23, 4 }
 0x590   : > { %v7091_v16 = vpop.eup %7090  ;;  %v3285_v14 = vadd.f32 %v3284_v47, %v3283_v29  ;;  %v3322_v42 = vrot.slane %v3321_v24, 2  ;;  %v3359_v49 = vadd.f32 %v7085_v43, %v3358_v25  ;;  %v3396_v38 = vrot.slane %v7089_v30, 4 }
 0x591   : > { %v3304_v39 = vadd.f32 %v3303_v28, %v3302_v32  ;;  %v3341_v6 = vrot.slane %v3340_v26, 2  ;;  %v3378_v58 = vadd.f32 %v7087_v23, %v3377_v33  ;;  %v3415_v40 = vrot.slane %v7091_v16, 4 }
 0x592   : > { %v3286_v41 = vrot.slane %v3285_v14, 1  ;;  %v3323_v8 = vadd.f32 %v3322_v42, %v3321_v24  ;;  %v3360_v5 = vrot.slane %v3359_v49, 2  ;;  %v3397_v36 = vadd.f32 %v7089_v30, %v3396_v38 }
 0x593   : > { %v3305_v51 = vrot.slane %v3304_v39, 1  ;;  %v3342_v52 = vadd.f32 %v3341_v6, %v3340_v26  ;;  %v3379_v53 = vrot.slane %v3378_v58, 2  ;;  %v3416_v54 = vadd.f32 %v7091_v16, %v3415_v40 }
 0x594   : > { %v3287_v56 = vadd.f32 %v3286_v41, %v3285_v14  ;;  %v3324_v57 = vrot.slane %v3323_v8, 1  ;;  %v3361_v59 = vadd.f32 %v3360_v5, %v3359_v49  ;;  %v3398_v62 = vrot.slane %v3397_v36, 2 }
 0x595   : > { %v3306_v4 = vadd.f32 %v3305_v51, %v3304_v39  ;;  %v3343_v27 = vrot.slane %v3342_v52, 1  ;;  %v3380_v19 = vadd.f32 %v3379_v53, %v3378_v58  ;;  %v3417_v55 = vrot.slane %v3416_v54, 2 }
 0x596   : > { %7092 = vlog2.f32 %v3287_v56  ;;  %v3325_v21 = vadd.f32 %v3324_v57, %v3323_v8  ;;  %v3362_v1 = vrot.slane %v3361_v59, 1  ;;  %v3399_v0 = vadd.f32 %v3398_v62, %v3397_v36 }
 0x597   : > { %7094 = vlog2.f32 %v3306_v4  ;;  %v3344_v10 = vadd.f32 %v3343_v27, %v3342_v52  ;;  %v3381_v22 = vrot.slane %v3380_v19, 1  ;;  %v3418_v31 = vadd.f32 %v3417_v55, %v3416_v54 }
 0x598   : > { %7096 = vlog2.f32 %v3325_v21  ;;  %v3363_v37 = vadd.f32 %v3362_v1, %v3361_v59  ;;  %v3400_v13 = vrot.slane %v3399_v0, 1 }
 0x599   : > { %7098 = vlog2.f32 %v3344_v10  ;;  %v3382_v63 = vadd.f32 %v3381_v22, %v3380_v19  ;;  %v3419_v44 = vrot.slane %v3418_v31, 1 }
 0x59a   : > { %7100 = vlog2.f32 %v3363_v37  ;;  %v3401_v29 = vadd.f32 %v3400_v13, %v3399_v0 }
 0x59b   : > { %7102 = vlog2.f32 %v3382_v63  ;;  %v3420_v15 = vadd.f32 %v3419_v44, %v3418_v31 }
 0x59c   : > { %7104 = vlog2.f32 %v3401_v29 }
 0x59d   : > { %7106 = vlog2.f32 %v3420_v15 }
 0x5a0   : > { %v7093_v43 = vpop.eup %7092 }
 0x5a1   : > { %v7095_v32 = vpop.eup %7094  ;;  %v3289_v18 = vmul.f32 0.6931472, %v7093_v43 }
 0x5a2   : > { %v7097_v23 = vpop.eup %7096  ;;  %v3308_v47 = vmul.f32 0.6931472, %v7095_v32 }
 0x5a3   : > { %v7099_v24 = vpop.eup %7098  ;;  %v3290_v25 = vadd.f32 %v3289_v18, %v8470_v60  ;;  %v3327_v30 = vmul.f32 0.6931472, %v7097_v23 }
 0x5a4   : > { %v7101_v28 = vpop.eup %7100  ;;  %v3309_v26 = vadd.f32 %v3308_v47, %v8472_v3  ;;  %v3346_v33 = vmul.f32 0.6931472, %v7099_v24 }
 0x5a5   : > { %v7103_v16 = vpop.eup %7102  ;;  %v8505_v14 = vsub.f32 %v8436_v9, %v3290_v25  ;;  %v3328_v42 = vadd.f32 %v3327_v30, %v8474_v45  ;;  %v3365_v49 = vmul.f32 0.6931472, %v7101_v28 }
 0x5a6   : > { %v7105_v38 = vpop.eup %7104  ;;  %v8509_v39 = vsub.f32 %v8439_v35, %v3309_v26  ;;  %v3347_v6 = vadd.f32 %v3346_v33, %v8476_v46  ;;  %v3384_v58 = vmul.f32 0.6931472, %v7103_v16 }
 0x5a7   : > { %v7107_v60 = vpop.eup %7106  ;;  %v8513_v40 = vsub.f32 %v8442_v34, %v3328_v42  ;;  %v3366_v3 = vadd.f32 %v3365_v49, %v8478_v2  ;;  %v3403_v41 = vmul.f32 0.6931472, %v7105_v38 }
 0x5a8   : > { %v3348_v9 = vsub.f32 %v8444_v7, %v3347_v6  ;;  %v3385_v8 = vadd.f32 %v3384_v58, %v8480_v48  ;;  %v3422_v45 = vmul.f32 0.6931472, %v7107_v60  ;;  %v3425_v5 = vmax.f32 %v8505_v14, %v8509_v39 }
 0x5a9   : > { %v3367_v35 = vsub.f32 %v8446_v50, %v3366_v3  ;;  %v3404_v46 = vadd.f32 %v3403_v41, %v8482_v20 }
 0x5aa   : > { %v3386_v36 = vsub.f32 %v8448_v11, %v3385_v8  ;;  %v3423_v34 = vadd.f32 %v3422_v45, %v8484_v17  ;;  %v3426_v51 = vmax.f32 %v8513_v40, %v3348_v9 }
 0x5ab   : > { %v3405_v2 = vsub.f32 %v8450_v61, %v3404_v46 }
 0x5ac   : > { %v3424_v7 = vsub.f32 %v8452_v12, %v3423_v34  ;;  %v3427_v52 = vmax.f32 %v3367_v35, %v3386_v36  ;;  %v3429_v48 = vmax.f32 %v3425_v5, %v3426_v51 }
 0x5ae   : > { %v3428_v53 = vmax.f32 %v3405_v2, %v3424_v7 }
 0x5b0   : > { %v3430_v54 = vmax.f32 %v3427_v52, %v3428_v53 }
 0x5b2   : > { %v3431_v56 = vmax.f32 %v3429_v48, %v3430_v54 }
 0x5b4   : > { %v3432_v57 = vsub.f32 %v8505_v14, %v3431_v56  ;;  %v3435_v50 = vsub.f32 %v8509_v39, %v3431_v56  ;;  %v3438_v20 = vsub.f32 %v8513_v40, %v3431_v56  ;;  %v3441_v11 = vsub.f32 %v3348_v9, %v3431_v56 }
 0x5b5   : > { %v3444_v59 = vsub.f32 %v3367_v35, %v3431_v56  ;;  %v3447_v17 = vsub.f32 %v3386_v36, %v3431_v56  ;;  %v3450_v62 = vsub.f32 %v3405_v2, %v3431_v56  ;;  %v3453_v4 = vsub.f32 %v3424_v7, %v3431_v56 }
 0x5b6   : > { %v3433_v27 = vmul.f32 1.442695, %v3432_v57  ;;  %v3436_v61 = vmul.f32 1.442695, %v3435_v50  ;;  %v3439_v19 = vmul.f32 1.442695, %v3438_v20 }
 0x5b7   : > { %v3442_v12 = vmul.f32 1.442695, %v3441_v11  ;;  %v3445_v55 = vmul.f32 1.442695, %v3444_v59  ;;  %v3448_v21 = vmul.f32 1.442695, %v3447_v17 }
 0x5b8   : > { %7108 = vpow2.f32 %v3433_v27  ;;  %v3451_v1 = vmul.f32 1.442695, %v3450_v62  ;;  %v3454_v0 = vmul.f32 1.442695, %v3453_v4 }
 0x5b9   : > { %7110 = vpow2.f32 %v3436_v61 }
 0x5ba   : > { %7112 = vpow2.f32 %v3439_v19 }
 0x5bb   : > { %7114 = vpow2.f32 %v3442_v12 }
 0x5bc   : > { %7116 = vpow2.f32 %v3445_v55 }
 0x5bd   : > { %7118 = vpow2.f32 %v3448_v21 }
 0x5be   : > { %7120 = vpow2.f32 %v3451_v1 }
 0x5bf   : > { %7122 = vpow2.f32 %v3454_v0 }
 0x5c2   : > { %v7109_v10 = vpop.eup %7108 }
 0x5c3   : > { %v7111_v22 = vpop.eup %7110 }
 0x5c4   : > { %v7113_v31 = vpop.eup %7112  ;;  %v3456_v37 = vadd.f32 %v7111_v22, %v7109_v10 }
 0x5c5   : > { %v7115_v13 = vpop.eup %7114 }
 0x5c6   : > { %v7117_v63 = vpop.eup %7116  ;;  %v3457_v44 = vadd.f32 %v7115_v13, %v7113_v31 }
 0x5c7   : > { %v7119_v29 = vpop.eup %7118 }
 0x5c8   : > { %v7121_v15 = vpop.eup %7120  ;;  %v3458_v43 = vadd.f32 %v7119_v29, %v7117_v63  ;;  %v3460_v32 = vadd.f32 %v3457_v44, %v3456_v37 }
 0x5c9   : > { %v7123_v18 = vpop.eup %7122 }
 0x5ca   : > { %v3459_v23 = vadd.f32 %v7123_v18, %v7121_v15 }
 0x5cc   : > { %v3461_v47 = vadd.f32 %v3459_v23, %v3458_v43 }
 0x5ce   : > { %v3462_v24 = vadd.f32 %v3461_v47, %v3460_v32 }
 0x5d0   : > { %7124 = vlog2.f32 %v3462_v24 }
 0x5da   : > { %v7125_v25 = vpop.eup %7124 }
 0x5db   : > { %v3464_v30 = vmul.f32 0.6931472, %v7125_v25 }
 0x5dd   : > { %v3465_v28 = vadd.f32 %v3464_v30, %v3431_v56 }
 0x5df   : > { %v8531_v26 = vsub.f32 %v8505_v14, %v3465_v28  ;;  %v8534_v33 = vsub.f32 %v8509_v39, %v3465_v28  ;;  %v8537_v16 = vsub.f32 %v8513_v40, %v3465_v28  ;;  %v8539_v42 = vsub.f32 %v3348_v9, %v3465_v28 }
 0x5e0   : > { %v8541_v49 = vsub.f32 %v3367_v35, %v3465_v28  ;;  %v8543_v38 = vsub.f32 %v3386_v36, %v3465_v28  ;;  %v8545_v6 = vsub.f32 %v3405_v2, %v3465_v28  ;;  %v8547_v58 = vsub.f32 %v3424_v7, %v3465_v28 }
 0x5e1   : > { %v3474_v60 = vrot.slane %v8531_v26, 4  ;;  %v3493_v14 = vrot.slane %v8534_v33, 4  ;;  %v3512_v39 = vrot.slane %v8537_v16, 4  ;;  %v3531_v3 = vrot.slane %v8539_v42, 4 }
 0x5e2   : > { %v3550_v40 = vrot.slane %v8541_v49, 4  ;;  %v3569_v41 = vrot.slane %v8543_v38, 4  ;;  %v3588_v9 = vrot.slane %v8545_v6, 4  ;;  %v3607_v8 = vrot.slane %v8547_v58, 4 }
 0x5e3   : > { %v3475_v45 = vmax.f32 %v8531_v26, %v3474_v60  ;;  %v3494_v5 = vmax.f32 %v8534_v33, %v3493_v14  ;;  %v3513_v35 = vmax.f32 %v8537_v16, %v3512_v39  ;;  %v3532_v46 = vmax.f32 %v8539_v42, %v3531_v3 }
 0x5e4   : > { %v3551_v36 = vmax.f32 %v8541_v49, %v3550_v40  ;;  %v3570_v34 = vmax.f32 %v8543_v38, %v3569_v41  ;;  %v3589_v51 = vmax.f32 %v8545_v6, %v3588_v9  ;;  %v3608_v2 = vmax.f32 %v8547_v58, %v3607_v8 }
 0x5e5   : > { %v3476_v7 = vrot.slane %v3475_v45, 2  ;;  %v3495_v52 = vrot.slane %v3494_v5, 2  ;;  %v3514_v48 = vrot.slane %v3513_v35, 2  ;;  %v3533_v53 = vrot.slane %v3532_v46, 2 }
 0x5e6   : > { %v3552_v54 = vrot.slane %v3551_v36, 2  ;;  %v3571_v56 = vrot.slane %v3570_v34, 2  ;;  %v3590_v57 = vrot.slane %v3589_v51, 2  ;;  %v3609_v50 = vrot.slane %v3608_v2, 2 }
 0x5e7   : > { %v3477_v20 = vmax.f32 %v3475_v45, %v3476_v7  ;;  %v3496_v11 = vmax.f32 %v3494_v5, %v3495_v52  ;;  %v3515_v59 = vmax.f32 %v3513_v35, %v3514_v48  ;;  %v3534_v17 = vmax.f32 %v3532_v46, %v3533_v53 }
 0x5e8   : > { %v3553_v62 = vmax.f32 %v3551_v36, %v3552_v54  ;;  %v3572_v4 = vmax.f32 %v3570_v34, %v3571_v56  ;;  %v3591_v27 = vmax.f32 %v3589_v51, %v3590_v57  ;;  %v3610_v61 = vmax.f32 %v3608_v2, %v3609_v50 }
 0x5e9   : > { %v3478_v19 = vrot.slane %v3477_v20, 1  ;;  %v3497_v12 = vrot.slane %v3496_v11, 1  ;;  %v3516_v55 = vrot.slane %v3515_v59, 1  ;;  %v3535_v21 = vrot.slane %v3534_v17, 1 }
 0x5ea   : > { %v3554_v1 = vrot.slane %v3553_v62, 1  ;;  %v3573_v0 = vrot.slane %v3572_v4, 1  ;;  %v3592_v10 = vrot.slane %v3591_v27, 1  ;;  %v3611_v22 = vrot.slane %v3610_v61, 1 }
 0x5eb   : > { %v8565_v31 = vmax.f32 %v3477_v20, %v3478_v19  ;;  %v8567_v37 = vmax.f32 %v3496_v11, %v3497_v12  ;;  %v8569_v13 = vmax.f32 %v3515_v59, %v3516_v55  ;;  %v8571_v63 = vmax.f32 %v3534_v17, %v3535_v21 }
 0x5ec   : > { %v8573_v44 = vmax.f32 %v3553_v62, %v3554_v1  ;;  %v8575_v29 = vmax.f32 %v3572_v4, %v3573_v0  ;;  %v8577_v15 = vmax.f32 %v3591_v27, %v3592_v10  ;;  %v8579_v43 = vmax.f32 %v3610_v61, %v3611_v22 }
 0x5ed   : > { %v3480_v32 = vsub.f32 %v8531_v26, %v8565_v31  ;;  %v3499_v18 = vsub.f32 %v8534_v33, %v8567_v37  ;;  %v3518_v23 = vsub.f32 %v8537_v16, %v8569_v13  ;;  %v3537_v47 = vsub.f32 %v8539_v42, %v8571_v63 }
 0x5ee   : > { %v3556_v24 = vsub.f32 %v8541_v49, %v8573_v44  ;;  %v3575_v25 = vsub.f32 %v8543_v38, %v8575_v29  ;;  %v3594_v14 = vsub.f32 %v8545_v6, %v8577_v15  ;;  %v3613_v3 = vsub.f32 %v8547_v58, %v8579_v43 }
 0x5ef   : > { %v3481_v30 = vmul.f32 1.442695, %v3480_v32  ;;  %v3500_v28 = vmul.f32 1.442695, %v3499_v18  ;;  %v3519_v60 = vmul.f32 1.442695, %v3518_v23 }
 0x5f0   : > { %v3538_v39 = vmul.f32 1.442695, %v3537_v47  ;;  %v3557_v40 = vmul.f32 1.442695, %v3556_v24  ;;  %v3576_v41 = vmul.f32 1.442695, %v3575_v25 }
 0x5f1   : > { %7126 = vpow2.f32 %v3481_v30  ;;  %v3595_v9 = vmul.f32 1.442695, %v3594_v14  ;;  %v3614_v8 = vmul.f32 1.442695, %v3613_v3 }
 0x5f2   : > { %7128 = vpow2.f32 %v3500_v28 }
 0x5f3   : > { %7130 = vpow2.f32 %v3519_v60 }
 0x5f4   : > { %7132 = vpow2.f32 %v3538_v39 }
 0x5f5   : > { %7134 = vpow2.f32 %v3557_v40 }
 0x5f6   : > { %7136 = vpow2.f32 %v3576_v41 }
 0x5f7   : > { %7138 = vpow2.f32 %v3595_v9 }
 0x5f8   : > { %7140 = vpow2.f32 %v3614_v8 }
 0x5fb   : > { %v7127_v45 = vpop.eup %7126 }
 0x5fc   : > { %v7129_v5 = vpop.eup %7128  ;;  %v3483_v35 = vrot.slane %v7127_v45, 4 }
 0x5fd   : > { %v7131_v46 = vpop.eup %7130  ;;  %v3502_v36 = vrot.slane %v7129_v5, 4 }
 0x5fe   : > { %v7133_v34 = vpop.eup %7132  ;;  %v3484_v51 = vadd.f32 %v7127_v45, %v3483_v35  ;;  %v3521_v2 = vrot.slane %v7131_v46, 4 }
 0x5ff   : > { %v7135_v7 = vpop.eup %7134  ;;  %v3503_v52 = vadd.f32 %v7129_v5, %v3502_v36  ;;  %v3540_v48 = vrot.slane %v7133_v34, 4 }
 0x600   : > { %v7137_v53 = vpop.eup %7136  ;;  %v3485_v54 = vrot.slane %v3484_v51, 2  ;;  %v3522_v56 = vadd.f32 %v7131_v46, %v3521_v2  ;;  %v3559_v57 = vrot.slane %v7135_v7, 4 }
 0x601   : > { %v7139_v50 = vpop.eup %7138  ;;  %v3504_v20 = vrot.slane %v3503_v52, 2  ;;  %v3541_v11 = vadd.f32 %v7133_v34, %v3540_v48  ;;  %v3578_v59 = vrot.slane %v7137_v53, 4 }
 0x602   : > { %v7141_v17 = vpop.eup %7140  ;;  %v3486_v62 = vadd.f32 %v3485_v54, %v3484_v51  ;;  %v3523_v4 = vrot.slane %v3522_v56, 2  ;;  %v3560_v27 = vadd.f32 %v7135_v7, %v3559_v57  ;;  %v3597_v61 = vrot.slane %v7139_v50, 4 }
 0x603   : > { %v3505_v19 = vadd.f32 %v3504_v20, %v3503_v52  ;;  %v3542_v12 = vrot.slane %v3541_v11, 2  ;;  %v3579_v55 = vadd.f32 %v7137_v53, %v3578_v59  ;;  %v3616_v21 = vrot.slane %v7141_v17, 4 }
 0x604   : > { %v3487_v1 = vrot.slane %v3486_v62, 1  ;;  %v3524_v0 = vadd.f32 %v3523_v4, %v3522_v56  ;;  %v3561_v10 = vrot.slane %v3560_v27, 2  ;;  %v3598_v22 = vadd.f32 %v7139_v50, %v3597_v61 }
 0x605   : > { %v3506_v32 = vrot.slane %v3505_v19, 1  ;;  %v3543_v18 = vadd.f32 %v3542_v12, %v3541_v11  ;;  %v3580_v23 = vrot.slane %v3579_v55, 2  ;;  %v3617_v47 = vadd.f32 %v7141_v17, %v3616_v21 }
 0x606   : > { %v3488_v24 = vadd.f32 %v3487_v1, %v3486_v62  ;;  %v3525_v25 = vrot.slane %v3524_v0, 1  ;;  %v3562_v30 = vadd.f32 %v3561_v10, %v3560_v27  ;;  %v3599_v28 = vrot.slane %v3598_v22, 2 }
 0x607   : > { %v3507_v60 = vadd.f32 %v3506_v32, %v3505_v19  ;;  %v3544_v14 = vrot.slane %v3543_v18, 1  ;;  %v3581_v39 = vadd.f32 %v3580_v23, %v3579_v55  ;;  %v3618_v3 = vrot.slane %v3617_v47, 2 }
 0x608   : > { %7142 = vlog2.f32 %v3488_v24  ;;  %v3526_v40 = vadd.f32 %v3525_v25, %v3524_v0  ;;  %v3563_v41 = vrot.slane %v3562_v30, 1  ;;  %v3600_v9 = vadd.f32 %v3599_v28, %v3598_v22 }
 0x609   : > { %7144 = vlog2.f32 %v3507_v60  ;;  %v3545_v8 = vadd.f32 %v3544_v14, %v3543_v18  ;;  %v3582_v45 = vrot.slane %v3581_v39, 1  ;;  %v3619_v5 = vadd.f32 %v3618_v3, %v3617_v47 }
 0x60a   : > { %7146 = vlog2.f32 %v3526_v40  ;;  %v3564_v35 = vadd.f32 %v3563_v41, %v3562_v30  ;;  %v3601_v46 = vrot.slane %v3600_v9, 1 }
 0x60b   : > { %7148 = vlog2.f32 %v3545_v8  ;;  %v3583_v36 = vadd.f32 %v3582_v45, %v3581_v39  ;;  %v3620_v34 = vrot.slane %v3619_v5, 1 }
 0x60c   : > { %7150 = vlog2.f32 %v3564_v35  ;;  %v3602_v51 = vadd.f32 %v3601_v46, %v3600_v9 }
 0x60d   : > { %7152 = vlog2.f32 %v3583_v36  ;;  %v3621_v2 = vadd.f32 %v3620_v34, %v3619_v5 }
 0x60e   : > { %7154 = vlog2.f32 %v3602_v51 }
 0x60f   : > { %7156 = vlog2.f32 %v3621_v2 }
 0x612   : > { %v7143_v7 = vpop.eup %7142 }
 0x613   : > { %v7145_v52 = vpop.eup %7144  ;;  %v3490_v48 = vmul.f32 0.6931472, %v7143_v7 }
 0x614   : > { %v7147_v53 = vpop.eup %7146  ;;  %v3509_v54 = vmul.f32 0.6931472, %v7145_v52 }
 0x615   : > { %v7149_v56 = vpop.eup %7148  ;;  %v3491_v57 = vadd.f32 %v3490_v48, %v8565_v31  ;;  %v3528_v50 = vmul.f32 0.6931472, %v7147_v53 }
 0x616   : > { %v7151_v20 = vpop.eup %7150  ;;  %v3510_v11 = vadd.f32 %v3509_v54, %v8567_v37  ;;  %v3547_v59 = vmul.f32 0.6931472, %v7149_v56 }
 0x617   : > { %v7153_v17 = vpop.eup %7152  ;;  %v8600_v62 = vsub.f32 %v8531_v26, %v3491_v57  ;;  %v3529_v4 = vadd.f32 %v3528_v50, %v8569_v13  ;;  %v3566_v27 = vmul.f32 0.6931472, %v7151_v20 }
 0x618   : > { %v7155_v61 = vpop.eup %7154  ;;  %v8604_v19 = vsub.f32 %v8534_v33, %v3510_v11  ;;  %v3548_v12 = vadd.f32 %v3547_v59, %v8571_v63  ;;  %v3585_v55 = vmul.f32 0.6931472, %v7153_v17 }
 0x619   : > { %v7157_v31 = vpop.eup %7156  ;;  %v8608_v21 = vsub.f32 %v8537_v16, %v3529_v4  ;;  %v3567_v37 = vadd.f32 %v3566_v27, %v8573_v44  ;;  %v3604_v1 = vmul.f32 0.6931472, %v7155_v61 }
 0x61a   : > { %v3549_v26 = vsub.f32 %v8539_v42, %v3548_v12  ;;  %v3586_v0 = vadd.f32 %v3585_v55, %v8575_v29  ;;  %v3623_v13 = vmul.f32 0.6931472, %v7157_v31  ;;  %v3626_v10 = vmax.f32 %v8600_v62, %v8604_v19 }
 0x61b   : > { %v3568_v33 = vsub.f32 %v8541_v49, %v3567_v37  ;;  %v3605_v63 = vadd.f32 %v3604_v1, %v8577_v15 }
 0x61c   : > { %v3587_v22 = vsub.f32 %v8543_v38, %v3586_v0  ;;  %v3624_v16 = vadd.f32 %v3623_v13, %v8579_v43  ;;  %v3627_v32 = vmax.f32 %v8608_v21, %v3549_v26 }
 0x61d   : > { %v3606_v44 = vsub.f32 %v8545_v6, %v3605_v63 }
 0x61e   : > { %v3625_v42 = vsub.f32 %v8547_v58, %v3624_v16  ;;  %v3628_v18 = vmax.f32 %v3568_v33, %v3587_v22  ;;  %v3630_v29 = vmax.f32 %v3626_v10, %v3627_v32 }
 0x620   : > { %v3629_v23 = vmax.f32 %v3606_v44, %v3625_v42 }
 0x622   : > { %v3631_v47 = vmax.f32 %v3628_v18, %v3629_v23 }
 0x624   : > { %v3632_v24 = vmax.f32 %v3630_v29, %v3631_v47 }
 0x626   : > { %v3633_v25 = vsub.f32 %v8600_v62, %v3632_v24  ;;  %v3636_v49 = vsub.f32 %v8604_v19, %v3632_v24  ;;  %v3639_v15 = vsub.f32 %v8608_v21, %v3632_v24  ;;  %v3642_v38 = vsub.f32 %v3549_v26, %v3632_v24 }
 0x627   : > { %v3645_v30 = vsub.f32 %v3568_v33, %v3632_v24  ;;  %v3648_v43 = vsub.f32 %v3587_v22, %v3632_v24  ;;  %v3651_v28 = vsub.f32 %v3606_v44, %v3632_v24  ;;  %v3654_v60 = vsub.f32 %v3625_v42, %v3632_v24 }
 0x628   : > { %v3634_v14 = vmul.f32 1.442695, %v3633_v25  ;;  %v3637_v6 = vmul.f32 1.442695, %v3636_v49  ;;  %v3640_v39 = vmul.f32 1.442695, %v3639_v15 }
 0x629   : > { %v3643_v58 = vmul.f32 1.442695, %v3642_v38  ;;  %v3646_v3 = vmul.f32 1.442695, %v3645_v30  ;;  %v3649_v40 = vmul.f32 1.442695, %v3648_v43 }
 0x62a   : > { %7158 = vpow2.f32 %v3634_v14  ;;  %v3652_v41 = vmul.f32 1.442695, %v3651_v28  ;;  %v3655_v9 = vmul.f32 1.442695, %v3654_v60 }
 0x62b   : > { %7160 = vpow2.f32 %v3637_v6 }
 0x62c   : > { %7162 = vpow2.f32 %v3640_v39 }
 0x62d   : > { %7164 = vpow2.f32 %v3643_v58 }
 0x62e   : > { %7166 = vpow2.f32 %v3646_v3 }
 0x62f   : > { %7168 = vpow2.f32 %v3649_v40 }
 0x630   : > { %7170 = vpow2.f32 %v3652_v41 }
 0x631   : > { %7172 = vpow2.f32 %v3655_v9 }
 0x634   : > { %v7159_v8 = vpop.eup %7158 }
 0x635   : > { %v7161_v45 = vpop.eup %7160 }
 0x636   : > { %v7163_v5 = vpop.eup %7162  ;;  %v3657_v35 = vadd.f32 %v7161_v45, %v7159_v8 }
 0x637   : > { %v7165_v46 = vpop.eup %7164 }
 0x638   : > { %v7167_v36 = vpop.eup %7166  ;;  %v3658_v34 = vadd.f32 %v7165_v46, %v7163_v5 }
 0x639   : > { %v7169_v51 = vpop.eup %7168 }
 0x63a   : > { %v7171_v2 = vpop.eup %7170  ;;  %v3659_v7 = vadd.f32 %v7169_v51, %v7167_v36  ;;  %v3661_v52 = vadd.f32 %v3658_v34, %v3657_v35 }
 0x63b   : > { %v7173_v48 = vpop.eup %7172 }
 0x63c   : > { %v3660_v53 = vadd.f32 %v7173_v48, %v7171_v2 }
 0x63e   : > { %v3662_v54 = vadd.f32 %v3660_v53, %v3659_v7 }
 0x640   : > { %v3663_v56 = vadd.f32 %v3662_v54, %v3661_v52 }
 0x642   : > { %7174 = vlog2.f32 %v3663_v56 }
 0x64c   : > { %v7175_v57 = vpop.eup %7174 }
 0x64d   : > { %v3665_v50 = vmul.f32 0.6931472, %v7175_v57 }
 0x64f   : > { %v3666_v20 = vadd.f32 %v3665_v50, %v3632_v24 }
 0x651   : > { %v8626_v11 = vsub.f32 %v8600_v62, %v3666_v20  ;;  %v8629_v59 = vsub.f32 %v8604_v19, %v3666_v20  ;;  %v8632_v17 = vsub.f32 %v8608_v21, %v3666_v20  ;;  %v8634_v4 = vsub.f32 %v3549_v26, %v3666_v20 }
 0x652   : > { %v8636_v27 = vsub.f32 %v3568_v33, %v3666_v20  ;;  %v8638_v61 = vsub.f32 %v3587_v22, %v3666_v20  ;;  %v8640_v12 = vsub.f32 %v3606_v44, %v3666_v20  ;;  %v8642_v55 = vsub.f32 %v3625_v42, %v3666_v20 }
 0x653   : > { %v3675_v31 = vrot.slane %v8626_v11, 4  ;;  %v3694_v62 = vrot.slane %v8629_v59, 4  ;;  %v3713_v19 = vrot.slane %v8632_v17, 4  ;;  %v3732_v37 = vrot.slane %v8634_v4, 4 }
 0x654   : > { %v3751_v21 = vrot.slane %v8636_v27, 4  ;;  %v3770_v1 = vrot.slane %v8638_v61, 4  ;;  %v3789_v26 = vrot.slane %v8640_v12, 4  ;;  %v3808_v0 = vrot.slane %v8642_v55, 4 }
 0x655   : > { %v3676_v13 = vmax.f32 %v8626_v11, %v3675_v31  ;;  %v3695_v10 = vmax.f32 %v8629_v59, %v3694_v62  ;;  %v3714_v33 = vmax.f32 %v8632_v17, %v3713_v19  ;;  %v3733_v63 = vmax.f32 %v8634_v4, %v3732_v37 }
 0x656   : > { %v3752_v22 = vmax.f32 %v8636_v27, %v3751_v21  ;;  %v3771_v16 = vmax.f32 %v8638_v61, %v3770_v1  ;;  %v3790_v32 = vmax.f32 %v8640_v12, %v3789_v26  ;;  %v3809_v44 = vmax.f32 %v8642_v55, %v3808_v0 }
 0x657   : > { %v3677_v42 = vrot.slane %v3676_v13, 2  ;;  %v3696_v18 = vrot.slane %v3695_v10, 2  ;;  %v3715_v29 = vrot.slane %v3714_v33, 2  ;;  %v3734_v23 = vrot.slane %v3733_v63, 2 }
 0x658   : > { %v3753_v47 = vrot.slane %v3752_v22, 2  ;;  %v3772_v24 = vrot.slane %v3771_v16, 2  ;;  %v3791_v25 = vrot.slane %v3790_v32, 2  ;;  %v3810_v49 = vrot.slane %v3809_v44, 2 }
 0x659   : > { %v3678_v15 = vmax.f32 %v3676_v13, %v3677_v42  ;;  %v3697_v38 = vmax.f32 %v3695_v10, %v3696_v18  ;;  %v3716_v30 = vmax.f32 %v3714_v33, %v3715_v29  ;;  %v3735_v43 = vmax.f32 %v3733_v63, %v3734_v23 }
 0x65a   : > { %v3754_v28 = vmax.f32 %v3752_v22, %v3753_v47  ;;  %v3773_v60 = vmax.f32 %v3771_v16, %v3772_v24  ;;  %v3792_v14 = vmax.f32 %v3790_v32, %v3791_v25  ;;  %v3811_v6 = vmax.f32 %v3809_v44, %v3810_v49 }
 0x65b   : > { %v3679_v39 = vrot.slane %v3678_v15, 1  ;;  %v3698_v58 = vrot.slane %v3697_v38, 1  ;;  %v3717_v3 = vrot.slane %v3716_v30, 1  ;;  %v3736_v40 = vrot.slane %v3735_v43, 1 }
 0x65c   : > { %v3755_v41 = vrot.slane %v3754_v28, 1  ;;  %v3774_v9 = vrot.slane %v3773_v60, 1  ;;  %v3793_v8 = vrot.slane %v3792_v14, 1  ;;  %v3812_v45 = vrot.slane %v3811_v6, 1 }
 0x65d   : > { %v8660_v5 = vmax.f32 %v3678_v15, %v3679_v39  ;;  %v8662_v35 = vmax.f32 %v3697_v38, %v3698_v58  ;;  %v8664_v46 = vmax.f32 %v3716_v30, %v3717_v3  ;;  %v8666_v36 = vmax.f32 %v3735_v43, %v3736_v40 }
 0x65e   : > { %v8668_v34 = vmax.f32 %v3754_v28, %v3755_v41  ;;  %v8670_v51 = vmax.f32 %v3773_v60, %v3774_v9  ;;  %v8672_v2 = vmax.f32 %v3792_v14, %v3793_v8  ;;  %v8674_v7 = vmax.f32 %v3811_v6, %v3812_v45 }
 0x65f   : > { %v3681_v52 = vsub.f32 %v8626_v11, %v8660_v5  ;;  %v3700_v48 = vsub.f32 %v8629_v59, %v8662_v35  ;;  %v3719_v53 = vsub.f32 %v8632_v17, %v8664_v46  ;;  %v3738_v54 = vsub.f32 %v8634_v4, %v8666_v36 }
 0x660   : > { %v3757_v56 = vsub.f32 %v8636_v27, %v8668_v34  ;;  %v3776_v57 = vsub.f32 %v8638_v61, %v8670_v51  ;;  %v3795_v62 = vsub.f32 %v8640_v12, %v8672_v2  ;;  %v3814_v37 = vsub.f32 %v8642_v55, %v8674_v7 }
 0x661   : > { %v3682_v50 = vmul.f32 1.442695, %v3681_v52  ;;  %v3701_v20 = vmul.f32 1.442695, %v3700_v48  ;;  %v3720_v31 = vmul.f32 1.442695, %v3719_v53 }
 0x662   : > { %v3739_v19 = vmul.f32 1.442695, %v3738_v54  ;;  %v3758_v21 = vmul.f32 1.442695, %v3757_v56  ;;  %v3777_v1 = vmul.f32 1.442695, %v3776_v57 }
 0x663   : > { %7176 = vpow2.f32 %v3682_v50  ;;  %v3796_v26 = vmul.f32 1.442695, %v3795_v62  ;;  %v3815_v0 = vmul.f32 1.442695, %v3814_v37 }
 0x664   : > { %7178 = vpow2.f32 %v3701_v20 }
 0x665   : > { %7180 = vpow2.f32 %v3720_v31 }
 0x666   : > { %7182 = vpow2.f32 %v3739_v19 }
 0x667   : > { %7184 = vpow2.f32 %v3758_v21 }
 0x668   : > { %7186 = vpow2.f32 %v3777_v1 }
 0x669   : > { %7188 = vpow2.f32 %v3796_v26 }
 0x66a   : > { %7190 = vpow2.f32 %v3815_v0 }
 0x66d   : > { %v7177_v13 = vpop.eup %7176 }
 0x66e   : > { %v7179_v10 = vpop.eup %7178  ;;  %v3684_v33 = vrot.slane %v7177_v13, 4 }
 0x66f   : > { %v7181_v63 = vpop.eup %7180  ;;  %v3703_v22 = vrot.slane %v7179_v10, 4 }
 0x670   : > { %v7183_v16 = vpop.eup %7182  ;;  %v3685_v32 = vadd.f32 %v7177_v13, %v3684_v33  ;;  %v3722_v44 = vrot.slane %v7181_v63, 4 }
 0x671   : > { %v7185_v42 = vpop.eup %7184  ;;  %v3704_v18 = vadd.f32 %v7179_v10, %v3703_v22  ;;  %v3741_v29 = vrot.slane %v7183_v16, 4 }
 0x672   : > { %v7187_v23 = vpop.eup %7186  ;;  %v3686_v47 = vrot.slane %v3685_v32, 2  ;;  %v3723_v24 = vadd.f32 %v7181_v63, %v3722_v44  ;;  %v3760_v25 = vrot.slane %v7185_v42, 4 }
 0x673   : > { %v7189_v49 = vpop.eup %7188  ;;  %v3705_v15 = vrot.slane %v3704_v18, 2  ;;  %v3742_v38 = vadd.f32 %v7183_v16, %v3741_v29  ;;  %v3779_v30 = vrot.slane %v7187_v23, 4 }
 0x674   : > { %v7191_v43 = vpop.eup %7190  ;;  %v3687_v28 = vadd.f32 %v3686_v47, %v3685_v32  ;;  %v3724_v60 = vrot.slane %v3723_v24, 2  ;;  %v3761_v14 = vadd.f32 %v7185_v42, %v3760_v25  ;;  %v3798_v6 = vrot.slane %v7189_v49, 4 }
 0x675   : > { %v3706_v39 = vadd.f32 %v3705_v15, %v3704_v18  ;;  %v3743_v58 = vrot.slane %v3742_v38, 2  ;;  %v3780_v3 = vadd.f32 %v7187_v23, %v3779_v30  ;;  %v3817_v40 = vrot.slane %v7191_v43, 4 }
 0x676   : > { %v3688_v41 = vrot.slane %v3687_v28, 1  ;;  %v3725_v9 = vadd.f32 %v3724_v60, %v3723_v24  ;;  %v3762_v8 = vrot.slane %v3761_v14, 2  ;;  %v3799_v45 = vadd.f32 %v7189_v49, %v3798_v6 }
 0x677   : > { %v3707_v52 = vrot.slane %v3706_v39, 1  ;;  %v3744_v48 = vadd.f32 %v3743_v58, %v3742_v38  ;;  %v3781_v53 = vrot.slane %v3780_v3, 2  ;;  %v3818_v54 = vadd.f32 %v7191_v43, %v3817_v40 }
 0x678   : > { %v3689_v56 = vadd.f32 %v3688_v41, %v3687_v28  ;;  %v3726_v57 = vrot.slane %v3725_v9, 1  ;;  %v3763_v50 = vadd.f32 %v3762_v8, %v3761_v14  ;;  %v3800_v20 = vrot.slane %v3799_v45, 2 }
 0x679   : > { %v3708_v31 = vadd.f32 %v3707_v52, %v3706_v39  ;;  %v3745_v62 = vrot.slane %v3744_v48, 1  ;;  %v3782_v19 = vadd.f32 %v3781_v53, %v3780_v3  ;;  %v3819_v37 = vrot.slane %v3818_v54, 2 }
 0x67a   : > { %7192 = vlog2.f32 %v3689_v56  ;;  %v3727_v21 = vadd.f32 %v3726_v57, %v3725_v9  ;;  %v3764_v1 = vrot.slane %v3763_v50, 1  ;;  %v3801_v26 = vadd.f32 %v3800_v20, %v3799_v45 }
 0x67b   : > { %7194 = vlog2.f32 %v3708_v31  ;;  %v3746_v0 = vadd.f32 %v3745_v62, %v3744_v48  ;;  %v3783_v13 = vrot.slane %v3782_v19, 1  ;;  %v3820_v10 = vadd.f32 %v3819_v37, %v3818_v54 }
 0x67c   : > { %7196 = vlog2.f32 %v3727_v21  ;;  %v3765_v33 = vadd.f32 %v3764_v1, %v3763_v50  ;;  %v3802_v63 = vrot.slane %v3801_v26, 1 }
 0x67d   : > { %7198 = vlog2.f32 %v3746_v0  ;;  %v3784_v22 = vadd.f32 %v3783_v13, %v3782_v19  ;;  %v3821_v16 = vrot.slane %v3820_v10, 1 }
 0x67e   : > { %7200 = vlog2.f32 %v3765_v33  ;;  %v3803_v32 = vadd.f32 %v3802_v63, %v3801_v26 }
 0x67f   : > { %7202 = vlog2.f32 %v3784_v22  ;;  %v3822_v44 = vadd.f32 %v3821_v16, %v3820_v10 }
 0x680   : > { %7204 = vlog2.f32 %v3803_v32 }
 0x681   : > { %7206 = vlog2.f32 %v3822_v44 }
 0x684   : > { %v7193_v42 = vpop.eup %7192 }
 0x685   : > { %v7195_v18 = vpop.eup %7194  ;;  %v3691_v29 = vmul.f32 0.6931472, %v7193_v42 }
 0x686   : > { %v7197_v23 = vpop.eup %7196  ;;  %v3710_v47 = vmul.f32 0.6931472, %v7195_v18 }
 0x687   : > { %v7199_v24 = vpop.eup %7198  ;;  %v3692_v25 = vadd.f32 %v3691_v29, %v8660_v5  ;;  %v3729_v49 = vmul.f32 0.6931472, %v7197_v23 }
 0x688   : > { %v7201_v15 = vpop.eup %7200  ;;  %v3711_v38 = vadd.f32 %v3710_v47, %v8662_v35  ;;  %v3748_v30 = vmul.f32 0.6931472, %v7199_v24 }
 0x689   : > { %v7203_v43 = vpop.eup %7202  ;;  %v8695_v28 = vsub.f32 %v8626_v11, %v3692_v25  ;;  %v3730_v60 = vadd.f32 %v3729_v49, %v8664_v46  ;;  %v3767_v14 = vmul.f32 0.6931472, %v7201_v15  ;;  %v3876_v49 = vlaneseq }
 0x68a   : > { %v7205_v6 = vpop.eup %7204  ;;  %v8699_v39 = vsub.f32 %v8629_v59, %v3711_v38  ;;  %v3749_v58 = vadd.f32 %v3748_v30, %v8666_v36  ;;  %v3786_v3 = vmul.f32 0.6931472, %v7203_v43 }
 0x68b   : > { %v7207_v5 = vpop.eup %7206  ;;  %v8703_v40 = vsub.f32 %v8632_v17, %v3730_v60  ;;  %v3768_v35 = vadd.f32 %v3767_v14, %v8668_v34  ;;  %v3805_v41 = vmul.f32 0.6931472, %v7205_v6  ;;  %v8724_v30 = vshrl.u32 %v3876_v49, 7 }
 0x68c   : > { %v8707_v11 = vsub.f32 %v8634_v4, %v3749_v58  ;;  %v3787_v46 = vadd.f32 %v3786_v3, %v8670_v51  ;;  %v3824_v9 = vmul.f32 0.6931472, %v7207_v5  ;;  %v3827_v59 = vmax.f32 %v8695_v28, %v8699_v39 }
 0x68d   : > { %v3769_v8 = vsub.f32 %v8636_v27, %v3768_v35  ;;  %v3806_v36 = vadd.f32 %v3805_v41, %v8672_v2 }
 0x68e   : > { %v3788_v45 = vsub.f32 %v8638_v61, %v3787_v46  ;;  %v3825_v17 = vadd.f32 %v3824_v9, %v8674_v7  ;;  %v3828_v34 = vmax.f32 %v8703_v40, %v8707_v11 }
 0x68f   : > { %v3807_v4 = vsub.f32 %v8640_v12, %v3806_v36 }
 0x690   : > { %v3826_v52 = vsub.f32 %v8642_v55, %v3825_v17  ;;  %v3829_v51 = vmax.f32 %v3769_v8, %v3788_v45  ;;  %v3831_v48 = vmax.f32 %v3827_v59, %v3828_v34 }
 0x692   : > { %v3830_v53 = vmax.f32 %v3807_v4, %v3826_v52 }
 0x694   : > { %v3832_v54 = vmax.f32 %v3829_v51, %v3830_v53 }
 0x696   : > { %v3833_v56 = vmax.f32 %v3831_v48, %v3832_v54 }
 0x698   : > { %v3834_v27 = vsub.f32 %v8695_v28, %v3833_v56  ;;  %v3837_v2 = vsub.f32 %v8699_v39, %v3833_v56  ;;  %v3840_v61 = vsub.f32 %v8703_v40, %v3833_v56  ;;  %v3843_v7 = vsub.f32 %v8707_v11, %v3833_v56 }
 0x699   : > { %v3846_v57 = vsub.f32 %v3769_v8, %v3833_v56  ;;  %v3849_v50 = vsub.f32 %v3788_v45, %v3833_v56  ;;  %v3852_v20 = vsub.f32 %v3807_v4, %v3833_v56  ;;  %v3855_v31 = vsub.f32 %v3826_v52, %v3833_v56 }
 0x69a   : > { %v3835_v12 = vmul.f32 1.442695, %v3834_v27  ;;  %v3838_v62 = vmul.f32 1.442695, %v3837_v2  ;;  %v3841_v55 = vmul.f32 1.442695, %v3840_v61 }
 0x69b   : > { %v3844_v19 = vmul.f32 1.442695, %v3843_v7  ;;  %v3847_v37 = vmul.f32 1.442695, %v3846_v57  ;;  %v3850_v21 = vmul.f32 1.442695, %v3849_v50 }
 0x69c   : > { %7208 = vpow2.f32 %v3835_v12  ;;  %v3853_v1 = vmul.f32 1.442695, %v3852_v20  ;;  %v3856_v26 = vmul.f32 1.442695, %v3855_v31 }
 0x69d   : > { %7210 = vpow2.f32 %v3838_v62 }
 0x69e   : > { %7212 = vpow2.f32 %v3841_v55 }
 0x69f   : > { %7214 = vpow2.f32 %v3844_v19 }
 0x6a0   : > { %7216 = vpow2.f32 %v3847_v37 }
 0x6a1   : > { %7218 = vpow2.f32 %v3850_v21 }
 0x6a2   : > { %7220 = vpow2.f32 %v3853_v1 }
 0x6a3   : > { %7222 = vpow2.f32 %v3856_v26 }
 0x6a6   : > { %v7209_v0 = vpop.eup %7208 }
 0x6a7   : > { %v7211_v13 = vpop.eup %7210 }
 0x6a8   : > { %v7213_v10 = vpop.eup %7212  ;;  %v3858_v33 = vadd.f32 %v7211_v13, %v7209_v0 }
 0x6a9   : > { %v7215_v63 = vpop.eup %7214 }
 0x6aa   : > { %v7217_v22 = vpop.eup %7216  ;;  %v3859_v16 = vadd.f32 %v7215_v63, %v7213_v10 }
 0x6ab   : > { %v7219_v32 = vpop.eup %7218 }
 0x6ac   : > { %v7221_v44 = vpop.eup %7220  ;;  %v3860_v42 = vadd.f32 %v7219_v32, %v7217_v22  ;;  %v3862_v18 = vadd.f32 %v3859_v16, %v3858_v33 }
 0x6ad   : > { %v7223_v29 = vpop.eup %7222 }
 0x6ae   : > { %v3861_v23 = vadd.f32 %v7223_v29, %v7221_v44 }
 0x6b0   : > { %v3863_v47 = vadd.f32 %v3861_v23, %v3860_v42 }
 0x6b2   : > { %v3864_v24 = vadd.f32 %v3863_v47, %v3862_v18 }
 0x6b4   : > { %7224 = vlog2.f32 %v3864_v24 }
 0x6be   : > { %v7225_v25 = vpop.eup %7224 }
 0x6bf   : > { %v3866_v15 = vmul.f32 0.6931472, %v7225_v25 }
 0x6c1   : > { %v3867_v38 = vadd.f32 %v3866_v15, %v3833_v56 }
 0x6c3   : > { %v3868_v43 = vsub.f32 %v8695_v28, %v3867_v38  ;;  %v3869_v60 = vsub.f32 %v8699_v39, %v3867_v38  ;;  %v3870_v14 = vsub.f32 %v8703_v40, %v3867_v38  ;;  %v3871_v6 = vsub.f32 %v8707_v11, %v3867_v38 }
 0x6c4   : > { %v8730_v58 = vsub.f32 %v3769_v8, %v3867_v38  ;;  %v8732_v3 = vsub.f32 %v3788_v45, %v3867_v38  ;;  %v8734_v5 = vsub.f32 %v3807_v4, %v3867_v38  ;;  %v8736_v35 = vsub.f32 %v3826_v52, %v3867_v38 }
 0x6c5   : > { %v3878_v41 = vrot.slane %v3868_v43, 4  ;;  %v3895_v46 = vrot.slane %v3869_v60, 4  ;;  %v3912_v9 = vrot.slane %v3870_v14, 4  ;;  %v3929_v59 = vrot.slane %v3871_v6, 4 }
 0x6c6   : > { %v3946_v28 = vrot.slane %v8730_v58, 4  ;;  %v3963_v39 = vrot.slane %v8732_v3, 4  ;;  %v3980_v40 = vrot.slane %v8734_v5, 4  ;;  %v3997_v11 = vrot.slane %v8736_v35, 4 }
 0x6c7   : > { %v3879_v8 = vmax.f32 %v3868_v43, %v3878_v41  ;;  %v3896_v36 = vmax.f32 %v3869_v60, %v3895_v46  ;;  %v3913_v45 = vmax.f32 %v3870_v14, %v3912_v9  ;;  %v3930_v17 = vmax.f32 %v3871_v6, %v3929_v59 }
 0x6c8   : > { %v3947_v34 = vmax.f32 %v8730_v58, %v3946_v28  ;;  %v3964_v4 = vmax.f32 %v8732_v3, %v3963_v39  ;;  %v3981_v52 = vmax.f32 %v8734_v5, %v3980_v40  ;;  %v3998_v51 = vmax.f32 %v8736_v35, %v3997_v11 }
 0x6c9   : > { %v3880_v48 = vrot.slane %v3879_v8, 2  ;;  %v3897_v53 = vrot.slane %v3896_v36, 2  ;;  %v3914_v54 = vrot.slane %v3913_v45, 2  ;;  %v3931_v56 = vrot.slane %v3930_v17, 2 }
 0x6ca   : > { %v3948_v27 = vrot.slane %v3947_v34, 2  ;;  %v3965_v2 = vrot.slane %v3964_v4, 2  ;;  %v3982_v61 = vrot.slane %v3981_v52, 2  ;;  %v3999_v7 = vrot.slane %v3998_v51, 2 }
 0x6cb   : > { %v3881_v57 = vmax.f32 %v3879_v8, %v3880_v48  ;;  %v3898_v50 = vmax.f32 %v3896_v36, %v3897_v53  ;;  %v3915_v20 = vmax.f32 %v3913_v45, %v3914_v54  ;;  %v3932_v31 = vmax.f32 %v3930_v17, %v3931_v56 }
 0x6cc   : > { %v3949_v12 = vmax.f32 %v3947_v34, %v3948_v27  ;;  %v3966_v62 = vmax.f32 %v3964_v4, %v3965_v2  ;;  %v3983_v55 = vmax.f32 %v3981_v52, %v3982_v61  ;;  %v4000_v19 = vmax.f32 %v3998_v51, %v3999_v7 }
 0x6cd   : > { %v3882_v37 = vrot.slane %v3881_v57, 1  ;;  %v3899_v21 = vrot.slane %v3898_v50, 1  ;;  %v3916_v1 = vrot.slane %v3915_v20, 1  ;;  %v3933_v26 = vrot.slane %v3932_v31, 1 }
 0x6ce   : > { %v3950_v0 = vrot.slane %v3949_v12, 1  ;;  %v3967_v13 = vrot.slane %v3966_v62, 1  ;;  %v3984_v10 = vrot.slane %v3983_v55, 1  ;;  %v4001_v33 = vrot.slane %v4000_v19, 1 }
 0x6cf   : > { %v3883_v63 = vmax.f32 %v3881_v57, %v3882_v37  ;;  %v3900_v22 = vmax.f32 %v3898_v50, %v3899_v21  ;;  %v3917_v16 = vmax.f32 %v3915_v20, %v3916_v1  ;;  %v3934_v32 = vmax.f32 %v3932_v31, %v3933_v26  ;;  %v8792_v37 = vld [vmem:[%s7404_s26 + $0x10] sm:$0xff] }
 0x6d0   : > { %v3951_v44 = vmax.f32 %v3949_v12, %v3950_v0  ;;  %v3968_v42 = vmax.f32 %v3966_v62, %v3967_v13  ;;  %v3985_v18 = vmax.f32 %v3983_v55, %v3984_v10  ;;  %v4002_v29 = vmax.f32 %v4000_v19, %v4001_v33  ;;  %v8786_v55 = vld [vmem:[%s7404_s26] sm:$0xff]  ;;  %v8789_v19 = vld [vmem:[%s7404_s26 + $0x8] sm:$0xff]  ;;  %v8796_v13 = vld [vmem:[%s7404_s26 + $0x18] sm:$0xff] }
 0x6d1   : > { %vm3884_vm3 = vcmp.ge.f32.partialorder %v3868_v43, %v3883_v63  ;;  %vm3901_vm4 = vcmp.ge.f32.partialorder %v3869_v60, %v3900_v22  ;;  %vm3918_vm5 = vcmp.ge.f32.partialorder %v3870_v14, %v3917_v16  ;;  %vm3935_vm6 = vcmp.ge.f32.partialorder %v3871_v6, %v3934_v32  ;;  %v8799_v10 = vld [vmem:[%s7404_s26 + $0x20] sm:$0xff]  ;;  %v8802_v33 = vld [vmem:[%s7404_s26 + $0x28] sm:$0xff] }
 0x6d2   : > { %v3885_v23 = vsel %vm3884_vm3, %v8724_v30, 8  ;;  %v3902_v47 = vsel %vm3901_vm4, %v8724_v30, 8  ;;  %v3919_v24 = vsel %vm3918_vm5, %v8724_v30, 8  ;;  %v3936_v25 = vsel %vm3935_vm6, %v8724_v30, 8  ;;  %10867 = vst [vmem:[#allocation6_spill] sm:$0xff] %v8799_v10  ;;  %10868 = vst [vmem:[#allocation7_spill] sm:$0xff] %v8802_v33 }
 0x6d3   : > { %v3886_v49 = vrot.slane %v3885_v23, 4  ;;  %v3903_v15 = vrot.slane %v3902_v47, 4  ;;  %v3920_v38 = vrot.slane %v3919_v24, 4  ;;  %v3937_v41 = vrot.slane %v3936_v25, 4 }
 0x6d4   : > { %vm3952_vm7 = vcmp.ge.f32.partialorder %v8730_v58, %v3951_v44  ;;  %vm3969_vm8 = vcmp.ge.f32.partialorder %v8732_v3, %v3968_v42  ;;  %vm3986_vm9 = vcmp.ge.f32.partialorder %v8734_v5, %v3985_v18  ;;  %vm4003_vm10 = vcmp.ge.f32.partialorder %v8736_v35, %v4002_v29  ;;  %v8806_v44 = vld [vmem:[%s7404_s26 + $0x30] sm:$0xff]  ;;  %v8809_v42 = vld [vmem:[%s7404_s26 + $0x38] sm:$0xff]  ;;  %v8812_v18 = vld [vmem:[%s7404_s26 + $0x40] sm:$0xff] }
 0x6d5   : > { %vm3887_vm11 = vcmp.lt.s32.totalorder %v3885_v23, %v3886_v49  ;;  %vm3904_vm12 = vcmp.lt.s32.totalorder %v3902_v47, %v3903_v15  ;;  %vm3921_vm13 = vcmp.lt.s32.totalorder %v3919_v24, %v3920_v38  ;;  %vm3938_vm14 = vcmp.lt.s32.totalorder %v3936_v25, %v3937_v41  ;;  %10869 = vst [vmem:[#allocation8_spill] sm:$0xff] %v8806_v44 }
 0x6d6   : > { %v3888_v43 = vsel %vm3887_vm11, %v3885_v23, %v3886_v49  ;;  %v3905_v60 = vsel %vm3904_vm12, %v3902_v47, %v3903_v15  ;;  %v3922_v14 = vsel %vm3921_vm13, %v3919_v24, %v3920_v38  ;;  %v3939_v6 = vsel %vm3938_vm14, %v3936_v25, %v3937_v41  ;;  %10870 = vst [vmem:[#allocation9_spill] sm:$0xff] %v8809_v42  ;;  %v8826_v25 = vld [vmem:[%s7404_s26 + $0x48] sm:$0xff]  ;;  %v8829_v49 = vld [vmem:[%s7404_s26 + $0x50] sm:$0xff]  ;;  %v8832_v15 = vld [vmem:[%s7404_s26 + $0x58] sm:$0xff] }
 0x6d7   : > { %v3889_v46 = vrot.slane %v3888_v43, 2  ;;  %v3906_v9 = vrot.slane %v3905_v60, 2  ;;  %v3923_v59 = vrot.slane %v3922_v14, 2  ;;  %v3940_v28 = vrot.slane %v3939_v6, 2  ;;  %v8835_v38 = vld [vmem:[%s7404_s26 + $0x60] sm:$0xff]  ;;  %v8838_v41 = vld [vmem:[%s7404_s26 + $0x68] sm:$0xff] }
 0x6d8   : > { %v3953_v39 = vsel %vm3952_vm7, %v8724_v30, 8  ;;  %v3970_v40 = vsel %vm3969_vm8, %v8724_v30, 8  ;;  %v3987_v11 = vsel %vm3986_vm9, %v8724_v30, 8  ;;  %v4004_v8 = vsel %vm4003_vm10, %v8724_v30, 8 }
 0x6d9   : > { %vm3890_vm0 = vcmp.lt.s32.totalorder %v3888_v43, %v3889_v46  ;;  %vm3907_vm1 = vcmp.lt.s32.totalorder %v3905_v60, %v3906_v9  ;;  %vm3924_vm2 = vcmp.lt.s32.totalorder %v3922_v14, %v3923_v59  ;;  %vm3941_vm3 = vcmp.lt.s32.totalorder %v3939_v6, %v3940_v28 }
 0x6da   : > { %v3891_v36 = vsel %vm3890_vm0, %v3888_v43, %v3889_v46  ;;  %v3908_v45 = vsel %vm3907_vm1, %v3905_v60, %v3906_v9  ;;  %v3925_v58 = vsel %vm3924_vm2, %v3922_v14, %v3923_v59  ;;  %v3942_v17 = vsel %vm3941_vm3, %v3939_v6, %v3940_v28  ;;  %v8841_v43 = vld [vmem:[%s7404_s26 + $0x70] sm:$0xff]  ;;  %v8856_v9 = vld [vmem:[%s7404_s26 + $0x78] sm:$0xff]  ;;  %v8859_v59 = vld [vmem:[%s7404_s26 + $0x80] sm:$0xff] }
 0x6db   : > { %v3892_v34 = vrot.slane %v3891_v36, 1  ;;  %v3909_v4 = vrot.slane %v3908_v45, 1  ;;  %v3926_v3 = vrot.slane %v3925_v58, 1  ;;  %v3943_v52 = vrot.slane %v3942_v17, 1  ;;  %v8862_v28 = vld [vmem:[%s7404_s26 + $0x88] sm:$0xff] }
 0x6dc   : > { %v3954_v51 = vrot.slane %v3953_v39, 4  ;;  %v3971_v48 = vrot.slane %v3970_v40, 4  ;;  %v3988_v5 = vrot.slane %v3987_v11, 4  ;;  %v4005_v53 = vrot.slane %v4004_v8, 4 }
 0x6dd   : > { %vm3893_vm4 = vcmp.lt.s32.totalorder %v3891_v36, %v3892_v34  ;;  %vm3910_vm5 = vcmp.lt.s32.totalorder %v3908_v45, %v3909_v4  ;;  %vm3927_vm6 = vcmp.lt.s32.totalorder %v3925_v58, %v3926_v3  ;;  %vm4016_vm7 = vcmask 1041408  }
 0x6de   : > { %v8766_v30 = vsel %vm3893_vm4, %v3891_v36, %v3892_v34  ;;  %v8768_v35 = vsel %vm3910_vm5, %v3908_v45, %v3909_v4  ;;  %v8770_v54 = vsel %vm3927_vm6, %v3925_v58, %v3926_v3  ;;  %vm8772_vm8 = vcmp.lt.s32.totalorder %v3942_v17, %v3943_v52  ;;  %v8876_v36 = vld [vmem:[%s7404_s26 + $0x90] sm:$0xff]  ;;  %v8879_v45 = vld [vmem:[%s7404_s26 + $0x98] sm:$0xff]  ;;  %v8882_v58 = vld [vmem:[%s7404_s26 + $0xa0] sm:$0xff] }
 0x6df   : > { %10864 = vst [vmem:[#allocation5_spill] sm:$0xff] %v8768_v35  ;;  %vm4018_vm9 = vcmask 1042432   ;;  %vm3955_vm10 = vcmp.lt.s32.totalorder %v3953_v39, %v3954_v51  ;;  %vm3972_vm11 = vcmp.lt.s32.totalorder %v3970_v40, %v3971_v48  ;;  %vm3989_vm12 = vcmp.lt.s32.totalorder %v3987_v11, %v3988_v5  ;;  %10872 = vst [vmem:[#allocation11_spill] sm:$0xff] %v8879_v45 }
 0x6e0   : > { %vm4006_vm13 = vcmp.lt.s32.totalorder %v4004_v8, %v4005_v53  ;;  %vm4020_vm14 = vcmask 1043456   ;;  %v3956_v27 = vsel %vm3955_vm10, %v3953_v39, %v3954_v51  ;;  %v3973_v2 = vsel %vm3972_vm11, %v3970_v40, %v3971_v48  ;;  %10873 = vst [vmem:[#allocation12_spill] sm:$0xff] %v8882_v58  ;;  %v8899_v51 = vld [vmem:[%s7404_s26 + $0xb0] sm:$0xff]  ;;  %v8902_v48 = vld [vmem:[%s7404_s26 + $0xb8] sm:$0xff] }
 0x6e1   : > { %v3990_v61 = vsel %vm3989_vm12, %v3987_v11, %v3988_v5  ;;  %v4007_v7 = vsel %vm4006_vm13, %v4004_v8, %v4005_v53  ;;  %vm4022_vm0 = vcmask 1044480   ;;  %v3957_v57 = vrot.slane %v3956_v27, 2  ;;  %10875 = vst [vmem:[#allocation14_spill] sm:$0xff] %v8899_v51  ;;  %10876 = vst [vmem:[#allocation15_spill] sm:$0xff] %v8902_v48 }
 0x6e2   : > { %v3974_v50 = vrot.slane %v3973_v2, 2  ;;  %v3991_v20 = vrot.slane %v3990_v61, 2  ;;  %v4008_v31 = vrot.slane %v4007_v7, 2  ;;  %vm4024_vm1 = vcmask 1045504  }
 0x6e3   : > { %v8778_v12 = vsel %vm8772_vm8, %v3942_v17, %v3943_v52  ;;  %v4015_v62 = vsel %vm4014_vm15, %v8766_v30, %v8768_v35  ;;  %vm4026_vm2 = vcmask 1046528   ;;  %vm4029_vm3 = vcmp.eq.s32.totalorder %v8766_v30, 0  ;;  %v8896_v52 = vld [vmem:[%s7404_s26 + $0xa8] sm:$0xff] }
 0x6e4   : > { %vm4048_vm4 = vcmp.eq.s32.totalorder %v8768_v35, 0  ;;  %vm3958_vm5 = vcmp.lt.s32.totalorder %v3956_v27, %v3957_v57  ;;  %vm3975_vm6 = vcmp.lt.s32.totalorder %v3973_v2, %v3974_v50  ;;  %vm3992_vm10 = vcmp.lt.s32.totalorder %v3990_v61, %v3991_v20  ;;  %10874 = vst [vmem:[#allocation13_spill] sm:$0xff] %v8896_v52 }
 0x6e5   : > { %vm4009_vm11 = vcmp.lt.s32.totalorder %v4007_v7, %v4008_v31  ;;  %v3959_v21 = vsel %vm3958_vm5, %v3956_v27, %v3957_v57  ;;  %v3976_v1 = vsel %vm3975_vm6, %v3973_v2, %v3974_v50  ;;  %v3993_v26 = vsel %vm3992_vm10, %v3990_v61, %v3991_v20  ;;  %v8916_v2 = vld [vmem:[%s7404_s26 + $0xc0] sm:$0xff]  ;;  %v8919_v61 = vld [vmem:[%s7404_s26 + $0xc8] sm:$0xff]  ;;  %v8925_v57 = vld [vmem:[%s7404_s26 + $0xd8] sm:$0xff] }
 0x6e6   : > { %v4010_v0 = vsel %vm4009_vm11, %v4007_v7, %v4008_v31  ;;  %vm4067_vm15 = vcmp.eq.s32.totalorder %v8770_v54, 0  ;;  %v3960_v63 = vrot.slane %v3959_v21, 1  ;;  %v3977_v22 = vrot.slane %v3976_v1, 1  ;;  %10877 = vst [vmem:[#allocation16_spill] sm:$0xff] %v8916_v2  ;;  %10878 = vst [vmem:[#allocation17_spill] sm:$0xff] %v8919_v61  ;;  %v8922_v7 = vld [vmem:[%s7404_s26 + $0xd0] sm:$0xff] }
 0x6e7   : > { %v3994_v16 = vrot.slane %v3993_v26, 1  ;;  %v4011_v32 = vrot.slane %v4010_v0, 1  ;;  %v4017_v29 = vsel %vm4016_vm7, %v4015_v62, %v8770_v54  ;;  %v4040_v23 = vsel %vm4029_vm3, %v8786_v55, 0.0  ;;  %10879 = vst [vmem:[#allocation18_spill] sm:$0xff] %v8922_v7  ;;  %10880 = vst [vmem:[#allocation19_spill] sm:$0xff] %v8925_v57 }
 0x6e8   : > { %v4041_v47 = vsel %vm4029_vm3, %v8789_v19, 0.0  ;;  %v4042_v24 = vsel %vm4029_vm3, %v8792_v37, 0.0  ;;  %vm3961_vm7 = vcmp.lt.s32.totalorder %v3959_v21, %v3960_v63  ;;  %vm3978_vm8 = vcmp.lt.s32.totalorder %v3976_v1, %v3977_v22 }
 0x6e9   : > { %vm3995_vm12 = vcmp.lt.s32.totalorder %v3993_v26, %v3994_v16  ;;  %vm4012_vm13 = vcmp.lt.s32.totalorder %v4010_v0, %v4011_v32  ;;  %v8847_v60 = vsel %vm3961_vm7, %v3959_v21, %v3960_v63  ;;  %v8849_v14 = vsel %vm3978_vm8, %v3976_v1, %v3977_v22  ;;  %v8939_v21 = vld [vmem:[%s7404_s26 + $0xe0] sm:$0xff]  ;;  %v8942_v1 = vld [vmem:[%s7404_s26 + $0xe8] sm:$0xff] }
 0x6ea   : > { %10871 = vst [vmem:[#allocation10_spill] sm:$0xff] %v8849_v14  ;;  %v8851_v6 = vsel %vm3995_vm12, %v3993_v26, %v3994_v16  ;;  %v8853_v46 = vsel %vm4012_vm13, %v4010_v0, %v4011_v32  ;;  %v4019_v39 = vsel %vm4018_vm9, %v4017_v29, %v8778_v12  ;;  %v4043_v40 = vsel %vm4029_vm3, %v8796_v13, 0.0  ;;  %10881 = vst [vmem:[#allocation20_spill] sm:$0xff] %v8939_v21  ;;  %v8945_v26 = vld [vmem:[%s7404_s26 + $0xf0] sm:$0xff]  ;;  %v8959_v32 = vld [vmem:[%s7404_s26 + $0xf8] sm:$0xff] }
 0x6eb   : > { %v4044_v11 = vsel %vm4029_vm3, %v8799_v10, 0.0  ;;  %v4045_v8 = vsel %vm4029_vm3, %v8802_v33, 0.0  ;;  %v4021_v17 = vsel %vm4020_vm14, %v4019_v39, %v8847_v60  ;;  %v4046_v34 = vsel %vm4029_vm3, %v8806_v44, 0.0  ;;  %10882 = vst [vmem:[#allocation21_spill] sm:$0xff] %v8942_v1  ;;  %10883 = vst [vmem:[#allocation22_spill] sm:$0xff] %v8945_v26  ;;  %v8962_v29 = vld [vmem:[%s7404_s26 + $0x100] sm:$0xff] }
 0x6ec   : > { %v4047_v4 = vsel %vm4029_vm3, %v8809_v42, 0.0  ;;  %v4059_v3 = vsel %vm4048_vm4, %v8812_v18, %v4040_v23  ;;  %v4023_v5 = vsel %vm4022_vm0, %v4021_v17, %v8849_v14  ;;  %v4060_v53 = vsel %vm4048_vm4, %v8826_v25, %v4041_v47  ;;  %10884 = vst [vmem:[#allocation23_spill] sm:$0xff] %v8959_v32  ;;  %10885 = vst [vmem:[#allocation24_spill] sm:$0xff] %v8962_v29  ;;  %v8965_v23 = vld [vmem:[%s7404_s26 + $0x108] sm:$0xff]  ;;  %v8989_v17 = vld [vmem:[%s7404_s26 + $0x120] sm:$0xff] }
 0x6ed   : > { %v4061_v56 = vsel %vm4048_vm4, %v8829_v49, %v4042_v24  ;;  %v4062_v27 = vsel %vm4048_vm4, %v8832_v15, %v4043_v40  ;;  %v4025_v50 = vsel %vm4024_vm1, %v4023_v5, %v8851_v6  ;;  %v4063_v20 = vsel %vm4048_vm4, %v8835_v38, %v4044_v11  ;;  %10886 = vst [vmem:[#allocation25_spill] sm:$0xff] %v8965_v23  ;;  %v8983_v11 = vld [vmem:[%s7404_s26 + $0x110] sm:$0xff] }
 0x6ee   : > { %v4064_v31 = vsel %vm4048_vm4, %v8838_v41, %v4045_v8  ;;  %v4065_v62 = vsel %vm4048_vm4, %v8841_v43, %v4046_v34  ;;  %v4027_v0 = vsel %vm4026_vm2, %v4025_v50, %v8853_v46  ;;  %v4066_v63 = vsel %vm4048_vm4, %v8856_v9, %v4047_v4  ;;  %10887 = vst [vmem:[#allocation26_spill] sm:$0xff] %v8983_v11  ;;  %v8986_v8 = vld [vmem:[%s7404_s26 + $0x118] sm:$0xff]  ;;  %v9003_v5 = vld [vmem:[%s7404_s26 + $0x130] sm:$0xff] }
 0x6ef   : > { %v4078_v22 = vsel %vm4067_vm15, %v8859_v59, %v4059_v3  ;;  %v4079_v16 = vsel %vm4067_vm15, %v8862_v28, %v4060_v53  ;;  %4028 = vst [vmem:[%s252_s14] sm:$0xff] %v4027_v0  ;;  %v4080_v47 = vsel %vm4067_vm15, %v8876_v36, %v4061_v56  ;;  %v4081_v24 = vsel %vm4067_vm15, %v8879_v45, %v4062_v27  ;;  %v9000_v3 = vld [vmem:[%s7404_s26 + $0x128] sm:$0xff]  ;;  %v9006_v53 = vld [vmem:[%s7404_s26 + $0x138] sm:$0xff]  ;;  %v9027_v0 = vld [vmem:[%s7404_s26 + $0x150] sm:$0xff] }
 0x6f0   : > { %v4082_v39 = vsel %vm4067_vm15, %v8882_v58, %v4063_v20  ;;  %v4083_v40 = vsel %vm4067_vm15, %v8896_v52, %v4064_v31  ;;  %10888 = vst [vmem:[#allocation27_spill] sm:$0xff] %v8986_v8  ;;  %10889 = vst [vmem:[#allocation28_spill] sm:$0xff] %v8989_v17  ;;  %v4084_v34 = vsel %vm4067_vm15, %v8899_v51, %v4065_v62  ;;  %vm4086_vm9 = vcmp.eq.s32.totalorder %v8778_v12, 0  ;;  %v9021_v31 = vld [vmem:[%s7404_s26 + $0x140] sm:$0xff]  ;;  %v9024_v62 = vld [vmem:[%s7404_s26 + $0x148] sm:$0xff] }
 0x6f1   : > { %v4085_v4 = vsel %vm4067_vm15, %v8902_v48, %v4066_v63  ;;  %vm4105_vm14 = vcmp.eq.s32.totalorder %v8847_v60, 0  ;;  %10890 = vst [vmem:[#allocation29_spill] sm:$0xff] %v9000_v3  ;;  %10891 = vst [vmem:[#allocation30_spill] sm:$0xff] %v9003_v5  ;;  %v4097_v56 = vsel %vm4086_vm9, %v8916_v2, %v4078_v22  ;;  %v4098_v27 = vsel %vm4086_vm9, %v8919_v61, %v4079_v16  ;;  %v9030_v63 = vld [vmem:[%s7404_s26 + $0x158] sm:$0xff] }
 0x6f2   : > { %10892 = vst [vmem:[#allocation31_spill] sm:$0xff] %v9006_v53  ;;  %v4099_v50 = vsel %vm4086_vm9, %v8922_v7, %v4080_v47  ;;  %v4100_v20 = vsel %vm4086_vm9, %v8925_v57, %v4081_v24  ;;  %10893 = vst [vmem:[#allocation32_spill] sm:$0xff] %v9021_v31  ;;  %v4101_v22 = vsel %vm4086_vm9, %v8939_v21, %v4082_v39  ;;  %v9045_v57 = vld [vmem:[%s7404_s26 + $0x160] sm:$0xff]  ;;  %v9048_v7 = vld [vmem:[%s7404_s26 + $0x168] sm:$0xff]  ;;  %vm4124_vm0 = vcmp.eq.s32.totalorder %v8849_v14, 0 }
 0x6f3   : > { %10894 = vst [vmem:[#allocation33_spill] sm:$0xff] %v9024_v62  ;;  %10895 = vst [vmem:[#allocation34_spill] sm:$0xff] %v9027_v0  ;;  %v4102_v16 = vsel %vm4086_vm9, %v8942_v1, %v4083_v40  ;;  %v4103_v47 = vsel %vm4086_vm9, %v8945_v26, %v4084_v34  ;;  %v4104_v24 = vsel %vm4086_vm9, %v8959_v32, %v4085_v4  ;;  %v9051_v39 = vld [vmem:[%s7404_s26 + $0x170] sm:$0xff]  ;;  %v9066_v26 = vld [vmem:[%s7404_s26 + $0x178] sm:$0xff]  ;;  %vm4143_vm1 = vcmp.eq.s32.totalorder %v8851_v6, 0 }
 0x6f4   : > { %10896 = vst [vmem:[#allocation35_spill] sm:$0xff] %v9030_v63  ;;  %10897 = vst [vmem:[#allocation36_spill] sm:$0xff] %v9048_v7  ;;  %v4116_v40 = vsel %vm4105_vm14, %v8962_v29, %v4097_v56  ;;  %v4117_v34 = vsel %vm4105_vm14, %v8965_v23, %v4098_v27  ;;  %v4118_v4 = vsel %vm4105_vm14, %v8983_v11, %v4099_v50  ;;  %v9069_v1 = vld [vmem:[%s7404_s26 + $0x180] sm:$0xff]  ;;  %v9072_v21 = vld [vmem:[%s7404_s26 + $0x188] sm:$0xff]  ;;  %vm4162_vm2 = vcmp.eq.s32.totalorder %v8853_v46, 0 }
 0x6f5   : > { %10898 = vst [vmem:[#allocation37_spill] sm:$0xff] %v9051_v39  ;;  %v4119_v32 = vsel %vm4105_vm14, %v8986_v8, %v4100_v20  ;;  %10899 = vst [vmem:[#allocation38_spill] sm:$0xff] %v9066_v26  ;;  %v4120_v56 = vsel %vm4105_vm14, %v8989_v17, %v4101_v22  ;;  %v4121_v27 = vsel %vm4105_vm14, %v9000_v3, %v4102_v16  ;;  %v9087_v8 = vld [vmem:[%s7404_s26 + $0x190] sm:$0xff]  ;;  %v9090_v11 = vld [vmem:[%s7404_s26 + $0x198] sm:$0xff]  ;;  %vm4189_vm3 = vcmp.eq.s32.totalorder %v8766_v30, 1 }
 0x6f6   : > { %v4122_v50 = vsel %vm4105_vm14, %v9003_v5, %v4103_v47  ;;  %v4123_v20 = vsel %vm4105_vm14, %v9006_v53, %v4104_v24  ;;  %10900 = vst [vmem:[#allocation39_spill] sm:$0xff] %v9090_v11  ;;  %v9093_v22 = vld [vmem:[%s7404_s26 + $0x1a0] sm:$0xff]  ;;  %v9098_v16 = vld [vmem:[%s7404_s26 + $0x1a8] sm:$0xff]  ;;  %v9101_v47 = vld [vmem:[%s7404_s26 + $0x1b0] sm:$0xff]  ;;  %v4135_v24 = vsel %vm4124_vm0, %v9021_v31, %v4116_v40  ;;  %v4136_v53 = vsel %vm4124_vm0, %v9024_v62, %v4117_v34 }
 0x6f7   : > { %v4137_v5 = vsel %vm4124_vm0, %v9027_v0, %v4118_v4  ;;  %v4138_v3 = vsel %vm4124_vm0, %v9030_v63, %v4119_v32  ;;  %v9118_v17 = vld [vmem:[%s7404_s26 + $0x1b8] sm:$0xff]  ;;  %v9121_v23 = vld [vmem:[%s7404_s26 + $0x1c0] sm:$0xff]  ;;  %v9124_v40 = vld [vmem:[%s7404_s26 + $0x1c8] sm:$0xff]  ;;  %v4139_v34 = vsel %vm4124_vm0, %v9045_v57, %v4120_v56  ;;  %v4140_v4 = vsel %vm4124_vm0, %v9048_v7, %v4121_v27 }
 0x6f8   : > { %v4141_v32 = vsel %vm4124_vm0, %v9051_v39, %v4122_v50  ;;  %v4142_v63 = vsel %vm4124_vm0, %v9066_v26, %v4123_v20  ;;  %v9139_v0 = vld [vmem:[%s7404_s26 + $0x1d0] sm:$0xff]  ;;  %v9142_v62 = vld [vmem:[%s7404_s26 + $0x1d8] sm:$0xff]  ;;  %v9145_v31 = vld [vmem:[%s7404_s26 + $0x1e0] sm:$0xff]  ;;  %v4154_v56 = vsel %vm4143_vm1, %v9069_v1, %v4135_v24  ;;  %v4155_v27 = vsel %vm4143_vm1, %v9072_v21, %v4136_v53 }
 0x6f9   : > { %v4156_v50 = vsel %vm4143_vm1, %v9087_v8, %v4137_v5  ;;  %v4157_v20 = vsel %vm4143_vm1, %v9090_v11, %v4138_v3  ;;  %v9167_v26 = vld [vmem:[%s7404_s26 + $0x1e8] sm:$0xff]  ;;  %v9170_v39 = vld [vmem:[%s7404_s26 + $0x1f0] sm:$0xff]  ;;  %v9173_v7 = vld [vmem:[%s7404_s26 + $0x1f8] sm:$0xff]  ;;  %v4158_v53 = vsel %vm4143_vm1, %v9093_v22, %v4139_v34  ;;  %v4159_v5 = vsel %vm4143_vm1, %v9098_v16, %v4140_v4 }
 0x6fa   : > { %v4160_v3 = vsel %vm4143_vm1, %v9101_v47, %v4141_v32  ;;  %v4161_v24 = vsel %vm4143_vm1, %v9118_v17, %v4142_v63  ;;  %v4173_v11 = vsel %vm4162_vm2, %v9121_v23, %v4154_v56  ;;  %v4174_v34 = vsel %vm4162_vm2, %v9124_v40, %v4155_v27 }
 0x6fb   : > { %v4175_v4 = vsel %vm4162_vm2, %v9139_v0, %v4156_v50  ;;  %v4176_v63 = vsel %vm4162_vm2, %v9142_v62, %v4157_v20  ;;  %v4177_v32 = vsel %vm4162_vm2, %v9145_v31, %v4158_v53  ;;  %v4178_v56 = vsel %vm4162_vm2, %v9167_v26, %v4159_v5  ;;  %4181 = vst [vmem:[%s9152_s18] sm:$0xff] %v4173_v11 }
 0x6fc   : > { %v4179_v27 = vsel %vm4162_vm2, %v9170_v39, %v4160_v3  ;;  %v4180_v50 = vsel %vm4162_vm2, %v9173_v7, %v4161_v24  ;;  %4182 = vst [vmem:[%s9152_s18 + $0x8] sm:$0xff] %v4174_v34  ;;  %4183 = vst [vmem:[%s9152_s18 + $0x10] sm:$0xff] %v4175_v4  ;;  %v4200_v11 = vsel %vm4189_vm3, %v8786_v55, 0.0  ;;  %v4201_v20 = vsel %vm4189_vm3, %v8789_v19, 0.0 }
 0x6fd   : > { %4184 = vst [vmem:[%s9152_s18 + $0x18] sm:$0xff] %v4176_v63  ;;  %4185 = vst [vmem:[%s9152_s18 + $0x20] sm:$0xff] %v4177_v32  ;;  %v4202_v53 = vsel %vm4189_vm3, %v8792_v37, 0.0  ;;  %v4203_v5 = vsel %vm4189_vm3, %v8796_v13, 0.0  ;;  %v4204_v3 = vsel %vm4189_vm3, %v8799_v10, 0.0  ;;  %v4205_v24 = vsel %vm4189_vm3, %v8802_v33, 0.0 }
 0x6fe   : > { %4186 = vst [vmem:[%s9152_s18 + $0x28] sm:$0xff] %v4178_v56  ;;  %4187 = vst [vmem:[%s9152_s18 + $0x30] sm:$0xff] %v4179_v27  ;;  %v4206_v34 = vsel %vm4189_vm3, %v8806_v44, 0.0  ;;  %v4207_v4 = vsel %vm4189_vm3, %v8809_v42, 0.0 }
 0x6ff   : > { %4188 = vst [vmem:[%s9152_s18 + $0x38] sm:$0xff] %v4180_v50 }
 0x700   : > { %7239 = shalt.err (!%p7236_p3)
}
 0x701   : > { %s7240_s12 = scalar_lea.hbm %s9219_s19, 128  ;;  %s7244_s17 = scalar_lea.hbm %s10730_s6, 256 }
 0x702   : > { %p7241_p4 = scmp.ne.s32.totalorder %s9219_s19, %s7240_s12  ;;  %p7245_p9 = scmp.lt.u32.totalorder %s9219_s19, %s10730_s6 }
 0x703   : > { %p7246_p10 = scmp.lt.u32.totalorder %s7244_s17, %s7240_s12  ;;  %p7248_p12 = scmp.lt.u32.totalorder %s7240_s12, %s9219_s19 }
 0x704   : > { %p7242_p7 = pnand %p7241_p4, %p7368_p5 }
 0x705   : > { %p7247_p11 = por %p7246_p10, %p7245_p9 }
 0x706   : > { %p7243_p8 = pneg %p7242_p7 }
 0x707   : > { %p7249_p13 = por %p7248_p12, %p7247_p11 }
 0x709   : > { %p7250_p0 = pnand %p7249_p13, %p7243_p8 }
 0x70b   : > { %7253 = shalt.err (!%p7250_p0)
}
 0x70c   : > { %6681 = dma.vmem_to_hbm [thread:$0]  (%p7368_p5), %s9239_s20, 128, %s9219_s19, %s5322_s28   ;;  %vm4208_vm4 = vcmp.eq.s32.totalorder %v8768_v35, 1  ;;  %vm4227_vm5 = vcmp.eq.s32.totalorder %v8770_v54, 1  ;;  %vm4246_vm6 = vcmp.eq.s32.totalorder %v8778_v12, 1  ;;  %vm4265_vm10 = vcmp.eq.s32.totalorder %v8847_v60, 1 }
 0x70d   : > { %v4219_v63 = vsel %vm4208_vm4, %v8812_v18, %v4200_v11  ;;  %v4220_v32 = vsel %vm4208_vm4, %v8826_v25, %v4201_v20  ;;  %v4221_v56 = vsel %vm4208_vm4, %v8829_v49, %v4202_v53  ;;  %v4222_v27 = vsel %vm4208_vm4, %v8832_v15, %v4203_v5 }
 0x70e   : > { %v4223_v50 = vsel %vm4208_vm4, %v8835_v38, %v4204_v3  ;;  %v4224_v42 = vsel %vm4208_vm4, %v8838_v41, %v4205_v24  ;;  %v4225_v35 = vsel %vm4208_vm4, %v8841_v43, %v4206_v34  ;;  %v4226_v44 = vsel %vm4208_vm4, %v8856_v9, %v4207_v4 }
 0x70f   : > { %v4238_v33 = vsel %vm4227_vm5, %v8859_v59, %v4219_v63  ;;  %v4239_v11 = vsel %vm4227_vm5, %v8862_v28, %v4220_v32  ;;  %v4240_v20 = vsel %vm4227_vm5, %v8876_v36, %v4221_v56  ;;  %v4241_v53 = vsel %vm4227_vm5, %v8879_v45, %v4222_v27  ;;  %v10901_v32 = vld [vmem:[#allocation18_spill] sm:$0xff]  ;;  %v10902_v56 = vld [vmem:[#allocation19_spill] sm:$0xff]  ;;  %v10903_v27 = vld [vmem:[#allocation20_spill] sm:$0xff] }
 0x710   : > { %v4242_v5 = vsel %vm4227_vm5, %v8882_v58, %v4223_v50  ;;  %v4243_v3 = vsel %vm4227_vm5, %v8896_v52, %v4224_v42  ;;  %v4244_v24 = vsel %vm4227_vm5, %v8899_v51, %v4225_v35  ;;  %v4245_v34 = vsel %vm4227_vm5, %v8902_v48, %v4226_v44  ;;  %v10904_v50 = vld [vmem:[#allocation21_spill] sm:$0xff]  ;;  %v10920_v48 = vld [vmem:[#allocation38_spill] sm:$0xff] }
 0x711   : > { %v4257_v4 = vsel %vm4246_vm6, %v8916_v2, %v4238_v33  ;;  %v4258_v63 = vsel %vm4246_vm6, %v8919_v61, %v4239_v11  ;;  %v4259_v42 = vsel %vm4246_vm6, %v10901_v32, %v4240_v20  ;;  %v4260_v35 = vsel %vm4246_vm6, %v10902_v56, %v4241_v53  ;;  %v10905_v2 = vld [vmem:[#allocation22_spill] sm:$0xff]  ;;  %v10906_v61 = vld [vmem:[#allocation23_spill] sm:$0xff]  ;;  %v10907_v56 = vld [vmem:[#allocation25_spill] sm:$0xff] }
 0x712   : > { %v4261_v44 = vsel %vm4246_vm6, %v10903_v27, %v4242_v5  ;;  %v4262_v33 = vsel %vm4246_vm6, %v10904_v50, %v4243_v3  ;;  %v4263_v11 = vsel %vm4246_vm6, %v10905_v2, %v4244_v24  ;;  %v4264_v20 = vsel %vm4246_vm6, %v10906_v61, %v4245_v34  ;;  %v10908_v27 = vld [vmem:[#allocation26_spill] sm:$0xff]  ;;  %v10909_v50 = vld [vmem:[#allocation27_spill] sm:$0xff]  ;;  %v10910_v2 = vld [vmem:[#allocation28_spill] sm:$0xff] }
 0x713   : > { %v4276_v53 = vsel %vm4265_vm10, %v8962_v29, %v4257_v4  ;;  %v4277_v5 = vsel %vm4265_vm10, %v10907_v56, %v4258_v63  ;;  %v4278_v3 = vsel %vm4265_vm10, %v10908_v27, %v4259_v42  ;;  %v4279_v24 = vsel %vm4265_vm10, %v10909_v50, %v4260_v35  ;;  %v10911_v61 = vld [vmem:[#allocation29_spill] sm:$0xff]  ;;  %v10912_v29 = vld [vmem:[#allocation30_spill] sm:$0xff]  ;;  %v10913_v56 = vld [vmem:[#allocation31_spill] sm:$0xff] }
 0x714   : > { %v4280_v34 = vsel %vm4265_vm10, %v10910_v2, %v4261_v44  ;;  %v4281_v4 = vsel %vm4265_vm10, %v10911_v61, %v4262_v33  ;;  %v4282_v63 = vsel %vm4265_vm10, %v10912_v29, %v4263_v11  ;;  %v4283_v42 = vsel %vm4265_vm10, %v10913_v56, %v4264_v20  ;;  %v10914_v35 = vld [vmem:[#allocation32_spill] sm:$0xff]  ;;  %v10915_v2 = vld [vmem:[#allocation33_spill] sm:$0xff]  ;;  %v10916_v61 = vld [vmem:[#allocation34_spill] sm:$0xff] }
 0x715   : > { %vm4284_vm11 = vcmp.eq.s32.totalorder %v8849_v14, 1  ;;  %vm4303_vm15 = vcmp.eq.s32.totalorder %v8851_v6, 1  ;;  %vm4322_vm7 = vcmp.eq.s32.totalorder %v8853_v46, 1  ;;  %vm4350_vm8 = vcmp.eq.s32.totalorder %v8766_v30, 2  ;;  %v10917_v27 = vld [vmem:[#allocation35_spill] sm:$0xff]  ;;  %v10918_v32 = vld [vmem:[#allocation36_spill] sm:$0xff] }
 0x716   : > { %v4295_v44 = vsel %vm4284_vm11, %v10914_v35, %v4276_v53  ;;  %v4296_v33 = vsel %vm4284_vm11, %v10915_v2, %v4277_v5  ;;  %v4297_v50 = vsel %vm4284_vm11, %v10916_v61, %v4278_v3  ;;  %v4298_v11 = vsel %vm4284_vm11, %v10917_v27, %v4279_v24  ;;  %v10919_v56 = vld [vmem:[#allocation37_spill] sm:$0xff]  ;;  %v10921_v3 = vld [vmem:[#allocation39_spill] sm:$0xff] }
 0x717   : > { %v4299_v29 = vsel %vm4284_vm11, %v9045_v57, %v4280_v34  ;;  %v4300_v20 = vsel %vm4284_vm11, %v10918_v32, %v4281_v4  ;;  %v4301_v14 = vsel %vm4284_vm11, %v10919_v56, %v4282_v63  ;;  %v4302_v51 = vsel %vm4284_vm11, %v10920_v48, %v4283_v42 }
 0x718   : > { %v4314_v52 = vsel %vm4303_vm15, %v9069_v1, %v4295_v44  ;;  %v4315_v53 = vsel %vm4303_vm15, %v9072_v21, %v4296_v33  ;;  %v4316_v5 = vsel %vm4303_vm15, %v9087_v8, %v4297_v50  ;;  %v4317_v24 = vsel %vm4303_vm15, %v10921_v3, %v4298_v11 }
 0x719   : > { %v4318_v34 = vsel %vm4303_vm15, %v9093_v22, %v4299_v29  ;;  %v4319_v4 = vsel %vm4303_vm15, %v9098_v16, %v4300_v20  ;;  %v4320_v50 = vsel %vm4303_vm15, %v9101_v47, %v4301_v14  ;;  %v4321_v63 = vsel %vm4303_vm15, %v9118_v17, %v4302_v51 }
 0x71a   : > { %v4333_v29 = vsel %vm4322_vm7, %v9121_v23, %v4314_v52  ;;  %v4334_v42 = vsel %vm4322_vm7, %v9124_v40, %v4315_v53  ;;  %v4335_v44 = vsel %vm4322_vm7, %v9139_v0, %v4316_v5  ;;  %v4336_v14 = vsel %vm4322_vm7, %v9142_v62, %v4317_v24 }
 0x71b   : > { %v4337_v51 = vsel %vm4322_vm7, %v9145_v31, %v4318_v34  ;;  %v4338_v52 = vsel %vm4322_vm7, %v9167_v26, %v4319_v4  ;;  %v4339_v33 = vsel %vm4322_vm7, %v9170_v39, %v4320_v50  ;;  %v4340_v11 = vsel %vm4322_vm7, %v9173_v7, %v4321_v63  ;;  %5643 = vst [vmem:[%s9152_s18 + $0x40] sm:$0xff] %v4333_v29  ;;  %v10922_v4 = vld [vmem:[#allocation7_spill] sm:$0xff]  ;;  %v10923_v63 = vld [vmem:[#allocation8_spill] sm:$0xff] }
 0x71c   : > { %5644 = vst [vmem:[%s9152_s18 + $0x48] sm:$0xff] %v4334_v42  ;;  %5645 = vst [vmem:[%s9152_s18 + $0x50] sm:$0xff] %v4335_v44  ;;  %v4361_v20 = vsel %vm4350_vm8, %v8786_v55, 0.0  ;;  %v4362_v53 = vsel %vm4350_vm8, %v8789_v19, 0.0  ;;  %v4363_v5 = vsel %vm4350_vm8, %v8792_v37, 0.0  ;;  %v4364_v24 = vsel %vm4350_vm8, %v8796_v13, 0.0 }
 0x71d   : > { %5646 = vst [vmem:[%s9152_s18 + $0x58] sm:$0xff] %v4336_v14  ;;  %5647 = vst [vmem:[%s9152_s18 + $0x60] sm:$0xff] %v4337_v51  ;;  %v4365_v34 = vsel %vm4350_vm8, %v8799_v10, 0.0  ;;  %v4366_v50 = vsel %vm4350_vm8, %v10922_v4, 0.0  ;;  %v4367_v29 = vsel %vm4350_vm8, %v10923_v63, 0.0  ;;  %v10924_v42 = vld [vmem:[#allocation9_spill] sm:$0xff] }
 0x71e   : > { %5648 = vst [vmem:[%s9152_s18 + $0x68] sm:$0xff] %v4338_v52  ;;  %5649 = vst [vmem:[%s9152_s18 + $0x70] sm:$0xff] %v4339_v33  ;;  %v4368_v44 = vsel %vm4350_vm8, %v10924_v42, 0.0  ;;  %v10925_v14 = vld [vmem:[#allocation5_spill] sm:$0xff]  ;;  %vm4388_vm13 = vcmp.eq.s32.totalorder %v8770_v54, 2  ;;  %vm4407_vm9 = vcmp.eq.s32.totalorder %v8778_v12, 2 }
 0x71f   : > { %5650 = vst [vmem:[%s9152_s18 + $0x78] sm:$0xff] %v4340_v11  ;;  %vm4369_vm12 = vcmp.eq.s32.totalorder %v10925_v14, 2  ;;  %vm4426_vm14 = vcmp.eq.s32.totalorder %v8847_v60, 2  ;;  %vm4464_vm1 = vcmp.eq.s32.totalorder %v8851_v6, 2  ;;  %vm4483_vm2 = vcmp.eq.s32.totalorder %v8853_v46, 2 }
 0x720   : > { %v4380_v51 = vsel %vm4369_vm12, %v8812_v18, %v4361_v20  ;;  %v4381_v52 = vsel %vm4369_vm12, %v8826_v25, %v4362_v53  ;;  %v4382_v33 = vsel %vm4369_vm12, %v8829_v49, %v4363_v5  ;;  %v4383_v11 = vsel %vm4369_vm12, %v8832_v15, %v4364_v24 }
 0x721   : > { %v4384_v63 = vsel %vm4369_vm12, %v8835_v38, %v4365_v34  ;;  %v4385_v42 = vsel %vm4369_vm12, %v8838_v41, %v4366_v50  ;;  %v4386_v14 = vsel %vm4369_vm12, %v8841_v43, %v4367_v29  ;;  %v4387_v4 = vsel %vm4369_vm12, %v8856_v9, %v4368_v44  ;;  %v10926_v34 = vld [vmem:[#allocation13_spill] sm:$0xff]  ;;  %v10927_v29 = vld [vmem:[#allocation14_spill] sm:$0xff] }
 0x722   : > { %v4399_v10 = vsel %vm4388_vm13, %v8859_v59, %v4380_v51  ;;  %v4400_v20 = vsel %vm4388_vm13, %v8862_v28, %v4381_v52  ;;  %v4401_v53 = vsel %vm4388_vm13, %v8876_v36, %v4382_v33  ;;  %v4402_v5 = vsel %vm4388_vm13, %v8879_v45, %v4383_v11  ;;  %v10928_v51 = vld [vmem:[#allocation15_spill] sm:$0xff]  ;;  %v10929_v33 = vld [vmem:[#allocation16_spill] sm:$0xff]  ;;  %v10930_v45 = vld [vmem:[#allocation17_spill] sm:$0xff] }
 0x723   : > { %v4403_v24 = vsel %vm4388_vm13, %v8882_v58, %v4384_v63  ;;  %v4404_v50 = vsel %vm4388_vm13, %v10926_v34, %v4385_v42  ;;  %v4405_v44 = vsel %vm4388_vm13, %v10927_v29, %v4386_v14  ;;  %v4406_v52 = vsel %vm4388_vm13, %v10928_v51, %v4387_v4  ;;  %v10931_v58 = vld [vmem:[#allocation18_spill] sm:$0xff]  ;;  %v10932_v34 = vld [vmem:[#allocation19_spill] sm:$0xff]  ;;  %v10933_v29 = vld [vmem:[#allocation20_spill] sm:$0xff] }
 0x724   : > { %v4418_v11 = vsel %vm4407_vm9, %v10929_v33, %v4399_v10  ;;  %v4419_v63 = vsel %vm4407_vm9, %v10930_v45, %v4400_v20  ;;  %v4420_v42 = vsel %vm4407_vm9, %v10931_v58, %v4401_v53  ;;  %v4421_v14 = vsel %vm4407_vm9, %v10932_v34, %v4402_v5  ;;  %v10934_v51 = vld [vmem:[#allocation21_spill] sm:$0xff]  ;;  %v10935_v33 = vld [vmem:[#allocation22_spill] sm:$0xff]  ;;  %v10936_v45 = vld [vmem:[#allocation23_spill] sm:$0xff] }
 0x725   : > { %v4422_v4 = vsel %vm4407_vm9, %v10933_v29, %v4403_v24  ;;  %v4423_v10 = vsel %vm4407_vm9, %v10934_v51, %v4404_v50  ;;  %v4424_v20 = vsel %vm4407_vm9, %v10935_v33, %v4405_v44  ;;  %v4425_v53 = vsel %vm4407_vm9, %v10936_v45, %v4406_v52  ;;  %v10937_v58 = vld [vmem:[#allocation24_spill] sm:$0xff]  ;;  %v10938_v34 = vld [vmem:[#allocation25_spill] sm:$0xff]  ;;  %v10939_v29 = vld [vmem:[#allocation26_spill] sm:$0xff] }
 0x726   : > { %v4437_v5 = vsel %vm4426_vm14, %v10937_v58, %v4418_v11  ;;  %v4438_v24 = vsel %vm4426_vm14, %v10938_v34, %v4419_v63  ;;  %v4439_v50 = vsel %vm4426_vm14, %v10939_v29, %v4420_v42  ;;  %v10940_v51 = vld [vmem:[#allocation27_spill] sm:$0xff]  ;;  %v10941_v33 = vld [vmem:[#allocation28_spill] sm:$0xff]  ;;  %v10942_v45 = vld [vmem:[#allocation29_spill] sm:$0xff]  ;;  %vm4511_vm3 = vcmp.eq.s32.totalorder %v8766_v30, 3 }
 0x727   : > { %v4440_v44 = vsel %vm4426_vm14, %v10940_v51, %v4421_v14  ;;  %v4441_v52 = vsel %vm4426_vm14, %v10941_v33, %v4422_v4  ;;  %v4442_v11 = vsel %vm4426_vm14, %v10942_v45, %v4423_v10  ;;  %v10943_v58 = vld [vmem:[#allocation30_spill] sm:$0xff]  ;;  %v10944_v34 = vld [vmem:[#allocation31_spill] sm:$0xff]  ;;  %vm4549_vm5 = vcmp.eq.s32.totalorder %v8770_v54, 3 }
 0x728   : > { %v4443_v63 = vsel %vm4426_vm14, %v10943_v58, %v4424_v20  ;;  %v4444_v42 = vsel %vm4426_vm14, %v10944_v34, %v4425_v53  ;;  %v10945_v29 = vld [vmem:[#allocation10_spill] sm:$0xff]  ;;  %vm4568_vm6 = vcmp.eq.s32.totalorder %v8778_v12, 3  ;;  %vm4587_vm10 = vcmp.eq.s32.totalorder %v8847_v60, 3 }
 0x729   : > { %vm4445_vm0 = vcmp.eq.s32.totalorder %v10945_v29, 2  ;;  %vm4625_vm15 = vcmp.eq.s32.totalorder %v8851_v6, 3  ;;  %vm4644_vm7 = vcmp.eq.s32.totalorder %v8853_v46, 3  ;;  %vm4672_vm8 = vcmp.eq.s32.totalorder %v8766_v30, 4 }
 0x72a   : > { %v4456_v14 = vsel %vm4445_vm0, %v10914_v35, %v4437_v5  ;;  %v4457_v4 = vsel %vm4445_vm0, %v10915_v2, %v4438_v24  ;;  %v4458_v10 = vsel %vm4445_vm0, %v10916_v61, %v4439_v50  ;;  %v4459_v20 = vsel %vm4445_vm0, %v10917_v27, %v4440_v44 }
 0x72b   : > { %v4460_v58 = vsel %vm4445_vm0, %v9045_v57, %v4441_v52  ;;  %v4461_v53 = vsel %vm4445_vm0, %v10918_v32, %v4442_v11  ;;  %v4462_v29 = vsel %vm4445_vm0, %v10919_v56, %v4443_v63  ;;  %v4463_v34 = vsel %vm4445_vm0, %v10920_v48, %v4444_v42 }
 0x72c   : > { %v4475_v45 = vsel %vm4464_vm1, %v9069_v1, %v4456_v14  ;;  %v4476_v5 = vsel %vm4464_vm1, %v9072_v21, %v4457_v4  ;;  %v4477_v24 = vsel %vm4464_vm1, %v9087_v8, %v4458_v10  ;;  %v4478_v50 = vsel %vm4464_vm1, %v10921_v3, %v4459_v20 }
 0x72d   : > { %v4479_v44 = vsel %vm4464_vm1, %v9093_v22, %v4460_v58  ;;  %v4480_v52 = vsel %vm4464_vm1, %v9098_v16, %v4461_v53  ;;  %v4481_v11 = vsel %vm4464_vm1, %v9101_v47, %v4462_v29  ;;  %v4482_v63 = vsel %vm4464_vm1, %v9118_v17, %v4463_v34 }
 0x72e   : > { %v4494_v58 = vsel %vm4483_vm2, %v9121_v23, %v4475_v45  ;;  %v4495_v42 = vsel %vm4483_vm2, %v9124_v40, %v4476_v5  ;;  %v4496_v14 = vsel %vm4483_vm2, %v9139_v0, %v4477_v24  ;;  %v4497_v29 = vsel %vm4483_vm2, %v9142_v62, %v4478_v50  ;;  %v10946_v50 = vld [vmem:[#allocation6_spill] sm:$0xff] }
 0x72f   : > { %v4498_v34 = vsel %vm4483_vm2, %v9145_v31, %v4479_v44  ;;  %v4499_v45 = vsel %vm4483_vm2, %v9167_v26, %v4480_v52  ;;  %v4500_v4 = vsel %vm4483_vm2, %v9170_v39, %v4481_v11  ;;  %v4501_v10 = vsel %vm4483_vm2, %v9173_v7, %v4482_v63  ;;  %5707 = vst [vmem:[%s9152_s18 + $0x80] sm:$0xff] %v4494_v58  ;;  %v10947_v52 = vld [vmem:[#allocation7_spill] sm:$0xff]  ;;  %v10948_v11 = vld [vmem:[#allocation8_spill] sm:$0xff]  ;;  %v10949_v63 = vld [vmem:[#allocation9_spill] sm:$0xff] }
 0x730   : > { %5708 = vst [vmem:[%s9152_s18 + $0x88] sm:$0xff] %v4495_v42  ;;  %5709 = vst [vmem:[%s9152_s18 + $0x90] sm:$0xff] %v4496_v14  ;;  %v4522_v20 = vsel %vm4511_vm3, %v8786_v55, 0.0  ;;  %v4523_v53 = vsel %vm4511_vm3, %v8789_v19, 0.0  ;;  %v4524_v5 = vsel %vm4511_vm3, %v8792_v37, 0.0  ;;  %v4525_v24 = vsel %vm4511_vm3, %v8796_v13, 0.0 }
 0x731   : > { %5710 = vst [vmem:[%s9152_s18 + $0x98] sm:$0xff] %v4497_v29  ;;  %5711 = vst [vmem:[%s9152_s18 + $0xa0] sm:$0xff] %v4498_v34  ;;  %v4526_v44 = vsel %vm4511_vm3, %v10946_v50, 0.0  ;;  %v4527_v55 = vsel %vm4511_vm3, %v10947_v52, 0.0  ;;  %v4528_v19 = vsel %vm4511_vm3, %v10948_v11, 0.0  ;;  %v4529_v37 = vsel %vm4511_vm3, %v10949_v63, 0.0 }
 0x732   : > { %5712 = vst [vmem:[%s9152_s18 + $0xa8] sm:$0xff] %v4499_v45  ;;  %5713 = vst [vmem:[%s9152_s18 + $0xb0] sm:$0xff] %v4500_v4  ;;  %v10950_v58 = vld [vmem:[#allocation5_spill] sm:$0xff]  ;;  %v10958_v52 = vld [vmem:[#allocation18_spill] sm:$0xff]  ;;  %vm4710_vm13 = vcmp.eq.s32.totalorder %v8770_v54, 4  ;;  %vm4729_vm9 = vcmp.eq.s32.totalorder %v8778_v12, 4 }
 0x733   : > { %5714 = vst [vmem:[%s9152_s18 + $0xb8] sm:$0xff] %v4501_v10  ;;  %vm4530_vm4 = vcmp.eq.s32.totalorder %v10950_v58, 3  ;;  %v10959_v11 = vld [vmem:[#allocation19_spill] sm:$0xff]  ;;  %v10960_v63 = vld [vmem:[#allocation20_spill] sm:$0xff]  ;;  %vm4691_vm12 = vcmp.eq.s32.totalorder %v10950_v58, 4  ;;  %vm4748_vm14 = vcmp.eq.s32.totalorder %v8847_v60, 4 }
 0x734   : > { %v4541_v13 = vsel %vm4530_vm4, %v8812_v18, %v4522_v20  ;;  %v4542_v42 = vsel %vm4530_vm4, %v8826_v25, %v4523_v53  ;;  %v4543_v14 = vsel %vm4530_vm4, %v8829_v49, %v4524_v5  ;;  %v4544_v29 = vsel %vm4530_vm4, %v8832_v15, %v4525_v24  ;;  %v10951_v49 = vld [vmem:[#allocation11_spill] sm:$0xff]  ;;  %v10956_v53 = vld [vmem:[#allocation16_spill] sm:$0xff]  ;;  %v10957_v24 = vld [vmem:[#allocation17_spill] sm:$0xff] }
 0x735   : > { %v4545_v34 = vsel %vm4530_vm4, %v8835_v38, %v4526_v44  ;;  %v4546_v45 = vsel %vm4530_vm4, %v8838_v41, %v4527_v55  ;;  %v4547_v4 = vsel %vm4530_vm4, %v8841_v43, %v4528_v19  ;;  %v4548_v10 = vsel %vm4530_vm4, %v8856_v9, %v4529_v37  ;;  %v10952_v38 = vld [vmem:[#allocation12_spill] sm:$0xff]  ;;  %v10953_v43 = vld [vmem:[#allocation13_spill] sm:$0xff]  ;;  %v10955_v20 = vld [vmem:[#allocation15_spill] sm:$0xff] }
 0x736   : > { %v4560_v50 = vsel %vm4549_vm5, %v8859_v59, %v4541_v13  ;;  %v4561_v18 = vsel %vm4549_vm5, %v8862_v28, %v4542_v42  ;;  %v4562_v25 = vsel %vm4549_vm5, %v8876_v36, %v4543_v14  ;;  %v4563_v15 = vsel %vm4549_vm5, %v10951_v49, %v4544_v29  ;;  %v10954_v59 = vld [vmem:[#allocation14_spill] sm:$0xff]  ;;  %v10961_v13 = vld [vmem:[#allocation21_spill] sm:$0xff] }
 0x737   : > { %v4564_v41 = vsel %vm4549_vm5, %v10952_v38, %v4545_v34  ;;  %v4565_v9 = vsel %vm4549_vm5, %v10953_v43, %v4546_v45  ;;  %v4566_v28 = vsel %vm4549_vm5, %v10954_v59, %v4547_v4  ;;  %v4567_v36 = vsel %vm4549_vm5, %v10955_v20, %v4548_v10  ;;  %v10962_v14 = vld [vmem:[#allocation22_spill] sm:$0xff]  ;;  %v10963_v34 = vld [vmem:[#allocation23_spill] sm:$0xff]  ;;  %v10964_v4 = vld [vmem:[#allocation24_spill] sm:$0xff] }
 0x738   : > { %v4579_v5 = vsel %vm4568_vm6, %v10956_v53, %v4560_v50  ;;  %v4580_v44 = vsel %vm4568_vm6, %v10957_v24, %v4561_v18  ;;  %v4581_v55 = vsel %vm4568_vm6, %v10958_v52, %v4562_v25  ;;  %v4582_v19 = vsel %vm4568_vm6, %v10959_v11, %v4563_v15  ;;  %v10965_v50 = vld [vmem:[#allocation25_spill] sm:$0xff]  ;;  %v10966_v25 = vld [vmem:[#allocation26_spill] sm:$0xff]  ;;  %v9725_v11 = vld [vmem:[%s7404_s26] sm:$0xff] }
 0x739   : > { %v4583_v37 = vsel %vm4568_vm6, %v10960_v63, %v4564_v41  ;;  %v4584_v42 = vsel %vm4568_vm6, %v10961_v13, %v4565_v9  ;;  %v4585_v29 = vsel %vm4568_vm6, %v10962_v14, %v4566_v28  ;;  %v4586_v45 = vsel %vm4568_vm6, %v10963_v34, %v4567_v36  ;;  %v10967_v41 = vld [vmem:[#allocation29_spill] sm:$0xff]  ;;  %v10968_v9 = vld [vmem:[#allocation30_spill] sm:$0xff]  ;;  %v10969_v28 = vld [vmem:[#allocation31_spill] sm:$0xff] }
 0x73a   : > { %v4598_v10 = vsel %vm4587_vm10, %v10964_v4, %v4579_v5  ;;  %v4599_v18 = vsel %vm4587_vm10, %v10965_v50, %v4580_v44  ;;  %v4600_v49 = vsel %vm4587_vm10, %v10966_v25, %v4581_v55  ;;  %v4601_v15 = vsel %vm4587_vm10, %v10940_v51, %v4582_v19  ;;  %v10970_v36 = vld [vmem:[#allocation10_spill] sm:$0xff]  ;;  %v9764_v19 = vld [vmem:[%s7404_s26 + $0x28] sm:$0xff]  ;;  %v9767_v63 = vld [vmem:[%s7404_s26 + $0x30] sm:$0xff] }
 0x73b   : > { %v4602_v38 = vsel %vm4587_vm10, %v10941_v33, %v4583_v37  ;;  %v4603_v43 = vsel %vm4587_vm10, %v10967_v41, %v4584_v42  ;;  %v4604_v59 = vsel %vm4587_vm10, %v10968_v9, %v4585_v29  ;;  %v4605_v20 = vsel %vm4587_vm10, %v10969_v28, %v4586_v45  ;;  %10973 = vst [vmem:[#allocation34_spill] sm:$0xff] %v9764_v19  ;;  %v9785_v13 = vld [vmem:[%s7404_s26 + $0x40] sm:$0xff]  ;;  %v9791_v42 = vld [vmem:[%s7404_s26 + $0x50] sm:$0xff]  ;;  %v9816_v34 = vld [vmem:[%s7404_s26 + $0x68] sm:$0xff] }
 0x73c   : > { %vm4606_vm11 = vcmp.eq.s32.totalorder %v10970_v36, 3  ;;  %10974 = vst [vmem:[#allocation35_spill] sm:$0xff] %v9767_v63  ;;  %v9822_v45 = vld [vmem:[%s7404_s26 + $0x78] sm:$0xff]  ;;  %v9841_v50 = vld [vmem:[%s7404_s26 + $0x80] sm:$0xff]  ;;  %v9847_v25 = vld [vmem:[%s7404_s26 + $0x90] sm:$0xff]  ;;  %v4689_v41 = vsel %vm4672_vm8, %v9767_v63, 0.0 }
 0x73d   : > { %v4617_v51 = vsel %vm4606_vm11, %v10914_v35, %v4598_v10  ;;  %v4618_v33 = vsel %vm4606_vm11, %v10915_v2, %v4599_v18  ;;  %v4619_v53 = vsel %vm4606_vm11, %v10916_v61, %v4600_v49  ;;  %v4620_v5 = vsel %vm4606_vm11, %v10917_v27, %v4601_v15  ;;  %v9728_v35 = vld [vmem:[%s7404_s26 + $0x8] sm:$0xff]  ;;  %v9850_v49 = vld [vmem:[%s7404_s26 + $0x98] sm:$0xff]  ;;  %v9865_v9 = vld [vmem:[%s7404_s26 + $0xa0] sm:$0xff] }
 0x73e   : > { %v4621_v24 = vsel %vm4606_vm11, %v9045_v57, %v4602_v38  ;;  %v4622_v44 = vsel %vm4606_vm11, %v10918_v32, %v4603_v43  ;;  %v4623_v52 = vsel %vm4606_vm11, %v10919_v56, %v4604_v59  ;;  %v4624_v55 = vsel %vm4606_vm11, %v10920_v48, %v4605_v20  ;;  %v9743_v32 = vld [vmem:[%s7404_s26 + $0x10] sm:$0xff]  ;;  %v9746_v56 = vld [vmem:[%s7404_s26 + $0x18] sm:$0xff]  ;;  %v9844_v18 = vld [vmem:[%s7404_s26 + $0x88] sm:$0xff]  ;;  %10976 = vst [vmem:[#allocation37_spill] sm:$0xff] %v9865_v9 }
 0x73f   : > { %v4636_v2 = vsel %vm4625_vm15, %v9069_v1, %v4617_v51  ;;  %v4637_v61 = vsel %vm4625_vm15, %v9072_v21, %v4618_v33  ;;  %v4638_v57 = vsel %vm4625_vm15, %v9087_v8, %v4619_v53  ;;  %v4639_v48 = vsel %vm4625_vm15, %v10921_v3, %v4620_v5  ;;  %10971 = vst [vmem:[#allocation32_spill] sm:$0xff] %v9746_v56  ;;  %v9749_v1 = vld [vmem:[%s7404_s26 + $0x20] sm:$0xff]  ;;  %v9868_v59 = vld [vmem:[%s7404_s26 + $0xa8] sm:$0xff]  ;;  %v9871_v28 = vld [vmem:[%s7404_s26 + $0xb0] sm:$0xff] }
 0x740   : > { %10972 = vst [vmem:[#allocation33_spill] sm:$0xff] %v9749_v1  ;;  %v4640_v21 = vsel %vm4625_vm15, %v9093_v22, %v4621_v24  ;;  %v4641_v8 = vsel %vm4625_vm15, %v9098_v16, %v4622_v44  ;;  %v4642_v27 = vsel %vm4625_vm15, %v9101_v47, %v4623_v52  ;;  %v4643_v3 = vsel %vm4625_vm15, %v9118_v17, %v4624_v55  ;;  %v9770_v22 = vld [vmem:[%s7404_s26 + $0x38] sm:$0xff]  ;;  %v9880_v51 = vld [vmem:[%s7404_s26 + $0xc0] sm:$0xff]  ;;  %v9883_v33 = vld [vmem:[%s7404_s26 + $0xc8] sm:$0xff] }
 0x741   : > { %10975 = vst [vmem:[#allocation36_spill] sm:$0xff] %v9770_v22  ;;  %v4655_v16 = vsel %vm4644_vm7, %v9121_v23, %v4636_v2  ;;  %v4656_v47 = vsel %vm4644_vm7, %v9124_v40, %v4637_v61  ;;  %v4657_v17 = vsel %vm4644_vm7, %v9139_v0, %v4638_v57  ;;  %v4658_v37 = vsel %vm4644_vm7, %v9142_v62, %v4639_v48  ;;  %v9788_v23 = vld [vmem:[%s7404_s26 + $0x48] sm:$0xff]  ;;  %v9794_v40 = vld [vmem:[%s7404_s26 + $0x58] sm:$0xff]  ;;  %v9886_v53 = vld [vmem:[%s7404_s26 + $0xd0] sm:$0xff] }
 0x742   : > { %v4659_v0 = vsel %vm4644_vm7, %v9145_v31, %v4640_v21  ;;  %v4660_v62 = vsel %vm4644_vm7, %v9167_v26, %v4641_v8  ;;  %v4661_v14 = vsel %vm4644_vm7, %v9170_v39, %v4642_v27  ;;  %v4662_v29 = vsel %vm4644_vm7, %v9173_v7, %v4643_v3  ;;  %5771 = vst [vmem:[%s9152_s18 + $0xc0] sm:$0xff] %v4655_v16  ;;  %v9813_v31 = vld [vmem:[%s7404_s26 + $0x60] sm:$0xff]  ;;  %v9819_v26 = vld [vmem:[%s7404_s26 + $0x70] sm:$0xff]  ;;  %v9874_v20 = vld [vmem:[%s7404_s26 + $0xb8] sm:$0xff] }
 0x743   : > { %5772 = vst [vmem:[%s9152_s18 + $0xc8] sm:$0xff] %v4656_v47  ;;  %5773 = vst [vmem:[%s9152_s18 + $0xd0] sm:$0xff] %v4657_v17  ;;  %v4683_v7 = vsel %vm4672_vm8, %v9725_v11, 0.0  ;;  %v4684_v39 = vsel %vm4672_vm8, %v9728_v35, 0.0  ;;  %v4685_v4 = vsel %vm4672_vm8, %v9743_v32, 0.0  ;;  %v4686_v10 = vsel %vm4672_vm8, %v9746_v56, 0.0 }
 0x744   : > { %5774 = vst [vmem:[%s9152_s18 + $0xd8] sm:$0xff] %v4658_v37  ;;  %5775 = vst [vmem:[%s9152_s18 + $0xe0] sm:$0xff] %v4659_v0  ;;  %v4687_v15 = vsel %vm4672_vm8, %v9749_v1, 0.0  ;;  %v4688_v38 = vsel %vm4672_vm8, %v9764_v19, 0.0  ;;  %v4690_v43 = vsel %vm4672_vm8, %v9770_v22, 0.0  ;;  %v9889_v5 = vld [vmem:[%s7404_s26 + $0xd8] sm:$0xff]  ;;  %v4702_v24 = vsel %vm4691_vm12, %v9785_v13, %v4683_v7 }
 0x745   : > { %5776 = vst [vmem:[%s9152_s18 + $0xe8] sm:$0xff] %v4660_v62  ;;  %5777 = vst [vmem:[%s9152_s18 + $0xf0] sm:$0xff] %v4661_v14  ;;  %v4703_v44 = vsel %vm4691_vm12, %v9788_v23, %v4684_v39  ;;  %v4704_v52 = vsel %vm4691_vm12, %v9791_v42, %v4685_v4  ;;  %v4705_v55 = vsel %vm4691_vm12, %v9794_v40, %v4686_v10  ;;  %v9905_v2 = vld [vmem:[%s7404_s26 + $0xe0] sm:$0xff]  ;;  %v9908_v61 = vld [vmem:[%s7404_s26 + $0xe8] sm:$0xff]  ;;  %vm4767_vm0 = vcmp.eq.s32.totalorder %v10970_v36, 4 }
 0x746   : > { %5778 = vst [vmem:[%s9152_s18 + $0xf8] sm:$0xff] %v4662_v29  ;;  %10977 = vst [vmem:[#allocation38_spill] sm:$0xff] %v9868_v59  ;;  %v9911_v57 = vld [vmem:[%s7404_s26 + $0xf0] sm:$0xff]  ;;  %v4706_v48 = vsel %vm4691_vm12, %v9813_v31, %v4687_v15  ;;  %v4707_v21 = vsel %vm4691_vm12, %v9816_v34, %v4688_v38  ;;  %v4708_v8 = vsel %vm4691_vm12, %v9819_v26, %v4689_v41  ;;  %v9926_v3 = vld [vmem:[%s7404_s26 + $0xf8] sm:$0xff]  ;;  %vm4786_vm1 = vcmp.eq.s32.totalorder %v8851_v6, 4 }
 0x747   : > { %10978 = vst [vmem:[#allocation39_spill] sm:$0xff] %v9871_v28  ;;  %10979 = vst [vmem:[#allocation27_spill] sm:$0xff] %v9874_v20  ;;  %v4709_v27 = vsel %vm4691_vm12, %v9822_v45, %v4690_v43  ;;  %v9929_v16 = vld [vmem:[%s7404_s26 + $0x100] sm:$0xff]  ;;  %v9932_v47 = vld [vmem:[%s7404_s26 + $0x108] sm:$0xff]  ;;  %v4721_v17 = vsel %vm4710_vm13, %v9841_v50, %v4702_v24  ;;  %v4722_v37 = vsel %vm4710_vm13, %v9844_v18, %v4703_v44  ;;  %vm4805_vm2 = vcmp.eq.s32.totalorder %v8853_v46, 4 }
 0x748   : > { %10980 = vst [vmem:[#allocation28_spill] sm:$0xff] %v9880_v51  ;;  %10981 = vst [vmem:[#allocation6_spill] sm:$0xff] %v9883_v33  ;;  %v4723_v0 = vsel %vm4710_vm13, %v9847_v25, %v4704_v52  ;;  %v4724_v62 = vsel %vm4710_vm13, %v9850_v49, %v4705_v55  ;;  %v9947_v14 = vld [vmem:[%s7404_s26 + $0x110] sm:$0xff]  ;;  %v9950_v29 = vld [vmem:[%s7404_s26 + $0x118] sm:$0xff]  ;;  %v4725_v39 = vsel %vm4710_vm13, %v9865_v9, %v4706_v48  ;;  %vm4833_vm3 = vcmp.eq.s32.totalorder %v8766_v30, 5 }
 0x749   : > { %10982 = vst [vmem:[#allocation7_spill] sm:$0xff] %v9886_v53  ;;  %10983 = vst [vmem:[#allocation8_spill] sm:$0xff] %v9889_v5  ;;  %v9953_v7 = vld [vmem:[%s7404_s26 + $0x120] sm:$0xff]  ;;  %v4726_v4 = vsel %vm4710_vm13, %v9868_v59, %v4707_v21  ;;  %v4727_v10 = vsel %vm4710_vm13, %v9871_v28, %v4708_v8  ;;  %v4728_v15 = vsel %vm4710_vm13, %v9874_v20, %v4709_v27  ;;  %v9968_v38 = vld [vmem:[%s7404_s26 + $0x128] sm:$0xff]  ;;  %vm4852_vm4 = vcmp.eq.s32.totalorder %v10950_v58, 5 }
 0x74a   : > { %10984 = vst [vmem:[#allocation9_spill] sm:$0xff] %v9905_v2  ;;  %10985 = vst [vmem:[#allocation11_spill] sm:$0xff] %v9908_v61  ;;  %v9971_v41 = vld [vmem:[%s7404_s26 + $0x130] sm:$0xff]  ;;  %v9974_v43 = vld [vmem:[%s7404_s26 + $0x138] sm:$0xff]  ;;  %v4740_v24 = vsel %vm4729_vm9, %v9880_v51, %v4721_v17  ;;  %v4741_v44 = vsel %vm4729_vm9, %v9883_v33, %v4722_v37  ;;  %v4742_v52 = vsel %vm4729_vm9, %v9886_v53, %v4723_v0  ;;  %vm4871_vm5 = vcmp.eq.s32.totalorder %v8770_v54, 5 }
 0x74b   : > { %10986 = vst [vmem:[#allocation12_spill] sm:$0xff] %v9911_v57  ;;  %10987 = vst [vmem:[#allocation13_spill] sm:$0xff] %v9926_v3  ;;  %v4743_v55 = vsel %vm4729_vm9, %v9889_v5, %v4724_v62  ;;  %v9989_v48 = vld [vmem:[%s7404_s26 + $0x140] sm:$0xff]  ;;  %v9992_v21 = vld [vmem:[%s7404_s26 + $0x148] sm:$0xff]  ;;  %v4744_v17 = vsel %vm4729_vm9, %v9905_v2, %v4725_v39  ;;  %v4745_v37 = vsel %vm4729_vm9, %v9908_v61, %v4726_v4  ;;  %vm4890_vm6 = vcmp.eq.s32.totalorder %v8778_v12, 5 }
 0x74c   : > { %10988 = vst [vmem:[#allocation14_spill] sm:$0xff] %v9929_v16  ;;  %10989 = vst [vmem:[#allocation15_spill] sm:$0xff] %v9932_v47  ;;  %v9995_v8 = vld [vmem:[%s7404_s26 + $0x150] sm:$0xff]  ;;  %v9998_v27 = vld [vmem:[%s7404_s26 + $0x158] sm:$0xff]  ;;  %v4746_v0 = vsel %vm4729_vm9, %v9911_v57, %v4727_v10  ;;  %v4747_v62 = vsel %vm4729_vm9, %v9926_v3, %v4728_v15  ;;  %v4759_v4 = vsel %vm4748_vm14, %v9929_v16, %v4740_v24  ;;  %vm4909_vm10 = vcmp.eq.s32.totalorder %v8847_v60, 5 }
 0x74d   : > { %10990 = vst [vmem:[#allocation16_spill] sm:$0xff] %v9947_v14  ;;  %10991 = vst [vmem:[#allocation17_spill] sm:$0xff] %v9950_v29  ;;  %v10013_v5 = vld [vmem:[%s7404_s26 + $0x160] sm:$0xff]  ;;  %v10016_v53 = vld [vmem:[%s7404_s26 + $0x168] sm:$0xff]  ;;  %v4760_v10 = vsel %vm4748_vm14, %v9932_v47, %v4741_v44  ;;  %v4761_v15 = vsel %vm4748_vm14, %v9947_v14, %v4742_v52  ;;  %v4762_v3 = vsel %vm4748_vm14, %v9950_v29, %v4743_v55  ;;  %vm4928_vm11 = vcmp.eq.s32.totalorder %v10970_v36, 5 }
 0x74e   : > { %10992 = vst [vmem:[#allocation18_spill] sm:$0xff] %v9953_v7  ;;  %10993 = vst [vmem:[#allocation19_spill] sm:$0xff] %v9968_v38  ;;  %v10019_v39 = vld [vmem:[%s7404_s26 + $0x170] sm:$0xff]  ;;  %v10034_v57 = vld [vmem:[%s7404_s26 + $0x178] sm:$0xff]  ;;  %v4763_v24 = vsel %vm4748_vm14, %v9953_v7, %v4744_v17  ;;  %v4764_v44 = vsel %vm4748_vm14, %v9968_v38, %v4745_v37  ;;  %v4765_v52 = vsel %vm4748_vm14, %v9971_v41, %v4746_v0  ;;  %vm4947_vm15 = vcmp.eq.s32.totalorder %v8851_v6, 5 }
 0x74f   : > { %10994 = vst [vmem:[#allocation20_spill] sm:$0xff] %v9971_v41  ;;  %10995 = vst [vmem:[#allocation21_spill] sm:$0xff] %v9974_v43  ;;  %v10037_v61 = vld [vmem:[%s7404_s26 + $0x180] sm:$0xff]  ;;  %v10040_v2 = vld [vmem:[%s7404_s26 + $0x188] sm:$0xff]  ;;  %v4766_v55 = vsel %vm4748_vm14, %v9974_v43, %v4747_v62  ;;  %v4778_v62 = vsel %vm4767_vm0, %v9989_v48, %v4759_v4  ;;  %v4779_v43 = vsel %vm4767_vm0, %v9992_v21, %v4760_v10  ;;  %vm4966_vm7 = vcmp.eq.s32.totalorder %v8853_v46, 5 }
 0x750   : > { %10996 = vst [vmem:[#allocation22_spill] sm:$0xff] %v9989_v48  ;;  %10997 = vst [vmem:[#allocation23_spill] sm:$0xff] %v9992_v21  ;;  %v10055_v29 = vld [vmem:[%s7404_s26 + $0x190] sm:$0xff]  ;;  %v10058_v14 = vld [vmem:[%s7404_s26 + $0x198] sm:$0xff]  ;;  %v4780_v41 = vsel %vm4767_vm0, %v9995_v8, %v4761_v15  ;;  %v4781_v38 = vsel %vm4767_vm0, %v9998_v27, %v4762_v3  ;;  %v4782_v10 = vsel %vm4767_vm0, %v10013_v5, %v4763_v24  ;;  %vm4994_vm8 = vcmp.eq.s32.totalorder %v8766_v30, 6 }
 0x751   : > { %10998 = vst [vmem:[#allocation24_spill] sm:$0xff] %v9995_v8  ;;  %10999 = vst [vmem:[#allocation25_spill] sm:$0xff] %v9998_v27  ;;  %v10061_v17 = vld [vmem:[%s7404_s26 + $0x1a0] sm:$0xff]  ;;  %v10066_v37 = vld [vmem:[%s7404_s26 + $0x1a8] sm:$0xff]  ;;  %v4783_v15 = vsel %vm4767_vm0, %v10016_v53, %v4764_v44  ;;  %v4784_v3 = vsel %vm4767_vm0, %v10019_v39, %v4765_v52  ;;  %v4785_v27 = vsel %vm4767_vm0, %v10034_v57, %v4766_v55  ;;  %vm5032_vm13 = vcmp.eq.s32.totalorder %v8770_v54, 6 }
 0x752   : > { %11000 = vst [vmem:[#allocation26_spill] sm:$0xff] %v10019_v39  ;;  %11001 = vst [vmem:[#allocation29_spill] sm:$0xff] %v10034_v57  ;;  %v10069_v0 = vld [vmem:[%s7404_s26 + $0x1b0] sm:$0xff]  ;;  %v10086_v7 = vld [vmem:[%s7404_s26 + $0x1b8] sm:$0xff]  ;;  %v4797_v24 = vsel %vm4786_vm1, %v10037_v61, %v4778_v62  ;;  %v4798_v44 = vsel %vm4786_vm1, %v10040_v2, %v4779_v43  ;;  %v4799_v52 = vsel %vm4786_vm1, %v10055_v29, %v4780_v41  ;;  %vm5051_vm9 = vcmp.eq.s32.totalorder %v8778_v12, 6 }
 0x753   : > { %11002 = vst [vmem:[#allocation30_spill] sm:$0xff] %v10058_v14  ;;  %11003 = vst [vmem:[#allocation31_spill] sm:$0xff] %v10061_v17  ;;  %v10089_v47 = vld [vmem:[%s7404_s26 + $0x1c0] sm:$0xff]  ;;  %v10092_v4 = vld [vmem:[%s7404_s26 + $0x1c8] sm:$0xff]  ;;  %v4800_v55 = vsel %vm4786_vm1, %v10058_v14, %v4781_v38  ;;  %v4801_v43 = vsel %vm4786_vm1, %v10061_v17, %v4782_v10  ;;  %v4802_v41 = vsel %vm4786_vm1, %v10066_v37, %v4783_v15  ;;  %vm5070_vm14 = vcmp.eq.s32.totalorder %v8847_v60, 6 }
 0x754   : > { %v10107_v8 = vld [vmem:[%s7404_s26 + $0x1d0] sm:$0xff]  ;;  %v10110_v21 = vld [vmem:[%s7404_s26 + $0x1d8] sm:$0xff]  ;;  %v10113_v48 = vld [vmem:[%s7404_s26 + $0x1e0] sm:$0xff]  ;;  %v4803_v38 = vsel %vm4786_vm1, %v10069_v0, %v4784_v3  ;;  %v4804_v14 = vsel %vm4786_vm1, %v10086_v7, %v4785_v27  ;;  %v4816_v10 = vsel %vm4805_vm2, %v10089_v47, %v4797_v24  ;;  %v4817_v17 = vsel %vm4805_vm2, %v10092_v4, %v4798_v44 }
 0x755   : > { %v10128_v57 = vld [vmem:[%s7404_s26 + $0x1e8] sm:$0xff]  ;;  %v10131_v39 = vld [vmem:[%s7404_s26 + $0x1f0] sm:$0xff]  ;;  %v10134_v62 = vld [vmem:[%s7404_s26 + $0x1f8] sm:$0xff]  ;;  %v4818_v15 = vsel %vm4805_vm2, %v10107_v8, %v4799_v52  ;;  %v4819_v3 = vsel %vm4805_vm2, %v10110_v21, %v4800_v55  ;;  %v4820_v27 = vsel %vm4805_vm2, %v10113_v48, %v4801_v43  ;;  %5835 = vst [vmem:[%s9152_s18 + $0x100] sm:$0xff] %v4816_v10  ;;  %v4844_v55 = vsel %vm4833_vm3, %v9725_v11, 0.0 }
 0x756   : > { %v4821_v24 = vsel %vm4805_vm2, %v10128_v57, %v4802_v41  ;;  %v4822_v44 = vsel %vm4805_vm2, %v10131_v39, %v4803_v38  ;;  %v4823_v52 = vsel %vm4805_vm2, %v10134_v62, %v4804_v14  ;;  %5836 = vst [vmem:[%s9152_s18 + $0x108] sm:$0xff] %v4817_v17  ;;  %5837 = vst [vmem:[%s9152_s18 + $0x110] sm:$0xff] %v4818_v15  ;;  %v4845_v43 = vsel %vm4833_vm3, %v9728_v35, 0.0 }
 0x757   : > { %5838 = vst [vmem:[%s9152_s18 + $0x118] sm:$0xff] %v4819_v3  ;;  %5839 = vst [vmem:[%s9152_s18 + $0x120] sm:$0xff] %v4820_v27  ;;  %v4846_v14 = vsel %vm4833_vm3, %v9743_v32, 0.0  ;;  %v4847_v17 = vsel %vm4833_vm3, %v9746_v56, 0.0  ;;  %v4848_v41 = vsel %vm4833_vm3, %v9749_v1, 0.0  ;;  %v4849_v38 = vsel %vm4833_vm3, %v9764_v19, 0.0 }
 0x758   : > { %5840 = vst [vmem:[%s9152_s18 + $0x128] sm:$0xff] %v4821_v24  ;;  %5841 = vst [vmem:[%s9152_s18 + $0x130] sm:$0xff] %v4822_v44  ;;  %v4850_v10 = vsel %vm4833_vm3, %v9767_v63, 0.0  ;;  %v4851_v15 = vsel %vm4833_vm3, %v9770_v22, 0.0  ;;  %v4863_v3 = vsel %vm4852_vm4, %v9785_v13, %v4844_v55  ;;  %v4864_v27 = vsel %vm4852_vm4, %v9788_v23, %v4845_v43 }
 0x759   : > { %5842 = vst [vmem:[%s9152_s18 + $0x138] sm:$0xff] %v4823_v52  ;;  %v4865_v24 = vsel %vm4852_vm4, %v9791_v42, %v4846_v14  ;;  %v4866_v44 = vsel %vm4852_vm4, %v9794_v40, %v4847_v17  ;;  %v4867_v52 = vsel %vm4852_vm4, %v9813_v31, %v4848_v41  ;;  %v4868_v22 = vsel %vm4852_vm4, %v9816_v34, %v4849_v38 }
 0x75a   : > { %v4869_v58 = vsel %vm4852_vm4, %v9819_v26, %v4850_v10  ;;  %v4870_v63 = vsel %vm4852_vm4, %v9822_v45, %v4851_v15  ;;  %v4882_v19 = vsel %vm4871_vm5, %v9841_v50, %v4863_v3  ;;  %v4883_v55 = vsel %vm4871_vm5, %v9844_v18, %v4864_v27  ;;  %v11004_v27 = vld [vmem:[#allocation7_spill] sm:$0xff] }
 0x75b   : > { %v4884_v43 = vsel %vm4871_vm5, %v9847_v25, %v4865_v24  ;;  %v4885_v14 = vsel %vm4871_vm5, %v9850_v49, %v4866_v44  ;;  %v4886_v17 = vsel %vm4871_vm5, %v9865_v9, %v4867_v52  ;;  %v4887_v41 = vsel %vm4871_vm5, %v9868_v59, %v4868_v22  ;;  %v11005_v24 = vld [vmem:[#allocation8_spill] sm:$0xff]  ;;  %v11006_v44 = vld [vmem:[#allocation9_spill] sm:$0xff]  ;;  %v11007_v52 = vld [vmem:[#allocation11_spill] sm:$0xff] }
 0x75c   : > { %v4888_v38 = vsel %vm4871_vm5, %v9871_v28, %v4869_v58  ;;  %v4889_v10 = vsel %vm4871_vm5, %v9874_v20, %v4870_v63  ;;  %v4901_v15 = vsel %vm4890_vm6, %v9880_v51, %v4882_v19  ;;  %v4902_v3 = vsel %vm4890_vm6, %v9883_v33, %v4883_v55  ;;  %v11008_v51 = vld [vmem:[#allocation12_spill] sm:$0xff]  ;;  %v11009_v33 = vld [vmem:[#allocation13_spill] sm:$0xff] }
 0x75d   : > { %v4903_v22 = vsel %vm4890_vm6, %v11004_v27, %v4884_v43  ;;  %v4904_v58 = vsel %vm4890_vm6, %v11005_v24, %v4885_v14  ;;  %v4905_v63 = vsel %vm4890_vm6, %v11006_v44, %v4886_v17  ;;  %v4906_v19 = vsel %vm4890_vm6, %v11007_v52, %v4887_v41  ;;  %v11010_v24 = vld [vmem:[#allocation15_spill] sm:$0xff]  ;;  %v11011_v44 = vld [vmem:[#allocation16_spill] sm:$0xff]  ;;  %v11012_v52 = vld [vmem:[#allocation17_spill] sm:$0xff] }
 0x75e   : > { %v4907_v55 = vsel %vm4890_vm6, %v11008_v51, %v4888_v38  ;;  %v4908_v43 = vsel %vm4890_vm6, %v11009_v33, %v4889_v10  ;;  %v4920_v14 = vsel %vm4909_vm10, %v9929_v16, %v4901_v15  ;;  %v4921_v17 = vsel %vm4909_vm10, %v11010_v24, %v4902_v3  ;;  %v11013_v51 = vld [vmem:[#allocation18_spill] sm:$0xff]  ;;  %v11014_v33 = vld [vmem:[#allocation19_spill] sm:$0xff]  ;;  %v11015_v16 = vld [vmem:[#allocation20_spill] sm:$0xff] }
 0x75f   : > { %v4922_v41 = vsel %vm4909_vm10, %v11011_v44, %v4903_v22  ;;  %v4923_v38 = vsel %vm4909_vm10, %v11012_v52, %v4904_v58  ;;  %v4924_v10 = vsel %vm4909_vm10, %v11013_v51, %v4905_v63  ;;  %v4925_v15 = vsel %vm4909_vm10, %v11014_v33, %v4906_v19  ;;  %v11016_v24 = vld [vmem:[#allocation21_spill] sm:$0xff]  ;;  %v11017_v58 = vld [vmem:[#allocation22_spill] sm:$0xff]  ;;  %v11018_v51 = vld [vmem:[#allocation23_spill] sm:$0xff] }
 0x760   : > { %v4926_v3 = vsel %vm4909_vm10, %v11015_v16, %v4907_v55  ;;  %v4927_v22 = vsel %vm4909_vm10, %v11016_v24, %v4908_v43  ;;  %v4939_v63 = vsel %vm4928_vm11, %v11017_v58, %v4920_v14  ;;  %v4940_v19 = vsel %vm4928_vm11, %v11018_v51, %v4921_v17  ;;  %v11019_v33 = vld [vmem:[#allocation24_spill] sm:$0xff]  ;;  %v11020_v44 = vld [vmem:[#allocation25_spill] sm:$0xff]  ;;  %v11021_v24 = vld [vmem:[#allocation26_spill] sm:$0xff] }
 0x761   : > { %v4941_v52 = vsel %vm4928_vm11, %v11019_v33, %v4922_v41  ;;  %v4942_v55 = vsel %vm4928_vm11, %v11020_v44, %v4923_v38  ;;  %v4943_v16 = vsel %vm4928_vm11, %v10013_v5, %v4924_v10  ;;  %v4944_v43 = vsel %vm4928_vm11, %v10016_v53, %v4925_v15  ;;  %v11022_v27 = vld [vmem:[#allocation29_spill] sm:$0xff]  ;;  %v11023_v41 = vld [vmem:[#allocation30_spill] sm:$0xff]  ;;  %v11024_v10 = vld [vmem:[#allocation31_spill] sm:$0xff] }
 0x762   : > { %v4945_v36 = vsel %vm4928_vm11, %v11021_v24, %v4926_v3  ;;  %v4946_v20 = vsel %vm4928_vm11, %v11022_v27, %v4927_v22  ;;  %v4958_v28 = vsel %vm4947_vm15, %v10037_v61, %v4939_v63  ;;  %v4959_v14 = vsel %vm4947_vm15, %v10040_v2, %v4940_v19 }
 0x763   : > { %v4960_v17 = vsel %vm4947_vm15, %v10055_v29, %v4941_v52  ;;  %v4961_v38 = vsel %vm4947_vm15, %v11023_v41, %v4942_v55  ;;  %v4962_v15 = vsel %vm4947_vm15, %v11024_v10, %v4943_v16  ;;  %v4963_v3 = vsel %vm4947_vm15, %v10066_v37, %v4944_v43 }
 0x764   : > { %v4964_v52 = vsel %vm4947_vm15, %v10069_v0, %v4945_v36  ;;  %v4965_v22 = vsel %vm4947_vm15, %v10086_v7, %v4946_v20  ;;  %v4977_v16 = vsel %vm4966_vm7, %v10089_v47, %v4958_v28  ;;  %v4978_v63 = vsel %vm4966_vm7, %v10092_v4, %v4959_v14 }
 0x765   : > { %v4979_v19 = vsel %vm4966_vm7, %v10107_v8, %v4960_v17  ;;  %v4980_v36 = vsel %vm4966_vm7, %v10110_v21, %v4961_v38  ;;  %v4981_v20 = vsel %vm4966_vm7, %v10113_v48, %v4962_v15  ;;  %v4982_v28 = vsel %vm4966_vm7, %v10128_v57, %v4963_v3  ;;  %5899 = vst [vmem:[%s9152_s18 + $0x140] sm:$0xff] %v4977_v16  ;;  %v11026_v16 = vld [vmem:[#allocation35_spill] sm:$0xff] }
 0x766   : > { %v4983_v55 = vsel %vm4966_vm7, %v10131_v39, %v4964_v52  ;;  %v4984_v43 = vsel %vm4966_vm7, %v10134_v62, %v4965_v22  ;;  %5900 = vst [vmem:[%s9152_s18 + $0x148] sm:$0xff] %v4978_v63  ;;  %5901 = vst [vmem:[%s9152_s18 + $0x150] sm:$0xff] %v4979_v19  ;;  %v5005_v14 = vsel %vm4994_vm8, %v9725_v11, 0.0  ;;  %v5006_v17 = vsel %vm4994_vm8, %v9728_v35, 0.0  ;;  %v11025_v52 = vld [vmem:[#allocation34_spill] sm:$0xff]  ;;  %v11027_v19 = vld [vmem:[#allocation36_spill] sm:$0xff] }
 0x767   : > { %5902 = vst [vmem:[%s9152_s18 + $0x158] sm:$0xff] %v4980_v36  ;;  %5903 = vst [vmem:[%s9152_s18 + $0x160] sm:$0xff] %v4981_v20  ;;  %v5007_v38 = vsel %vm4994_vm8, %v9743_v32, 0.0  ;;  %v5008_v15 = vsel %vm4994_vm8, %v9746_v56, 0.0  ;;  %v5009_v3 = vsel %vm4994_vm8, %v9749_v1, 0.0  ;;  %v5010_v22 = vsel %vm4994_vm8, %v11025_v52, 0.0 }
 0x768   : > { %5904 = vst [vmem:[%s9152_s18 + $0x168] sm:$0xff] %v4982_v28  ;;  %5905 = vst [vmem:[%s9152_s18 + $0x170] sm:$0xff] %v4983_v55  ;;  %v5011_v63 = vsel %vm4994_vm8, %v11026_v16, 0.0  ;;  %v5012_v36 = vsel %vm4994_vm8, %v11027_v19, 0.0  ;;  %v11028_v20 = vld [vmem:[#allocation5_spill] sm:$0xff]  ;;  %vm5108_vm1 = vcmp.eq.s32.totalorder %v8851_v6, 6 }
 0x769   : > { %5906 = vst [vmem:[%s9152_s18 + $0x178] sm:$0xff] %v4984_v43  ;;  %vm5013_vm12 = vcmp.eq.s32.totalorder %v11028_v20, 6  ;;  %vm5127_vm2 = vcmp.eq.s32.totalorder %v8853_v46, 6  ;;  %vm5155_vm3 = vcmp.eq.s32.totalorder %v8766_v30, 7  ;;  %vm5193_vm5 = vcmp.eq.s32.totalorder %v8770_v54, 7 }
 0x76a   : > { %v5024_v28 = vsel %vm5013_vm12, %v9785_v13, %v5005_v14  ;;  %v5025_v55 = vsel %vm5013_vm12, %v9788_v23, %v5006_v17  ;;  %v5026_v43 = vsel %vm5013_vm12, %v9791_v42, %v5007_v38  ;;  %v5027_v16 = vsel %vm5013_vm12, %v9794_v40, %v5008_v15 }
 0x76b   : > { %v5028_v52 = vsel %vm5013_vm12, %v9813_v31, %v5009_v3  ;;  %v5029_v19 = vsel %vm5013_vm12, %v9816_v34, %v5010_v22  ;;  %v5030_v20 = vsel %vm5013_vm12, %v9819_v26, %v5011_v63  ;;  %v5031_v1 = vsel %vm5013_vm12, %v9822_v45, %v5012_v36  ;;  %v11029_v22 = vld [vmem:[#allocation39_spill] sm:$0xff] }
 0x76c   : > { %v5043_v56 = vsel %vm5032_vm13, %v9841_v50, %v5024_v28  ;;  %v5044_v14 = vsel %vm5032_vm13, %v9844_v18, %v5025_v55  ;;  %v5045_v17 = vsel %vm5032_vm13, %v9847_v25, %v5026_v43  ;;  %v5046_v38 = vsel %vm5032_vm13, %v9850_v49, %v5027_v16  ;;  %v11030_v36 = vld [vmem:[#allocation27_spill] sm:$0xff]  ;;  %v11031_v55 = vld [vmem:[#allocation28_spill] sm:$0xff]  ;;  %v11032_v43 = vld [vmem:[#allocation6_spill] sm:$0xff] }
 0x76d   : > { %v5047_v15 = vsel %vm5032_vm13, %v9865_v9, %v5028_v52  ;;  %v5048_v3 = vsel %vm5032_vm13, %v9868_v59, %v5029_v19  ;;  %v5049_v63 = vsel %vm5032_vm13, %v11029_v22, %v5030_v20  ;;  %v5050_v28 = vsel %vm5032_vm13, %v11030_v36, %v5031_v1  ;;  %v11033_v9 = vld [vmem:[#allocation7_spill] sm:$0xff]  ;;  %v11034_v59 = vld [vmem:[#allocation8_spill] sm:$0xff]  ;;  %v11035_v22 = vld [vmem:[#allocation9_spill] sm:$0xff] }
 0x76e   : > { %v5062_v16 = vsel %vm5051_vm9, %v11031_v55, %v5043_v56  ;;  %v5063_v52 = vsel %vm5051_vm9, %v11032_v43, %v5044_v14  ;;  %v5064_v19 = vsel %vm5051_vm9, %v11033_v9, %v5045_v17  ;;  %v5065_v20 = vsel %vm5051_vm9, %v11034_v59, %v5046_v38  ;;  %v11036_v36 = vld [vmem:[#allocation11_spill] sm:$0xff]  ;;  %v11037_v55 = vld [vmem:[#allocation12_spill] sm:$0xff]  ;;  %v11038_v43 = vld [vmem:[#allocation13_spill] sm:$0xff] }
 0x76f   : > { %v5066_v1 = vsel %vm5051_vm9, %v11035_v22, %v5047_v15  ;;  %v5067_v56 = vsel %vm5051_vm9, %v11036_v36, %v5048_v3  ;;  %v5068_v14 = vsel %vm5051_vm9, %v11037_v55, %v5049_v63  ;;  %v5069_v17 = vsel %vm5051_vm9, %v11038_v43, %v5050_v28  ;;  %v11039_v9 = vld [vmem:[#allocation14_spill] sm:$0xff]  ;;  %v11040_v59 = vld [vmem:[#allocation15_spill] sm:$0xff]  ;;  %v11041_v22 = vld [vmem:[#allocation16_spill] sm:$0xff] }
 0x770   : > { %v5081_v38 = vsel %vm5070_vm14, %v11039_v9, %v5062_v16  ;;  %v5082_v15 = vsel %vm5070_vm14, %v11040_v59, %v5063_v52  ;;  %v5083_v3 = vsel %vm5070_vm14, %v11041_v22, %v5064_v19  ;;  %v11042_v36 = vld [vmem:[#allocation17_spill] sm:$0xff]  ;;  %v11043_v55 = vld [vmem:[#allocation18_spill] sm:$0xff]  ;;  %v11044_v43 = vld [vmem:[#allocation19_spill] sm:$0xff]  ;;  %vm5212_vm6 = vcmp.eq.s32.totalorder %v8778_v12, 7 }
 0x771   : > { %v5084_v63 = vsel %vm5070_vm14, %v11042_v36, %v5065_v20  ;;  %v5085_v28 = vsel %vm5070_vm14, %v11043_v55, %v5066_v1  ;;  %v5086_v16 = vsel %vm5070_vm14, %v11044_v43, %v5067_v56  ;;  %v11045_v9 = vld [vmem:[#allocation20_spill] sm:$0xff]  ;;  %v11046_v59 = vld [vmem:[#allocation21_spill] sm:$0xff]  ;;  %v11047_v22 = vld [vmem:[#allocation10_spill] sm:$0xff]  ;;  %vm5231_vm10 = vcmp.eq.s32.totalorder %v8847_v60, 7 }
 0x772   : > { %v5087_v52 = vsel %vm5070_vm14, %v11045_v9, %v5068_v14  ;;  %v5088_v19 = vsel %vm5070_vm14, %v11046_v59, %v5069_v17  ;;  %vm5089_vm0 = vcmp.eq.s32.totalorder %v11047_v22, 6  ;;  %vm5269_vm15 = vcmp.eq.s32.totalorder %v8851_v6, 7 }
 0x773   : > { %v5100_v20 = vsel %vm5089_vm0, %v11017_v58, %v5081_v38  ;;  %v5101_v1 = vsel %vm5089_vm0, %v11018_v51, %v5082_v15  ;;  %v5102_v56 = vsel %vm5089_vm0, %v11019_v33, %v5083_v3  ;;  %v5103_v14 = vsel %vm5089_vm0, %v11020_v44, %v5084_v63 }
 0x774   : > { %v5104_v9 = vsel %vm5089_vm0, %v10013_v5, %v5085_v28  ;;  %v5105_v17 = vsel %vm5089_vm0, %v10016_v53, %v5086_v16  ;;  %v5106_v22 = vsel %vm5089_vm0, %v11021_v24, %v5087_v52  ;;  %v5107_v59 = vsel %vm5089_vm0, %v11022_v27, %v5088_v19 }
 0x775   : > { %v5119_v43 = vsel %vm5108_vm1, %v10037_v61, %v5100_v20  ;;  %v5120_v38 = vsel %vm5108_vm1, %v10040_v2, %v5101_v1  ;;  %v5121_v15 = vsel %vm5108_vm1, %v10055_v29, %v5102_v56  ;;  %v5122_v3 = vsel %vm5108_vm1, %v11023_v41, %v5103_v14 }
 0x776   : > { %v5123_v63 = vsel %vm5108_vm1, %v11024_v10, %v5104_v9  ;;  %v5124_v28 = vsel %vm5108_vm1, %v10066_v37, %v5105_v17  ;;  %v5125_v16 = vsel %vm5108_vm1, %v10069_v0, %v5106_v22  ;;  %v5126_v52 = vsel %vm5108_vm1, %v10086_v7, %v5107_v59 }
 0x777   : > { %v5138_v9 = vsel %vm5127_vm2, %v10089_v47, %v5119_v43  ;;  %v5139_v19 = vsel %vm5127_vm2, %v10092_v4, %v5120_v38  ;;  %v5140_v20 = vsel %vm5127_vm2, %v10107_v8, %v5121_v15  ;;  %v5141_v22 = vsel %vm5127_vm2, %v10110_v21, %v5122_v3  ;;  %v11048_v15 = vld [vmem:[#allocation32_spill] sm:$0xff] }
 0x778   : > { %v5142_v59 = vsel %vm5127_vm2, %v10113_v48, %v5123_v63  ;;  %v5143_v43 = vsel %vm5127_vm2, %v10128_v57, %v5124_v28  ;;  %v5144_v1 = vsel %vm5127_vm2, %v10131_v39, %v5125_v16  ;;  %v5145_v56 = vsel %vm5127_vm2, %v10134_v62, %v5126_v52  ;;  %5963 = vst [vmem:[%s9152_s18 + $0x180] sm:$0xff] %v5138_v9  ;;  %v11049_v63 = vld [vmem:[#allocation33_spill] sm:$0xff]  ;;  %v11050_v16 = vld [vmem:[#allocation34_spill] sm:$0xff]  ;;  %v11051_v52 = vld [vmem:[#allocation35_spill] sm:$0xff] }
 0x779   : > { %5964 = vst [vmem:[%s9152_s18 + $0x188] sm:$0xff] %v5139_v19  ;;  %5965 = vst [vmem:[%s9152_s18 + $0x190] sm:$0xff] %v5140_v20  ;;  %v5166_v14 = vsel %vm5155_vm3, %v9725_v11, 0.0  ;;  %v5167_v17 = vsel %vm5155_vm3, %v9728_v35, 0.0  ;;  %v5168_v38 = vsel %vm5155_vm3, %v9743_v32, 0.0  ;;  %v5169_v3 = vsel %vm5155_vm3, %v11048_v15, 0.0 }
 0x77a   : > { %5966 = vst [vmem:[%s9152_s18 + $0x198] sm:$0xff] %v5141_v22  ;;  %5967 = vst [vmem:[%s9152_s18 + $0x1a0] sm:$0xff] %v5142_v59  ;;  %v5170_v28 = vsel %vm5155_vm3, %v11049_v63, 0.0  ;;  %v5171_v11 = vsel %vm5155_vm3, %v11050_v16, 0.0  ;;  %v5172_v35 = vsel %vm5155_vm3, %v11051_v52, 0.0  ;;  %v11052_v9 = vld [vmem:[#allocation36_spill] sm:$0xff] }
 0x77b   : > { %5968 = vst [vmem:[%s9152_s18 + $0x1a8] sm:$0xff] %v5143_v43  ;;  %5969 = vst [vmem:[%s9152_s18 + $0x1b0] sm:$0xff] %v5144_v1  ;;  %v5173_v32 = vsel %vm5155_vm3, %v11052_v9, 0.0  ;;  %v11053_v19 = vld [vmem:[#allocation5_spill] sm:$0xff]  ;;  %v11061_v16 = vld [vmem:[#allocation8_spill] sm:$0xff]  ;;  %vm5288_vm7 = vcmp.eq.s32.totalorder %v8853_v46, 7 }
 0x77c   : > { %5970 = vst [vmem:[%s9152_s18 + $0x1b8] sm:$0xff] %v5145_v56  ;;  %vm5174_vm4 = vcmp.eq.s32.totalorder %v11053_v19, 7  ;;  %v11062_v52 = vld [vmem:[#allocation9_spill] sm:$0xff] }
 0x77d   : > { %v5185_v20 = vsel %vm5174_vm4, %v9785_v13, %v5166_v14  ;;  %v5186_v22 = vsel %vm5174_vm4, %v9788_v23, %v5167_v17  ;;  %v5187_v59 = vsel %vm5174_vm4, %v9791_v42, %v5168_v38  ;;  %v5188_v43 = vsel %vm5174_vm4, %v9794_v40, %v5169_v3  ;;  %v11054_v40 = vld [vmem:[#allocation37_spill] sm:$0xff]  ;;  %v11058_v14 = vld [vmem:[#allocation28_spill] sm:$0xff]  ;;  %v11059_v17 = vld [vmem:[#allocation6_spill] sm:$0xff] }
 0x77e   : > { %v5189_v1 = vsel %vm5174_vm4, %v9813_v31, %v5170_v28  ;;  %v5190_v30 = vsel %vm5174_vm4, %v9816_v34, %v5171_v11  ;;  %v5191_v56 = vsel %vm5174_vm4, %v9819_v26, %v5172_v35  ;;  %v5192_v15 = vsel %vm5174_vm4, %v9822_v45, %v5173_v32  ;;  %v11055_v34 = vld [vmem:[#allocation38_spill] sm:$0xff]  ;;  %v11056_v45 = vld [vmem:[#allocation39_spill] sm:$0xff]  ;;  %v11064_v32 = vld [vmem:[#allocation12_spill] sm:$0xff] }
 0x77f   : > { %v5204_v63 = vsel %vm5193_vm5, %v9841_v50, %v5185_v20  ;;  %v5205_v13 = vsel %vm5193_vm5, %v9844_v18, %v5186_v22  ;;  %v5206_v23 = vsel %vm5193_vm5, %v9847_v25, %v5187_v59  ;;  %v5207_v42 = vsel %vm5193_vm5, %v9850_v49, %v5188_v43  ;;  %v11057_v18 = vld [vmem:[#allocation27_spill] sm:$0xff]  ;;  %v11065_v20 = vld [vmem:[#allocation13_spill] sm:$0xff]  ;;  %v11066_v59 = vld [vmem:[#allocation14_spill] sm:$0xff] }
 0x780   : > { %v5208_v31 = vsel %vm5193_vm5, %v11054_v40, %v5189_v1  ;;  %v5209_v26 = vsel %vm5193_vm5, %v11055_v34, %v5190_v30  ;;  %v5210_v50 = vsel %vm5193_vm5, %v11056_v45, %v5191_v56  ;;  %v5211_v25 = vsel %vm5193_vm5, %v11057_v18, %v5192_v15  ;;  %v11060_v3 = vld [vmem:[#allocation7_spill] sm:$0xff]  ;;  %v11068_v56 = vld [vmem:[#allocation16_spill] sm:$0xff] }
 0x781   : > { %v5223_v49 = vsel %vm5212_vm6, %v11058_v14, %v5204_v63  ;;  %v5224_v38 = vsel %vm5212_vm6, %v11059_v17, %v5205_v13  ;;  %v5225_v28 = vsel %vm5212_vm6, %v11060_v3, %v5206_v23  ;;  %v5226_v11 = vsel %vm5212_vm6, %v11061_v16, %v5207_v42  ;;  %v11063_v35 = vld [vmem:[#allocation11_spill] sm:$0xff]  ;;  %v11070_v42 = vld [vmem:[#allocation20_spill] sm:$0xff] }
 0x782   : > { %v5227_v54 = vsel %vm5212_vm6, %v11062_v52, %v5208_v31  ;;  %v5228_v9 = vsel %vm5212_vm6, %v11063_v35, %v5209_v26  ;;  %v5229_v19 = vsel %vm5212_vm6, %v11064_v32, %v5210_v50  ;;  %v5230_v22 = vsel %vm5212_vm6, %v11065_v20, %v5211_v25  ;;  %v11067_v1 = vld [vmem:[#allocation15_spill] sm:$0xff]  ;;  %v11071_v31 = vld [vmem:[#allocation21_spill] sm:$0xff]  ;;  %v11072_v26 = vld [vmem:[#allocation10_spill] sm:$0xff] }
 0x783   : > { %v5242_v43 = vsel %vm5231_vm10, %v11066_v59, %v5223_v49  ;;  %v5243_v30 = vsel %vm5231_vm10, %v11067_v1, %v5224_v38  ;;  %v5244_v15 = vsel %vm5231_vm10, %v11068_v56, %v5225_v28  ;;  %v5245_v63 = vsel %vm5231_vm10, %v11042_v36, %v5226_v11  ;;  %v11069_v13 = vld [vmem:[#allocation19_spill] sm:$0xff] }
 0x784   : > { %v5246_v12 = vsel %vm5231_vm10, %v11043_v55, %v5227_v54  ;;  %v5247_v23 = vsel %vm5231_vm10, %v11069_v13, %v5228_v9  ;;  %v5248_v40 = vsel %vm5231_vm10, %v11070_v42, %v5229_v19  ;;  %v5249_v34 = vsel %vm5231_vm10, %v11071_v31, %v5230_v22 }
 0x785   : > { %vm5250_vm11 = vcmp.eq.s32.totalorder %v11072_v26, 7 }
 0x786   : > { %v5261_v36 = vsel %vm5250_vm11, %v11017_v58, %v5242_v43  ;;  %v5262_v55 = vsel %vm5250_vm11, %v11018_v51, %v5243_v30  ;;  %v5263_v45 = vsel %vm5250_vm11, %v11019_v33, %v5244_v15  ;;  %v5264_v50 = vsel %vm5250_vm11, %v11020_v44, %v5245_v63 }
 0x787   : > { %v5265_v18 = vsel %vm5250_vm11, %v10013_v5, %v5246_v12  ;;  %v5266_v25 = vsel %vm5250_vm11, %v10016_v53, %v5247_v23  ;;  %v5267_v60 = vsel %vm5250_vm11, %v11021_v24, %v5248_v40  ;;  %v5268_v14 = vsel %vm5250_vm11, %v11022_v27, %v5249_v34 }
 0x788   : > { %v5280_v49 = vsel %vm5269_vm15, %v10037_v61, %v5261_v36  ;;  %v5281_v51 = vsel %vm5269_vm15, %v10040_v2, %v5262_v55  ;;  %v5282_v33 = vsel %vm5269_vm15, %v10055_v29, %v5263_v45  ;;  %v5283_v53 = vsel %vm5269_vm15, %v11023_v41, %v5264_v50 }
 0x789   : > { %v5284_v5 = vsel %vm5269_vm15, %v11024_v10, %v5265_v18  ;;  %v5285_v2 = vsel %vm5269_vm15, %v10066_v37, %v5266_v25  ;;  %v5286_v61 = vsel %vm5269_vm15, %v10069_v0, %v5267_v60  ;;  %v5287_v29 = vsel %vm5269_vm15, %v10086_v7, %v5268_v14 }
 0x78a   : > { %v5299_v27 = vsel %vm5288_vm7, %v10089_v47, %v5280_v49  ;;  %v5300_v24 = vsel %vm5288_vm7, %v10092_v4, %v5281_v51  ;;  %v5301_v37 = vsel %vm5288_vm7, %v10107_v8, %v5282_v33  ;;  %v5302_v0 = vsel %vm5288_vm7, %v10110_v21, %v5283_v53 }
 0x78b   : > { %v5303_v6 = vsel %vm5288_vm7, %v10113_v48, %v5284_v5  ;;  %v5304_v47 = vsel %vm5288_vm7, %v10128_v57, %v5285_v2  ;;  %v5305_v7 = vsel %vm5288_vm7, %v10131_v39, %v5286_v61  ;;  %v5306_v8 = vsel %vm5288_vm7, %v10134_v62, %v5287_v29  ;;  %6027 = vst [vmem:[%s9152_s18 + $0x1c0] sm:$0xff] %v5299_v27 }
 0x78c   : > { %6028 = vst [vmem:[%s9152_s18 + $0x1c8] sm:$0xff] %v5300_v24  ;;  %6029 = vst [vmem:[%s9152_s18 + $0x1d0] sm:$0xff] %v5301_v37 }
 0x78d   : > { %6030 = vst [vmem:[%s9152_s18 + $0x1d8] sm:$0xff] %v5302_v0  ;;  %6031 = vst [vmem:[%s9152_s18 + $0x1e0] sm:$0xff] %v5303_v6 }
 0x78e   : > { %6032 = vst [vmem:[%s9152_s18 + $0x1e8] sm:$0xff] %v5304_v47  ;;  %6033 = vst [vmem:[%s9152_s18 + $0x1f0] sm:$0xff] %v5305_v7 }
 0x78f   : > { %6034 = vst [vmem:[%s9152_s18 + $0x1f8] sm:$0xff] %v5306_v8 }
 0x790 PF: > { %p6687_p5 = scmp.ge.s32.totalorder %s7288_s24, 2  ;;  %s5358_s7 = sand.u32 1, %s7276_s21  }
 0x791   : > { %s5359_s26 = scalar_lea.sflag [#allocation3], %s5358_s7 }
 0x792   : > { %p6684_p1 = pnand %p6687_p5, %p7372_p6 }
 0x794   : > { %7271 = dma.done.wait (!%p6684_p1), %s5359_s26, 128  }
 0x795   : > { %7273 = vsyncadd (!%p6684_p1), %s5359_s26, 4294967168  ;;  %p17_p2 = scmp.ge.s32.totalorder %s7355_s27, 4   ;;  %s11073_s21 = smov %s7280_s22 }
 0x796   : > { %s11074_s22 = smov %s7284_s23  ;;  %s11075_s23 = smov %s7366_s30 }
 0x797   : > { %s11076_s24 = smov %s7355_s27  ;;  %19 = sbr.rel (!%p17_p2) target bundleno = 3 (0x3), region = 101 }
 0x79e   :  { %5364 = vsyncpa [#allocation3], 1 }
 0x79f   :  { %5366 = vsyncpa [#allocation3 + $0x1], 1 }

</bundles_post_ra>
